<compile_context>
chip_gen: v7x
topology: tpu7x:2x2x1
jax: 0.10.0
libtpu: 0.0.40
codegen_flags: <defaults>
</compile_context>

<pallas_src>
import functools
import numpy as np
import jax
import jax.numpy as jnp
from jax.experimental import pallas as pl
from jax.experimental.pallas import tpu as pltpu

C_PAD = 128  # lane-dense padding of the Conv1d channel dim (30 -> 128)


# -----------------------------------------------------------------------------
# Kernel A: fused matmul + bias + ReLU + AvgPool((pool,1)) epilogue.
# The im2col rows are pre-ordered (n, h % pool, h // pool, w) so each pooling
# group is `pool` contiguous row-slabs inside one M-tile.
# -----------------------------------------------------------------------------
def _matmul_bias_relu_pool_kernel(x_ref, w_ref, b_ref, o_ref, *, pool):
    acc = jnp.dot(x_ref[...], w_ref[...], preferred_element_type=jnp.float32)
    y = jnp.maximum(acc + b_ref[...], 0.0)            # f32 epilogue (v5e-safe)
    rows_out = o_ref.shape[0]
    p = y[0:rows_out]
    for j in range(1, pool):
        p = p + y[j * rows_out:(j + 1) * rows_out]     # aligned 2-D slab adds
    o_ref[...] = (p * (1.0 / pool)).astype(o_ref.dtype)


def conv_matmul_pool(xcol, w, b, *, pool, tiles, out_dtype=jnp.bfloat16):
    """relu(xcol @ w + b) then mean over `pool` row-slabs per grid tile."""
    m, k = xcol.shape
    k2, ncol = w.shape
    assert k == k2 and b.shape == (1, ncol)
    assert m % tiles == 0
    tm = m // tiles
    assert tm % pool == 0
    to = tm // pool

    kern = functools.partial(_matmul_bias_relu_pool_kernel, pool=pool)
    return pl.pallas_call(
        kern,
        out_shape=jax.ShapeDtypeStruct((tiles * to, ncol), out_dtype),
        grid=(tiles,),
        in_specs=[
            pl.BlockSpec((tm, k), lambda i: (i, 0)),
            pl.BlockSpec((k, ncol), lambda i: (0, 0)),
            pl.BlockSpec((1, ncol), lambda i: (0, 0)),
        ],
        out_specs=pl.BlockSpec((to, ncol), lambda i: (i, 0)),
        compiler_params=pltpu.CompilerParams(
            dimension_semantics=("parallel",)),
    )(xcol, w, b)


# -----------------------------------------------------------------------------
# Kernel B: fused tail.  conv6(4,1)+ReLU -> AvgPool((5,1)) -> flatten ->
# conv4(k5,p2)+ReLU -> conv5(k5,p2)+ReLU, all VMEM-resident in one call.
# Conv1d shifts/masks are done with an exact 0/1 selector matmul.
# -----------------------------------------------------------------------------
def _tail_kernel(xcol6_ref, smat_ref, w6_ref, b6_ref, w4_ref, b4_ref,
                 w5_ref, b5_ref, o_ref, *, rows, pool2):
    # conv6 (im2col'd, rows ordered (ho, n, w)) + bias + ReLU  -> (pool2*rows, 256)
    y6 = jnp.dot(xcol6_ref[...], w6_ref[...], preferred_element_type=jnp.float32)
    y6 = jnp.maximum(y6 + b6_ref[...], 0.0)
    # AvgPool2d((5,1)): mean over the pool2 slabs -> (rows, 256), rows = (n, l)
    p = y6[0:rows]
    for j in range(1, pool2):
        p = p + y6[j * rows:(j + 1) * rows]
    x = (p * (1.0 / pool2)).astype(jnp.bfloat16)

    def conv1d5_relu(xb, w_ref, b_ref):
        cin = xb.shape[1]
        cout = w_ref.shape[1]
        # (5*rows, rows) 0/1 selector: implements shift+zero-pad of the 5 taps
        # exactly (one MXU pass), keeping everything as plain 2-D dots.
        xs = jnp.dot(smat_ref[...], xb,
                     preferred_element_type=jnp.float32).astype(xb.dtype)
        acc = jnp.zeros((rows, cout), jnp.float32)
        for t in range(5):
            acc = acc + jnp.dot(xs[t * rows:(t + 1) * rows],
                                w_ref[t * cin:(t + 1) * cin, :],
                                preferred_element_type=jnp.float32)
        return jnp.maximum(acc + b_ref[...], 0.0)

    h4 = conv1d5_relu(x, w4_ref, b4_ref)                       # (rows, 128) f32
    h5 = conv1d5_relu(h4.astype(jnp.bfloat16), w5_ref, b5_ref)  # (rows, 128) f32
    o_ref[...] = h5


def fused_tail(xcol6, smat, w6, b6, w4, b4, w5, b5, *, rows, pool2):
    kern = functools.partial(_tail_kernel, rows=rows, pool2=pool2)
    return pl.pallas_call(
        kern,
        out_shape=jax.ShapeDtypeStruct((rows, w5.shape[1]), jnp.float32),
    )(xcol6, smat, w6, b6, w4, b4, w5, b5)


# -----------------------------------------------------------------------------
# Wrapper-side glue (XLA): im2col, pooling-group row reorder, selector matrices
# -----------------------------------------------------------------------------
def _im2col_3x3(x):
    """NHWC (n,h,w,c) -> (n,h,w,9c); feature order (kh, kw, c)."""
    n, h, w, c = x.shape
    xp = jnp.pad(x, ((0, 0), (1, 1), (1, 1), (0, 0)))
    cols = [xp[:, kh:kh + h, kw:kw + w, :] for kh in range(3) for kw in range(3)]
    return jnp.concatenate(cols, axis=-1)


def _im2col_h4(x):
    """Conv2d kernel (4,1), pad 0: (n,h,w,c) -> (n,h-3,w,4c)."""
    n, h, w, c = x.shape
    cols = [x[:, kh:kh + h - 3, :, :] for kh in range(4)]
    return jnp.concatenate(cols, axis=-1)


def _pool_reorder(xcol, pool):
    """(n,h,w,f) -> (n*h*w, f) with rows ordered (n, h % pool, h // pool, w)."""
    n, h, w, f = xcol.shape
    hg = h // pool
    xr = xcol.reshape(n, hg, pool, w, f).transpose(0, 2, 1, 3, 4)
    return xr.reshape(n * h * w, f)


def _make_shift_selectors(n_batch, seq_len):
    """0/1 selectors for Conv1d k=5 pad=2 taps on a (n_batch*seq_len) row layout."""
    rows = n_batch * seq_len
    s = np.zeros((5, rows, rows), np.float32)
    for t in range(5):
        d = t - 2
        for r in range(rows):
            l = r % seq_len
            if 0 <= l + d < seq_len:
                s[t, r, r + d] = 1.0
    return jnp.asarray(s.reshape(5 * rows, rows), jnp.bfloat16)


# -----------------------------------------------------------------------------
# Parameters (deterministic synthetic init; matmul-ready 2-D layouts, bf16)
# -----------------------------------------------------------------------------
def init_params(key, n_comp=30, in_maps=1, c_pad=C_PAD):
    ks = jax.random.split(key, 10)

    def conv_w(k, shape):  # fan_in = prod of all dims except Cout (last)
        fan_in = int(np.prod(shape[:-1]))
        return float(np.sqrt(2.0 / fan_in)) * jax.random.normal(k, shape, jnp.float32)

    def bias(k, cout):
        return 0.01 * jax.random.normal(k, (1, cout), jnp.float32)

    bf = lambda a: a.astype(jnp.bfloat16)

    # Conv1d weights, zero-padded to lane-dense channel counts (30 -> 128).
    w4 = conv_w(ks[6], (5, 256, n_comp))
    w5 = conv_w(ks[8], (5, n_comp, n_comp))
    w4p = jnp.zeros((5, 256, c_pad), jnp.float32).at[:, :, :n_comp].set(w4)
    w5p = jnp.zeros((5, c_pad, c_pad), jnp.float32).at[:, :n_comp, :n_comp].set(w5)
    b4p = jnp.zeros((1, c_pad), jnp.float32).at[:, :n_comp].set(bias(ks[7], n_comp))
    b5p = jnp.zeros((1, c_pad), jnp.float32).at[:, :n_comp].set(bias(ks[9], n_comp))

    return {
        "w1": bf(conv_w(ks[0], (3, 3, in_maps, 256)).reshape(9 * in_maps, 256)),
        "b1": bias(ks[1], 256),
        "w2": bf(conv_w(ks[2], (3, 3, 256, 256)).reshape(9 * 256, 256)),
        "b2": bias(ks[3], 256),
        "w6": bf(conv_w(ks[4], (4, 256, 256)).reshape(4 * 256, 256)),
        "b6": bias(ks[5], 256),
        "w4": bf(w4p.reshape(5 * 256, c_pad)), "b4": b4p,
        "w5": bf(w5p.reshape(5 * c_pad, c_pad)), "b5": b5p,
    }


# -----------------------------------------------------------------------------
# Forward pass (mirrors HNet_FtEx_stupid.forward)
# -----------------------------------------------------------------------------
def hnet_forward(params, inp, n_comp=30):
    n, in_maps, h_in, w_in = inp.shape
    # torch does inp.transpose(2, 3); fold with NCHW->NHWC: (n, W, H, in_maps).
    x = jnp.transpose(inp, (0, 3, 2, 1)).astype(jnp.bfloat16)   # (n, 128, 8, 1)

    # conv1 (3x3 pad1) + ReLU + AvgPool((4,1)), fused into one call.
    xcol = _pool_reorder(_im2col_3x3(x), 4)                     # (2048, 9) bf16
    h1 = conv_matmul_pool(xcol, params["w1"], params["b1"], pool=4, tiles=n)
    h1 = h1.reshape(n, w_in // 4, h_in, 256)                    # (2, 32, 8, 256)

    # conv2 (3x3 pad1) + ReLU + AvgPool((4,1)), fused.
    xcol = _pool_reorder(_im2col_3x3(h1), 4)                    # (512, 2304) bf16
    h2 = conv_matmul_pool(xcol, params["w2"], params["b2"], pool=4, tiles=n)
    h2 = h2.reshape(n, w_in // 16, h_in, 256)                   # (2, 8, 8, 256)

    # Fused tail: conv6(4,1)+ReLU+AvgPool((5,1))+flatten+conv4+ReLU+conv5+ReLU.
    xcol6 = _im2col_h4(h2)                                      # (n, 5, 8, 1024)
    pool2 = xcol6.shape[1]
    assert pool2 == 5, "AvgPool2d((5,1)) expects 5 rows after conv6"
    seq_len = h_in                                              # Conv1d length L
    xcol6 = jnp.transpose(xcol6, (1, 0, 2, 3)).reshape(pool2 * n * seq_len, 4 * 256)
    smat = _make_shift_selectors(n, seq_len)
    out = fused_tail(xcol6, smat, params["w6"], params["b6"],
                     params["w4"], params["b4"], params["w5"], params["b5"],
                     rows=n * seq_len, pool2=pool2)              # (16, 128) f32

    out = out.reshape(n, seq_len, -1)[:, :, :n_comp]             # drop channel pad
    return jnp.transpose(out, (0, 2, 1))                         # (n, N_COMP, L)


# -----------------------------------------------------------------------------
if __name__ == "__main__":
    key = jax.random.PRNGKey(0)
    kp, kx = jax.random.split(key)

    n_comp, in_maps = 30, 1
    params = init_params(kp, n_comp=n_comp, in_maps=in_maps)

    # NCHW input. After transpose(2,3) the pooled spatial dim is W=128:
    # 128 -pool4-> 32 -pool4-> 8 -conv6(4,1)-> 5 -pool(5,1)-> 1 ; L = H = 8.
    N, H, W = 2, 8, 128
    inp = jax.random.normal(kx, (N, in_maps, H, W), jnp.float32)

    out = jax.jit(hnet_forward)(params, inp)
    out = jax.block_until_ready(out)

    assert out.shape == (N, n_comp, 8), out.shape
    assert out.dtype == jnp.float32
    assert bool(jnp.all(jnp.isfinite(out)))
    assert bool(jnp.all(out >= 0.0))  # final ReLU
    print("KERNEL_OK")
</pallas_src>

<mosaic_0001>
module attributes {stable_mosaic.version = 11 : i64} {
  func.func @_matmul_bias_relu_pool_kernel(%arg0: i32, %arg1: memref<1024x9xbf16, #tpu.memory_space<vmem>>, %arg2: memref<9x256xbf16, #tpu.memory_space<vmem>>, %arg3: memref<1x256xf32, #tpu.memory_space<vmem>>, %arg4: memref<256x256xbf16, #tpu.memory_space<vmem>>) attributes {dimension_semantics = [#tpu.dimension_semantics<parallel>], iteration_bounds = array<i64: 2>, scalar_prefetch = 0 : i64, scratch_operands = 0 : i64, tpu.core_type = #tpu.core_type<tc>, window_params = [{transform_indices = @transform_0, window_bounds = array<i64: 1024, 9>}, {pipeline_mode = #tpu.pipeline_mode<synchronous>, transform_indices = @transform_1, window_bounds = array<i64: 9, 256>}, {pipeline_mode = #tpu.pipeline_mode<synchronous>, transform_indices = @transform_2, window_bounds = array<i64: 1, 256>}, {transform_indices = @transform_3, window_bounds = array<i64: 256, 256>}]} {
    %c0 = arith.constant 0 : index
    %c0_0 = arith.constant 0 : index
    %0 = vector.load %arg1[%c0, %c0_0] : memref<1024x9xbf16, #tpu.memory_space<vmem>>, vector<1024x9xbf16>
    %c0_1 = arith.constant 0 : index
    %c0_2 = arith.constant 0 : index
    %1 = vector.load %arg2[%c0_1, %c0_2] : memref<9x256xbf16, #tpu.memory_space<vmem>>, vector<9x256xbf16>
    %cst = arith.constant dense<0.000000e+00> : vector<1024x256xf32>
    %2 = tpu.matmul %0, %1, %cst {dimension_numbers = #tpu.dot_dimension_numbers<[1], [0], [0], [1], [0, 0, 1, 1], [], []>} : vector<1024x9xbf16>, vector<9x256xbf16>, vector<1024x256xf32> -> vector<1024x256xf32>
    %c0_3 = arith.constant 0 : index
    %c0_4 = arith.constant 0 : index
    %3 = vector.load %arg3[%c0_3, %c0_4] : memref<1x256xf32, #tpu.memory_space<vmem>>, vector<1x256xf32>
    %4 = vector.broadcast %3 : vector<1x256xf32> to vector<1024x256xf32>
    %5 = arith.addf %2, %4 : vector<1024x256xf32>
    %cst_5 = arith.constant 0.000000e+00 : f32
    %6 = vector.broadcast %cst_5 : f32 to vector<1024x256xf32>
    %7 = arith.maximumf %5, %6 : vector<1024x256xf32>
    %8 = vector.extract_strided_slice %7 {offsets = [0, 0], sizes = [256, 256], strides = [1, 1]} : vector<1024x256xf32> to vector<256x256xf32>
    %9 = vector.extract_strided_slice %7 {offsets = [256, 0], sizes = [256, 256], strides = [1, 1]} : vector<1024x256xf32> to vector<256x256xf32>
    %10 = arith.addf %8, %9 : vector<256x256xf32>
    %11 = vector.extract_strided_slice %7 {offsets = [512, 0], sizes = [256, 256], strides = [1, 1]} : vector<1024x256xf32> to vector<256x256xf32>
    %12 = arith.addf %10, %11 : vector<256x256xf32>
    %13 = vector.extract_strided_slice %7 {offsets = [768, 0], sizes = [256, 256], strides = [1, 1]} : vector<1024x256xf32> to vector<256x256xf32>
    %14 = arith.addf %12, %13 : vector<256x256xf32>
    %cst_6 = arith.constant 2.500000e-01 : f32
    %15 = vector.broadcast %cst_6 : f32 to vector<256x256xf32>
    %16 = arith.mulf %14, %15 : vector<256x256xf32>
    %17 = arith.truncf %16 : vector<256x256xf32> to vector<256x256xbf16>
    %c0_7 = arith.constant 0 : index
    %c0_8 = arith.constant 0 : index
    %18 = vector.load %arg4[%c0_7, %c0_8] : memref<256x256xbf16, #tpu.memory_space<vmem>>, vector<256x256xbf16>
    tpu.vector_store %arg4[%c0_7, %c0_8], %17 {strides = array<i32>} : memref<256x256xbf16, #tpu.memory_space<vmem>>, vector<256x256xbf16>,
    return
  }
  func.func @transform_0(%arg0: i32) -> (i32, i32) {
    %c0_i32 = arith.constant 0 : i32
    %c0_i32_0 = arith.constant 0 : i32
    return %arg0, %c0_i32 : i32, i32
  }
  func.func @transform_1(%arg0: i32) -> (i32, i32) {
    %c0_i32 = arith.constant 0 : i32
    %c0_i32_0 = arith.constant 0 : i32
    %c0_i32_1 = arith.constant 0 : i32
    return %c0_i32, %c0_i32_0 : i32, i32
  }
  func.func @transform_2(%arg0: i32) -> (i32, i32) {
    %c0_i32 = arith.constant 0 : i32
    %c0_i32_0 = arith.constant 0 : i32
    %c0_i32_1 = arith.constant 0 : i32
    return %c0_i32, %c0_i32_0 : i32, i32
  }
  func.func @transform_3(%arg0: i32) -> (i32, i32) {
    %c0_i32 = arith.constant 0 : i32
    %c0_i32_0 = arith.constant 0 : i32
    return %arg0, %c0_i32 : i32, i32
  }
}

module attributes {stable_mosaic.version = 11 : i64} {
  func.func @_matmul_bias_relu_pool_kernel(%arg0: i32, %arg1: memref<256x2304xbf16, #tpu.memory_space<vmem>>, %arg2: memref<2304x256xbf16, #tpu.memory_space<vmem>>, %arg3: memref<1x256xf32, #tpu.memory_space<vmem>>, %arg4: memref<64x256xbf16, #tpu.memory_space<vmem>>) attributes {dimension_semantics = [#tpu.dimension_semantics<parallel>], iteration_bounds = array<i64: 2>, scalar_prefetch = 0 : i64, scratch_operands = 0 : i64, tpu.core_type = #tpu.core_type<tc>, window_params = [{transform_indices = @transform_0, window_bounds = array<i64: 256, 2304>}, {pipeline_mode = #tpu.pipeline_mode<synchronous>, transform_indices = @transform_1, window_bounds = array<i64: 2304, 256>}, {pipeline_mode = #tpu.pipeline_mode<synchronous>, transform_indices = @transform_2, window_bounds = array<i64: 1, 256>}, {transform_indices = @transform_3, window_bounds = array<i64: 64, 256>}]} {
    %c0 = arith.constant 0 : index
    %c0_0 = arith.constant 0 : index
    %0 = vector.load %arg1[%c0, %c0_0] : memref<256x2304xbf16, #tpu.memory_space<vmem>>, vector<256x2304xbf16>
    %c0_1 = arith.constant 0 : index
    %c0_2 = arith.constant 0 : index
    %1 = vector.load %arg2[%c0_1, %c0_2] : memref<2304x256xbf16, #tpu.memory_space<vmem>>, vector<2304x256xbf16>
    %cst = arith.constant dense<0.000000e+00> : vector<256x256xf32>
    %2 = tpu.matmul %0, %1, %cst {dimension_numbers = #tpu.dot_dimension_numbers<[1], [0], [0], [1], [0, 0, 1, 1], [], []>} : vector<256x2304xbf16>, vector<2304x256xbf16>, vector<256x256xf32> -> vector<256x256xf32>
    %c0_3 = arith.constant 0 : index
    %c0_4 = arith.constant 0 : index
    %3 = vector.load %arg3[%c0_3, %c0_4] : memref<1x256xf32, #tpu.memory_space<vmem>>, vector<1x256xf32>
    %4 = vector.broadcast %3 : vector<1x256xf32> to vector<256x256xf32>
    %5 = arith.addf %2, %4 : vector<256x256xf32>
    %cst_5 = arith.constant 0.000000e+00 : f32
    %6 = vector.broadcast %cst_5 : f32 to vector<256x256xf32>
    %7 = arith.maximumf %5, %6 : vector<256x256xf32>
    %8 = vector.extract_strided_slice %7 {offsets = [0, 0], sizes = [64, 256], strides = [1, 1]} : vector<256x256xf32> to vector<64x256xf32>
    %9 = vector.extract_strided_slice %7 {offsets = [64, 0], sizes = [64, 256], strides = [1, 1]} : vector<256x256xf32> to vector<64x256xf32>
    %10 = arith.addf %8, %9 : vector<64x256xf32>
    %11 = vector.extract_strided_slice %7 {offsets = [128, 0], sizes = [64, 256], strides = [1, 1]} : vector<256x256xf32> to vector<64x256xf32>
    %12 = arith.addf %10, %11 : vector<64x256xf32>
    %13 = vector.extract_strided_slice %7 {offsets = [192, 0], sizes = [64, 256], strides = [1, 1]} : vector<256x256xf32> to vector<64x256xf32>
    %14 = arith.addf %12, %13 : vector<64x256xf32>
    %cst_6 = arith.constant 2.500000e-01 : f32
    %15 = vector.broadcast %cst_6 : f32 to vector<64x256xf32>
    %16 = arith.mulf %14, %15 : vector<64x256xf32>
    %17 = arith.truncf %16 : vector<64x256xf32> to vector<64x256xbf16>
    %c0_7 = arith.constant 0 : index
    %c0_8 = arith.constant 0 : index
    %18 = vector.load %arg4[%c0_7, %c0_8] : memref<64x256xbf16, #tpu.memory_space<vmem>>, vector<64x256xbf16>
    tpu.vector_store %arg4[%c0_7, %c0_8], %17 {strides = array<i32>} : memref<64x256xbf16, #tpu.memory_space<vmem>>, vector<64x256xbf16>,
    return
  }
  func.func @transform_0(%arg0: i32) -> (i32, i32) {
    %c0_i32 = arith.constant 0 : i32
    %c0_i32_0 = arith.constant 0 : i32
    return %arg0, %c0_i32 : i32, i32
  }
  func.func @transform_1(%arg0: i32) -> (i32, i32) {
    %c0_i32 = arith.constant 0 : i32
    %c0_i32_0 = arith.constant 0 : i32
    %c0_i32_1 = arith.constant 0 : i32
    return %c0_i32, %c0_i32_0 : i32, i32
  }
  func.func @transform_2(%arg0: i32) -> (i32, i32) {
    %c0_i32 = arith.constant 0 : i32
    %c0_i32_0 = arith.constant 0 : i32
    %c0_i32_1 = arith.constant 0 : i32
    return %c0_i32, %c0_i32_0 : i32, i32
  }
  func.func @transform_3(%arg0: i32) -> (i32, i32) {
    %c0_i32 = arith.constant 0 : i32
    %c0_i32_0 = arith.constant 0 : i32
    return %arg0, %c0_i32 : i32, i32
  }
}

module attributes {stable_mosaic.version = 11 : i64} {
  func.func @_tail_kernel(%arg0: memref<80x1024xbf16, #tpu.memory_space<vmem>>, %arg1: memref<80x16xbf16, #tpu.memory_space<vmem>>, %arg2: memref<1024x256xbf16, #tpu.memory_space<vmem>>, %arg3: memref<1x256xf32, #tpu.memory_space<vmem>>, %arg4: memref<1280x128xbf16, #tpu.memory_space<vmem>>, %arg5: memref<1x128xf32, #tpu.memory_space<vmem>>, %arg6: memref<640x128xbf16, #tpu.memory_space<vmem>>, %arg7: memref<1x128xf32, #tpu.memory_space<vmem>>, %arg8: memref<16x128xf32, #tpu.memory_space<vmem>>) attributes {dimension_semantics = [], scalar_prefetch = 0 : i64, scratch_operands = 0 : i64, tpu.core_type = #tpu.core_type<tc>} {
    %c0 = arith.constant 0 : index
    %c0_0 = arith.constant 0 : index
    %0 = vector.load %arg0[%c0, %c0_0] : memref<80x1024xbf16, #tpu.memory_space<vmem>>, vector<80x1024xbf16>
    %c0_1 = arith.constant 0 : index
    %c0_2 = arith.constant 0 : index
    %1 = vector.load %arg2[%c0_1, %c0_2] : memref<1024x256xbf16, #tpu.memory_space<vmem>>, vector<1024x256xbf16>
    %cst = arith.constant dense<0.000000e+00> : vector<80x256xf32>
    %2 = tpu.matmul %0, %1, %cst {dimension_numbers = #tpu.dot_dimension_numbers<[1], [0], [0], [1], [0, 0, 1, 1], [], []>} : vector<80x1024xbf16>, vector<1024x256xbf16>, vector<80x256xf32> -> vector<80x256xf32>
    %c0_3 = arith.constant 0 : index
    %c0_4 = arith.constant 0 : index
    %3 = vector.load %arg3[%c0_3, %c0_4] : memref<1x256xf32, #tpu.memory_space<vmem>>, vector<1x256xf32>
    %4 = vector.broadcast %3 : vector<1x256xf32> to vector<80x256xf32>
    %5 = arith.addf %2, %4 : vector<80x256xf32>
    %cst_5 = arith.constant 0.000000e+00 : f32
    %6 = vector.broadcast %cst_5 : f32 to vector<80x256xf32>
    %7 = arith.maximumf %5, %6 : vector<80x256xf32>
    %8 = vector.extract_strided_slice %7 {offsets = [0, 0], sizes = [16, 256], strides = [1, 1]} : vector<80x256xf32> to vector<16x256xf32>
    %9 = vector.extract_strided_slice %7 {offsets = [16, 0], sizes = [16, 256], strides = [1, 1]} : vector<80x256xf32> to vector<16x256xf32>
    %10 = arith.addf %8, %9 : vector<16x256xf32>
    %11 = vector.extract_strided_slice %7 {offsets = [32, 0], sizes = [16, 256], strides = [1, 1]} : vector<80x256xf32> to vector<16x256xf32>
    %12 = arith.addf %10, %11 : vector<16x256xf32>
    %13 = vector.extract_strided_slice %7 {offsets = [48, 0], sizes = [16, 256], strides = [1, 1]} : vector<80x256xf32> to vector<16x256xf32>
    %14 = arith.addf %12, %13 : vector<16x256xf32>
    %15 = vector.extract_strided_slice %7 {offsets = [64, 0], sizes = [16, 256], strides = [1, 1]} : vector<80x256xf32> to vector<16x256xf32>
    %16 = arith.addf %14, %15 : vector<16x256xf32>
    %cst_6 = arith.constant 2.000000e-01 : f32
    %17 = vector.broadcast %cst_6 : f32 to vector<16x256xf32>
    %18 = arith.mulf %16, %17 : vector<16x256xf32>
    %19 = arith.truncf %18 : vector<16x256xf32> to vector<16x256xbf16>
    %c0_7 = arith.constant 0 : index
    %c0_8 = arith.constant 0 : index
    %20 = vector.load %arg1[%c0_7, %c0_8] : memref<80x16xbf16, #tpu.memory_space<vmem>>, vector<80x16xbf16>
    %cst_9 = arith.constant dense<0.000000e+00> : vector<80x256xf32>
    %21 = tpu.matmul %20, %19, %cst_9 {dimension_numbers = #tpu.dot_dimension_numbers<[1], [0], [0], [1], [0, 0, 1, 1], [], []>} : vector<80x16xbf16>, vector<16x256xbf16>, vector<80x256xf32> -> vector<80x256xf32>
    %22 = arith.truncf %21 : vector<80x256xf32> to vector<80x256xbf16>
    %cst_10 = arith.constant 0.000000e+00 : f32
    %23 = vector.broadcast %cst_10 : f32 to vector<16x128xf32>
    %24 = vector.extract_strided_slice %22 {offsets = [0, 0], sizes = [16, 256], strides = [1, 1]} : vector<80x256xbf16> to vector<16x256xbf16>
    %c0_11 = arith.constant 0 : index
    %c0_12 = arith.constant 0 : index
    %25 = vector.load %arg4[%c0_11, %c0_12] : memref<1280x128xbf16, #tpu.memory_space<vmem>>, vector<256x128xbf16>
    %cst_13 = arith.constant dense<0.000000e+00> : vector<16x128xf32>
    %26 = tpu.matmul %24, %25, %cst_13 {dimension_numbers = #tpu.dot_dimension_numbers<[1], [0], [0], [1], [0, 0, 1, 1], [], []>} : vector<16x256xbf16>, vector<256x128xbf16>, vector<16x128xf32> -> vector<16x128xf32>
    %27 = arith.addf %23, %26 : vector<16x128xf32>
    %28 = vector.extract_strided_slice %22 {offsets = [16, 0], sizes = [16, 256], strides = [1, 1]} : vector<80x256xbf16> to vector<16x256xbf16>
    %c256 = arith.constant 256 : index
    %c0_14 = arith.constant 0 : index
    %29 = vector.load %arg4[%c256, %c0_14] : memref<1280x128xbf16, #tpu.memory_space<vmem>>, vector<256x128xbf16>
    %cst_15 = arith.constant dense<0.000000e+00> : vector<16x128xf32>
    %30 = tpu.matmul %28, %29, %cst_15 {dimension_numbers = #tpu.dot_dimension_numbers<[1], [0], [0], [1], [0, 0, 1, 1], [], []>} : vector<16x256xbf16>, vector<256x128xbf16>, vector<16x128xf32> -> vector<16x128xf32>
    %31 = arith.addf %27, %30 : vector<16x128xf32>
    %32 = vector.extract_strided_slice %22 {offsets = [32, 0], sizes = [16, 256], strides = [1, 1]} : vector<80x256xbf16> to vector<16x256xbf16>
    %c512 = arith.constant 512 : index
    %c0_16 = arith.constant 0 : index
    %33 = vector.load %arg4[%c512, %c0_16] : memref<1280x128xbf16, #tpu.memory_space<vmem>>, vector<256x128xbf16>
    %cst_17 = arith.constant dense<0.000000e+00> : vector<16x128xf32>
    %34 = tpu.matmul %32, %33, %cst_17 {dimension_numbers = #tpu.dot_dimension_numbers<[1], [0], [0], [1], [0, 0, 1, 1], [], []>} : vector<16x256xbf16>, vector<256x128xbf16>, vector<16x128xf32> -> vector<16x128xf32>
    %35 = arith.addf %31, %34 : vector<16x128xf32>
    %36 = vector.extract_strided_slice %22 {offsets = [48, 0], sizes = [16, 256], strides = [1, 1]} : vector<80x256xbf16> to vector<16x256xbf16>
    %c768 = arith.constant 768 : index
    %c0_18 = arith.constant 0 : index
    %37 = vector.load %arg4[%c768, %c0_18] : memref<1280x128xbf16, #tpu.memory_space<vmem>>, vector<256x128xbf16>
    %cst_19 = arith.constant dense<0.000000e+00> : vector<16x128xf32>
    %38 = tpu.matmul %36, %37, %cst_19 {dimension_numbers = #tpu.dot_dimension_numbers<[1], [0], [0], [1], [0, 0, 1, 1], [], []>} : vector<16x256xbf16>, vector<256x128xbf16>, vector<16x128xf32> -> vector<16x128xf32>
    %39 = arith.addf %35, %38 : vector<16x128xf32>
    %40 = vector.extract_strided_slice %22 {offsets = [64, 0], sizes = [16, 256], strides = [1, 1]} : vector<80x256xbf16> to vector<16x256xbf16>
    %c1024 = arith.constant 1024 : index
    %c0_20 = arith.constant 0 : index
    %41 = vector.load %arg4[%c1024, %c0_20] : memref<1280x128xbf16, #tpu.memory_space<vmem>>, vector<256x128xbf16>
    %cst_21 = arith.constant dense<0.000000e+00> : vector<16x128xf32>
    %42 = tpu.matmul %40, %41, %cst_21 {dimension_numbers = #tpu.dot_dimension_numbers<[1], [0], [0], [1], [0, 0, 1, 1], [], []>} : vector<16x256xbf16>, vector<256x128xbf16>, vector<16x128xf32> -> vector<16x128xf32>
    %43 = arith.addf %39, %42 : vector<16x128xf32>
    %c0_22 = arith.constant 0 : index
    %c0_23 = arith.constant 0 : index
    %44 = vector.load %arg5[%c0_22, %c0_23] : memref<1x128xf32, #tpu.memory_space<vmem>>, vector<1x128xf32>
    %45 = vector.broadcast %44 : vector<1x128xf32> to vector<16x128xf32>
    %46 = arith.addf %43, %45 : vector<16x128xf32>
    %cst_24 = arith.constant 0.000000e+00 : f32
    %47 = vector.broadcast %cst_24 : f32 to vector<16x128xf32>
    %48 = arith.maximumf %46, %47 : vector<16x128xf32>
    %49 = arith.truncf %48 : vector<16x128xf32> to vector<16x128xbf16>
    %c0_25 = arith.constant 0 : index
    %c0_26 = arith.constant 0 : index
    %50 = vector.load %arg1[%c0_25, %c0_26] : memref<80x16xbf16, #tpu.memory_space<vmem>>, vector<80x16xbf16>
    %cst_27 = arith.constant dense<0.000000e+00> : vector<80x128xf32>
    %51 = tpu.matmul %50, %49, %cst_27 {dimension_numbers = #tpu.dot_dimension_numbers<[1], [0], [0], [1], [0, 0, 1, 1], [], []>} : vector<80x16xbf16>, vector<16x128xbf16>, vector<80x128xf32> -> vector<80x128xf32>
    %52 = arith.truncf %51 : vector<80x128xf32> to vector<80x128xbf16>
    %cst_28 = arith.constant 0.000000e+00 : f32
    %53 = vector.broadcast %cst_28 : f32 to vector<16x128xf32>
    %54 = vector.extract_strided_slice %52 {offsets = [0, 0], sizes = [16, 128], strides = [1, 1]} : vector<80x128xbf16> to vector<16x128xbf16>
    %c0_29 = arith.constant 0 : index
    %c0_30 = arith.constant 0 : index
    %55 = vector.load %arg6[%c0_29, %c0_30] : memref<640x128xbf16, #tpu.memory_space<vmem>>, vector<128x128xbf16>
    %cst_31 = arith.constant dense<0.000000e+00> : vector<16x128xf32>
    %56 = tpu.matmul %54, %55, %cst_31 {dimension_numbers = #tpu.dot_dimension_numbers<[1], [0], [0], [1], [0, 0, 1, 1], [], []>} : vector<16x128xbf16>, vector<128x128xbf16>, vector<16x128xf32> -> vector<16x128xf32>
    %57 = arith.addf %53, %56 : vector<16x128xf32>
    %58 = vector.extract_strided_slice %52 {offsets = [16, 0], sizes = [16, 128], strides = [1, 1]} : vector<80x128xbf16> to vector<16x128xbf16>
    %c128 = arith.constant 128 : index
    %c0_32 = arith.constant 0 : index
    %59 = vector.load %arg6[%c128, %c0_32] : memref<640x128xbf16, #tpu.memory_space<vmem>>, vector<128x128xbf16>
    %cst_33 = arith.constant dense<0.000000e+00> : vector<16x128xf32>
    %60 = tpu.matmul %58, %59, %cst_33 {dimension_numbers = #tpu.dot_dimension_numbers<[1], [0], [0], [1], [0, 0, 1, 1], [], []>} : vector<16x128xbf16>, vector<128x128xbf16>, vector<16x128xf32> -> vector<16x128xf32>
    %61 = arith.addf %57, %60 : vector<16x128xf32>
    %62 = vector.extract_strided_slice %52 {offsets = [32, 0], sizes = [16, 128], strides = [1, 1]} : vector<80x128xbf16> to vector<16x128xbf16>
    %c256_34 = arith.constant 256 : index
    %c0_35 = arith.constant 0 : index
    %63 = vector.load %arg6[%c256_34, %c0_35] : memref<640x128xbf16, #tpu.memory_space<vmem>>, vector<128x128xbf16>
    %cst_36 = arith.constant dense<0.000000e+00> : vector<16x128xf32>
    %64 = tpu.matmul %62, %63, %cst_36 {dimension_numbers = #tpu.dot_dimension_numbers<[1], [0], [0], [1], [0, 0, 1, 1], [], []>} : vector<16x128xbf16>, vector<128x128xbf16>, vector<16x128xf32> -> vector<16x128xf32>
    %65 = arith.addf %61, %64 : vector<16x128xf32>
    %66 = vector.extract_strided_slice %52 {offsets = [48, 0], sizes = [16, 128], strides = [1, 1]} : vector<80x128xbf16> to vector<16x128xbf16>
    %c384 = arith.constant 384 : index
    %c0_37 = arith.constant 0 : index
    %67 = vector.load %arg6[%c384, %c0_37] : memref<640x128xbf16, #tpu.memory_space<vmem>>, vector<128x128xbf16>
    %cst_38 = arith.constant dense<0.000000e+00> : vector<16x128xf32>
    %68 = tpu.matmul %66, %67, %cst_38 {dimension_numbers = #tpu.dot_dimension_numbers<[1], [0], [0], [1], [0, 0, 1, 1], [], []>} : vector<16x128xbf16>, vector<128x128xbf16>, vector<16x128xf32> -> vector<16x128xf32>
    %69 = arith.addf %65, %68 : vector<16x128xf32>
    %70 = vector.extract_strided_slice %52 {offsets = [64, 0], sizes = [16, 128], strides = [1, 1]} : vector<80x128xbf16> to vector<16x128xbf16>
    %c512_39 = arith.constant 512 : index
    %c0_40 = arith.constant 0 : index
    %71 = vector.load %arg6[%c512_39, %c0_40] : memref<640x128xbf16, #tpu.memory_space<vmem>>, vector<128x128xbf16>
    %cst_41 = arith.constant dense<0.000000e+00> : vector<16x128xf32>
    %72 = tpu.matmul %70, %71, %cst_41 {dimension_numbers = #tpu.dot_dimension_numbers<[1], [0], [0], [1], [0, 0, 1, 1], [], []>} : vector<16x128xbf16>, vector<128x128xbf16>, vector<16x128xf32> -> vector<16x128xf32>
    %73 = arith.addf %69, %72 : vector<16x128xf32>
    %c0_42 = arith.constant 0 : index
    %c0_43 = arith.constant 0 : index
    %74 = vector.load %arg7[%c0_42, %c0_43] : memref<1x128xf32, #tpu.memory_space<vmem>>, vector<1x128xf32>
    %75 = vector.broadcast %74 : vector<1x128xf32> to vector<16x128xf32>
    %76 = arith.addf %73, %75 : vector<16x128xf32>
    %cst_44 = arith.constant 0.000000e+00 : f32
    %77 = vector.broadcast %cst_44 : f32 to vector<16x128xf32>
    %78 = arith.maximumf %76, %77 : vector<16x128xf32>
    %c0_45 = arith.constant 0 : index
    %c0_46 = arith.constant 0 : index
    %79 = vector.load %arg8[%c0_45, %c0_46] : memref<16x128xf32, #tpu.memory_space<vmem>>, vector<16x128xf32>
    tpu.vector_store %arg8[%c0_45, %c0_46], %78 {strides = array<i32>} : memref<16x128xf32, #tpu.memory_space<vmem>>, vector<16x128xf32>,
    return
  }
}

</mosaic_0001>

<bundles_post_ra>
// kernel: hnet_forward.3
= control target key start
LH: loop header
LB: loop body
LE: loop exit
PB: predicated region body
PF: predicated region fallthrough
CT: control target
= control target key end

     0   :  { %8 = vsyncpa [#allocation3], 0  ;;  %s4344_s0 = inlined_call_operand.vmem [shape: bf16[2048,9], index: 0, kind: input, shape index: {}]   ;;  %s4345_s1 = inlined_call_operand.hbm [shape: bf16[9,256], index: 1, kind: input, shape index: {}]   ;;  %s4346_s2 = inlined_call_operand.hbm [shape: f32[1,256], index: 2, kind: input, shape index: {}]   ;;  %s4347_s3 = inlined_call_operand.vmem [shape: bf16[512,256], index: 3, kind: output, shape index: {}]  }
   0x1   :  { %9 = vsyncpa [#allocation5], 0  ;;  %s2778_s12 = smov 0  }
   0x2 LB: > { %s2784_s13 = sadd.s32 4294967295, %s2750_s12   ;;  %p2369_p0 = scmp.ge.s32.totalorder %s2750_s12, 1  ;;  %s2750_s12 = sphi %s2778_s12, %s15_s12  }
   0x3   : > { %p114_p1 = scmp.lt.s32.totalorder %s2750_s12, 3  ;;  %s2752_s14 = smov [#allocation2]  }
   0x4   : > { %s126_s15 = sshll.u32 %s2752_s14, 4  ;;  %p4348_p3 = scmp.eq.s32.totalorder %s2784_s13, 0  ;;  %s127_s15 = int_to_ptr.vmem [resolvable:$true] %s126_s15 }
   0x5   : > { %p2788_p2 = pnand %p2369_p0, %p114_p1  ;;  %s2753_s17 = smov [#allocation4]  }
   0x6   : > { %s140_s18 = sshll.u32 %s2753_s17, 4  ;;  %s2680_s22 = scalar_lea.hbm %s4345_s1, 256  ;;  %s2801_s18 = int_to_ptr.vmem [resolvable:$true] %s140_s18 }
   0x7   : > { %s4439_s16 = scalar_select %p2788_p2, 1, 0 }
   0x8   : > { %p2588_p4 = pneg %p2788_p2  ;;  %p2681_p6 = scmp.ne.s32.totalorder %s4345_s1, %s2680_s22 }
   0x9   : > { %p2687_p10 = scmp.lt.u32.totalorder %s2680_s22, %s4345_s1 }
   0xa   : > { %p2797_p5 = pnand %p4348_p3, %p2588_p4 }
   0xc   : > { %p2682_p7 = pneg %p2797_p5 }
   0xe   : > { %p2683_p8 = pnand %p2682_p7, %p2681_p6 }
  0x10   : > { %p2684_p9 = pneg %p2683_p8 }
  0x12   : > { %p2689_p11 = pnand %p2687_p10, %p2684_p9 }
  0x14   : > { %2692 = shalt.err (!%p2689_p11)
}
  0x15   : > { %s2693_s27 = scalar_lea.vmem %s127_s15, 256  ;;  %p2701_p1 = scmp.lt.s32.totalorder %s127_s15, %s127_s15 }
  0x16   : > { %p2694_p12 = scmp.ne.s32.totalorder %s127_s15, %s2693_s27  ;;  %p2702_p4 = scmp.lt.s32.totalorder %s2693_s27, %s2693_s27 }
  0x18   : > { %p2696_p13 = pnand %p2694_p12, %p2682_p7  ;;  %p2703_p3 = por %p2702_p4, %p2701_p1 }
  0x1a   : > { %p2697_p0 = pneg %p2696_p13 }
  0x1c   : > { %p2704_p2 = pnand %p2703_p3, %p2697_p0 }
  0x1e   : > { %2707 = shalt.err (!%p2704_p2)
}
  0x1f   : > { %s2754_s28 = smov 128   ;;  %s2755_s29 = smov 8  }
  0x20   : > { %2591 = dma.hbm_to_vmem [thread:$0]  (!%p2797_p5), %s4345_s1, 256, %s127_s15, [#allocation3], %s2754_s28, %s2754_s28, %s2755_s29  }
  0x21   : > { %s2708_s7 = scalar_lea.hbm %s4346_s2, 32 }
  0x22   : > { %p2709_p6 = scmp.ne.s32.totalorder %s4346_s2, %s2708_s7  ;;  %p2715_p8 = scmp.lt.u32.totalorder %s2708_s7, %s4346_s2 }
  0x24   : > { %p2711_p2 = pnand %p2709_p6, %p2682_p7 }
  0x26   : > { %p2712_p3 = pneg %p2711_p2 }
  0x28   : > { %p2717_p9 = pnand %p2715_p8, %p2712_p3 }
  0x2a   : > { %2720 = shalt.err (!%p2717_p9)
}
  0x2b   : > { %s2721_s14 = scalar_lea.vmem %s2801_s18, 32  ;;  %p2729_p13 = scmp.lt.s32.totalorder %s2801_s18, %s2801_s18 }
  0x2c   : > { %p2722_p10 = scmp.ne.s32.totalorder %s2801_s18, %s2721_s14  ;;  %p2730_p0 = scmp.lt.s32.totalorder %s2721_s14, %s2721_s14 }
  0x2e   : > { %p2724_p11 = pnand %p2722_p10, %p2682_p7  ;;  %p2731_p1 = por %p2730_p0, %p2729_p13 }
  0x30   : > { %p2725_p12 = pneg %p2724_p11 }
  0x32   : > { %p2732_p4 = pnand %p2731_p1, %p2725_p12 }
  0x34   : > { %2735 = shalt.err (!%p2732_p4)
}
  0x35   : > { %2594 = dma.hbm_to_vmem [thread:$0]  (!%p2797_p5), %s4346_s2, 32, %s2801_s18, [#allocation5]  }
  0x36   : > { %p4441_p6 = scmp.ne.s32.totalorder %s4439_s16, 0 }
  0x38   : > { %162 = sbr.rel (%p4441_p6) target bundleno = 595 (0x253), region = 32 }
  0x3f   : > { %p4442_p2 = scmp.eq.s32.totalorder %s2784_s13, 0 }
  0x41   : > { %2741 = dma.done.wait (%p4442_p2), [#allocation3], 256   ;;  %p4443_p7 = pmov %p4442_p2 }
  0x42   : > { %p4444_p3 = pmov %p4442_p2 }
  0x43   : > { %2743 = vsyncadd (%p4443_p7), [#allocation3], 4294967040 }
  0x44   : > { %2745 = dma.done.wait (%p4444_p3), [#allocation5], 32   ;;  %p4445_p8 = pmov %p4442_p2 }
  0x45   : > { %vm868_vm0 = vcmask 1043456   ;;  %v2756_v0 = vmov 0   ;;  %s2376_s18 = sshll.u32 %s2784_s13, 7  ;;  %vm869_vm1 = vcmask 1044480   ;;  %v2757_v1 = vmov 65535   ;;  %s2378_s22 = sshll.u32 %s2784_s13, 5 }
  0x46   : > { %2747 = vsyncadd (%p4445_p8), [#allocation5], 4294967264  ;;  %910 = vmatprep.mubr.bf16.mxu0 %v2756_v0  ;;  %1230 = vmatprep.mubr.bf16.mxu1 %v2756_v0  ;;  %p192_p5 = scmp.lt.s32.totalorder %s2376_s18, 255  ;;  %v870_v2 = vsel %vm868_vm0, 4294967295, %v2757_v1  ;;  %vm675_vm2 = vcmask 72704   ;;  %p3901_p9 = scmp.lt.s32.totalorder %s2378_s22, 63 }
  0x47   : > { %v871_v3 = vsel %vm869_vm1, %v870_v2, 0  ;;  %v2613_v4 = vld [vmem:[#allocation2 + $0x4] ss:$8 sps:$4 sm:$0x1f]  }
  0x48   : > { %s4794_s18 = smov (!%p192_p5, %s2376_s18), 255  ;;  %v2615_v5 = vld [vmem:[#allocation2] ss:$8 sps:$4 sm:$0x1f]   ;;  %v876_v6 = vand.u32 %v2613_v4, %v871_v3  ;;  %s4796_s22 = smov (!%p3901_p9, %s2378_s22), 63 }
  0x49   : > { %s2377_s16 = sshll.u32 %s4794_s18, 2  ;;  %v873_v7 = vand.u32 %v2615_v5, %v871_v3  ;;  %s2545_s13 = sshll.u32 %s4796_s22, 3 }
  0x4a   : > { %s2866_s21 = scalar_lea.vmem %s4344_s0, %s2377_s16  ;;  %878 = vmatprep.subr.bf16.mxu0 %v876_v6  ;;  %2578 = vmatprep.subr.bf16.mxu1 %v876_v6  ;;  %s3953_s26 = scalar_lea.vmem %s4347_s3, %s2545_s13 }
  0x4b   : > { %v2616_v8 = vld [vmem:[%s2866_s21] sm:$0xff]   ;;  %879 = vmatpush1.bf16.msra.mxu0 %v873_v7  ;;  %2579 = vmatpush1.bf16.msra.mxu1 %v873_v7  ;;  %v2618_v10 = vld [vmem:[%s2866_s21 + $0x8] sm:$0xff]   ;;  %v2620_v12 = vld [vmem:[%s2866_s21 + $0x10] sm:$0xff]  }
  0x4c   : > { %v2617_v9 = vld [vmem:[%s2866_s21 + $0x100] sm:$0xff]   ;;  %v2619_v11 = vld [vmem:[%s2866_s21 + $0x108] sm:$0xff]   ;;  %v2621_v13 = vld [vmem:[%s2866_s21 + $0x110] sm:$0xff]  }
  0x4d   : > { %v2622_v14 = vld [vmem:[%s2866_s21 + $0x18] sm:$0xff]   ;;  %v2624_v16 = vld [vmem:[%s2866_s21 + $0x20] sm:$0xff]   ;;  %v2626_v18 = vld [vmem:[%s2866_s21 + $0x28] sm:$0xff]  }
  0x4e   : > { %2447 = vmatmul.mubr.msk.bf16.vlgmr.msra.gmra.mrb[0].mxu0 %vm675_vm2, %v2616_v8  ;;  %2479 = vmatmul.mubr.msk.bf16.vlgmr.msra.gmra.mrb[0].mxu1 %vm675_vm2, %v2617_v9  ;;  %v2623_v15 = vld [vmem:[%s2866_s21 + $0x118] sm:$0xff]   ;;  %v2625_v17 = vld [vmem:[%s2866_s21 + $0x120] sm:$0xff]   ;;  %v2627_v19 = vld [vmem:[%s2866_s21 + $0x128] sm:$0xff]  }
  0x4f   : > { %920 = vmatprep.mubr.bf16.mxu0 %v2756_v0  ;;  %1240 = vmatprep.mubr.bf16.mxu1 %v2756_v0  ;;  %v2628_v20 = vld [vmem:[%s2866_s21 + $0x30] sm:$0xff]   ;;  %v2630_v22 = vld [vmem:[%s2866_s21 + $0x38] sm:$0xff]   ;;  %v2632_v24 = vld [vmem:[%s2866_s21 + $0x40] sm:$0xff]  }
  0x50   : > { %v2629_v21 = vld [vmem:[%s2866_s21 + $0x130] sm:$0xff]   ;;  %v2631_v23 = vld [vmem:[%s2866_s21 + $0x138] sm:$0xff]   ;;  %v2633_v25 = vld [vmem:[%s2866_s21 + $0x140] sm:$0xff]  }
  0x51   : > { %v2634_v26 = vld [vmem:[%s2866_s21 + $0x48] sm:$0xff]   ;;  %v2636_v28 = vld [vmem:[%s2866_s21 + $0x50] sm:$0xff]   ;;  %v2638_v30 = vld [vmem:[%s2866_s21 + $0x58] sm:$0xff]  }
  0x52   : > { %v2635_v27 = vld [vmem:[%s2866_s21 + $0x148] sm:$0xff]   ;;  %v2637_v29 = vld [vmem:[%s2866_s21 + $0x150] sm:$0xff]   ;;  %v2639_v31 = vld [vmem:[%s2866_s21 + $0x158] sm:$0xff]  }
  0x53   : > { %v2640_v32 = vld [vmem:[%s2866_s21 + $0x60] sm:$0xff]   ;;  %v2642_v34 = vld [vmem:[%s2866_s21 + $0x68] sm:$0xff]   ;;  %v2644_v36 = vld [vmem:[%s2866_s21 + $0x70] sm:$0xff]  }
  0x54   : > { %v2641_v33 = vld [vmem:[%s2866_s21 + $0x160] sm:$0xff]   ;;  %v2643_v35 = vld [vmem:[%s2866_s21 + $0x168] sm:$0xff]   ;;  %v2645_v37 = vld [vmem:[%s2866_s21 + $0x170] sm:$0xff]  }
  0x55   : > { %v2646_v38 = vld [vmem:[%s2866_s21 + $0x78] sm:$0xff]   ;;  %v2648_v40 = vld [vmem:[%s2866_s21 + $0x80] sm:$0xff]   ;;  %v2650_v42 = vld [vmem:[%s2866_s21 + $0x88] sm:$0xff]  }
  0x56   : > { %2448 = vmatmul.mubr.msk.bf16.gmra.mrb[4].mxu0 %vm675_vm2, %v2618_v10  ;;  %2480 = vmatmul.mubr.msk.bf16.gmra.mrb[4].mxu1 %vm675_vm2, %v2619_v11  ;;  %v2647_v39 = vld [vmem:[%s2866_s21 + $0x178] sm:$0xff]   ;;  %v2649_v41 = vld [vmem:[%s2866_s21 + $0x180] sm:$0xff]   ;;  %v2651_v43 = vld [vmem:[%s2866_s21 + $0x188] sm:$0xff]  }
  0x57   : > { %930 = vmatprep.mubr.bf16.mxu0 %v2756_v0  ;;  %1250 = vmatprep.mubr.bf16.mxu1 %v2756_v0  ;;  %v2652_v44 = vld [vmem:[%s2866_s21 + $0x90] sm:$0xff]   ;;  %v2654_v46 = vld [vmem:[%s2866_s21 + $0x98] sm:$0xff]   ;;  %v2656_v48 = vld [vmem:[%s2866_s21 + $0xa0] sm:$0xff]  }
  0x58   : > { %v2653_v45 = vld [vmem:[%s2866_s21 + $0x190] sm:$0xff]   ;;  %v2655_v47 = vld [vmem:[%s2866_s21 + $0x198] sm:$0xff]   ;;  %v2657_v49 = vld [vmem:[%s2866_s21 + $0x1a0] sm:$0xff]  }
  0x59   : > { %v2658_v50 = vld [vmem:[%s2866_s21 + $0xa8] sm:$0xff]   ;;  %v2660_v52 = vld [vmem:[%s2866_s21 + $0xb0] sm:$0xff]   ;;  %v2662_v54 = vld [vmem:[%s2866_s21 + $0xb8] sm:$0xff]  }
  0x5a   : > { %v2659_v51 = vld [vmem:[%s2866_s21 + $0x1a8] sm:$0xff]   ;;  %v2661_v53 = vld [vmem:[%s2866_s21 + $0x1b0] sm:$0xff]   ;;  %v2663_v55 = vld [vmem:[%s2866_s21 + $0x1b8] sm:$0xff]  }
  0x5b   : > { %v2664_v56 = vld [vmem:[%s2866_s21 + $0xc0] sm:$0xff]   ;;  %v2666_v58 = vld [vmem:[%s2866_s21 + $0xc8] sm:$0xff]   ;;  %v2668_v60 = vld [vmem:[%s2866_s21 + $0xd0] sm:$0xff]  }
  0x5c   : > { %v2665_v57 = vld [vmem:[%s2866_s21 + $0x1c0] sm:$0xff]   ;;  %v2667_v59 = vld [vmem:[%s2866_s21 + $0x1c8] sm:$0xff]   ;;  %v2669_v61 = vld [vmem:[%s2866_s21 + $0x1d0] sm:$0xff]  }
  0x5d   : > { %v2670_v3 = vld [vmem:[%s2866_s21 + $0xd8] sm:$0xff]  }
  0x5e   : > { %2449 = vmatmul.mubr.msk.bf16.gmra.mrb[8].mxu0 %vm675_vm2, %v2620_v12  ;;  %2481 = vmatmul.mubr.msk.bf16.gmra.mrb[8].mxu1 %vm675_vm2, %v2621_v13  ;;  %v2671_v4 = vld [vmem:[%s2866_s21 + $0x1d8] sm:$0xff]   ;;  %v2672_v13 = vld [vmem:[%s2866_s21 + $0xe0] sm:$0xff]  }
  0x5f   : > { %940 = vmatprep.mubr.bf16.mxu0 %v2756_v0  ;;  %1260 = vmatprep.mubr.bf16.mxu1 %v2756_v0 }
  0x66   : > { %2450 = vmatmul.mubr.msk.bf16.gmra.mrb[12].mxu0 %vm675_vm2, %v2622_v14  ;;  %2482 = vmatmul.mubr.msk.bf16.gmra.mrb[12].mxu1 %vm675_vm2, %v2623_v15  ;;  %v2673_v14 = vld [vmem:[%s2866_s21 + $0x1e0] sm:$0xff]  }
  0x67   : > { %950 = vmatprep.mubr.bf16.mxu0 %v2756_v0  ;;  %1270 = vmatprep.mubr.bf16.mxu1 %v2756_v0 }
  0x6e   : > { %2451 = vmatmul.mubr.msk.bf16.gmra.mrb[16].mxu0 %vm675_vm2, %v2624_v16  ;;  %2483 = vmatmul.mubr.msk.bf16.gmra.mrb[16].mxu1 %vm675_vm2, %v2625_v17 }
  0x6f   : > { %960 = vmatprep.mubr.bf16.mxu0 %v2756_v0  ;;  %1280 = vmatprep.mubr.bf16.mxu1 %v2756_v0 }
  0x76   : > { %2452 = vmatmul.mubr.msk.bf16.gmra.mrb[20].mxu0 %vm675_vm2, %v2626_v18  ;;  %2484 = vmatmul.mubr.msk.bf16.gmra.mrb[20].mxu1 %vm675_vm2, %v2627_v19 }
  0x77   : > { %970 = vmatprep.mubr.bf16.mxu0 %v2756_v0  ;;  %1290 = vmatprep.mubr.bf16.mxu1 %v2756_v0 }
  0x7e   : > { %2453 = vmatmul.mubr.msk.bf16.gmra.mrb[24].mxu0 %vm675_vm2, %v2628_v20  ;;  %2485 = vmatmul.mubr.msk.bf16.gmra.mrb[24].mxu1 %vm675_vm2, %v2629_v21 }
  0x7f   : > { %980 = vmatprep.mubr.bf16.mxu0 %v2756_v0  ;;  %1300 = vmatprep.mubr.bf16.mxu1 %v2756_v0 }
  0x86   : > { %2454 = vmatmul.mubr.msk.bf16.gmra.mrb[28].mxu0 %vm675_vm2, %v2630_v22  ;;  %2486 = vmatmul.mubr.msk.bf16.gmra.mrb[28].mxu1 %vm675_vm2, %v2631_v23  ;;  %v2674_v23 = vld [vmem:[%s2866_s21 + $0xe8] sm:$0xff]  }
  0x87   : > { %990 = vmatprep.mubr.bf16.mxu0 %v2756_v0  ;;  %1310 = vmatprep.mubr.bf16.mxu1 %v2756_v0 }
  0x8e   : > { %2455 = vmatmul.mubr.msk.bf16.gmra.mrb[32].mxu0 %vm675_vm2, %v2632_v24  ;;  %2487 = vmatmul.mubr.msk.bf16.gmra.mrb[32].mxu1 %vm675_vm2, %v2633_v25  ;;  %v2675_v24 = vld [vmem:[%s2866_s21 + $0x1e8] sm:$0xff]  }
  0x8f   : > { %1000 = vmatprep.mubr.bf16.mxu0 %v2756_v0  ;;  %1320 = vmatprep.mubr.bf16.mxu1 %v2756_v0 }
  0x96   : > { %2456 = vmatmul.mubr.msk.bf16.gmra.mrb[36].mxu0 %vm675_vm2, %v2634_v26  ;;  %2488 = vmatmul.mubr.msk.bf16.gmra.mrb[36].mxu1 %vm675_vm2, %v2635_v27 }
  0x97   : > { %1010 = vmatprep.mubr.bf16.mxu0 %v2756_v0  ;;  %1330 = vmatprep.mubr.bf16.mxu1 %v2756_v0 }
  0x9e   : > { %2457 = vmatmul.mubr.msk.bf16.gmra.mrb[40].mxu0 %vm675_vm2, %v2636_v28  ;;  %2489 = vmatmul.mubr.msk.bf16.gmra.mrb[40].mxu1 %vm675_vm2, %v2637_v29 }
  0x9f   : > { %1020 = vmatprep.mubr.bf16.mxu0 %v2756_v0  ;;  %1340 = vmatprep.mubr.bf16.mxu1 %v2756_v0 }
  0xa6   : > { %2458 = vmatmul.mubr.msk.bf16.gmra.mrb[44].mxu0 %vm675_vm2, %v2638_v30  ;;  %2490 = vmatmul.mubr.msk.bf16.gmra.mrb[44].mxu1 %vm675_vm2, %v2639_v31 }
  0xa7   : > { %1030 = vmatprep.mubr.bf16.mxu0 %v2756_v0  ;;  %1350 = vmatprep.mubr.bf16.mxu1 %v2756_v0 }
  0xae   : > { %2459 = vmatmul.mubr.msk.bf16.gmra.mrb[48].mxu0 %vm675_vm2, %v2640_v32  ;;  %2491 = vmatmul.mubr.msk.bf16.gmra.mrb[48].mxu1 %vm675_vm2, %v2641_v33  ;;  %v2676_v33 = vld [vmem:[%s2866_s21 + $0xf0] sm:$0xff]  }
  0xaf   : > { %1040 = vmatprep.mubr.bf16.mxu0 %v2756_v0  ;;  %1360 = vmatprep.mubr.bf16.mxu1 %v2756_v0 }
  0xb6   : > { %2460 = vmatmul.mubr.msk.bf16.gmra.mrb[52].mxu0 %vm675_vm2, %v2642_v34  ;;  %2492 = vmatmul.mubr.msk.bf16.gmra.mrb[52].mxu1 %vm675_vm2, %v2643_v35  ;;  %v2677_v34 = vld [vmem:[%s2866_s21 + $0x1f0] sm:$0xff]  }
  0xb7   : > { %1050 = vmatprep.mubr.bf16.mxu0 %v2756_v0  ;;  %1370 = vmatprep.mubr.bf16.mxu1 %v2756_v0 }
  0xbe   : > { %2461 = vmatmul.mubr.msk.bf16.gmra.mrb[56].mxu0 %vm675_vm2, %v2644_v36  ;;  %2493 = vmatmul.mubr.msk.bf16.gmra.mrb[56].mxu1 %vm675_vm2, %v2645_v37 }
  0xbf   : > { %1060 = vmatprep.mubr.bf16.mxu0 %v2756_v0  ;;  %1380 = vmatprep.mubr.bf16.mxu1 %v2756_v0 }
  0xc6   : > { %2462 = vmatmul.mubr.msk.bf16.gmra.mrb[60].mxu0 %vm675_vm2, %v2646_v38  ;;  %2494 = vmatmul.mubr.msk.bf16.gmra.mrb[60].mxu1 %vm675_vm2, %v2647_v39 }
  0xc7   : > { %1070 = vmatprep.mubr.bf16.mxu0 %v2756_v0  ;;  %1390 = vmatprep.mubr.bf16.mxu1 %v2756_v0 }
  0xce   : > { %2463 = vmatmul.mubr.msk.bf16.gmra.mrb[64].mxu0 %vm675_vm2, %v2648_v40  ;;  %2495 = vmatmul.mubr.msk.bf16.gmra.mrb[64].mxu1 %vm675_vm2, %v2649_v41 }
  0xcf   : > { %1080 = vmatprep.mubr.bf16.mxu0 %v2756_v0  ;;  %1400 = vmatprep.mubr.bf16.mxu1 %v2756_v0 }
  0xd6   : > { %2464 = vmatmul.mubr.msk.bf16.gmra.mrb[68].mxu0 %vm675_vm2, %v2650_v42  ;;  %2496 = vmatmul.mubr.msk.bf16.gmra.mrb[68].mxu1 %vm675_vm2, %v2651_v43  ;;  %v2678_v43 = vld [vmem:[%s2866_s21 + $0xf8] sm:$0xff]  }
  0xd7   : > { %1090 = vmatprep.mubr.bf16.mxu0 %v2756_v0  ;;  %1410 = vmatprep.mubr.bf16.mxu1 %v2756_v0 }
  0xde   : > { %2465 = vmatmul.mubr.msk.bf16.gmra.mrb[72].mxu0 %vm675_vm2, %v2652_v44  ;;  %2497 = vmatmul.mubr.msk.bf16.gmra.mrb[72].mxu1 %vm675_vm2, %v2653_v45  ;;  %v2679_v44 = vld [vmem:[%s2866_s21 + $0x1f8] sm:$0xff]  }
  0xdf   : > { %1100 = vmatprep.mubr.bf16.mxu0 %v2756_v0  ;;  %1420 = vmatprep.mubr.bf16.mxu1 %v2756_v0 }
  0xe6   : > { %2466 = vmatmul.mubr.msk.bf16.gmra.mrb[76].mxu0 %vm675_vm2, %v2654_v46  ;;  %2498 = vmatmul.mubr.msk.bf16.gmra.mrb[76].mxu1 %vm675_vm2, %v2655_v47 }
  0xe7   : > { %1110 = vmatprep.mubr.bf16.mxu0 %v2756_v0  ;;  %1430 = vmatprep.mubr.bf16.mxu1 %v2756_v0 }
  0xee   : > { %2467 = vmatmul.mubr.msk.bf16.gmra.mrb[80].mxu0 %vm675_vm2, %v2656_v48  ;;  %2499 = vmatmul.mubr.msk.bf16.gmra.mrb[80].mxu1 %vm675_vm2, %v2657_v49 }
  0xef   : > { %1120 = vmatprep.mubr.bf16.mxu0 %v2756_v0  ;;  %1440 = vmatprep.mubr.bf16.mxu1 %v2756_v0 }
  0xf6   : > { %2468 = vmatmul.mubr.msk.bf16.gmra.mrb[84].mxu0 %vm675_vm2, %v2658_v50  ;;  %2500 = vmatmul.mubr.msk.bf16.gmra.mrb[84].mxu1 %vm675_vm2, %v2659_v51 }
  0xf7   : > { %1130 = vmatprep.mubr.bf16.mxu0 %v2756_v0  ;;  %1450 = vmatprep.mubr.bf16.mxu1 %v2756_v0 }
  0xfe   : > { %2469 = vmatmul.mubr.msk.bf16.gmra.mrb[88].mxu0 %vm675_vm2, %v2660_v52  ;;  %2501 = vmatmul.mubr.msk.bf16.gmra.mrb[88].mxu1 %vm675_vm2, %v2661_v53 }
  0xff   : > { %1140 = vmatprep.mubr.bf16.mxu0 %v2756_v0  ;;  %1460 = vmatprep.mubr.bf16.mxu1 %v2756_v0 }
 0x106   : > { %2470 = vmatmul.mubr.msk.bf16.gmra.mrb[92].mxu0 %vm675_vm2, %v2662_v54  ;;  %2502 = vmatmul.mubr.msk.bf16.gmra.mrb[92].mxu1 %vm675_vm2, %v2663_v55 }
 0x107   : > { %1150 = vmatprep.mubr.bf16.mxu0 %v2756_v0  ;;  %1470 = vmatprep.mubr.bf16.mxu1 %v2756_v0 }
 0x10e   : > { %2471 = vmatmul.mubr.msk.bf16.gmra.mrb[96].mxu0 %vm675_vm2, %v2664_v56  ;;  %2503 = vmatmul.mubr.msk.bf16.gmra.mrb[96].mxu1 %vm675_vm2, %v2665_v57 }
 0x10f   : > { %1160 = vmatprep.mubr.bf16.mxu0 %v2756_v0  ;;  %1480 = vmatprep.mubr.bf16.mxu1 %v2756_v0 }
 0x116   : > { %2472 = vmatmul.mubr.msk.bf16.gmra.mrb[100].mxu0 %vm675_vm2, %v2666_v58  ;;  %2504 = vmatmul.mubr.msk.bf16.gmra.mrb[100].mxu1 %vm675_vm2, %v2667_v59 }
 0x117   : > { %1170 = vmatprep.mubr.bf16.mxu0 %v2756_v0  ;;  %1490 = vmatprep.mubr.bf16.mxu1 %v2756_v0 }
 0x11e   : > { %2473 = vmatmul.mubr.msk.bf16.gmra.mrb[104].mxu0 %vm675_vm2, %v2668_v60  ;;  %2505 = vmatmul.mubr.msk.bf16.gmra.mrb[104].mxu1 %vm675_vm2, %v2669_v61  ;;  %v337_v60 = vlaneseq }
 0x11f   : > { %1180 = vmatprep.mubr.bf16.mxu0 %v2756_v0  ;;  %1500 = vmatprep.mubr.bf16.mxu1 %v2756_v0 }
 0x121   : > { %v3030_v62 = vpop.f32.mrb[0].mxu0  ;;  %v3032_v63 = vpop.f32.mrb[0].mxu1 }
 0x122   : > { %v3034_v1 = vpop.f32.mrb[1].mxu0  ;;  %v3036_v2 = vpop.f32.mrb[1].mxu1 }
 0x123   : > { %v3040_v5 = vpop.f32.mrb[2].mxu0  ;;  %v3042_v6 = vpop.f32.mrb[2].mxu1 }
 0x124   : > { %v3044_v7 = vpop.f32.mrb[3].mxu0  ;;  %v3046_v8 = vpop.f32.mrb[3].mxu1 }
 0x126   : > { %2474 = vmatmul.mubr.msk.bf16.gmra.mrb[108].mxu0 %vm675_vm2, %v2670_v3  ;;  %2506 = vmatmul.mubr.msk.bf16.gmra.mrb[108].mxu1 %vm675_vm2, %v2671_v4 }
 0x127   : > { %1190 = vmatprep.mubr.bf16.mxu0 %v2756_v0  ;;  %1510 = vmatprep.mubr.bf16.mxu1 %v2756_v0 }
 0x129   : > { %v3052_v9 = vpop.f32.mrb[4].mxu0  ;;  %v3054_v10 = vpop.f32.mrb[4].mxu1 }
 0x12a   : > { %v3056_v11 = vpop.f32.mrb[5].mxu0  ;;  %v3058_v12 = vpop.f32.mrb[5].mxu1 }
 0x12b   : > { %v3062_v15 = vpop.f32.mrb[6].mxu0  ;;  %v3064_v16 = vpop.f32.mrb[6].mxu1 }
 0x12c   : > { %v3066_v17 = vpop.f32.mrb[7].mxu0  ;;  %v3068_v18 = vpop.f32.mrb[7].mxu1 }
 0x12e   : > { %2475 = vmatmul.mubr.msk.bf16.gmra.mrb[112].mxu0 %vm675_vm2, %v2672_v13  ;;  %2507 = vmatmul.mubr.msk.bf16.gmra.mrb[112].mxu1 %vm675_vm2, %v2673_v14  ;;  %v338_v14 = vshrl.u32 %v337_v60, 7 }
 0x12f   : > { %1200 = vmatprep.mubr.bf16.mxu0 %v2756_v0  ;;  %1520 = vmatprep.mubr.bf16.mxu1 %v2756_v0 }
 0x131   : > { %v3074_v19 = vpop.f32.mrb[8].mxu0  ;;  %v3076_v20 = vpop.f32.mrb[8].mxu1 }
 0x132   : > { %v3078_v21 = vpop.f32.mrb[9].mxu0  ;;  %v3080_v22 = vpop.f32.mrb[9].mxu1 }
 0x133   : > { %v3084_v25 = vpop.f32.mrb[10].mxu0  ;;  %v3086_v26 = vpop.f32.mrb[10].mxu1 }
 0x134   : > { %v3088_v27 = vpop.f32.mrb[11].mxu0  ;;  %v3090_v28 = vpop.f32.mrb[11].mxu1 }
 0x136   : > { %2476 = vmatmul.mubr.msk.bf16.gmra.mrb[116].mxu0 %vm675_vm2, %v2674_v23  ;;  %2508 = vmatmul.mubr.msk.bf16.gmra.mrb[116].mxu1 %vm675_vm2, %v2675_v24 }
 0x137   : > { %1210 = vmatprep.mubr.bf16.mxu0 %v2756_v0  ;;  %1530 = vmatprep.mubr.bf16.mxu1 %v2756_v0 }
 0x139   : > { %v3096_v29 = vpop.f32.mrb[12].mxu0  ;;  %v3098_v30 = vpop.f32.mrb[12].mxu1 }
 0x13a   : > { %v3100_v31 = vpop.f32.mrb[13].mxu0  ;;  %v3102_v32 = vpop.f32.mrb[13].mxu1 }
 0x13b   : > { %v3106_v35 = vpop.f32.mrb[14].mxu0  ;;  %v3108_v36 = vpop.f32.mrb[14].mxu1 }
 0x13c   : > { %v3110_v37 = vpop.f32.mrb[15].mxu0  ;;  %v3112_v38 = vpop.f32.mrb[15].mxu1 }
 0x13e   : > { %2477 = vmatmul.mubr.msk.bf16.gmra.mrb[120].mxu0 %vm675_vm2, %v2676_v33  ;;  %2509 = vmatmul.mubr.msk.bf16.gmra.mrb[120].mxu1 %vm675_vm2, %v2677_v34 }
 0x13f   : > { %1220 = vmatprep.mubr.bf16.mxu0 %v2756_v0  ;;  %1540 = vmatprep.mubr.bf16.mxu1 %v2756_v0 }
 0x141   : > { %v3118_v39 = vpop.f32.mrb[16].mxu0  ;;  %v3120_v40 = vpop.f32.mrb[16].mxu1 }
 0x142   : > { %v3122_v41 = vpop.f32.mrb[17].mxu0  ;;  %v3124_v42 = vpop.f32.mrb[17].mxu1 }
 0x143   : > { %v3128_v45 = vpop.f32.mrb[18].mxu0  ;;  %v3130_v46 = vpop.f32.mrb[18].mxu1 }
 0x144   : > { %v3132_v47 = vpop.f32.mrb[19].mxu0  ;;  %v3134_v48 = vpop.f32.mrb[19].mxu1 }
 0x146   : > { %2478 = vmatmul.mubr.msk.bf16.gmra.mrb[124].mxu0 %vm675_vm2, %v2678_v43  ;;  %2510 = vmatmul.mubr.msk.bf16.gmra.mrb[124].mxu1 %vm675_vm2, %v2679_v44  ;;  %v339_v43 = vsub.s32 0, %v338_v14 }
 0x149   : > { %v3138_v0 = vpop.f32.mrb[20].mxu0  ;;  %v3140_v49 = vpop.f32.mrb[20].mxu1 }
 0x14a   : > { %v3142_v50 = vpop.f32.mrb[21].mxu0  ;;  %v3144_v51 = vpop.f32.mrb[21].mxu1 }
 0x14b   : > { %v3146_v52 = vpop.f32.mrb[22].mxu0  ;;  %v3148_v53 = vpop.f32.mrb[22].mxu1 }
 0x14c   : > { %v3150_v54 = vpop.f32.mrb[23].mxu0  ;;  %v3152_v55 = vpop.f32.mrb[23].mxu1 }
 0x151   : > { %v3154_v56 = vpop.f32.mrb[24].mxu0  ;;  %v3156_v57 = vpop.f32.mrb[24].mxu1 }
 0x152   : > { %4446 = vst [vmem:[#allocation8_spill] sm:$0xff] %v3156_v57  ;;  %v3158_v58 = vpop.f32.mrb[25].mxu0  ;;  %v3160_v59 = vpop.f32.mrb[25].mxu1 }
 0x153   : > { %4447 = vst [vmem:[#allocation9_spill] sm:$0xff] %v3160_v59  ;;  %v3162_v61 = vpop.f32.mrb[26].mxu0  ;;  %v3164_v3 = vpop.f32.mrb[26].mxu1 }
 0x154   : > { %4448 = vst [vmem:[#allocation10_spill] sm:$0xff] %v3162_v61  ;;  %4449 = vst [vmem:[#allocation11_spill] sm:$0xff] %v3164_v3  ;;  %v3166_v4 = vpop.f32.mrb[27].mxu0  ;;  %v3168_v13 = vpop.f32.mrb[27].mxu1  ;;  %v335_v61 = vld [vmem:[#allocation4] sm:$0x3] }
 0x155   : > { %4450 = vst [vmem:[#allocation12_spill] sm:$0xff] %v3166_v4  ;;  %4451 = vst [vmem:[#allocation13_spill] sm:$0xff] %v3168_v13  ;;  %v343_v3 = vsub.s32 1, %v338_v14  ;;  %v3186_v60 = vrot.slane %v335_v61, %v339_v43 }
 0x159   : > { %v3170_v23 = vpop.f32.mrb[28].mxu0  ;;  %v3172_v24 = vpop.f32.mrb[28].mxu1 }
 0x15a   : > { %4452 = vst [vmem:[#allocation14_spill] sm:$0xff] %v3170_v23  ;;  %4453 = vst [vmem:[#allocation15_spill] sm:$0xff] %v3172_v24  ;;  %v3174_v33 = vpop.f32.mrb[29].mxu0  ;;  %v3176_v34 = vpop.f32.mrb[29].mxu1  ;;  %v3188_v23 = vrot.slane %v335_v61, %v343_v3  ;;  %v3212_v3 = vadd.f32 %v3032_v63, %v3186_v60  ;;  %v3232_v63 = vadd.f32 %v3042_v6, %v3186_v60 }
 0x15b   : > { %4454 = vst [vmem:[#allocation16_spill] sm:$0xff] %v3174_v33  ;;  %4455 = vst [vmem:[#allocation17_spill] sm:$0xff] %v3176_v34  ;;  %v3178_v44 = vpop.f32.mrb[30].mxu0  ;;  %v3180_v59 = vpop.f32.mrb[30].mxu1  ;;  %v3265_v6 = vadd.f32 %v3062_v15, %v3186_v60 }
 0x15c   : > { %4456 = vst [vmem:[#allocation18_spill] sm:$0xff] %v3180_v59  ;;  %v3182_v57 = vpop.f32.mrb[31].mxu0  ;;  %v3184_v4 = vpop.f32.mrb[31].mxu1  ;;  %v3200_v59 = vadd.f32 %v3030_v62, %v3186_v60  ;;  %v3208_v61 = vadd.f32 %v3034_v1, %v3188_v23  ;;  %v3216_v43 = vadd.f32 %v3036_v2, %v3188_v23  ;;  %v3228_v1 = vadd.f32 %v3044_v7, %v3188_v23 }
 0x15d   : > { %4457 = vst [vmem:[#allocation19_spill] sm:$0xff] %v3182_v57  ;;  %4467 = vst [vmem:[#allocation29_spill] sm:$0xff] %v3232_v63  ;;  %v3236_v2 = vadd.f32 %v3046_v8, %v3188_v23  ;;  %v3252_v8 = vadd.f32 %v3056_v11, %v3188_v23  ;;  %v3269_v11 = vadd.f32 %v3058_v12, %v3188_v23 }
 0x15e   : > { %4461 = vst [vmem:[#allocation23_spill] sm:$0xff] %v3200_v59  ;;  %4466 = vst [vmem:[#allocation28_spill] sm:$0xff] %v3228_v1  ;;  %v3286_v15 = vadd.f32 %v3068_v18, %v3188_v23  ;;  %v3290_v12 = vadd.f32 %v3074_v19, %v3186_v60  ;;  %v3307_v18 = vadd.f32 %v3080_v22, %v3188_v23 }
 0x15f   : > { %4468 = vst [vmem:[#allocation30_spill] sm:$0xff] %v3236_v2  ;;  %4471 = vst [vmem:[#allocation33_spill] sm:$0xff] %v3252_v8  ;;  %v3315_v2 = vadd.f32 %v3084_v25, %v3186_v60  ;;  %v3327_v22 = vadd.f32 %v3090_v28, %v3188_v23  ;;  %v3334_v25 = vadd.f32 %v3096_v29, %v3186_v60 }
 0x160   : > { %4472 = vst [vmem:[#allocation34_spill] sm:$0xff] %v3286_v15  ;;  %4473 = vst [vmem:[#allocation35_spill] sm:$0xff] %v3290_v12  ;;  %v3341_v28 = vadd.f32 %v3098_v30, %v3186_v60  ;;  %v3348_v29 = vadd.f32 %v3100_v31, %v3188_v23  ;;  %v3361_v63 = vadd.f32 %v3106_v35, %v3186_v60 }
 0x161   : > { %v3190_v24 = vpop.f32.mrb[32].mxu0  ;;  %v3192_v33 = vpop.f32.mrb[32].mxu1  ;;  %4475 = vst [vmem:[#allocation37_spill] sm:$0xff] %v3307_v18  ;;  %4476 = vst [vmem:[#allocation38_spill] sm:$0xff] %v3315_v2  ;;  %v3365_v31 = vadd.f32 %v3102_v32, %v3188_v23  ;;  %v3369_v1 = vadd.f32 %v3108_v36, %v3186_v60  ;;  %v3378_v8 = vadd.f32 %v3110_v37, %v3188_v23 }
 0x162   : > { %4458 = vst [vmem:[#allocation20_spill] sm:$0xff] %v3192_v33  ;;  %v3194_v34 = vpop.f32.mrb[33].mxu0  ;;  %v3196_v13 = vpop.f32.mrb[33].mxu1  ;;  %v3299_v33 = vadd.f32 %v3078_v21, %v3188_v23  ;;  %v3319_v21 = vadd.f32 %v3088_v27, %v3188_v23  ;;  %4479 = vst [vmem:[#allocation41_spill] sm:$0xff] %v3327_v22  ;;  %v3382_v35 = vadd.f32 %v3112_v38, %v3188_v23 }
 0x163   : > { %4459 = vst [vmem:[#allocation21_spill] sm:$0xff] %v3194_v34  ;;  %4460 = vst [vmem:[#allocation22_spill] sm:$0xff] %v3196_v13  ;;  %v3202_v14 = vpop.f32.mrb[34].mxu0  ;;  %v3204_v57 = vpop.f32.mrb[34].mxu1  ;;  %v3386_v32 = vadd.f32 %v3118_v39, %v3186_v60  ;;  %v3395_v27 = vadd.f32 %v3122_v41, %v3188_v23  ;;  %v3399_v37 = vadd.f32 %v3120_v40, %v3186_v60 }
 0x164   : > { %4462 = vst [vmem:[#allocation24_spill] sm:$0xff] %v3202_v14  ;;  %4463 = vst [vmem:[#allocation25_spill] sm:$0xff] %v3204_v57  ;;  %v3218_v13 = vpop.f32.mrb[35].mxu0  ;;  %v3220_v62 = vpop.f32.mrb[35].mxu1  ;;  %v3224_v14 = vadd.f32 %v3040_v5, %v3186_v60  ;;  %v3240_v57 = vadd.f32 %v3052_v9, %v3186_v60  ;;  %v3245_v5 = vadd.f32 %v3054_v10, %v3186_v60 }
 0x165   : > { %4464 = vst [vmem:[#allocation26_spill] sm:$0xff] %v3218_v13  ;;  %4465 = vst [vmem:[#allocation27_spill] sm:$0xff] %v3220_v62  ;;  %v3273_v9 = vadd.f32 %v3064_v16, %v3186_v60  ;;  %v3282_v13 = vadd.f32 %v3066_v17, %v3188_v23  ;;  %v3303_v17 = vadd.f32 %v3076_v20, %v3186_v60 }
 0x166   : > { %4469 = vst [vmem:[#allocation31_spill] sm:$0xff] %v3240_v57  ;;  %4470 = vst [vmem:[#allocation32_spill] sm:$0xff] %v3245_v5  ;;  %v3323_v20 = vadd.f32 %v3086_v26, %v3186_v60  ;;  %v3403_v38 = vadd.f32 %v3124_v42, %v3188_v23  ;;  %v3411_v22 = vadd.f32 %v3128_v45, %v3186_v60 }
 0x167   : > { %4474 = vst [vmem:[#allocation36_spill] sm:$0xff] %v3303_v17  ;;  %4477 = vst [vmem:[#allocation39_spill] sm:$0xff] %v3319_v21  ;;  %v3415_v41 = vadd.f32 %v3132_v47, %v3188_v23  ;;  %v3419_v40 = vadd.f32 %v3130_v46, %v3186_v60  ;;  %v3423_v42 = vadd.f32 %v3134_v48, %v3188_v23 }
 0x168   : > { %4478 = vst [vmem:[#allocation40_spill] sm:$0xff] %v3323_v20  ;;  %4480 = vst [vmem:[#allocation42_spill] sm:$0xff] %v3334_v25  ;;  %v3430_v45 = vadd.f32 %v3138_v0, %v3186_v60  ;;  %v3437_v48 = vadd.f32 %v3140_v49, %v3186_v60  ;;  %v3444_v0 = vadd.f32 %v3142_v50, %v3188_v23 }
 0x169   : > { %v3258_v10 = vpop.f32.mrb[36].mxu0  ;;  %v3260_v34 = vpop.f32.mrb[36].mxu1  ;;  %4481 = vst [vmem:[#allocation43_spill] sm:$0xff] %v3341_v28  ;;  %4482 = vst [vmem:[#allocation44_spill] sm:$0xff] %v3348_v29  ;;  %v3457_v21 = vadd.f32 %v3146_v52, %v3186_v60  ;;  %v3461_v50 = vadd.f32 %v3144_v51, %v3188_v23  ;;  %v3465_v20 = vadd.f32 %v3148_v53, %v3186_v60 }
 0x16a   : > { %v3275_v62 = vpop.f32.mrb[37].mxu0  ;;  %v3277_v59 = vpop.f32.mrb[37].mxu1  ;;  %4483 = vst [vmem:[#allocation45_spill] sm:$0xff] %v3361_v63  ;;  %4484 = vst [vmem:[#allocation46_spill] sm:$0xff] %v3365_v31  ;;  %v3474_v29 = vadd.f32 %v3150_v54, %v3188_v23  ;;  %v3478_v52 = vadd.f32 %v3152_v55, %v3188_v23  ;;  %v3482_v51 = vadd.f32 %v3154_v56, %v3186_v60  ;;  %v4506_v54 = vld [vmem:[#allocation8_spill] sm:$0xff]  ;;  %v4508_v55 = vld [vmem:[#allocation9_spill] sm:$0xff] }
 0x16b   : > { %v3292_v16 = vpop.f32.mrb[38].mxu0  ;;  %v3294_v7 = vpop.f32.mrb[38].mxu1  ;;  %4485 = vst [vmem:[#allocation47_spill] sm:$0xff] %v3369_v1  ;;  %4486 = vst [vmem:[#allocation48_spill] sm:$0xff] %v3378_v8  ;;  %v3491_v47 = vadd.f32 %v3158_v58, %v3188_v23  ;;  %v4520_v63 = vld [vmem:[#allocation15_spill] sm:$0xff]  ;;  %v3553_v8 = vadd.f32 %v3178_v44, %v3186_v60  ;;  %v4525_v31 = vld [vmem:[#allocation18_spill] sm:$0xff]  ;;  %v3574_v44 = vadd.f32 %v3184_v4, %v3188_v23 }
 0x16c   : > { %v3309_v19 = vpop.f32.mrb[39].mxu0  ;;  %v3311_v5 = vpop.f32.mrb[39].mxu1  ;;  %4487 = vst [vmem:[#allocation49_spill] sm:$0xff] %v3382_v35  ;;  %4488 = vst [vmem:[#allocation50_spill] sm:$0xff] %v3386_v32  ;;  %v4531_v4 = vld [vmem:[#allocation22_spill] sm:$0xff]  ;;  %v3649_v17 = vadd.f32 %v3292_v16, %v3186_v60  ;;  %v3657_v2 = vadd.f32 %v3294_v7, %v3186_v60 }
 0x16d   : > { %4489 = vst [vmem:[#allocation51_spill] sm:$0xff] %v3395_v27  ;;  %4490 = vst [vmem:[#allocation52_spill] sm:$0xff] %v3399_v37  ;;  %v4526_v37 = vld [vmem:[#allocation19_spill] sm:$0xff]  ;;  %v3670_v16 = vadd.f32 %v3311_v5, %v3188_v23 }
 0x16e   : > { %4491 = vst [vmem:[#allocation53_spill] sm:$0xff] %v3403_v38  ;;  %4492 = vst [vmem:[#allocation54_spill] sm:$0xff] %v3411_v22  ;;  %v4516_v22 = vld [vmem:[#allocation13_spill] sm:$0xff] }
 0x16f   : > { %4493 = vst [vmem:[#allocation55_spill] sm:$0xff] %v3415_v41  ;;  %4494 = vst [vmem:[#allocation56_spill] sm:$0xff] %v3419_v40  ;;  %v4510_v40 = vld [vmem:[#allocation10_spill] sm:$0xff] }
 0x170   : > { %4495 = vst [vmem:[#allocation57_spill] sm:$0xff] %v3423_v42  ;;  %4496 = vst [vmem:[#allocation58_spill] sm:$0xff] %v3430_v45  ;;  %v3499_v45 = vadd.f32 %v4508_v55, %v3188_v23  ;;  %v3507_v38 = vadd.f32 %v4510_v40, %v3186_v60  ;;  %v4512_v42 = vld [vmem:[#allocation12_spill] sm:$0xff]  ;;  %v3519_v55 = vadd.f32 %v4516_v22, %v3188_v23  ;;  %v4518_v40 = vld [vmem:[#allocation14_spill] sm:$0xff] }
 0x171   : > { %v3354_v30 = vpop.f32.mrb[40].mxu0  ;;  %v3356_v15 = vpop.f32.mrb[40].mxu1  ;;  %4497 = vst [vmem:[#allocation59_spill] sm:$0xff] %v3437_v48  ;;  %4498 = vst [vmem:[#allocation60_spill] sm:$0xff] %v3444_v0  ;;  %v3495_v48 = vadd.f32 %v4506_v54, %v3186_v60  ;;  %v3511_v58 = vadd.f32 %v4512_v42, %v3188_v23  ;;  %v4514_v0 = vld [vmem:[#allocation11_spill] sm:$0xff]  ;;  %v3526_v1 = vadd.f32 %v4518_v40, %v3186_v60 }
 0x172   : > { %v3371_v26 = vpop.f32.mrb[41].mxu0  ;;  %v3373_v12 = vpop.f32.mrb[41].mxu1  ;;  %4499 = vst [vmem:[#allocation61_spill] sm:$0xff] %v3457_v21  ;;  %4500 = vst [vmem:[#allocation62_spill] sm:$0xff] %v3461_v50  ;;  %v3515_v54 = vadd.f32 %v4514_v0, %v3186_v60  ;;  %v3533_v22 = vadd.f32 %v4520_v63, %v3186_v60  ;;  %v3561_v42 = vadd.f32 %v4525_v31, %v3186_v60  ;;  %v4537_v50 = vld [vmem:[#allocation27_spill] sm:$0xff] }
 0x173   : > { %v3388_v36 = vpop.f32.mrb[42].mxu0  ;;  %v3390_v57 = vpop.f32.mrb[42].mxu1  ;;  %4501 = vst [vmem:[#allocation63_spill] sm:$0xff] %v3465_v20  ;;  %4502 = vst [vmem:[#allocation64_spill] sm:$0xff] %v3474_v29  ;;  %v4522_v20 = vld [vmem:[#allocation16_spill] sm:$0xff]  ;;  %v3666_v21 = vadd.f32 %v3309_v19, %v3188_v23  ;;  %v3687_v19 = vadd.f32 %v3356_v15, %v3186_v60  ;;  %v3691_v5 = vadd.f32 %v3373_v12, %v3188_v23 }
 0x174   : > { %v3405_v39 = vpop.f32.mrb[43].mxu0  ;;  %v3407_v28 = vpop.f32.mrb[43].mxu1  ;;  %4503 = vst [vmem:[#allocation65_spill] sm:$0xff] %v3478_v52  ;;  %4504 = vst [vmem:[#allocation66_spill] sm:$0xff] %v3482_v51  ;;  %v3540_v40 = vadd.f32 %v4522_v20, %v3188_v23  ;;  %v4524_v20 = vld [vmem:[#allocation17_spill] sm:$0xff]  ;;  %v3707_v15 = vadd.f32 %v3390_v57, %v3186_v60 }
 0x175   : > { %4505 = vst [vmem:[#allocation67_spill] sm:$0xff] %v3491_v47  ;;  %4507 = vst [vmem:[#allocation8_spill] sm:$0xff] %v3495_v48  ;;  %v3557_v27 = vadd.f32 %v4524_v20, %v3188_v23  ;;  %v3578_v20 = vadd.f32 %v3190_v24, %v3186_v60  ;;  %v4532_v48 = vld [vmem:[#allocation24_spill] sm:$0xff]  ;;  %v3711_v12 = vadd.f32 %v3407_v28, %v3188_v23 }
 0x176   : > { %4509 = vst [vmem:[#allocation9_spill] sm:$0xff] %v3499_v45  ;;  %4511 = vst [vmem:[#allocation10_spill] sm:$0xff] %v3507_v38  ;;  %v3595_v38 = vadd.f32 %v4531_v4, %v3188_v23  ;;  %v3603_v29 = vadd.f32 %v4532_v48, %v3186_v60  ;;  %v3615_v4 = vadd.f32 %v4537_v50, %v3188_v23 }
 0x177   : > { %4513 = vst [vmem:[#allocation12_spill] sm:$0xff] %v3511_v58  ;;  %4515 = vst [vmem:[#allocation11_spill] sm:$0xff] %v3515_v54  ;;  %v4533_v54 = vld [vmem:[#allocation26_spill] sm:$0xff]  ;;  %v3622_v48 = vadd.f32 %v3258_v10, %v3186_v60  ;;  %v3629_v50 = vadd.f32 %v3260_v34, %v3186_v60  ;;  %v3636_v10 = vadd.f32 %v3275_v62, %v3188_v23 }
 0x178   : > { %4517 = vst [vmem:[#allocation13_spill] sm:$0xff] %v3519_v55  ;;  %4519 = vst [vmem:[#allocation14_spill] sm:$0xff] %v3526_v1  ;;  %v3570_v1 = vadd.f32 %v4526_v37, %v3188_v23  ;;  %v4529_v55 = vld [vmem:[#allocation21_spill] sm:$0xff]  ;;  %v4530_v37 = vld [vmem:[#allocation20_spill] sm:$0xff]  ;;  %v3653_v62 = vadd.f32 %v3277_v59, %v3188_v23  ;;  %v3674_v59 = vadd.f32 %v3354_v30, %v3186_v60 }
 0x179   : > { %v3450_v49 = vpop.f32.mrb[44].mxu0  ;;  %v3452_v35 = vpop.f32.mrb[44].mxu1  ;;  %4521 = vst [vmem:[#allocation15_spill] sm:$0xff] %v3533_v22  ;;  %4523 = vst [vmem:[#allocation16_spill] sm:$0xff] %v3540_v40  ;;  %v3587_v22 = vadd.f32 %v4529_v55, %v3188_v23  ;;  %v3591_v45 = vadd.f32 %v4530_v37, %v3186_v60  ;;  %v3607_v55 = vadd.f32 %v4533_v54, %v3188_v23  ;;  %v4535_v40 = vld [vmem:[#allocation25_spill] sm:$0xff] }
 0x17a   : > { %v3467_v46 = vpop.f32.mrb[45].mxu0  ;;  %v3469_v32 = vpop.f32.mrb[45].mxu1  ;;  %4527 = vst [vmem:[#allocation17_spill] sm:$0xff] %v3574_v44  ;;  %4528 = vst [vmem:[#allocation18_spill] sm:$0xff] %v3578_v20  ;;  %v3611_v37 = vadd.f32 %v4535_v40, %v3186_v60  ;;  %v3683_v54 = vadd.f32 %v3371_v26, %v3188_v23  ;;  %v3703_v26 = vadd.f32 %v3405_v39, %v3188_v23 }
 0x17b   : > { %v3484_v53 = vpop.f32.mrb[46].mxu0  ;;  %v3486_v25 = vpop.f32.mrb[46].mxu1  ;;  %4534 = vst [vmem:[#allocation19_spill] sm:$0xff] %v3607_v55  ;;  %4538 = vst [vmem:[#allocation20_spill] sm:$0xff] %v3615_v4  ;;  %v3725_v28 = vadd.f32 %v3452_v35, %v3186_v60 }
 0x17c   : > { %v3501_v56 = vpop.f32.mrb[47].mxu0  ;;  %v3503_v41 = vpop.f32.mrb[47].mxu1  ;;  %4536 = vst [vmem:[#allocation21_spill] sm:$0xff] %v3611_v37  ;;  %4539 = vst [vmem:[#allocation22_spill] sm:$0xff] %v3622_v48  ;;  %v3699_v48 = vadd.f32 %v3388_v36, %v3186_v60  ;;  %v3718_v36 = vadd.f32 %v3450_v49, %v3186_v60  ;;  %v3732_v49 = vadd.f32 %v3467_v46, %v3188_v23 }
 0x17d   : > { %4540 = vst [vmem:[#allocation24_spill] sm:$0xff] %v3629_v50  ;;  %4541 = vst [vmem:[#allocation26_spill] sm:$0xff] %v3636_v10  ;;  %v3741_v10 = vadd.f32 %v3484_v53, %v3186_v60  ;;  %v3745_v46 = vadd.f32 %v3469_v32, %v3188_v23  ;;  %v3749_v55 = vadd.f32 %v3486_v25, %v3186_v60 }
 0x17e   : > { %4542 = vst [vmem:[#allocation25_spill] sm:$0xff] %v3670_v16  ;;  %4543 = vst [vmem:[#allocation27_spill] sm:$0xff] %v3674_v59  ;;  %v3754_v39 = vadd.f32 %v3501_v56, %v3188_v23  ;;  %v3758_v53 = vadd.f32 %v3503_v41, %v3188_v23 }
 0x17f   : > { %4544 = vst [vmem:[#allocation68_spill] sm:$0xff] %v3703_v26  ;;  %4545 = vst [vmem:[#allocation69_spill] sm:$0xff] %v3707_v15 }
 0x180   : > { %4546 = vst [vmem:[#allocation70_spill] sm:$0xff] %v3711_v12  ;;  %4547 = vst [vmem:[#allocation71_spill] sm:$0xff] %v3718_v36 }
 0x181   : > { %v3546_v63 = vpop.f32.mrb[48].mxu0  ;;  %v3548_v51 = vpop.f32.mrb[48].mxu1  ;;  %4548 = vst [vmem:[#allocation72_spill] sm:$0xff] %v3725_v28  ;;  %4549 = vst [vmem:[#allocation73_spill] sm:$0xff] %v3732_v49 }
 0x182   : > { %v3563_v0 = vpop.f32.mrb[49].mxu0  ;;  %v3565_v52 = vpop.f32.mrb[49].mxu1  ;;  %4550 = vst [vmem:[#allocation74_spill] sm:$0xff] %v3758_v53  ;;  %v3762_v32 = vadd.f32 %v3546_v63, %v3186_v60  ;;  %v3771_v56 = vadd.f32 %v3548_v51, %v3186_v60 }
 0x183   : > { %v3580_v31 = vpop.f32.mrb[50].mxu0  ;;  %v3582_v58 = vpop.f32.mrb[50].mxu1  ;;  %v3767_v36 = vadd.f32 %v3563_v0, %v3188_v23  ;;  %v3775_v41 = vadd.f32 %v3565_v52, %v3188_v23 }
 0x184   : > { %v3597_v24 = vpop.f32.mrb[51].mxu0  ;;  %v3599_v47 = vpop.f32.mrb[51].mxu1  ;;  %4551 = vst [vmem:[#allocation75_spill] sm:$0xff] %v3762_v32  ;;  %v3779_v63 = vadd.f32 %v3580_v31, %v3186_v60  ;;  %v3787_v0 = vadd.f32 %v3582_v58, %v3186_v60 }
 0x185   : > { %4552 = vst [vmem:[#allocation76_spill] sm:$0xff] %v3775_v41  ;;  %v3783_v25 = vadd.f32 %v3597_v24, %v3188_v23  ;;  %v3791_v51 = vadd.f32 %v3599_v47, %v3188_v23 }
 0x186   : > { %4554 = vst [vmem:[#allocation78_spill] sm:$0xff] %v3787_v0 }
 0x187   : > { %4553 = vst [vmem:[#allocation77_spill] sm:$0xff] %v3783_v25  ;;  %4555 = vst [vmem:[#allocation79_spill] sm:$0xff] %v3791_v51 }
 0x189   : > { %v3642_v34 = vpop.f32.mrb[52].mxu0  ;;  %v3644_v20 = vpop.f32.mrb[52].mxu1 }
 0x18a   : > { %v3659_v40 = vpop.f32.mrb[53].mxu0  ;;  %v3661_v44 = vpop.f32.mrb[53].mxu1  ;;  %v3798_v31 = vadd.f32 %v3642_v34, %v3186_v60  ;;  %v3805_v47 = vadd.f32 %v3644_v20, %v3186_v60 }
 0x18b   : > { %v3676_v7 = vpop.f32.mrb[54].mxu0  ;;  %v3678_v18 = vpop.f32.mrb[54].mxu1  ;;  %v3812_v34 = vadd.f32 %v3659_v40, %v3188_v23  ;;  %v3825_v40 = vadd.f32 %v3661_v44, %v3188_v23 }
 0x18c   : > { %v3693_v30 = vpop.f32.mrb[55].mxu0  ;;  %v3695_v50 = vpop.f32.mrb[55].mxu1  ;;  %4556 = vst [vmem:[#allocation80_spill] sm:$0xff] %v3798_v31  ;;  %4557 = vst [vmem:[#allocation81_spill] sm:$0xff] %v3805_v47  ;;  %v3821_v49 = vadd.f32 %v3676_v7, %v3186_v60  ;;  %v3829_v26 = vadd.f32 %v3678_v18, %v3186_v60 }
 0x18d   : > { %4558 = vst [vmem:[#allocation82_spill] sm:$0xff] %v3812_v34  ;;  %v3834_v24 = vadd.f32 %v3693_v30, %v3188_v23  ;;  %v3838_v7 = vadd.f32 %v3695_v50, %v3188_v23 }
 0x18f   : > { %4559 = vst [vmem:[#allocation83_spill] sm:$0xff] %v3838_v7 }
 0x191   : > { %v1052_v35 = vpop.f32.mrb[56].mxu0  ;;  %v1372_v59 = vpop.f32.mrb[56].mxu1 }
 0x192   : > { %v1054_v37 = vpop.f32.mrb[57].mxu0  ;;  %v1374_v57 = vpop.f32.mrb[57].mxu1  ;;  %v3841_v52 = vadd.f32 %v1052_v35, %v3186_v60  ;;  %v3848_v53 = vadd.f32 %v1372_v59, %v3186_v60 }
 0x193   : > { %v1056_v4 = vpop.f32.mrb[58].mxu0  ;;  %v1376_v12 = vpop.f32.mrb[58].mxu1  ;;  %v3845_v31 = vadd.f32 %v1054_v37, %v3188_v23  ;;  %v3851_v30 = vadd.f32 %v1374_v57, %v3188_v23 }
 0x194   : > { %v1058_v16 = vpop.f32.mrb[59].mxu0  ;;  %v1378_v28 = vpop.f32.mrb[59].mxu1  ;;  %4560 = vst [vmem:[#allocation84_spill] sm:$0xff] %v3841_v52  ;;  %4562 = vst [vmem:[#allocation86_spill] sm:$0xff] %v3848_v53  ;;  %v3854_v50 = vadd.f32 %v1056_v4, %v3186_v60  ;;  %v3860_v18 = vadd.f32 %v1376_v12, %v3186_v60 }
 0x195   : > { %4561 = vst [vmem:[#allocation85_spill] sm:$0xff] %v3845_v31  ;;  %4563 = vst [vmem:[#allocation87_spill] sm:$0xff] %v3851_v30  ;;  %v3857_v35 = vadd.f32 %v1058_v16, %v3188_v23  ;;  %v3863_v37 = vadd.f32 %v1378_v28, %v3188_v23  ;;  %v4574_v28 = vld [vmem:[#allocation23_spill] sm:$0xff] }
 0x196   : > { %4564 = vst [vmem:[#allocation88_spill] sm:$0xff] %v3854_v50  ;;  %4566 = vst [vmem:[#allocation90_spill] sm:$0xff] %v3860_v18 }
 0x197   : > { %4565 = vst [vmem:[#allocation89_spill] sm:$0xff] %v3857_v35  ;;  %4567 = vst [vmem:[#allocation91_spill] sm:$0xff] %v3863_v37 }
 0x199   : > { %v1062_v20 = vpop.f32.mrb[60].mxu0  ;;  %v1382_v32 = vpop.f32.mrb[60].mxu1 }
 0x19a   : > { %v1064_v15 = vpop.f32.mrb[61].mxu0  ;;  %v1384_v58 = vpop.f32.mrb[61].mxu1  ;;  %v3869_v0 = vadd.f32 %v1062_v20, %v3186_v60  ;;  %v3875_v12 = vadd.f32 %v1382_v32, %v3186_v60 }
 0x19b   : > { %v1066_v44 = vpop.f32.mrb[62].mxu0  ;;  %v1386_v51 = vpop.f32.mrb[62].mxu1  ;;  %v3881_v34 = vadd.f32 %v1064_v15, %v3188_v23  ;;  %v3890_v59 = vadd.f32 %v1384_v58, %v3188_v23 }
 0x19c   : > { %v1068_v47 = vpop.f32.mrb[63].mxu0  ;;  %v1388_v25 = vpop.f32.mrb[63].mxu1  ;;  %4568 = vst [vmem:[#allocation92_spill] sm:$0xff] %v3869_v0  ;;  %4569 = vst [vmem:[#allocation93_spill] sm:$0xff] %v3875_v12  ;;  %v3896_v16 = vadd.f32 %v1066_v44, %v3186_v60 }
 0x19d   : > { %4570 = vst [vmem:[#allocation94_spill] sm:$0xff] %v3881_v34  ;;  %4571 = vst [vmem:[#allocation95_spill] sm:$0xff] %v3890_v59  ;;  %v4575_v34 = vmax.f32 %v4574_v28, 0.0  ;;  %v3930_v28 = vadd.f32 %v1388_v25, %v3188_v23 }
 0x19e   : > { %4572 = vst [vmem:[#allocation96_spill] sm:$0xff] %v3896_v16 }
 0x19f   : > { %4578 = vst [vmem:[#allocation97_spill] sm:$0xff] %v3930_v28 }
 0x1a1   : > { %v1072_v4 = vpop.f32.mrb[64].mxu0  ;;  %v1392_v7 = vpop.f32.mrb[64].mxu1 }
 0x1a2   : > { %v1073_v15 = vadd.f32 %v1072_v4, %v3186_v60  ;;  %v1074_v57 = vpop.f32.mrb[65].mxu0  ;;  %v1393_v30 = vadd.f32 %v1392_v7, %v3186_v60  ;;  %v1394_v20 = vpop.f32.mrb[65].mxu1  ;;  %v3908_v7 = vadd.f32 %v1386_v51, %v3186_v60 }
 0x1a3   : > { %v1075_v32 = vadd.f32 %v1074_v57, %v3188_v23  ;;  %v1076_v41 = vpop.f32.mrb[66].mxu0  ;;  %v1395_v58 = vadd.f32 %v1394_v20, %v3188_v23  ;;  %v1396_v4 = vpop.f32.mrb[66].mxu1 }
 0x1a4   : > { %v1615_v44 = vmax.f32 %v1073_v15, 0.0  ;;  %v1077_v50 = vadd.f32 %v1076_v41, %v3186_v60  ;;  %v1078_v57 = vpop.f32.mrb[67].mxu0  ;;  %v1398_v12 = vpop.f32.mrb[67].mxu1  ;;  %v1397_v35 = vadd.f32 %v1396_v4, %v3186_v60  ;;  %v1743_v53 = vmax.f32 %v1393_v30, 0.0 }
 0x1a5   : > { %v1616_v37 = vmax.f32 %v1075_v32, 0.0  ;;  %v1079_v0 = vadd.f32 %v1078_v57, %v3188_v23  ;;  %v1399_v20 = vadd.f32 %v1398_v12, %v3188_v23  ;;  %v3918_v15 = vadd.f32 %v1068_v47, %v3188_v23 }
 0x1a6   : > { %v1807_v31 = vadd.f32 %v1615_v44, %v4575_v34  ;;  %v1617_v51 = vmax.f32 %v1077_v50, 0.0  ;;  %v4577_v41 = vmax.f32 %v3208_v61, 0.0  ;;  %v1744_v32 = vmax.f32 %v1395_v58, 0.0  ;;  %v4582_v44 = vld [vmem:[#allocation28_spill] sm:$0xff] }
 0x1a7   : > { %4576 = vst [vmem:[#allocation23_spill] sm:$0xff] %v3918_v15  ;;  %v1618_v4 = vmax.f32 %v1079_v0, 0.0  ;;  %v4579_v34 = vmax.f32 %v3212_v3, 0.0  ;;  %v4580_v47 = vmax.f32 %v3224_v14, 0.0  ;;  %v4581_v61 = vmax.f32 %v3216_v43, 0.0  ;;  %v4584_v15 = vld [vmem:[#allocation29_spill] sm:$0xff] }
 0x1a8   : > { %v1808_v52 = vadd.f32 %v1616_v37, %v4577_v41  ;;  %v4583_v57 = vmax.f32 %v4582_v44, 0.0  ;;  %v1745_v58 = vmax.f32 %v1397_v35, 0.0  ;;  %v1746_v0 = vmax.f32 %v1399_v20, 0.0 }
 0x1a9   : > { %v1871_v30 = vadd.f32 %v1807_v31, %v4579_v34  ;;  %v1809_v50 = vadd.f32 %v1617_v51, %v4580_v47  ;;  %v1082_v18 = vpop.f32.mrb[68].mxu0  ;;  %v1402_v12 = vpop.f32.mrb[68].mxu1  ;;  %v4585_v25 = vmax.f32 %v4584_v15, 0.0 }
 0x1aa   : > { %v1872_v37 = vadd.f32 %v1808_v52, %v4581_v61  ;;  %v1810_v41 = vadd.f32 %v1618_v4, %v4583_v57  ;;  %v1083_v3 = vadd.f32 %v1082_v18, %v3186_v60  ;;  %v1084_v31 = vpop.f32.mrb[69].mxu0  ;;  %v1403_v14 = vadd.f32 %v1402_v12, %v3186_v60  ;;  %v1404_v51 = vpop.f32.mrb[69].mxu1  ;;  %v4586_v52 = vld [vmem:[#allocation30_spill] sm:$0xff] }
 0x1ab   : > { %v1935_v59 = vadd.f32 %v1871_v30, %v1743_v53  ;;  %v1873_v28 = vadd.f32 %v1809_v50, %v4585_v25  ;;  %v4587_v34 = vmax.f32 %v4586_v52, 0.0  ;;  %v1085_v35 = vadd.f32 %v1084_v31, %v3188_v23  ;;  %v1086_v20 = vpop.f32.mrb[70].mxu0  ;;  %v1406_v53 = vpop.f32.mrb[70].mxu1 }
 0x1ac   : > { %v1936_v43 = vadd.f32 %v1872_v37, %v1744_v32  ;;  %v1405_v4 = vadd.f32 %v1404_v51, %v3188_v23  ;;  %v1619_v50 = vmax.f32 %v1083_v3, 0.0  ;;  %v1747_v61 = vmax.f32 %v1403_v14, 0.0  ;;  %v1088_v18 = vpop.f32.mrb[71].mxu0  ;;  %v1408_v44 = vpop.f32.mrb[71].mxu1  ;;  %v4590_v51 = vld [vmem:[#allocation33_spill] sm:$0xff] }
 0x1ad   : > { %v1874_v47 = vadd.f32 %v1810_v41, %v4587_v34  ;;  %v1999_v30 = vmul.f32 0.25, %v1935_v59  ;;  %v1937_v15 = vadd.f32 %v1873_v28, %v1745_v58  ;;  %v1620_v25 = vmax.f32 %v1085_v35, 0.0  ;;  %v4588_v41 = vld [vmem:[#allocation31_spill] sm:$0xff]  ;;  %v4592_v34 = vld [vmem:[#allocation32_spill] sm:$0xff] }
 0x1ae   : > { %v2000_v57 = vmul.f32 0.25, %v1936_v43  ;;  %v1087_v32 = vadd.f32 %v1086_v20, %v3186_v60  ;;  %v4589_v31 = vmax.f32 %v4588_v41, 0.0  ;;  %v1748_v28 = vmax.f32 %v1405_v4, 0.0 }
 0x1af   : > { %v1938_v12 = vadd.f32 %v1874_v47, %v1746_v0  ;;  %v2001_v37 = vmul.f32 0.25, %v1937_v15  ;;  %v1089_v58 = vadd.f32 %v1088_v18, %v3188_v23  ;;  %v4591_v0 = vmax.f32 %v4590_v51, 0.0 }
 0x1b0   : > { %v1811_v59 = vadd.f32 %v1619_v50, %v4589_v31  ;;  %v2546_v3 = vpack.c.bf16 %v2000_v57, %v1999_v30  ;;  %v1621_v52 = vmax.f32 %v1087_v32, 0.0  ;;  %v4593_v47 = vmax.f32 %v4592_v34, 0.0 }
 0x1b1   : > { %v2002_v14 = vmul.f32 0.25, %v1938_v12  ;;  %v1812_v43 = vadd.f32 %v1620_v25, %v4591_v0  ;;  %v1622_v20 = vmax.f32 %v1089_v58, 0.0  ;;  %v1407_v16 = vadd.f32 %v1406_v53, %v3186_v60  ;;  %v1092_v25 = vpop.f32.mrb[72].mxu0  ;;  %v1412_v32 = vpop.f32.mrb[72].mxu1 }
 0x1b2   : > { %v1875_v35 = vadd.f32 %v1811_v59, %v4593_v47  ;;  %v1409_v15 = vadd.f32 %v1408_v44, %v3188_v23  ;;  %2255 = vst [vmem:[%s3953_s26] sm:$0xff] %v2546_v3  ;;  %v4594_v30 = vmax.f32 %v3265_v6, 0.0  ;;  %v4595_v57 = vmax.f32 %v3269_v11, 0.0  ;;  %v1094_v51 = vpop.f32.mrb[73].mxu0  ;;  %v1414_v44 = vpop.f32.mrb[73].mxu1 }
 0x1b3   : > { %v2547_v4 = vpack.c.bf16 %v2002_v14, %v2001_v37  ;;  %v4596_v31 = vmax.f32 %v3282_v13, 0.0  ;;  %v1749_v58 = vmax.f32 %v1407_v16, 0.0  ;;  %v4597_v37 = vmax.f32 %v3273_v9, 0.0  ;;  %v1096_v14 = vpop.f32.mrb[74].mxu0 }
 0x1b4   : > { %v1813_v18 = vadd.f32 %v1621_v52, %v4594_v30  ;;  %v1876_v12 = vadd.f32 %v1812_v43, %v4595_v57  ;;  %v1939_v41 = vadd.f32 %v1875_v35, %v1747_v61  ;;  %v1750_v53 = vmax.f32 %v1409_v15, 0.0  ;;  %v1416_v43 = vpop.f32.mrb[74].mxu1  ;;  %v4598_v61 = vld [vmem:[#allocation34_spill] sm:$0xff]  ;;  %v1098_v35 = vpop.f32.mrb[75].mxu0 }
 0x1b5   : > { %v1814_v59 = vadd.f32 %v1622_v20, %v4596_v31  ;;  %2256 = vst [vmem:[%s3953_s26 + $0x8] sm:$0xff] %v2547_v4  ;;  %v1093_v6 = vadd.f32 %v1092_v25, %v3186_v60  ;;  %v1095_v11 = vadd.f32 %v1094_v51, %v3188_v23  ;;  %v4599_v34 = vmax.f32 %v4598_v61, 0.0  ;;  %v1418_v20 = vpop.f32.mrb[75].mxu1  ;;  %v4600_v31 = vld [vmem:[#allocation35_spill] sm:$0xff]  ;;  %v4603_v61 = vld [vmem:[#allocation38_spill] sm:$0xff] }
 0x1b6   : > { %v1940_v0 = vadd.f32 %v1876_v12, %v1748_v28  ;;  %v1877_v3 = vadd.f32 %v1813_v18, %v4597_v37  ;;  %v2003_v52 = vmul.f32 0.25, %v1939_v41  ;;  %v1413_v16 = vadd.f32 %v1412_v32, %v3186_v60 }
 0x1b7   : > { %v1878_v13 = vadd.f32 %v1814_v59, %v4599_v34  ;;  %v1097_v47 = vadd.f32 %v1096_v14, %v3186_v60  ;;  %v1623_v15 = vmax.f32 %v1093_v6, 0.0  ;;  %v1624_v4 = vmax.f32 %v1095_v11, 0.0 }
 0x1b8   : > { %v2004_v28 = vmul.f32 0.25, %v1940_v0  ;;  %v1941_v9 = vadd.f32 %v1877_v3, %v1749_v58  ;;  %v1751_v18 = vmax.f32 %v1413_v16, 0.0  ;;  %v1415_v12 = vadd.f32 %v1414_v44, %v3188_v23  ;;  %v4607_v44 = vld [vmem:[#allocation37_spill] sm:$0xff] }
 0x1b9   : > { %v1942_v30 = vadd.f32 %v1878_v13, %v1750_v53  ;;  %v1625_v57 = vmax.f32 %v1097_v47, 0.0  ;;  %v4601_v59 = vmax.f32 %v4600_v31, 0.0  ;;  %v4602_v32 = vmax.f32 %v3299_v33, 0.0  ;;  %v4605_v53 = vld [vmem:[#allocation36_spill] sm:$0xff]  ;;  %v1102_v47 = vpop.f32.mrb[76].mxu0 }
 0x1ba   : > { %v2548_v25 = vpack.c.bf16 %v2004_v28, %v2003_v52  ;;  %v2005_v41 = vmul.f32 0.25, %v1941_v9  ;;  %v4604_v0 = vmax.f32 %v4603_v61, 0.0  ;;  %v1752_v58 = vmax.f32 %v1415_v12, 0.0  ;;  %v1422_v28 = vpop.f32.mrb[76].mxu1  ;;  %v1104_v12 = vpop.f32.mrb[77].mxu0  ;;  %v4611_v61 = vld [vmem:[#allocation39_spill] sm:$0xff] }
 0x1bb   : > { %v1815_v51 = vadd.f32 %v1623_v15, %v4601_v59  ;;  %v1816_v37 = vadd.f32 %v1624_v4, %v4602_v32  ;;  %v2006_v14 = vmul.f32 0.25, %v1942_v30  ;;  %v1099_v3 = vadd.f32 %v1098_v35, %v3188_v23  ;;  %v4609_v4 = vld [vmem:[#allocation40_spill] sm:$0xff] }
 0x1bc   : > { %v1817_v34 = vadd.f32 %v1625_v57, %v4604_v0  ;;  %2257 = vst [vmem:[%s3953_s26 + $0x10] sm:$0xff] %v2548_v25  ;;  %v4606_v6 = vmax.f32 %v4605_v53, 0.0  ;;  %v4608_v52 = vmax.f32 %v4607_v44, 0.0  ;;  %v1417_v16 = vadd.f32 %v1416_v43, %v3186_v60  ;;  %v1424_v25 = vpop.f32.mrb[77].mxu1 }
 0x1bd   : > { %v1419_v33 = vadd.f32 %v1418_v20, %v3188_v23  ;;  %v2549_v9 = vpack.c.bf16 %v2006_v14, %v2005_v41  ;;  %v1626_v15 = vmax.f32 %v1099_v3, 0.0  ;;  %v4610_v30 = vmax.f32 %v4609_v4, 0.0  ;;  %v1426_v43 = vpop.f32.mrb[78].mxu1 }
 0x1be   : > { %v1879_v11 = vadd.f32 %v1815_v51, %v4606_v6  ;;  %v1880_v13 = vadd.f32 %v1816_v37, %v4608_v52  ;;  %v1103_v35 = vadd.f32 %v1102_v47, %v3186_v60  ;;  %v1753_v51 = vmax.f32 %v1417_v16, 0.0  ;;  %v1106_v37 = vpop.f32.mrb[78].mxu0  ;;  %v1428_v3 = vpop.f32.mrb[79].mxu1  ;;  %v4615_v16 = vld [vmem:[#allocation42_spill] sm:$0xff] }
 0x1bf   : > { %v1881_v57 = vadd.f32 %v1817_v34, %v4610_v30  ;;  %v1754_v32 = vmax.f32 %v1419_v33, 0.0  ;;  %2258 = vst [vmem:[%s3953_s26 + $0x18] sm:$0xff] %v2549_v9  ;;  %v4612_v20 = vmax.f32 %v4611_v61, 0.0  ;;  %v1105_v41 = vadd.f32 %v1104_v12, %v3188_v23  ;;  %v1108_v34 = vpop.f32.mrb[79].mxu0 }
 0x1c0   : > { %v1943_v31 = vadd.f32 %v1879_v11, %v1751_v18  ;;  %v1944_v59 = vadd.f32 %v1880_v13, %v1752_v58  ;;  %v1627_v53 = vmax.f32 %v1103_v35, 0.0  ;;  %v1423_v14 = vadd.f32 %v1422_v28, %v3186_v60  ;;  %v4613_v11 = vld [vmem:[#allocation41_spill] sm:$0xff] }
 0x1c1   : > { %v1818_v0 = vadd.f32 %v1626_v15, %v4612_v20  ;;  %v1945_v18 = vadd.f32 %v1881_v57, %v1753_v51  ;;  %v1107_v58 = vadd.f32 %v1106_v37, %v3186_v60  ;;  %v4614_v52 = vmax.f32 %v4613_v11, 0.0  ;;  %v4619_v57 = vld [vmem:[#allocation43_spill] sm:$0xff] }
 0x1c2   : > { %v2007_v6 = vmul.f32 0.25, %v1943_v31  ;;  %v2008_v44 = vmul.f32 0.25, %v1944_v59  ;;  %v4616_v33 = vmax.f32 %v4615_v16, 0.0  ;;  %v1628_v9 = vmax.f32 %v1105_v41, 0.0  ;;  %v4617_v31 = vld [vmem:[#allocation44_spill] sm:$0xff] }
 0x1c3   : > { %v1882_v13 = vadd.f32 %v1818_v0, %v4614_v52  ;;  %v1755_v15 = vmax.f32 %v1423_v14, 0.0  ;;  %v2009_v30 = vmul.f32 0.25, %v1945_v18  ;;  %v1629_v35 = vmax.f32 %v1107_v58, 0.0  ;;  %v4621_v0 = vld [vmem:[#allocation45_spill] sm:$0xff]  ;;  %v4623_v58 = vld [vmem:[#allocation46_spill] sm:$0xff] }
 0x1c4   : > { %v1819_v47 = vadd.f32 %v1627_v53, %v4616_v33  ;;  %v2550_v4 = vpack.c.bf16 %v2008_v44, %v2007_v6  ;;  %v1425_v28 = vadd.f32 %v1424_v25, %v3188_v23  ;;  %v4618_v61 = vmax.f32 %v4617_v31, 0.0  ;;  %v1112_v44 = vpop.f32.mrb[80].mxu0  ;;  %v1432_v25 = vpop.f32.mrb[80].mxu1 }
 0x1c5   : > { %v1946_v12 = vadd.f32 %v1882_v13, %v1754_v32  ;;  %v4620_v51 = vmax.f32 %v4619_v57, 0.0  ;;  %v1109_v20 = vadd.f32 %v1108_v34, %v3188_v23  ;;  %v4622_v11 = vmax.f32 %v4621_v0, 0.0  ;;  %v1114_v33 = vpop.f32.mrb[81].mxu0 }
 0x1c6   : > { %v1820_v59 = vadd.f32 %v1628_v9, %v4618_v61  ;;  %2259 = vst [vmem:[%s3953_s26 + $0x20] sm:$0xff] %v2550_v4  ;;  %v1756_v41 = vmax.f32 %v1425_v28, 0.0  ;;  %v1427_v14 = vadd.f32 %v1426_v43, %v3186_v60  ;;  %v1429_v6 = vadd.f32 %v1428_v3, %v3188_v23  ;;  %v4625_v9 = vld [vmem:[#allocation47_spill] sm:$0xff]  ;;  %v1116_v31 = vpop.f32.mrb[82].mxu0 }
 0x1c7   : > { %v1883_v37 = vadd.f32 %v1819_v47, %v4620_v51  ;;  %v1821_v53 = vadd.f32 %v1629_v35, %v4622_v11  ;;  %v2010_v32 = vmul.f32 0.25, %v1946_v12  ;;  %v4624_v52 = vmax.f32 %v4623_v58, 0.0  ;;  %v1434_v47 = vpop.f32.mrb[81].mxu1 }
 0x1c8   : > { %v1630_v16 = vmax.f32 %v1109_v20, 0.0  ;;  %v1757_v34 = vmax.f32 %v1427_v14, 0.0  ;;  %v4626_v4 = vmax.f32 %v4625_v9, 0.0  ;;  %v1758_v28 = vmax.f32 %v1429_v6, 0.0  ;;  %v1436_v3 = vpop.f32.mrb[82].mxu1  ;;  %v4629_v6 = vld [vmem:[#allocation49_spill] sm:$0xff] }
 0x1c9   : > { %v1947_v18 = vadd.f32 %v1883_v37, %v1755_v15  ;;  %v1884_v13 = vadd.f32 %v1820_v59, %v4624_v52  ;;  %v1113_v43 = vadd.f32 %v1112_v44, %v3186_v60  ;;  %v2551_v61 = vpack.c.bf16 %v2010_v32, %v2009_v30  ;;  %v4627_v15 = vld [vmem:[#allocation48_spill] sm:$0xff]  ;;  %v1118_v59 = vpop.f32.mrb[83].mxu0  ;;  %v1438_v20 = vpop.f32.mrb[83].mxu1 }
 0x1ca   : > { %v1885_v35 = vadd.f32 %v1821_v53, %v4626_v4  ;;  %v4628_v51 = vmax.f32 %v4627_v15, 0.0  ;;  %v1115_v14 = vadd.f32 %v1114_v33, %v3188_v23  ;;  %v1433_v58 = vadd.f32 %v1432_v25, %v3186_v60  ;;  %v4635_v15 = vld [vmem:[#allocation52_spill] sm:$0xff] }
 0x1cb   : > { %v2011_v57 = vmul.f32 0.25, %v1947_v18  ;;  %v1948_v12 = vadd.f32 %v1884_v13, %v1756_v41  ;;  %v1631_v11 = vmax.f32 %v1113_v43, 0.0  ;;  %2260 = vst [vmem:[%s3953_s26 + $0x28] sm:$0xff] %v2551_v61  ;;  %v4630_v44 = vmax.f32 %v4629_v6, 0.0  ;;  %v4631_v18 = vld [vmem:[#allocation50_spill] sm:$0xff]  ;;  %v4633_v43 = vld [vmem:[#allocation51_spill] sm:$0xff] }
 0x1cc   : > { %v1822_v37 = vadd.f32 %v1630_v16, %v4628_v51  ;;  %v1949_v0 = vadd.f32 %v1885_v35, %v1757_v34  ;;  %v1117_v30 = vadd.f32 %v1116_v31, %v3186_v60  ;;  %v1435_v41 = vadd.f32 %v1434_v47, %v3188_v23  ;;  %v1442_v6 = vpop.f32.mrb[84].mxu1 }
 0x1cd   : > { %v2012_v53 = vmul.f32 0.25, %v1948_v12  ;;  %v4632_v13 = vmax.f32 %v4631_v18, 0.0  ;;  %v1632_v34 = vmax.f32 %v1115_v14, 0.0  ;;  %v1759_v9 = vmax.f32 %v1433_v58, 0.0  ;;  %v4637_v14 = vld [vmem:[#allocation54_spill] sm:$0xff] }
 0x1ce   : > { %v1886_v52 = vadd.f32 %v1822_v37, %v4630_v44  ;;  %v2013_v32 = vmul.f32 0.25, %v1949_v0  ;;  %v1633_v35 = vmax.f32 %v1117_v30, 0.0  ;;  %v1760_v25 = vmax.f32 %v1435_v41, 0.0  ;;  %v1122_v0 = vpop.f32.mrb[84].mxu0  ;;  %v4639_v41 = vld [vmem:[#allocation53_spill] sm:$0xff] }
 0x1cf   : > { %v1823_v16 = vadd.f32 %v1631_v11, %v4632_v13  ;;  %v2552_v4 = vpack.c.bf16 %v2012_v53, %v2011_v57  ;;  %v4634_v61 = vmax.f32 %v4633_v43, 0.0  ;;  %v4636_v51 = vmax.f32 %v4635_v15, 0.0  ;;  %v1124_v44 = vpop.f32.mrb[85].mxu0 }
 0x1d0   : > { %v1950_v33 = vadd.f32 %v1886_v52, %v1758_v28  ;;  %v1119_v31 = vadd.f32 %v1118_v59, %v3188_v23  ;;  %v1437_v47 = vadd.f32 %v1436_v3, %v3186_v60  ;;  %v4638_v58 = vmax.f32 %v4637_v14, 0.0  ;;  %v1444_v52 = vpop.f32.mrb[85].mxu1 }
 0x1d1   : > { %v1824_v12 = vadd.f32 %v1632_v34, %v4634_v61  ;;  %v1887_v37 = vadd.f32 %v1823_v16, %v4636_v51  ;;  %2261 = vst [vmem:[%s3953_s26 + $0x30] sm:$0xff] %v2552_v4  ;;  %v1439_v28 = vadd.f32 %v1438_v20, %v3188_v23  ;;  %v1123_v53 = vadd.f32 %v1122_v0, %v3186_v60  ;;  %v1126_v16 = vpop.f32.mrb[86].mxu0  ;;  %v1446_v34 = vpop.f32.mrb[86].mxu1 }
 0x1d2   : > { %v2014_v11 = vmul.f32 0.25, %v1950_v33  ;;  %v1825_v57 = vadd.f32 %v1633_v35, %v4638_v58  ;;  %v4640_v18 = vmax.f32 %v4639_v41, 0.0  ;;  %v1634_v13 = vmax.f32 %v1119_v31, 0.0  ;;  %v4641_v33 = vld [vmem:[#allocation56_spill] sm:$0xff]  ;;  %v1128_v20 = vpop.f32.mrb[87].mxu0  ;;  %v1448_v51 = vpop.f32.mrb[87].mxu1 }
 0x1d3   : > { %v1951_v30 = vadd.f32 %v1887_v37, %v1759_v9  ;;  %v1761_v3 = vmax.f32 %v1437_v47, 0.0  ;;  %v4642_v43 = vmax.f32 %v4641_v33, 0.0  ;;  %v1762_v35 = vmax.f32 %v1439_v28, 0.0  ;;  %v4643_v58 = vld [vmem:[#allocation55_spill] sm:$0xff]  ;;  %v4645_v31 = vld [vmem:[#allocation58_spill] sm:$0xff]  ;;  %v4647_v28 = vld [vmem:[#allocation57_spill] sm:$0xff] }
 0x1d4   : > { %v1888_v59 = vadd.f32 %v1824_v12, %v4640_v18  ;;  %v2553_v4 = vpack.c.bf16 %v2014_v11, %v2013_v32  ;;  %v1635_v15 = vmax.f32 %v1123_v53, 0.0  ;;  %v4644_v9 = vmax.f32 %v4643_v58, 0.0  ;;  %v4651_v58 = vld [vmem:[#allocation60_spill] sm:$0xff] }
 0x1d5   : > { %v1889_v61 = vadd.f32 %v1825_v57, %v4642_v43  ;;  %v2015_v0 = vmul.f32 0.25, %v1951_v30  ;;  %v1125_v41 = vadd.f32 %v1124_v44, %v3188_v23  ;;  %v4646_v47 = vmax.f32 %v4645_v31, 0.0  ;;  %v4649_v44 = vld [vmem:[#allocation59_spill] sm:$0xff]  ;;  %v1452_v31 = vpop.f32.mrb[88].mxu1 }
 0x1d6   : > { %v1952_v14 = vadd.f32 %v1888_v59, %v1760_v25  ;;  %v1826_v37 = vadd.f32 %v1634_v13, %v4644_v9  ;;  %2262 = vst [vmem:[%s3953_s26 + $0x38] sm:$0xff] %v2553_v4  ;;  %v1443_v32 = vadd.f32 %v1442_v6, %v3186_v60  ;;  %v1127_v11 = vadd.f32 %v1126_v16, %v3186_v60 }
 0x1d7   : > { %v1953_v12 = vadd.f32 %v1889_v61, %v1761_v3  ;;  %v1827_v18 = vadd.f32 %v1635_v15, %v4646_v47  ;;  %v4648_v53 = vmax.f32 %v4647_v28, 0.0  ;;  %v1636_v30 = vmax.f32 %v1125_v41, 0.0 }
 0x1d8   : > { %v2016_v57 = vmul.f32 0.25, %v1952_v14  ;;  %v1445_v25 = vadd.f32 %v1444_v52, %v3188_v23  ;;  %v1763_v13 = vmax.f32 %v1443_v32, 0.0  ;;  %v4650_v4 = vmax.f32 %v4649_v44, 0.0  ;;  %v1132_v14 = vpop.f32.mrb[88].mxu0 }
 0x1d9   : > { %v1890_v33 = vadd.f32 %v1826_v37, %v4648_v53  ;;  %v2017_v59 = vmul.f32 0.25, %v1953_v12  ;;  %v1637_v43 = vmax.f32 %v1127_v11, 0.0  ;;  %v4652_v6 = vmax.f32 %v4651_v58, 0.0  ;;  %v4653_v37 = vld [vmem:[#allocation61_spill] sm:$0xff]  ;;  %v1134_v32 = vpop.f32.mrb[89].mxu0  ;;  %v1454_v53 = vpop.f32.mrb[89].mxu1 }
 0x1da   : > { %v1891_v3 = vadd.f32 %v1827_v18, %v4650_v4  ;;  %v2554_v61 = vpack.c.bf16 %v2016_v57, %v2015_v0  ;;  %v1764_v16 = vmax.f32 %v1445_v25, 0.0  ;;  %v4654_v41 = vmax.f32 %v4653_v37, 0.0  ;;  %v4655_v0 = vld [vmem:[#allocation62_spill] sm:$0xff]  ;;  %v1456_v25 = vpop.f32.mrb[90].mxu1 }
 0x1db   : > { %v1954_v15 = vadd.f32 %v1890_v33, %v1762_v35  ;;  %v1828_v9 = vadd.f32 %v1636_v30, %v4652_v6  ;;  %v1129_v52 = vadd.f32 %v1128_v20, %v3188_v23  ;;  %v1447_v12 = vadd.f32 %v1446_v34, %v3186_v60  ;;  %v1136_v30 = vpop.f32.mrb[90].mxu0  ;;  %v4657_v20 = vld [vmem:[#allocation63_spill] sm:$0xff]  ;;  %v1458_v58 = vpop.f32.mrb[91].mxu1 }
 0x1dc   : > { %v1955_v47 = vadd.f32 %v1891_v3, %v1763_v13  ;;  %v1829_v28 = vadd.f32 %v1637_v43, %v4654_v41  ;;  %2263 = vst [vmem:[%s3953_s26 + $0x40] sm:$0xff] %v2554_v61  ;;  %v4656_v35 = vmax.f32 %v4655_v0, 0.0  ;;  %v1449_v57 = vadd.f32 %v1448_v51, %v3188_v23  ;;  %v1138_v43 = vpop.f32.mrb[91].mxu0 }
 0x1dd   : > { %v2018_v18 = vmul.f32 0.25, %v1954_v15  ;;  %v1133_v33 = vadd.f32 %v1132_v14, %v3186_v60  ;;  %v1638_v44 = vmax.f32 %v1129_v52, 0.0  ;;  %v1765_v4 = vmax.f32 %v1447_v12, 0.0  ;;  %v4661_v52 = vld [vmem:[#allocation66_spill] sm:$0xff] }
 0x1de   : > { %v1892_v11 = vadd.f32 %v1828_v9, %v4656_v35  ;;  %v2019_v13 = vmul.f32 0.25, %v1955_v47  ;;  %v4658_v3 = vmax.f32 %v4657_v20, 0.0  ;;  %v1766_v6 = vmax.f32 %v1449_v57, 0.0  ;;  %v4659_v9 = vld [vmem:[#allocation64_spill] sm:$0xff] }
 0x1df   : > { %v2555_v61 = vpack.c.bf16 %v2018_v18, %v2017_v59  ;;  %v1639_v37 = vmax.f32 %v1133_v33, 0.0  ;;  %v4660_v41 = vmax.f32 %v4659_v9, 0.0  ;;  %v1135_v14 = vadd.f32 %v1134_v32, %v3188_v23  ;;  %v4663_v18 = vld [vmem:[#allocation65_spill] sm:$0xff]  ;;  %v4665_v32 = vld [vmem:[#allocation8_spill] sm:$0xff]  ;;  %v1462_v9 = vpop.f32.mrb[92].mxu1 }
 0x1e0   : > { %v1893_v34 = vadd.f32 %v1829_v28, %v4658_v3  ;;  %v1956_v15 = vadd.f32 %v1892_v11, %v1764_v16  ;;  %v1453_v35 = vadd.f32 %v1452_v31, %v3186_v60  ;;  %v4662_v12 = vmax.f32 %v4661_v52, 0.0 }
 0x1e1   : > { %v1830_v51 = vadd.f32 %v1638_v44, %v4660_v41  ;;  %2264 = vst [vmem:[%s3953_s26 + $0x48] sm:$0xff] %v2555_v61  ;;  %v1137_v28 = vadd.f32 %v1136_v30, %v3186_v60  ;;  %v1455_v59 = vadd.f32 %v1454_v53, %v3188_v23  ;;  %v4664_v11 = vmax.f32 %v4663_v18, 0.0  ;;  %v4667_v41 = vld [vmem:[#allocation67_spill] sm:$0xff] }
 0x1e2   : > { %v1957_v0 = vadd.f32 %v1893_v34, %v1765_v4  ;;  %v2020_v47 = vmul.f32 0.25, %v1956_v15  ;;  %v1831_v20 = vadd.f32 %v1639_v37, %v4662_v12  ;;  %v1640_v33 = vmax.f32 %v1135_v14, 0.0  ;;  %v1142_v15 = vpop.f32.mrb[92].mxu0 }
 0x1e3   : > { %v1894_v57 = vadd.f32 %v1830_v51, %v4664_v11  ;;  %v1767_v44 = vmax.f32 %v1453_v35, 0.0  ;;  %v4666_v3 = vmax.f32 %v4665_v32, 0.0  ;;  %v1641_v34 = vmax.f32 %v1137_v28, 0.0  ;;  %v1144_v12 = vpop.f32.mrb[93].mxu0  ;;  %v1464_v51 = vpop.f32.mrb[93].mxu1  ;;  %v4671_v11 = vld [vmem:[#allocation9_spill] sm:$0xff] }
 0x1e4   : > { %v2021_v16 = vmul.f32 0.25, %v1957_v0  ;;  %v2556_v4 = vpack.c.bf16 %v2020_v47, %v2019_v13  ;;  %v1768_v61 = vmax.f32 %v1455_v59, 0.0  ;;  %v4668_v30 = vmax.f32 %v4667_v41, 0.0  ;;  %v4669_v13 = vld [vmem:[#allocation10_spill] sm:$0xff]  ;;  %v1146_v59 = vpop.f32.mrb[94].mxu0 }
 0x1e5   : > { %v1895_v31 = vadd.f32 %v1831_v20, %v4666_v3  ;;  %v1958_v37 = vadd.f32 %v1894_v57, %v1766_v6  ;;  %v1139_v53 = vadd.f32 %v1138_v43, %v3188_v23  ;;  %v1457_v0 = vadd.f32 %v1456_v25, %v3186_v60  ;;  %v1466_v6 = vpop.f32.mrb[94].mxu1  ;;  %v1148_v32 = vpop.f32.mrb[95].mxu0 }
 0x1e6   : > { %v1832_v52 = vadd.f32 %v1640_v33, %v4668_v30  ;;  %2265 = vst [vmem:[%s3953_s26 + $0x50] sm:$0xff] %v2556_v4  ;;  %v4670_v35 = vmax.f32 %v4669_v13, 0.0  ;;  %v1459_v20 = vadd.f32 %v1458_v58, %v3188_v23  ;;  %v1143_v28 = vadd.f32 %v1142_v15, %v3186_v60  ;;  %v1468_v3 = vpop.f32.mrb[95].mxu1  ;;  %v4675_v15 = vld [vmem:[#allocation12_spill] sm:$0xff] }
 0x1e7   : > { %v1959_v14 = vadd.f32 %v1895_v31, %v1767_v44  ;;  %v2022_v18 = vmul.f32 0.25, %v1958_v37  ;;  %v4672_v57 = vmax.f32 %v4671_v11, 0.0  ;;  %v1642_v43 = vmax.f32 %v1139_v53, 0.0  ;;  %v4673_v44 = vld [vmem:[#allocation11_spill] sm:$0xff] }
 0x1e8   : > { %v1833_v47 = vadd.f32 %v1641_v34, %v4670_v35  ;;  %v1769_v25 = vmax.f32 %v1457_v0, 0.0  ;;  %v4674_v31 = vmax.f32 %v4673_v44, 0.0  ;;  %v1770_v34 = vmax.f32 %v1459_v20, 0.0 }
 0x1e9   : > { %v1896_v33 = vadd.f32 %v1832_v52, %v4672_v57  ;;  %v2023_v4 = vmul.f32 0.25, %v1959_v14  ;;  %v1643_v30 = vmax.f32 %v1143_v28, 0.0  ;;  %v2557_v58 = vpack.c.bf16 %v2022_v18, %v2021_v16  ;;  %v4677_v52 = vld [vmem:[#allocation14_spill] sm:$0xff] }
 0x1ea   : > { %v1897_v41 = vadd.f32 %v1833_v47, %v4674_v31  ;;  %v4676_v35 = vmax.f32 %v4675_v15, 0.0  ;;  %v1145_v37 = vadd.f32 %v1144_v12, %v3188_v23  ;;  %v4678_v53 = vmax.f32 %v4677_v52, 0.0  ;;  %v4679_v47 = vld [vmem:[#allocation13_spill] sm:$0xff] }
 0x1eb   : > { %v1960_v13 = vadd.f32 %v1896_v33, %v1768_v61  ;;  %v1463_v0 = vadd.f32 %v1462_v9, %v3186_v60  ;;  %v1147_v14 = vadd.f32 %v1146_v59, %v3186_v60  ;;  %2266 = vst [vmem:[%s3953_s26 + $0x58] sm:$0xff] %v2557_v58  ;;  %v4680_v20 = vmax.f32 %v4679_v47, 0.0  ;;  %v4683_v59 = vld [vmem:[#allocation16_spill] sm:$0xff] }
 0x1ec   : > { %v1834_v50 = vadd.f32 %v1642_v43, %v4676_v35  ;;  %v1961_v11 = vadd.f32 %v1897_v41, %v1769_v25  ;;  %v1835_v57 = vadd.f32 %v1643_v30, %v4678_v53  ;;  %v1644_v16 = vmax.f32 %v1145_v37, 0.0  ;;  %v4681_v43 = vld [vmem:[#allocation15_spill] sm:$0xff]  ;;  %v1152_v41 = vpop.f32.mrb[96].mxu0  ;;  %v1472_v30 = vpop.f32.mrb[96].mxu1 }
 0x1ed   : > { %v2024_v44 = vmul.f32 0.25, %v1960_v13  ;;  %v1465_v61 = vadd.f32 %v1464_v51, %v3188_v23  ;;  %v1771_v33 = vmax.f32 %v1463_v0, 0.0  ;;  %v4682_v12 = vmax.f32 %v4681_v43, 0.0  ;;  %v1154_v52 = vpop.f32.mrb[97].mxu0 }
 0x1ee   : > { %v1898_v28 = vadd.f32 %v1834_v50, %v4680_v20  ;;  %v2025_v18 = vmul.f32 0.25, %v1961_v11  ;;  %v1645_v31 = vmax.f32 %v1147_v14, 0.0  ;;  %v4684_v58 = vmax.f32 %v4683_v59, 0.0  ;;  %v1474_v50 = vpop.f32.mrb[97].mxu1  ;;  %v1156_v0 = vpop.f32.mrb[98].mxu0 }
 0x1ef   : > { %v1899_v25 = vadd.f32 %v1835_v57, %v4682_v12  ;;  %v2558_v9 = vpack.c.bf16 %v2024_v44, %v2023_v4  ;;  %v1772_v35 = vmax.f32 %v1465_v61, 0.0  ;;  %v4685_v51 = vmax.f32 %v3553_v8, 0.0  ;;  %v1476_v14 = vpop.f32.mrb[98].mxu1 }
 0x1f0   : > { %v1962_v15 = vadd.f32 %v1898_v28, %v1770_v34  ;;  %v1836_v13 = vadd.f32 %v1644_v16, %v4684_v58  ;;  %v1149_v53 = vadd.f32 %v1148_v32, %v3188_v23  ;;  %v1467_v57 = vadd.f32 %v1466_v6, %v3186_v60  ;;  %v1158_v28 = vpop.f32.mrb[99].mxu0  ;;  %v1478_v16 = vpop.f32.mrb[99].mxu1  ;;  %v4689_v58 = vld [vmem:[#allocation18_spill] sm:$0xff] }
 0x1f1   : > { %v1963_v37 = vadd.f32 %v1899_v25, %v1771_v33  ;;  %v1837_v11 = vadd.f32 %v1645_v31, %v4685_v51  ;;  %2267 = vst [vmem:[%s3953_s26 + $0x60] sm:$0xff] %v2558_v9  ;;  %v4686_v4 = vmax.f32 %v3557_v27, 0.0  ;;  %v1469_v44 = vadd.f32 %v1468_v3, %v3188_v23  ;;  %v4691_v51 = vld [vmem:[#allocation17_spill] sm:$0xff] }
 0x1f2   : > { %v2026_v47 = vmul.f32 0.25, %v1962_v15  ;;  %v1153_v20 = vadd.f32 %v1152_v41, %v3186_v60  ;;  %v1646_v61 = vmax.f32 %v1149_v53, 0.0  ;;  %v1773_v33 = vmax.f32 %v1467_v57, 0.0 }
 0x1f3   : > { %v1900_v34 = vadd.f32 %v1836_v13, %v4686_v4  ;;  %v2027_v8 = vmul.f32 0.25, %v1963_v37  ;;  %v4687_v32 = vmax.f32 %v3561_v42, 0.0  ;;  %v1774_v25 = vmax.f32 %v1469_v44, 0.0 }
 0x1f4   : > { %v2559_v43 = vpack.c.bf16 %v2026_v47, %v2025_v18  ;;  %v1647_v31 = vmax.f32 %v1153_v20, 0.0  ;;  %v4688_v27 = vmax.f32 %v3570_v1, 0.0  ;;  %v1155_v3 = vadd.f32 %v1154_v52, %v3188_v23  ;;  %v1162_v47 = vpop.f32.mrb[100].mxu0  ;;  %v1482_v52 = vpop.f32.mrb[100].mxu1 }
 0x1f5   : > { %v1901_v6 = vadd.f32 %v1837_v11, %v4687_v32  ;;  %v1964_v12 = vadd.f32 %v1900_v34, %v1772_v35  ;;  %v1473_v41 = vadd.f32 %v1472_v30, %v3186_v60  ;;  %v4690_v13 = vmax.f32 %v4689_v58, 0.0 }
 0x1f6   : > { %v1838_v9 = vadd.f32 %v1646_v61, %v4688_v27  ;;  %2268 = vst [vmem:[%s3953_s26 + $0x68] sm:$0xff] %v2559_v43  ;;  %v1157_v42 = vadd.f32 %v1156_v0, %v3186_v60  ;;  %v1475_v18 = vadd.f32 %v1474_v50, %v3188_v23  ;;  %v4692_v11 = vmax.f32 %v4691_v51, 0.0  ;;  %v1164_v61 = vpop.f32.mrb[101].mxu0 }
 0x1f7   : > { %v1965_v15 = vadd.f32 %v1901_v6, %v1773_v33  ;;  %v2028_v59 = vmul.f32 0.25, %v1964_v12  ;;  %v1839_v37 = vadd.f32 %v1647_v31, %v4690_v13  ;;  %v1648_v1 = vmax.f32 %v1155_v3, 0.0  ;;  %v1484_v33 = vpop.f32.mrb[101].mxu1  ;;  %v1166_v12 = vpop.f32.mrb[102].mxu0  ;;  %v4697_v13 = vld [vmem:[#allocation21_spill] sm:$0xff] }
 0x1f8   : > { %v1902_v53 = vadd.f32 %v1838_v9, %v4692_v11  ;;  %v1775_v57 = vmax.f32 %v1473_v41, 0.0  ;;  %v4693_v30 = vmax.f32 %v3591_v45, 0.0  ;;  %v1649_v44 = vmax.f32 %v1157_v42, 0.0  ;;  %v1486_v31 = vpop.f32.mrb[102].mxu1  ;;  %v1168_v3 = vpop.f32.mrb[103].mxu0 }
 0x1f9   : > { %v2029_v35 = vmul.f32 0.25, %v1965_v15  ;;  %v2560_v4 = vpack.c.bf16 %v2028_v59, %v2027_v8  ;;  %v1776_v20 = vmax.f32 %v1475_v18, 0.0  ;;  %v4694_v50 = vmax.f32 %v3587_v22, 0.0 }
 0x1fa   : > { %v1903_v34 = vadd.f32 %v1839_v37, %v4693_v30  ;;  %v1966_v0 = vadd.f32 %v1902_v53, %v1774_v25  ;;  %v1159_v6 = vadd.f32 %v1158_v28, %v3188_v23  ;;  %v1477_v43 = vadd.f32 %v1476_v14, %v3186_v60  ;;  %v1488_v25 = vpop.f32.mrb[103].mxu1 }
 0x1fb   : > { %v1840_v32 = vadd.f32 %v1648_v1, %v4694_v50  ;;  %2269 = vst [vmem:[%s3953_s26 + $0x70] sm:$0xff] %v2560_v4  ;;  %v4695_v8 = vmax.f32 %v3603_v29, 0.0  ;;  %v1479_v9 = vadd.f32 %v1478_v16, %v3188_v23  ;;  %v1163_v15 = vadd.f32 %v1162_v47, %v3186_v60  ;;  %v4699_v16 = vld [vmem:[#allocation19_spill] sm:$0xff]  ;;  %v4701_v4 = vld [vmem:[#allocation22_spill] sm:$0xff]  ;;  %v4703_v50 = vld [vmem:[#allocation20_spill] sm:$0xff] }
 0x1fc   : > { %v1967_v27 = vadd.f32 %v1903_v34, %v1775_v57  ;;  %v2030_v41 = vmul.f32 0.25, %v1966_v0  ;;  %v4696_v22 = vmax.f32 %v3595_v38, 0.0  ;;  %v1650_v59 = vmax.f32 %v1159_v6, 0.0 }
 0x1fd   : > { %v1841_v45 = vadd.f32 %v1649_v44, %v4695_v8  ;;  %v1777_v14 = vmax.f32 %v1477_v43, 0.0  ;;  %v4698_v37 = vmax.f32 %v4697_v13, 0.0  ;;  %v1778_v18 = vmax.f32 %v1479_v9, 0.0  ;;  %v1172_v43 = vpop.f32.mrb[104].mxu0 }
 0x1fe   : > { %v1904_v28 = vadd.f32 %v1840_v32, %v4696_v22  ;;  %v2031_v58 = vmul.f32 0.25, %v1967_v27  ;;  %v1651_v29 = vmax.f32 %v1163_v15, 0.0  ;;  %v2561_v51 = vpack.c.bf16 %v2030_v41, %v2029_v35  ;;  %v1492_v27 = vpop.f32.mrb[104].mxu1 }
 0x1ff   : > { %v1905_v42 = vadd.f32 %v1841_v45, %v4698_v37  ;;  %v4700_v53 = vmax.f32 %v4699_v16, 0.0  ;;  %v1165_v57 = vadd.f32 %v1164_v61, %v3188_v23  ;;  %v4702_v38 = vmax.f32 %v4701_v4, 0.0  ;;  %v4705_v45 = vld [vmem:[#allocation24_spill] sm:$0xff]  ;;  %v1494_v22 = vpop.f32.mrb[105].mxu1 }
 0x200   : > { %v1968_v11 = vadd.f32 %v1904_v28, %v1776_v20  ;;  %v1483_v34 = vadd.f32 %v1482_v52, %v3186_v60  ;;  %v1167_v44 = vadd.f32 %v1166_v12, %v3186_v60  ;;  %2270 = vst [vmem:[%s3953_s26 + $0x78] sm:$0xff] %v2561_v51  ;;  %v4704_v32 = vmax.f32 %v4703_v50, 0.0  ;;  %v1174_v52 = vpop.f32.mrb[105].mxu0 }
 0x201   : > { %v1842_v1 = vadd.f32 %v1650_v59, %v4700_v53  ;;  %v1969_v47 = vadd.f32 %v1905_v42, %v1777_v14  ;;  %v1843_v30 = vadd.f32 %v1651_v29, %v4702_v38  ;;  %v1652_v35 = vmax.f32 %v1165_v57, 0.0  ;;  %v4707_v59 = vld [vmem:[#allocation26_spill] sm:$0xff]  ;;  %v1176_v42 = vpop.f32.mrb[106].mxu0  ;;  %v1496_v29 = vpop.f32.mrb[106].mxu1 }
 0x202   : > { %v2032_v0 = vmul.f32 0.25, %v1968_v11  ;;  %v1485_v20 = vadd.f32 %v1484_v33, %v3188_v23  ;;  %v1779_v61 = vmax.f32 %v1483_v34, 0.0  ;;  %v4706_v9 = vmax.f32 %v4705_v45, 0.0  ;;  %v1498_v57 = vpop.f32.mrb[107].mxu1 }
 0x203   : > { %v1906_v6 = vadd.f32 %v1842_v1, %v4704_v32  ;;  %v2033_v8 = vmul.f32 0.25, %v1969_v47  ;;  %v1653_v41 = vmax.f32 %v1167_v44, 0.0  ;;  %v4708_v14 = vmax.f32 %v4707_v59, 0.0  ;;  %v1178_v1 = vpop.f32.mrb[107].mxu0 }
 0x204   : > { %v1907_v15 = vadd.f32 %v1843_v30, %v4706_v9  ;;  %v2562_v12 = vpack.c.bf16 %v2032_v0, %v2031_v58  ;;  %v1780_v37 = vmax.f32 %v1485_v20, 0.0  ;;  %v4709_v51 = vmax.f32 %v3649_v17, 0.0 }
 0x205   : > { %v1970_v28 = vadd.f32 %v1906_v6, %v1778_v18  ;;  %v1844_v13 = vadd.f32 %v1652_v35, %v4708_v14  ;;  %v1169_v16 = vadd.f32 %v1168_v3, %v3188_v23  ;;  %v1487_v53 = vadd.f32 %v1486_v31, %v3186_v60 }
 0x206   : > { %v1971_v33 = vadd.f32 %v1907_v15, %v1779_v61  ;;  %v1845_v11 = vadd.f32 %v1653_v41, %v4709_v51  ;;  %2271 = vst [vmem:[%s3953_s26 + $0x80] sm:$0xff] %v2562_v12  ;;  %v4710_v58 = vmax.f32 %v3653_v62, 0.0  ;;  %v1489_v4 = vadd.f32 %v1488_v25, %v3188_v23  ;;  %v4713_v61 = vld [vmem:[#allocation27_spill] sm:$0xff]  ;;  %v1182_v15 = vpop.f32.mrb[108].mxu0  ;;  %v1502_v41 = vpop.f32.mrb[108].mxu1 }
 0x207   : > { %v2034_v47 = vmul.f32 0.25, %v1970_v28  ;;  %v1173_v38 = vadd.f32 %v1172_v43, %v3186_v60  ;;  %v1654_v34 = vmax.f32 %v1169_v16, 0.0  ;;  %v1781_v17 = vmax.f32 %v1487_v53, 0.0  ;;  %v4715_v28 = vld [vmem:[#allocation25_spill] sm:$0xff] }
 0x208   : > { %v1908_v18 = vadd.f32 %v1844_v13, %v4710_v58  ;;  %v2035_v30 = vmul.f32 0.25, %v1971_v33  ;;  %v4711_v44 = vmax.f32 %v3657_v2, 0.0  ;;  %v1782_v50 = vmax.f32 %v1489_v4, 0.0  ;;  %v1184_v13 = vpop.f32.mrb[109].mxu0 }
 0x209   : > { %v2563_v0 = vpack.c.bf16 %v2034_v47, %v2033_v8  ;;  %v1655_v32 = vmax.f32 %v1173_v38, 0.0  ;;  %v4712_v6 = vmax.f32 %v3666_v21, 0.0  ;;  %v1175_v20 = vadd.f32 %v1174_v52, %v3188_v23 }
 0x20a   : > { %v1909_v3 = vadd.f32 %v1845_v11, %v4711_v44  ;;  %v1972_v31 = vadd.f32 %v1908_v18, %v1780_v37  ;;  %v1493_v25 = vadd.f32 %v1492_v27, %v3186_v60  ;;  %v4714_v45 = vmax.f32 %v4713_v61, 0.0  ;;  %v1504_v27 = vpop.f32.mrb[109].mxu1 }
 0x20b   : > { %v1846_v35 = vadd.f32 %v1654_v34, %v4712_v6  ;;  %2272 = vst [vmem:[%s3953_s26 + $0x88] sm:$0xff] %v2563_v0  ;;  %v1177_v2 = vadd.f32 %v1176_v42, %v3186_v60  ;;  %v1495_v8 = vadd.f32 %v1494_v22, %v3188_v23  ;;  %v4716_v21 = vmax.f32 %v4715_v28, 0.0  ;;  %v1186_v42 = vpop.f32.mrb[110].mxu0  ;;  %v1506_v53 = vpop.f32.mrb[110].mxu1 }
 0x20c   : > { %v1973_v62 = vadd.f32 %v1909_v3, %v1781_v17  ;;  %v2036_v43 = vmul.f32 0.25, %v1972_v31  ;;  %v1847_v9 = vadd.f32 %v1655_v32, %v4714_v45  ;;  %v1656_v14 = vmax.f32 %v1175_v20, 0.0  ;;  %v1188_v38 = vpop.f32.mrb[111].mxu0  ;;  %v1508_v34 = vpop.f32.mrb[111].mxu1 }
 0x20d   : > { %v1910_v59 = vadd.f32 %v1846_v35, %v4716_v21  ;;  %v1783_v52 = vmax.f32 %v1493_v25, 0.0  ;;  %v4717_v33 = vmax.f32 %v3687_v19, 0.0  ;;  %v1657_v11 = vmax.f32 %v1177_v2, 0.0  ;;  %v4725_v2 = vld [vmem:[#allocation71_spill] sm:$0xff]  ;;  %v1192_v21 = vpop.f32.mrb[112].mxu0 }
 0x20e   : > { %v2037_v12 = vmul.f32 0.25, %v1973_v62  ;;  %v2564_v37 = vpack.c.bf16 %v2036_v43, %v2035_v30  ;;  %v1784_v16 = vmax.f32 %v1495_v8, 0.0  ;;  %v4718_v47 = vmax.f32 %v3683_v54, 0.0  ;;  %v4723_v43 = vld [vmem:[#allocation68_spill] sm:$0xff] }
 0x20f   : > { %v1911_v51 = vadd.f32 %v1847_v9, %v4717_v33  ;;  %v1974_v22 = vadd.f32 %v1910_v59, %v1782_v50  ;;  %v1179_v18 = vadd.f32 %v1178_v1, %v3188_v23  ;;  %v1497_v4 = vadd.f32 %v1496_v29, %v3186_v60  ;;  %v4721_v29 = vld [vmem:[#allocation69_spill] sm:$0xff]  ;;  %v1512_v59 = vpop.f32.mrb[112].mxu1 }
 0x210   : > { %v1848_v58 = vadd.f32 %v1656_v14, %v4718_v47  ;;  %2273 = vst [vmem:[%s3953_s26 + $0x90] sm:$0xff] %v2564_v37  ;;  %v4719_v30 = vmax.f32 %v3699_v48, 0.0  ;;  %v1499_v44 = vadd.f32 %v1498_v57, %v3188_v23  ;;  %v1183_v3 = vadd.f32 %v1182_v15, %v3186_v60  ;;  %v4729_v47 = vld [vmem:[#allocation72_spill] sm:$0xff] }
 0x211   : > { %v1975_v17 = vadd.f32 %v1911_v51, %v1783_v52  ;;  %v2038_v0 = vmul.f32 0.25, %v1974_v22  ;;  %v4720_v31 = vmax.f32 %v3691_v5, 0.0  ;;  %v1658_v50 = vmax.f32 %v1179_v18, 0.0  ;;  %v4727_v52 = vld [vmem:[#allocation70_spill] sm:$0xff] }
 0x212   : > { %v1849_v19 = vadd.f32 %v1657_v11, %v4719_v30  ;;  %v1785_v1 = vmax.f32 %v1497_v4, 0.0  ;;  %v4722_v6 = vmax.f32 %v4721_v29, 0.0  ;;  %v1786_v62 = vmax.f32 %v1499_v44, 0.0  ;;  %v1194_v11 = vpop.f32.mrb[113].mxu0 }
 0x213   : > { %v1912_v54 = vadd.f32 %v1848_v58, %v4720_v31  ;;  %v2039_v32 = vmul.f32 0.25, %v1975_v17  ;;  %v1659_v20 = vmax.f32 %v1183_v3, 0.0  ;;  %v2565_v25 = vpack.c.bf16 %v2038_v0, %v2037_v12 }
 0x214   : > { %v1913_v35 = vadd.f32 %v1849_v19, %v4722_v6  ;;  %v4724_v61 = vmax.f32 %v4723_v43, 0.0  ;;  %v1185_v45 = vadd.f32 %v1184_v13, %v3188_v23  ;;  %v4726_v5 = vmax.f32 %v4725_v2, 0.0  ;;  %v1514_v13 = vpop.f32.mrb[113].mxu1  ;;  %v4731_v19 = vld [vmem:[#allocation73_spill] sm:$0xff] }
 0x215   : > { %v1976_v48 = vadd.f32 %v1912_v54, %v1784_v16  ;;  %v1503_v15 = vadd.f32 %v1502_v41, %v3186_v60  ;;  %v1187_v28 = vadd.f32 %v1186_v42, %v3186_v60  ;;  %2274 = vst [vmem:[%s3953_s26 + $0x98] sm:$0xff] %v2565_v25  ;;  %v4728_v12 = vmax.f32 %v4727_v52, 0.0  ;;  %v1196_v42 = vpop.f32.mrb[114].mxu0  ;;  %v1516_v4 = vpop.f32.mrb[114].mxu1 }
 0x216   : > { %v1850_v57 = vadd.f32 %v1658_v50, %v4724_v61  ;;  %v1977_v9 = vadd.f32 %v1913_v35, %v1785_v1  ;;  %v1851_v8 = vadd.f32 %v1659_v20, %v4726_v5  ;;  %v1660_v33 = vmax.f32 %v1185_v45, 0.0  ;;  %v1198_v31 = vpop.f32.mrb[115].mxu0  ;;  %v1518_v54 = vpop.f32.mrb[115].mxu1 }
 0x217   : > { %v2040_v14 = vmul.f32 0.25, %v1976_v48  ;;  %v1505_v51 = vadd.f32 %v1504_v27, %v3188_v23  ;;  %v1787_v22 = vmax.f32 %v1503_v15, 0.0  ;;  %v4730_v58 = vmax.f32 %v4729_v47, 0.0  ;;  %v1202_v15 = vpop.f32.mrb[116].mxu0 }
 0x218   : > { %v1914_v37 = vadd.f32 %v1850_v57, %v4728_v12  ;;  %v2041_v16 = vmul.f32 0.25, %v1977_v9  ;;  %v1661_v18 = vmax.f32 %v1187_v28, 0.0  ;;  %v4732_v44 = vmax.f32 %v4731_v19, 0.0  ;;  %v1522_v28 = vpop.f32.mrb[116].mxu1 }
 0x219   : > { %v1915_v41 = vadd.f32 %v1851_v8, %v4730_v58  ;;  %v2566_v17 = vpack.c.bf16 %v2040_v14, %v2039_v32  ;;  %v1788_v0 = vmax.f32 %v1505_v51, 0.0  ;;  %v4733_v50 = vmax.f32 %v3741_v10, 0.0  ;;  %v4737_v14 = vld [vmem:[#allocation75_spill] sm:$0xff]  ;;  %v1524_v51 = vpop.f32.mrb[117].mxu1 }
 0x21a   : > { %v1978_v30 = vadd.f32 %v1914_v37, %v1786_v62  ;;  %v1852_v3 = vadd.f32 %v1660_v33, %v4732_v44  ;;  %v1189_v29 = vadd.f32 %v1188_v38, %v3188_v23  ;;  %v1507_v6 = vadd.f32 %v1506_v53, %v3186_v60  ;;  %v1204_v33 = vpop.f32.mrb[117].mxu0 }
 0x21b   : > { %v1979_v27 = vadd.f32 %v1915_v41, %v1787_v22  ;;  %v1853_v1 = vadd.f32 %v1661_v18, %v4733_v50  ;;  %2275 = vst [vmem:[%s3953_s26 + $0xa0] sm:$0xff] %v2566_v17  ;;  %v4734_v20 = vmax.f32 %v3745_v46, 0.0  ;;  %v1509_v62 = vadd.f32 %v1508_v34, %v3188_v23  ;;  %v1206_v58 = vpop.f32.mrb[118].mxu0  ;;  %v1526_v41 = vpop.f32.mrb[118].mxu1 }
 0x21c   : > { %v2042_v35 = vmul.f32 0.25, %v1978_v30  ;;  %v1193_v25 = vadd.f32 %v1192_v21, %v3186_v60  ;;  %v1662_v43 = vmax.f32 %v1189_v29, 0.0  ;;  %v1789_v61 = vmax.f32 %v1507_v6, 0.0 }
 0x21d   : > { %v1916_v32 = vadd.f32 %v1852_v3, %v4734_v20  ;;  %v2043_v48 = vmul.f32 0.25, %v1979_v27  ;;  %v4735_v10 = vmax.f32 %v3749_v55, 0.0  ;;  %v1790_v9 = vmax.f32 %v1509_v62, 0.0  ;;  %v1528_v3 = vpop.f32.mrb[119].mxu1  ;;  %v4744_v62 = vld [vmem:[#allocation76_spill] sm:$0xff] }
 0x21e   : > { %v2567_v45 = vpack.c.bf16 %v2042_v35, %v2041_v16  ;;  %v1663_v53 = vmax.f32 %v1193_v25, 0.0  ;;  %v4736_v2 = vmax.f32 %v3754_v39, 0.0  ;;  %v1195_v8 = vadd.f32 %v1194_v11, %v3188_v23  ;;  %v4739_v16 = vld [vmem:[#allocation74_spill] sm:$0xff] }
 0x21f   : > { %v1917_v57 = vadd.f32 %v1853_v1, %v4735_v10  ;;  %v1980_v38 = vadd.f32 %v1916_v32, %v1788_v0  ;;  %v1513_v34 = vadd.f32 %v1512_v59, %v3186_v60  ;;  %v4738_v52 = vmax.f32 %v4737_v14, 0.0  ;;  %v4746_v10 = vld [vmem:[#allocation78_spill] sm:$0xff] }
 0x220   : > { %v1854_v5 = vadd.f32 %v1662_v43, %v4736_v2  ;;  %2276 = vst [vmem:[%s3953_s26 + $0xa8] sm:$0xff] %v2567_v45  ;;  %v1197_v12 = vadd.f32 %v1196_v42, %v3186_v60  ;;  %v1515_v37 = vadd.f32 %v1514_v13, %v3188_v23  ;;  %v4740_v22 = vmax.f32 %v4739_v16, 0.0  ;;  %v1208_v42 = vpop.f32.mrb[119].mxu0 }
 0x221   : > { %v1981_v46 = vadd.f32 %v1917_v57, %v1789_v61  ;;  %v2044_v21 = vmul.f32 0.25, %v1980_v38  ;;  %v1855_v55 = vadd.f32 %v1663_v53, %v4738_v52  ;;  %v1664_v47 = vmax.f32 %v1195_v8, 0.0 }
 0x222   : > { %v1918_v11 = vadd.f32 %v1854_v5, %v4740_v22  ;;  %v1791_v59 = vmax.f32 %v1513_v34, 0.0  ;;  %v4741_v17 = vmax.f32 %v3771_v56, 0.0  ;;  %v1665_v19 = vmax.f32 %v1197_v12, 0.0  ;;  %v1212_v5 = vpop.f32.mrb[120].mxu0  ;;  %v4750_v34 = vld [vmem:[#allocation80_spill] sm:$0xff] }
 0x223   : > { %v2045_v39 = vmul.f32 0.25, %v1981_v46  ;;  %v2568_v18 = vpack.c.bf16 %v2044_v21, %v2043_v48  ;;  %v1792_v44 = vmax.f32 %v1515_v37, 0.0  ;;  %v4742_v0 = vmax.f32 %v3767_v36, 0.0  ;;  %v1532_v46 = vpop.f32.mrb[120].mxu1 }
 0x224   : > { %v1919_v30 = vadd.f32 %v1855_v55, %v4741_v17  ;;  %v1982_v13 = vadd.f32 %v1918_v11, %v1790_v9  ;;  %v1199_v50 = vadd.f32 %v1198_v31, %v3188_v23  ;;  %v1517_v1 = vadd.f32 %v1516_v4, %v3186_v60  ;;  %v4748_v9 = vld [vmem:[#allocation77_spill] sm:$0xff]  ;;  %v1214_v55 = vpop.f32.mrb[121].mxu0  ;;  %v1534_v12 = vpop.f32.mrb[121].mxu1 }
 0x225   : > { %v1856_v27 = vadd.f32 %v1664_v47, %v4742_v0  ;;  %2277 = vst [vmem:[%s3953_s26 + $0xb0] sm:$0xff] %v2568_v18  ;;  %v4743_v6 = vmax.f32 %v3779_v63, 0.0  ;;  %v1519_v56 = vadd.f32 %v1518_v54, %v3188_v23  ;;  %v1203_v20 = vadd.f32 %v1202_v15, %v3186_v60  ;;  %v1216_v47 = vpop.f32.mrb[122].mxu0 }
 0x226   : > { %v1983_v29 = vadd.f32 %v1919_v30, %v1791_v59  ;;  %v2046_v32 = vmul.f32 0.25, %v1982_v13  ;;  %v4745_v25 = vmax.f32 %v4744_v62, 0.0  ;;  %v1666_v43 = vmax.f32 %v1199_v50, 0.0  ;;  %v1536_v59 = vpop.f32.mrb[122].mxu1  ;;  %v4754_v30 = vld [vmem:[#allocation81_spill] sm:$0xff]  ;;  %v4756_v50 = vld [vmem:[#allocation82_spill] sm:$0xff] }
 0x227   : > { %v1857_v35 = vadd.f32 %v1665_v19, %v4743_v6  ;;  %v1793_v36 = vmax.f32 %v1517_v1, 0.0  ;;  %v4747_v31 = vmax.f32 %v4746_v10, 0.0  ;;  %v1794_v57 = vmax.f32 %v1519_v56, 0.0  ;;  %v1538_v13 = vpop.f32.mrb[123].mxu1 }
 0x228   : > { %v1920_v48 = vadd.f32 %v1856_v27, %v4745_v25  ;;  %v2047_v61 = vmul.f32 0.25, %v1983_v29  ;;  %v1667_v45 = vmax.f32 %v1203_v20, 0.0  ;;  %v2569_v38 = vpack.c.bf16 %v2046_v32, %v2045_v39  ;;  %v4752_v39 = vld [vmem:[#allocation79_spill] sm:$0xff] }
 0x229   : > { %v1921_v4 = vadd.f32 %v1857_v35, %v4747_v31  ;;  %v4749_v53 = vmax.f32 %v4748_v9, 0.0  ;;  %v1205_v2 = vadd.f32 %v1204_v33, %v3188_v23  ;;  %v4751_v15 = vmax.f32 %v4750_v34, 0.0 }
 0x22a   : > { %v1984_v63 = vadd.f32 %v1920_v48, %v1792_v44  ;;  %v1523_v14 = vadd.f32 %v1522_v28, %v3186_v60  ;;  %v1207_v52 = vadd.f32 %v1206_v58, %v3186_v60  ;;  %2278 = vst [vmem:[%s3953_s26 + $0xb8] sm:$0xff] %v2569_v38  ;;  %v4753_v16 = vmax.f32 %v4752_v39, 0.0  ;;  %v1218_v58 = vpop.f32.mrb[123].mxu0  ;;  %v4764_v39 = vld [vmem:[#allocation83_spill] sm:$0xff] }
 0x22b   : > { %v1858_v54 = vadd.f32 %v1666_v43, %v4749_v53  ;;  %v1985_v8 = vadd.f32 %v1921_v4, %v1793_v36  ;;  %v1859_v21 = vadd.f32 %v1667_v45, %v4751_v15  ;;  %v1668_v11 = vmax.f32 %v1205_v2, 0.0  ;;  %v1222_v38 = vpop.f32.mrb[124].mxu0 }
 0x22c   : > { %v2048_v37 = vmul.f32 0.25, %v1984_v63  ;;  %v1525_v33 = vadd.f32 %v1524_v51, %v3188_v23  ;;  %v1795_v17 = vmax.f32 %v1523_v14, 0.0  ;;  %v4755_v19 = vmax.f32 %v4754_v30, 0.0  ;;  %v1542_v63 = vpop.f32.mrb[124].mxu1  ;;  %v1224_v2 = vpop.f32.mrb[125].mxu0 }
 0x22d   : > { %v1922_v22 = vadd.f32 %v1858_v54, %v4753_v16  ;;  %v2049_v18 = vmul.f32 0.25, %v1985_v8  ;;  %v1669_v44 = vmax.f32 %v1207_v52, 0.0  ;;  %v4757_v1 = vmax.f32 %v4756_v50, 0.0  ;;  %v1226_v52 = vpop.f32.mrb[126].mxu0 }
 0x22e   : > { %v1923_v28 = vadd.f32 %v1859_v21, %v4755_v19  ;;  %v2570_v0 = vpack.c.bf16 %v2048_v37, %v2047_v61  ;;  %v1796_v6 = vmax.f32 %v1525_v33, 0.0  ;;  %v4758_v51 = vmax.f32 %v3821_v49, 0.0 }
 0x22f   : > { %v1986_v27 = vadd.f32 %v1922_v22, %v1794_v57  ;;  %v1860_v29 = vadd.f32 %v1668_v11, %v4757_v1  ;;  %v1209_v20 = vadd.f32 %v1208_v42, %v3188_v23  ;;  %v1527_v32 = vadd.f32 %v1526_v41, %v3186_v60  ;;  %v1228_v11 = vpop.f32.mrb[127].mxu0 }
 0x230   : > { %v1987_v35 = vadd.f32 %v1923_v28, %v1795_v17  ;;  %v1861_v56 = vadd.f32 %v1669_v44, %v4758_v51  ;;  %2279 = vst [vmem:[%s3953_s26 + $0xc0] sm:$0xff] %v2570_v0  ;;  %v4759_v25 = vmax.f32 %v3825_v40, 0.0  ;;  %v1529_v43 = vadd.f32 %v1528_v3, %v3188_v23  ;;  %v4766_v17 = vld [vmem:[#allocation86_spill] sm:$0xff]  ;;  %v4768_v0 = vld [vmem:[#allocation85_spill] sm:$0xff] }
 0x231   : > { %v2050_v62 = vmul.f32 0.25, %v1986_v27  ;;  %v1213_v36 = vadd.f32 %v1212_v5, %v3186_v60  ;;  %v1670_v10 = vmax.f32 %v1209_v20, 0.0  ;;  %v1797_v31 = vmax.f32 %v1527_v32, 0.0  ;;  %v1544_v5 = vpop.f32.mrb[125].mxu1 }
 0x232   : > { %v1924_v48 = vadd.f32 %v1860_v29, %v4759_v25  ;;  %v2051_v61 = vmul.f32 0.25, %v1987_v35  ;;  %v4760_v49 = vmax.f32 %v3829_v26, 0.0  ;;  %v1798_v45 = vmax.f32 %v1529_v43, 0.0  ;;  %v4762_v26 = vld [vmem:[#allocation84_spill] sm:$0xff] }
 0x233   : > { %v2571_v57 = vpack.c.bf16 %v2050_v62, %v2049_v18  ;;  %v1671_v41 = vmax.f32 %v1213_v36, 0.0  ;;  %v4761_v40 = vmax.f32 %v3834_v24, 0.0  ;;  %v1215_v3 = vadd.f32 %v1214_v55, %v3188_v23  ;;  %v1546_v24 = vpop.f32.mrb[126].mxu1  ;;  %v4772_v62 = vld [vmem:[#allocation87_spill] sm:$0xff] }
 0x234   : > { %v1925_v4 = vadd.f32 %v1861_v56, %v4760_v49  ;;  %v1988_v42 = vadd.f32 %v1924_v48, %v1796_v6  ;;  %v1533_v54 = vadd.f32 %v1532_v46, %v3186_v60  ;;  %v4763_v34 = vmax.f32 %v4762_v26, 0.0  ;;  %v1548_v33 = vpop.f32.mrb[127].mxu1  ;;  %v4770_v6 = vld [vmem:[#allocation88_spill] sm:$0xff]  ;;  %v4780_v26 = vld [vmem:[#allocation91_spill] sm:$0xff] }
 0x235   : > { %v1862_v9 = vadd.f32 %v1670_v10, %v4761_v40  ;;  %2280 = vst [vmem:[%s3953_s26 + $0xc8] sm:$0xff] %v2571_v57  ;;  %v1217_v21 = vadd.f32 %v1216_v47, %v3186_v60  ;;  %v1535_v14 = vadd.f32 %v1534_v12, %v3188_v23  ;;  %v4765_v16 = vmax.f32 %v4764_v39, 0.0  ;;  %v4778_v40 = vld [vmem:[#allocation92_spill] sm:$0xff] }
 0x236   : > { %v1989_v53 = vadd.f32 %v1925_v4, %v1797_v31  ;;  %v2052_v8 = vmul.f32 0.25, %v1988_v42  ;;  %v1863_v15 = vadd.f32 %v1671_v41, %v4763_v34  ;;  %v1672_v22 = vmax.f32 %v1215_v3, 0.0  ;;  %v4776_v42 = vld [vmem:[#allocation89_spill] sm:$0xff] }
 0x237   : > { %v1926_v55 = vadd.f32 %v1862_v9, %v4765_v16  ;;  %v1799_v46 = vmax.f32 %v1533_v54, 0.0  ;;  %v4767_v30 = vmax.f32 %v4766_v17, 0.0  ;;  %v1673_v28 = vmax.f32 %v1217_v21, 0.0 }
 0x238   : > { %v2053_v37 = vmul.f32 0.25, %v1989_v53  ;;  %v2572_v18 = vpack.c.bf16 %v2052_v8, %v2051_v61  ;;  %v1800_v44 = vmax.f32 %v1535_v14, 0.0  ;;  %v4769_v12 = vmax.f32 %v4768_v0, 0.0 }
 0x239   : > { %v1927_v19 = vadd.f32 %v1863_v15, %v4767_v30  ;;  %v1990_v47 = vadd.f32 %v1926_v55, %v1798_v45  ;;  %v1219_v50 = vadd.f32 %v1218_v58, %v3188_v23  ;;  %v1537_v1 = vadd.f32 %v1536_v59, %v3186_v60  ;;  %v4774_v58 = vld [vmem:[#allocation90_spill] sm:$0xff] }
 0x23a   : > { %v1864_v27 = vadd.f32 %v1672_v22, %v4769_v12  ;;  %2281 = vst [vmem:[%s3953_s26 + $0xd0] sm:$0xff] %v2572_v18  ;;  %v4771_v35 = vmax.f32 %v4770_v6, 0.0  ;;  %v1539_v56 = vadd.f32 %v1538_v13, %v3188_v23  ;;  %v1223_v20 = vadd.f32 %v1222_v38, %v3186_v60  ;;  %v4788_v12 = vld [vmem:[#allocation23_spill] sm:$0xff] }
 0x23b   : > { %v1991_v29 = vadd.f32 %v1927_v19, %v1799_v46  ;;  %v2054_v32 = vmul.f32 0.25, %v1990_v47  ;;  %v4773_v25 = vmax.f32 %v4772_v62, 0.0  ;;  %v1674_v43 = vmax.f32 %v1219_v50, 0.0 }
 0x23c   : > { %v1865_v51 = vadd.f32 %v1673_v28, %v4771_v35  ;;  %v1801_v36 = vmax.f32 %v1537_v1, 0.0  ;;  %v4775_v10 = vmax.f32 %v4774_v58, 0.0  ;;  %v1802_v31 = vmax.f32 %v1539_v56, 0.0  ;;  %v4786_v28 = vld [vmem:[#allocation96_spill] sm:$0xff]  ;;  %v4789_v1 = vld [vmem:[#allocation95_spill] sm:$0xff] }
 0x23d   : > { %v1928_v48 = vadd.f32 %v1864_v27, %v4773_v25  ;;  %v2055_v61 = vmul.f32 0.25, %v1991_v29  ;;  %v1675_v49 = vmax.f32 %v1223_v20, 0.0  ;;  %v2573_v4 = vpack.c.bf16 %v2054_v32, %v2053_v37 }
 0x23e   : > { %v1929_v59 = vadd.f32 %v1865_v51, %v4775_v10  ;;  %v4777_v45 = vmax.f32 %v4776_v42, 0.0  ;;  %v1225_v41 = vadd.f32 %v1224_v2, %v3188_v23  ;;  %v4779_v9 = vmax.f32 %v4778_v40, 0.0  ;;  %v4782_v2 = vld [vmem:[#allocation93_spill] sm:$0xff] }
 0x23f   : > { %v1992_v57 = vadd.f32 %v1928_v48, %v1800_v44  ;;  %v1543_v3 = vadd.f32 %v1542_v63, %v3186_v60  ;;  %v1227_v54 = vadd.f32 %v1226_v52, %v3186_v60  ;;  %2282 = vst [vmem:[%s3953_s26 + $0xd8] sm:$0xff] %v2573_v4  ;;  %v4781_v34 = vmax.f32 %v4780_v26, 0.0  ;;  %v4784_v63 = vld [vmem:[#allocation94_spill] sm:$0xff] }
 0x240   : > { %v1866_v13 = vadd.f32 %v1674_v43, %v4777_v45  ;;  %v1993_v38 = vadd.f32 %v1929_v59, %v1801_v36  ;;  %v1867_v53 = vadd.f32 %v1675_v49, %v4779_v9  ;;  %v1676_v21 = vmax.f32 %v1225_v41, 0.0 }
 0x241   : > { %v2056_v8 = vmul.f32 0.25, %v1992_v57  ;;  %v1545_v14 = vadd.f32 %v1544_v5, %v3188_v23  ;;  %v1803_v39 = vmax.f32 %v1543_v3, 0.0  ;;  %v4783_v16 = vmax.f32 %v4782_v2, 0.0 }
 0x242   : > { %v1930_v15 = vadd.f32 %v1866_v13, %v4781_v34  ;;  %v2057_v37 = vmul.f32 0.25, %v1993_v38  ;;  %v1677_v22 = vmax.f32 %v1227_v54, 0.0  ;;  %v4785_v17 = vmax.f32 %v4784_v63, 0.0 }
 0x243   : > { %v1931_v55 = vadd.f32 %v1867_v53, %v4783_v16  ;;  %v2574_v46 = vpack.c.bf16 %v2056_v8, %v2055_v61  ;;  %v1804_v30 = vmax.f32 %v1545_v14, 0.0  ;;  %v4787_v44 = vmax.f32 %v4786_v28, 0.0 }
 0x244   : > { %v1994_v18 = vadd.f32 %v1930_v15, %v1802_v31  ;;  %v1868_v52 = vadd.f32 %v1676_v21, %v4785_v17  ;;  %v1229_v0 = vadd.f32 %v1228_v11, %v3188_v23  ;;  %v1547_v5 = vadd.f32 %v1546_v24, %v3186_v60  ;;  %v4792_v60 = vld [vmem:[#allocation97_spill] sm:$0xff] }
 0x245   : > { %v1995_v19 = vadd.f32 %v1931_v55, %v1803_v39  ;;  %v1869_v47 = vadd.f32 %v1677_v22, %v4787_v44  ;;  %v1614_v27 = vmax.f32 %v4788_v12, 0.0  ;;  %2283 = vst [vmem:[%s3953_s26 + $0xe0] sm:$0xff] %v2574_v46  ;;  %v4790_v29 = vmax.f32 %v4789_v1, 0.0 }
 0x246   : > { %v2058_v50 = vmul.f32 0.25, %v1994_v18  ;;  %v1678_v35 = vmax.f32 %v1229_v0, 0.0  ;;  %v1805_v51 = vmax.f32 %v1547_v5, 0.0  ;;  %v4791_v56 = vmax.f32 %v3908_v7, 0.0 }
 0x247   : > { %v1932_v6 = vadd.f32 %v1868_v52, %v4790_v29  ;;  %v1549_v32 = vadd.f32 %v1548_v33, %v3188_v23  ;;  %v2059_v11 = vmul.f32 0.25, %v1995_v19  ;;  %v1742_v24 = vmax.f32 %v4792_v60, 0.0 }
 0x248   : > { %v1933_v20 = vadd.f32 %v1869_v47, %v4791_v56  ;;  %v2575_v62 = vpack.c.bf16 %v2058_v50, %v2057_v37  ;;  %v1870_v48 = vadd.f32 %v1678_v35, %v1614_v27 }
 0x249   : > { %v1996_v25 = vadd.f32 %v1932_v6, %v1804_v30  ;;  %v1806_v61 = vmax.f32 %v1549_v32, 0.0 }
 0x24a   : > { %v1997_v43 = vadd.f32 %v1933_v20, %v1805_v51  ;;  %2284 = vst [vmem:[%s3953_s26 + $0xe8] sm:$0xff] %v2575_v62  ;;  %v1934_v58 = vadd.f32 %v1870_v48, %v1742_v24 }
 0x24b   : > { %v2060_v36 = vmul.f32 0.25, %v1996_v25 }
 0x24c   : > { %v2061_v59 = vmul.f32 0.25, %v1997_v43  ;;  %v1998_v31 = vadd.f32 %v1934_v58, %v1806_v61 }
 0x24d   : > { %v2576_v10 = vpack.c.bf16 %v2060_v36, %v2059_v11 }
 0x24e   : > { %v2062_v7 = vmul.f32 0.25, %v1998_v31 }
 0x24f   : > { %2285 = vst [vmem:[%s3953_s26 + $0xf0] sm:$0xff] %v2576_v10 }
 0x250   : > { %v2577_v49 = vpack.c.bf16 %v2062_v7, %v2061_v59 }
 0x252   : > { %2286 = vst [vmem:[%s3953_s26 + $0xf8] sm:$0xff] %v2577_v49 }
 0x253 PF: > { %s15_s12 = sadd.s32 1, %s2750_s12  }
 0x254   : > { %p12_p10 = scmp.ge.s32.totalorder %s15_s12, 4  }
 0x256   :  { %14 = sbr.rel (!%p12_p10) target bundleno = 2 (0x2), region = 71 }
 0x25d   :  { %2311 = vsyncpa [#allocation3], 1 }
 0x25e   :  { %2313 = vsyncpa [#allocation3 + $0x1], 1 }
 0x25f   :  { %2314 = vsyncpa [#allocation5], 1 }

// kernel: hnet_forward.5
= control target key start
LH: loop header
LB: loop body
LE: loop exit
PB: predicated region body
PF: predicated region fallthrough
CT: control target
= control target key end

     0   :  { %vm1459_vm0 = vcmask 130048   ;;  %vm4047_vm1 = vmmov 0   ;;  %s5164_s2 = inlined_call_operand.vmem [shape: bf16[1024,256], index: 2, kind: input, shape index: {}]   ;;  %s5165_s0 = inlined_call_operand.vmem [shape: bf16[80,1024], index: 0, kind: input, shape index: {}]   ;;  %s5166_s1 = inlined_call_operand.vmem [shape: bf16[80,16], index: 1, kind: input, shape index: {}]   ;;  %s5167_s4 = inlined_call_operand.vmem [shape: bf16[1280,128], index: 4, kind: input, shape index: {}]   ;;  %s5168_s3 = inlined_call_operand.vmem [shape: f32[1,256], index: 3, kind: input, shape index: {}]   ;;  %s5169_s6 = inlined_call_operand.vmem [shape: bf16[640,128], index: 6, kind: input, shape index: {}]   ;;  %s5170_s5 = inlined_call_operand.vmem [shape: f32[1,128], index: 5, kind: input, shape index: {}]   ;;  %s5171_s7 = inlined_call_operand.vmem [shape: f32[1,128], index: 7, kind: input, shape index: {}]   ;;  %s5172_s8 = inlined_call_operand.vmem [shape: f32[16,128], index: 8, kind: output, shape index: {}]  }
   0x1   :  { %v3728_v0 = vld [vmem:[%s5164_s2 + $0x4] ss:$8 sps:$4 sm:$0xff]   ;;  %v3730_v1 = vld [vmem:[%s5164_s2] ss:$8 sps:$4 sm:$0xff]   ;;  %v3731_v2 = vld [vmem:[%s5164_s2 + $0x14] ss:$8 sps:$4 sm:$0xff]  }
   0x2   :  { %1050 = vmatprep.subr.bf16.mxu0 %v3728_v0  ;;  %v3733_v3 = vld [vmem:[%s5164_s2 + $0x10] ss:$8 sps:$4 sm:$0xff]   ;;  %v3734_v4 = vld [vmem:[%s5164_s2 + $0x24] ss:$8 sps:$4 sm:$0xff]   ;;  %v3736_v5 = vld [vmem:[%s5164_s2 + $0x20] ss:$8 sps:$4 sm:$0xff]  }
   0x3   :  { %1051 = vmatpush1.bf16.msra.mxu0 %v3730_v1  ;;  %v3737_v6 = vld [vmem:[%s5164_s2 + $0x34] ss:$8 sps:$4 sm:$0xff]   ;;  %v3739_v7 = vld [vmem:[%s5164_s2 + $0x30] ss:$8 sps:$4 sm:$0xff]   ;;  %v3740_v8 = vld [vmem:[%s5164_s2 + $0x44] ss:$8 sps:$4 sm:$0xff]  }
   0x4   :  { %1052 = vmatprep.subr.bf16.mxu0 %v3731_v2  ;;  %v3742_v9 = vld [vmem:[%s5164_s2 + $0x40] ss:$8 sps:$4 sm:$0xff]   ;;  %v3743_v10 = vld [vmem:[%s5164_s2 + $0x54] ss:$8 sps:$4 sm:$0xff]   ;;  %v3745_v11 = vld [vmem:[%s5164_s2 + $0x50] ss:$8 sps:$4 sm:$0xff]  }
   0x5   :  { %v3746_v12 = vld [vmem:[%s5164_s2 + $0x64] ss:$8 sps:$4 sm:$0xff]   ;;  %v3748_v16 = vld [vmem:[%s5164_s2 + $0x60] ss:$8 sps:$4 sm:$0xff]   ;;  %v3749_v17 = vld [vmem:[%s5164_s2 + $0x74] ss:$8 sps:$4 sm:$0xff]  }
   0x6   :  { %v30_v13 = vld [vmem:[%s5165_s0] sm:$0xff]  ;;  %v3751_v18 = vld [vmem:[%s5164_s2 + $0x70] ss:$8 sps:$4 sm:$0xff]   ;;  %v3755_v21 = vld [vmem:[%s5164_s2 + $0x94] ss:$8 sps:$4 sm:$0xff]  }
   0x7   :  { %1053 = vmatpush1.bf16.msra.mxu0 %v3733_v3  ;;  %v34_v14 = vld [vmem:[%s5165_s0 + $0x20] sm:$0xff]  ;;  %v3757_v22 = vld [vmem:[%s5164_s2 + $0x90] ss:$8 sps:$4 sm:$0xff]   ;;  %v3761_v25 = vld [vmem:[%s5164_s2 + $0xb4] ss:$8 sps:$4 sm:$0xff]  }
   0x8   :  { %1054 = vmatprep.subr.bf16.mxu0 %v3734_v4  ;;  %v3058_v15 = vcombine.high %v30_v13, %v34_v14  ;;  %v3752_v19 = vld [vmem:[%s5164_s2 + $0x84] ss:$8 sps:$4 sm:$0xff]   ;;  %v3754_v20 = vld [vmem:[%s5164_s2 + $0x80] ss:$8 sps:$4 sm:$0xff]   ;;  %v3763_v26 = vld [vmem:[%s5164_s2 + $0xb0] ss:$8 sps:$4 sm:$0xff]   ;;  %v3057_v38 = vcombine.low %v30_v13, %v34_v14 }
   0x9   :  { %v3758_v23 = vld [vmem:[%s5164_s2 + $0xa4] ss:$8 sps:$4 sm:$0xff]   ;;  %v3760_v24 = vld [vmem:[%s5164_s2 + $0xa0] ss:$8 sps:$4 sm:$0xff]   ;;  %v3767_v29 = vld [vmem:[%s5164_s2 + $0xd4] ss:$8 sps:$4 sm:$0xff]  }
   0xa   :  { %1082 = vmatprep.mubr.bf16.mxu0 %v3058_v15  ;;  %v3764_v27 = vld [vmem:[%s5164_s2 + $0xc4] ss:$8 sps:$4 sm:$0xff]   ;;  %v3766_v28 = vld [vmem:[%s5164_s2 + $0xc0] ss:$8 sps:$4 sm:$0xff]   ;;  %v3769_v30 = vld [vmem:[%s5164_s2 + $0xd0] ss:$8 sps:$4 sm:$0xff]  }
   0xb   :  { %1055 = vmatpush1.bf16.msra.mxu0 %v3736_v5  ;;  %v3770_v31 = vld [vmem:[%s5164_s2 + $0xe4] ss:$8 sps:$4 sm:$0xff]   ;;  %v3772_v32 = vld [vmem:[%s5164_s2 + $0xe0] ss:$8 sps:$4 sm:$0xff]   ;;  %v3773_v33 = vld [vmem:[%s5164_s2 + $0xf4] ss:$8 sps:$4 sm:$0xff]  }
   0xc   :  { %1056 = vmatprep.subr.bf16.mxu0 %v3737_v6  ;;  %v3775_v34 = vld [vmem:[%s5164_s2 + $0xf0] ss:$8 sps:$4 sm:$0xff]   ;;  %v3778_v35 = vld [vmem:[%s5164_s2 + $0x104] ss:$8 sps:$4 sm:$0xff]   ;;  %v3776_v39 = vld [vmem:[%s5164_s2 + $0x100] ss:$8 sps:$4 sm:$0xff]  }
   0xd   :  { %v38_v36 = vld [vmem:[%s5165_s0 + $0x40] sm:$0xff]  ;;  %v3781_v41 = vld [vmem:[%s5164_s2 + $0x114] ss:$8 sps:$4 sm:$0xff]   ;;  %v3779_v42 = vld [vmem:[%s5164_s2 + $0x110] ss:$8 sps:$4 sm:$0xff]  }
   0xe   :  { %v42_v37 = vld [vmem:[%s5165_s0 + $0x60] sm:$0xff]  ;;  %v3787_v49 = vld [vmem:[%s5164_s2 + $0x134] ss:$8 sps:$4 sm:$0xff]   ;;  %v3785_v50 = vld [vmem:[%s5164_s2 + $0x130] ss:$8 sps:$4 sm:$0xff]  }
   0xf   :  { %1057 = vmatpush1.bf16.msra.mxu0 %v3739_v7  ;;  %v3066_v40 = vcombine.high %v38_v36, %v42_v37  ;;  %v3784_v43 = vld [vmem:[%s5164_s2 + $0x124] ss:$8 sps:$4 sm:$0xff]   ;;  %v3065_v46 = vcombine.low %v38_v36, %v42_v37  ;;  %v3782_v47 = vld [vmem:[%s5164_s2 + $0x120] ss:$8 sps:$4 sm:$0xff]   ;;  %v3793_v56 = vld [vmem:[%s5164_s2 + $0x154] ss:$8 sps:$4 sm:$0xff]  }
  0x10   :  { %1058 = vmatprep.subr.bf16.mxu0 %v3740_v8  ;;  %v46_v44 = vld [vmem:[%s5165_s0 + $0x80] sm:$0xff]  ;;  %v3791_v58 = vld [vmem:[%s5164_s2 + $0x150] ss:$8 sps:$4 sm:$0xff]   ;;  %v3799_v1 = vld [vmem:[%s5164_s2 + $0x174] ss:$8 sps:$4 sm:$0xff]  }
  0x11   :  { %v50_v45 = vld [vmem:[%s5165_s0 + $0xa0] sm:$0xff]  ;;  %v3797_v2 = vld [vmem:[%s5164_s2 + $0x170] ss:$8 sps:$4 sm:$0xff]   ;;  %v31_v4 = vld [vmem:[%s5165_s0 + $0x8] sm:$0xff] }
  0x12   :  { %v3074_v48 = vcombine.high %v46_v44, %v50_v45  ;;  %v3790_v51 = vld [vmem:[%s5164_s2 + $0x144] ss:$8 sps:$4 sm:$0xff]   ;;  %v3073_v54 = vcombine.low %v46_v44, %v50_v45  ;;  %v3788_v55 = vld [vmem:[%s5164_s2 + $0x140] ss:$8 sps:$4 sm:$0xff]   ;;  %v3811_v13 = vld [vmem:[%s5164_s2 + $0x1b4] ss:$8 sps:$4 sm:$0xff]  }
  0x13   :  { %1059 = vmatpush1.bf16.msra.mxu0 %v3742_v9  ;;  %v54_v52 = vld [vmem:[%s5165_s0 + $0xc0] sm:$0xff]  ;;  %v35_v5 = vld [vmem:[%s5165_s0 + $0x28] sm:$0xff]  ;;  %v3805_v9 = vld [vmem:[%s5164_s2 + $0x194] ss:$8 sps:$4 sm:$0xff]  }
  0x14   :  { %1060 = vmatprep.subr.bf16.mxu0 %v3743_v10  ;;  %v58_v53 = vld [vmem:[%s5165_s0 + $0xe0] sm:$0xff]  ;;  %v3060_v8 = vcombine.high %v31_v4, %v35_v5  ;;  %v3803_v10 = vld [vmem:[%s5164_s2 + $0x190] ss:$8 sps:$4 sm:$0xff]   ;;  %v3835_v37 = vld [vmem:[%s5164_s2 + $0x234] ss:$8 sps:$4 sm:$0xff]  }
  0x15   :  { %v3082_v57 = vcombine.high %v54_v52, %v58_v53  ;;  %v3796_v59 = vld [vmem:[%s5164_s2 + $0x164] ss:$8 sps:$4 sm:$0xff]   ;;  %v3081_v62 = vcombine.low %v54_v52, %v58_v53  ;;  %v3794_v63 = vld [vmem:[%s5164_s2 + $0x160] ss:$8 sps:$4 sm:$0xff]   ;;  %v3809_v14 = vld [vmem:[%s5164_s2 + $0x1b0] ss:$8 sps:$4 sm:$0xff]  }
  0x16   :  { %v62_v60 = vld [vmem:[%s5165_s0 + $0x100] sm:$0xff]  ;;  %v3841_v45 = vld [vmem:[%s5164_s2 + $0x254] ss:$8 sps:$4 sm:$0xff]  }
  0x17   :  { %1061 = vmatpush1.bf16.msra.mxu0 %v3745_v11  ;;  %v66_v61 = vld [vmem:[%s5165_s0 + $0x120] sm:$0xff]  ;;  %v3847_v53 = vld [vmem:[%s5164_s2 + $0x274] ss:$8 sps:$4 sm:$0xff]  }
  0x18   :  { %1062 = vmatprep.subr.bf16.mxu0 %v3746_v12  ;;  %v3090_v0 = vcombine.high %v62_v60, %v66_v61  ;;  %v3802_v3 = vld [vmem:[%s5164_s2 + $0x184] ss:$8 sps:$4 sm:$0xff]   ;;  %v3089_v6 = vcombine.low %v62_v60, %v66_v61  ;;  %v3800_v7 = vld [vmem:[%s5164_s2 + $0x180] ss:$8 sps:$4 sm:$0xff]   ;;  %v3853_v61 = vld [vmem:[%s5164_s2 + $0x294] ss:$8 sps:$4 sm:$0xff]  }
  0x19   :  { %v3808_v11 = vld [vmem:[%s5164_s2 + $0x1a4] ss:$8 sps:$4 sm:$0xff]   ;;  %v3806_v12 = vld [vmem:[%s5164_s2 + $0x1a0] ss:$8 sps:$4 sm:$0xff]  }
  0x1a   :  { %v3814_v15 = vld [vmem:[%s5164_s2 + $0x1c4] ss:$8 sps:$4 sm:$0xff]  }
  0x1b   :  { %1063 = vmatpush1.bf16.msra.mxu0 %v3748_v16  ;;  %v3812_v16 = vld [vmem:[%s5164_s2 + $0x1c0] ss:$8 sps:$4 sm:$0xff]  }
  0x1c   :  { %1064 = vmatprep.subr.bf16.mxu0 %v3749_v17  ;;  %v3817_v17 = vld [vmem:[%s5164_s2 + $0x1d4] ss:$8 sps:$4 sm:$0xff]  }
  0x1f   :  { %1065 = vmatpush1.bf16.msra.mxu0 %v3751_v18  ;;  %v3815_v18 = vld [vmem:[%s5164_s2 + $0x1d0] ss:$8 sps:$4 sm:$0xff]  }
  0x20   :  { %1066 = vmatprep.subr.bf16.mxu0 %v3752_v19  ;;  %v3820_v19 = vld [vmem:[%s5164_s2 + $0x1e4] ss:$8 sps:$4 sm:$0xff]  }
  0x23   :  { %1067 = vmatpush1.bf16.msra.mxu0 %v3754_v20  ;;  %v3818_v20 = vld [vmem:[%s5164_s2 + $0x1e0] ss:$8 sps:$4 sm:$0xff]  }
  0x24   :  { %1068 = vmatprep.subr.bf16.mxu0 %v3755_v21  ;;  %v3823_v21 = vld [vmem:[%s5164_s2 + $0x1f4] ss:$8 sps:$4 sm:$0xff]  }
  0x27   :  { %1069 = vmatpush1.bf16.msra.mxu0 %v3757_v22  ;;  %v3821_v22 = vld [vmem:[%s5164_s2 + $0x1f0] ss:$8 sps:$4 sm:$0xff]  }
  0x28   :  { %1070 = vmatprep.subr.bf16.mxu0 %v3758_v23  ;;  %v3826_v23 = vld [vmem:[%s5164_s2 + $0x204] ss:$8 sps:$4 sm:$0xff]  }
  0x2b   :  { %1071 = vmatpush1.bf16.msra.mxu0 %v3760_v24  ;;  %v39_v24 = vld [vmem:[%s5165_s0 + $0x48] sm:$0xff] }
  0x2c   :  { %1072 = vmatprep.subr.bf16.mxu0 %v3761_v25  ;;  %v43_v25 = vld [vmem:[%s5165_s0 + $0x68] sm:$0xff] }
  0x2f   :  { %1073 = vmatpush1.bf16.msra.mxu0 %v3763_v26  ;;  %v3059_v26 = vcombine.low %v31_v4, %v35_v5  ;;  %v3860_v4 = vld [vmem:[%s5164_s2 + $0x2c0] ss:$8 sps:$4 sm:$0xff]   ;;  %v3865_v5 = vld [vmem:[%s5164_s2 + $0x2d4] ss:$8 sps:$4 sm:$0xff]  }
  0x30   :  { %1074 = vmatprep.subr.bf16.mxu0 %v3764_v27  ;;  %v3824_v27 = vld [vmem:[%s5164_s2 + $0x200] ss:$8 sps:$4 sm:$0xff]  }
  0x33   :  { %1075 = vmatpush1.bf16.msra.mxu0 %v3766_v28  ;;  %v3068_v28 = vcombine.high %v39_v24, %v43_v25 }
  0x34   :  { %1076 = vmatprep.subr.bf16.mxu0 %v3767_v29  ;;  %v3829_v29 = vld [vmem:[%s5164_s2 + $0x214] ss:$8 sps:$4 sm:$0xff]  }
  0x37   :  { %1077 = vmatpush1.bf16.msra.mxu0 %v3769_v30  ;;  %v3827_v30 = vld [vmem:[%s5164_s2 + $0x210] ss:$8 sps:$4 sm:$0xff]  }
  0x38   :  { %1078 = vmatprep.subr.bf16.mxu0 %v3770_v31  ;;  %v3832_v31 = vld [vmem:[%s5164_s2 + $0x224] ss:$8 sps:$4 sm:$0xff]  }
  0x3b   :  { %1079 = vmatpush1.bf16.msra.mxu0 %v3772_v32  ;;  %v47_v32 = vld [vmem:[%s5165_s0 + $0x88] sm:$0xff] }
  0x3c   :  { %1080 = vmatprep.subr.bf16.mxu0 %v3773_v33  ;;  %v51_v33 = vld [vmem:[%s5165_s0 + $0xa8] sm:$0xff] }
  0x3d   :  { %v3076_v36 = vcombine.high %v47_v32, %v51_v33 }
  0x3f   :  { %1081 = vmatpush1.bf16.msra.mxu0 %v3775_v34  ;;  %v3067_v34 = vcombine.low %v39_v24, %v43_v25  ;;  %v3883_v25 = vld [vmem:[%s5164_s2 + $0x334] ss:$8 sps:$4 sm:$0xff]  }
  0x40   :  { %1133 = vmatprep.subr.bf16.mxu0 %v3778_v35  ;;  %v3830_v35 = vld [vmem:[%s5164_s2 + $0x220] ss:$8 sps:$4 sm:$0xff]  }
  0x42   :  { %1083 = vmatmul.mubr.bf16.vlgmr.msra.gmra.mrb[0].mxu0 %v3057_v38  ;;  %v3833_v38 = vld [vmem:[%s5164_s2 + $0x230] ss:$8 sps:$4 sm:$0xff]  }
  0x43   :  { %1134 = vmatpush1.bf16.msra.mxu0 %v3776_v39  ;;  %1092 = vmatprep.mubr.bf16.mxu0 %v3066_v40  ;;  %v3838_v39 = vld [vmem:[%s5164_s2 + $0x244] ss:$8 sps:$4 sm:$0xff]  }
  0x44   :  { %1135 = vmatprep.subr.bf16.mxu0 %v3781_v41  ;;  %v55_v40 = vld [vmem:[%s5165_s0 + $0xc8] sm:$0xff] }
  0x45   :  { %v59_v41 = vld [vmem:[%s5165_s0 + $0xe8] sm:$0xff] }
  0x46   :  { %v3084_v44 = vcombine.high %v55_v40, %v59_v41 }
  0x47   :  { %1136 = vmatpush1.bf16.msra.mxu0 %v3779_v42  ;;  %v3075_v42 = vcombine.low %v47_v32, %v51_v33  ;;  %v3889_v33 = vld [vmem:[%s5164_s2 + $0x354] ss:$8 sps:$4 sm:$0xff]  }
  0x48   :  { %1137 = vmatprep.subr.bf16.mxu0 %v3784_v43  ;;  %v3836_v43 = vld [vmem:[%s5164_s2 + $0x240] ss:$8 sps:$4 sm:$0xff]  }
  0x4a   :  { %1093 = vmatmul.mubr.bf16.gmra.mrb[4].mxu0 %v3065_v46  ;;  %v3839_v46 = vld [vmem:[%s5164_s2 + $0x250] ss:$8 sps:$4 sm:$0xff]  }
  0x4b   :  { %1138 = vmatpush1.bf16.msra.mxu0 %v3782_v47  ;;  %1102 = vmatprep.mubr.bf16.mxu0 %v3074_v48  ;;  %v3844_v47 = vld [vmem:[%s5164_s2 + $0x264] ss:$8 sps:$4 sm:$0xff]  }
  0x4c   :  { %1139 = vmatprep.subr.bf16.mxu0 %v3787_v49  ;;  %v63_v48 = vld [vmem:[%s5165_s0 + $0x108] sm:$0xff] }
  0x4d   :  { %v67_v49 = vld [vmem:[%s5165_s0 + $0x128] sm:$0xff] }
  0x4e   :  { %v3092_v52 = vcombine.high %v63_v48, %v67_v49 }
  0x4f   :  { %1140 = vmatpush1.bf16.msra.mxu0 %v3785_v50  ;;  %v3083_v50 = vcombine.low %v55_v40, %v59_v41  ;;  %v3895_v41 = vld [vmem:[%s5164_s2 + $0x374] ss:$8 sps:$4 sm:$0xff]  }
  0x50   :  { %1141 = vmatprep.subr.bf16.mxu0 %v3790_v51  ;;  %v3842_v51 = vld [vmem:[%s5164_s2 + $0x260] ss:$8 sps:$4 sm:$0xff]  }
  0x52   :  { %1103 = vmatmul.mubr.bf16.gmra.mrb[8].mxu0 %v3073_v54  ;;  %v3845_v54 = vld [vmem:[%s5164_s2 + $0x270] ss:$8 sps:$4 sm:$0xff]  }
  0x53   :  { %1142 = vmatpush1.bf16.msra.mxu0 %v3788_v55  ;;  %1112 = vmatprep.mubr.bf16.mxu0 %v3082_v57  ;;  %v3850_v55 = vld [vmem:[%s5164_s2 + $0x284] ss:$8 sps:$4 sm:$0xff]   ;;  %v36_v57 = vld [vmem:[%s5165_s0 + $0x30] sm:$0xff] }
  0x54   :  { %1143 = vmatprep.subr.bf16.mxu0 %v3793_v56  ;;  %v32_v56 = vld [vmem:[%s5165_s0 + $0x10] sm:$0xff] }
  0x55   :  { %v3062_v60 = vcombine.high %v32_v56, %v36_v57 }
  0x57   :  { %1144 = vmatpush1.bf16.msra.mxu0 %v3791_v58  ;;  %v3091_v58 = vcombine.low %v63_v48, %v67_v49  ;;  %v3901_v49 = vld [vmem:[%s5164_s2 + $0x394] ss:$8 sps:$4 sm:$0xff]  }
  0x58   :  { %1145 = vmatprep.subr.bf16.mxu0 %v3796_v59  ;;  %v3848_v59 = vld [vmem:[%s5164_s2 + $0x280] ss:$8 sps:$4 sm:$0xff]  }
  0x5a   :  { %1113 = vmatmul.mubr.bf16.gmra.mrb[12].mxu0 %v3081_v62  ;;  %v3851_v62 = vld [vmem:[%s5164_s2 + $0x290] ss:$8 sps:$4 sm:$0xff]  }
  0x5b   :  { %1146 = vmatpush1.bf16.msra.mxu0 %v3794_v63  ;;  %1122 = vmatprep.mubr.bf16.mxu0 %v3090_v0  ;;  %v3856_v63 = vld [vmem:[%s5164_s2 + $0x2a4] ss:$8 sps:$4 sm:$0xff]   ;;  %v3854_v0 = vld [vmem:[%s5164_s2 + $0x2a0] ss:$8 sps:$4 sm:$0xff]  }
  0x5c   :  { %1147 = vmatprep.subr.bf16.mxu0 %v3799_v1  ;;  %v3859_v1 = vld [vmem:[%s5164_s2 + $0x2b4] ss:$8 sps:$4 sm:$0xff]  }
  0x5f   :  { %1148 = vmatpush1.bf16.msra.mxu0 %v3797_v2  ;;  %v3857_v2 = vld [vmem:[%s5164_s2 + $0x2b0] ss:$8 sps:$4 sm:$0xff]  }
  0x60   :  { %1149 = vmatprep.subr.bf16.mxu0 %v3802_v3  ;;  %v3862_v3 = vld [vmem:[%s5164_s2 + $0x2c4] ss:$8 sps:$4 sm:$0xff]  }
  0x62   :  { %1123 = vmatmul.mubr.bf16.gmra.mrb[16].mxu0 %v3089_v6  ;;  %v3863_v6 = vld [vmem:[%s5164_s2 + $0x2d0] ss:$8 sps:$4 sm:$0xff]  }
  0x63   :  { %1150 = vmatpush1.bf16.msra.mxu0 %v3800_v7  ;;  %1165 = vmatprep.mubr.bf16.mxu0 %v3060_v8  ;;  %v3868_v7 = vld [vmem:[%s5164_s2 + $0x2e4] ss:$8 sps:$4 sm:$0xff]   ;;  %v3866_v8 = vld [vmem:[%s5164_s2 + $0x2e0] ss:$8 sps:$4 sm:$0xff]  }
  0x64   :  { %1151 = vmatprep.subr.bf16.mxu0 %v3805_v9  ;;  %v3871_v9 = vld [vmem:[%s5164_s2 + $0x2f4] ss:$8 sps:$4 sm:$0xff]  }
  0x67   :  { %1152 = vmatpush1.bf16.msra.mxu0 %v3803_v10  ;;  %v3869_v10 = vld [vmem:[%s5164_s2 + $0x2f0] ss:$8 sps:$4 sm:$0xff]  }
  0x68   :  { %1153 = vmatprep.subr.bf16.mxu0 %v3808_v11  ;;  %v3874_v11 = vld [vmem:[%s5164_s2 + $0x304] ss:$8 sps:$4 sm:$0xff]  }
  0x6b   :  { %1154 = vmatpush1.bf16.msra.mxu0 %v3806_v12  ;;  %v40_v12 = vld [vmem:[%s5165_s0 + $0x50] sm:$0xff] }
  0x6c   :  { %1155 = vmatprep.subr.bf16.mxu0 %v3811_v13  ;;  %v44_v13 = vld [vmem:[%s5165_s0 + $0x70] sm:$0xff] }
  0x6f   :  { %1156 = vmatpush1.bf16.msra.mxu0 %v3809_v14  ;;  %v3061_v14 = vcombine.low %v32_v56, %v36_v57  ;;  %v3908_v56 = vld [vmem:[%s5164_s2 + $0x3c0] ss:$8 sps:$4 sm:$0xff]   ;;  %v3913_v57 = vld [vmem:[%s5164_s2 + $0x3d4] ss:$8 sps:$4 sm:$0xff]  }
  0x70   :  { %1157 = vmatprep.subr.bf16.mxu0 %v3814_v15  ;;  %v3872_v15 = vld [vmem:[%s5164_s2 + $0x300] ss:$8 sps:$4 sm:$0xff]  }
  0x73   :  { %1158 = vmatpush1.bf16.msra.mxu0 %v3812_v16  ;;  %v3070_v16 = vcombine.high %v40_v12, %v44_v13 }
  0x74   :  { %1159 = vmatprep.subr.bf16.mxu0 %v3817_v17  ;;  %v3877_v17 = vld [vmem:[%s5164_s2 + $0x314] ss:$8 sps:$4 sm:$0xff]  }
  0x77   :  { %1160 = vmatpush1.bf16.msra.mxu0 %v3815_v18  ;;  %v3875_v18 = vld [vmem:[%s5164_s2 + $0x310] ss:$8 sps:$4 sm:$0xff]  }
  0x78   :  { %1161 = vmatprep.subr.bf16.mxu0 %v3820_v19  ;;  %v3880_v19 = vld [vmem:[%s5164_s2 + $0x324] ss:$8 sps:$4 sm:$0xff]  }
  0x7b   :  { %1162 = vmatpush1.bf16.msra.mxu0 %v3818_v20  ;;  %v48_v20 = vld [vmem:[%s5165_s0 + $0x90] sm:$0xff] }
  0x7c   :  { %1163 = vmatprep.subr.bf16.mxu0 %v3823_v21  ;;  %v52_v21 = vld [vmem:[%s5165_s0 + $0xb0] sm:$0xff] }
  0x7d   :  { %v3078_v24 = vcombine.high %v48_v20, %v52_v21 }
  0x7f   :  { %1164 = vmatpush1.bf16.msra.mxu0 %v3821_v22  ;;  %v3069_v22 = vcombine.low %v40_v12, %v44_v13  ;;  %v69_v12 = vld [vmem:[%s5165_s0 + $0x138] sm:$0xff] }
  0x80   :  { %1216 = vmatprep.subr.bf16.mxu0 %v3826_v23  ;;  %v3878_v23 = vld [vmem:[%s5164_s2 + $0x320] ss:$8 sps:$4 sm:$0xff]  }
  0x82   :  { %1166 = vmatmul.mubr.bf16.vlgmr.msra.gmra.mrb[0].mxu0 %v3059_v26  ;;  %v3881_v26 = vld [vmem:[%s5164_s2 + $0x330] ss:$8 sps:$4 sm:$0xff]  }
  0x83   :  { %1217 = vmatpush1.bf16.msra.mxu0 %v3824_v27  ;;  %1175 = vmatprep.mubr.bf16.mxu0 %v3068_v28  ;;  %v3886_v27 = vld [vmem:[%s5164_s2 + $0x344] ss:$8 sps:$4 sm:$0xff]   ;;  %v56_v28 = vld [vmem:[%s5165_s0 + $0xd0] sm:$0xff] }
  0x84   :  { %1218 = vmatprep.subr.bf16.mxu0 %v3829_v29  ;;  %v60_v29 = vld [vmem:[%s5165_s0 + $0xf0] sm:$0xff] }
  0x85   :  { %v3086_v32 = vcombine.high %v56_v28, %v60_v29 }
  0x87   :  { %1219 = vmatpush1.bf16.msra.mxu0 %v3827_v30  ;;  %v3077_v30 = vcombine.low %v48_v20, %v52_v21  ;;  %v198_v20 = vld [vmem:[%s5168_s3] sm:$0x3] }
  0x88   :  { %1220 = vmatprep.subr.bf16.mxu0 %v3832_v31  ;;  %v3884_v31 = vld [vmem:[%s5164_s2 + $0x340] ss:$8 sps:$4 sm:$0xff]  }
  0x8a   :  { %1176 = vmatmul.mubr.bf16.gmra.mrb[4].mxu0 %v3067_v34  ;;  %v3887_v34 = vld [vmem:[%s5164_s2 + $0x350] ss:$8 sps:$4 sm:$0xff]  }
  0x8b   :  { %1221 = vmatpush1.bf16.msra.mxu0 %v3830_v35  ;;  %1185 = vmatprep.mubr.bf16.mxu0 %v3076_v36  ;;  %v3892_v35 = vld [vmem:[%s5164_s2 + $0x364] ss:$8 sps:$4 sm:$0xff]   ;;  %v64_v36 = vld [vmem:[%s5165_s0 + $0x110] sm:$0xff] }
  0x8c   :  { %1222 = vmatprep.subr.bf16.mxu0 %v3835_v37  ;;  %v68_v37 = vld [vmem:[%s5165_s0 + $0x130] sm:$0xff] }
  0x8d   :  { %v3094_v40 = vcombine.high %v64_v36, %v68_v37 }
  0x8f   :  { %1223 = vmatpush1.bf16.msra.mxu0 %v3833_v38  ;;  %v3085_v38 = vcombine.low %v56_v28, %v60_v29 }
  0x90   :  { %1224 = vmatprep.subr.bf16.mxu0 %v3838_v39  ;;  %v3890_v39 = vld [vmem:[%s5164_s2 + $0x360] ss:$8 sps:$4 sm:$0xff]  }
  0x92   :  { %1186 = vmatmul.mubr.bf16.gmra.mrb[8].mxu0 %v3075_v42  ;;  %v3893_v42 = vld [vmem:[%s5164_s2 + $0x370] ss:$8 sps:$4 sm:$0xff]  }
  0x93   :  { %1225 = vmatpush1.bf16.msra.mxu0 %v3836_v43  ;;  %1195 = vmatprep.mubr.bf16.mxu0 %v3084_v44  ;;  %v3898_v43 = vld [vmem:[%s5164_s2 + $0x384] ss:$8 sps:$4 sm:$0xff]   ;;  %v33_v44 = vld [vmem:[%s5165_s0 + $0x18] sm:$0xff] }
  0x94   :  { %1226 = vmatprep.subr.bf16.mxu0 %v3841_v45  ;;  %v37_v45 = vld [vmem:[%s5165_s0 + $0x38] sm:$0xff] }
  0x95   :  { %v3064_v48 = vcombine.high %v33_v44, %v37_v45 }
  0x97   :  { %1227 = vmatpush1.bf16.msra.mxu0 %v3839_v46  ;;  %v3093_v46 = vcombine.low %v64_v36, %v68_v37 }
  0x98   :  { %1228 = vmatprep.subr.bf16.mxu0 %v3844_v47  ;;  %v3896_v47 = vld [vmem:[%s5164_s2 + $0x380] ss:$8 sps:$4 sm:$0xff]  }
  0x9a   :  { %1196 = vmatmul.mubr.bf16.gmra.mrb[12].mxu0 %v3083_v50  ;;  %v3899_v50 = vld [vmem:[%s5164_s2 + $0x390] ss:$8 sps:$4 sm:$0xff]  }
  0x9b   :  { %1229 = vmatpush1.bf16.msra.mxu0 %v3842_v51  ;;  %1205 = vmatprep.mubr.bf16.mxu0 %v3092_v52  ;;  %v3904_v51 = vld [vmem:[%s5164_s2 + $0x3a4] ss:$8 sps:$4 sm:$0xff]   ;;  %v3902_v52 = vld [vmem:[%s5164_s2 + $0x3a0] ss:$8 sps:$4 sm:$0xff]  }
  0x9c   :  { %1230 = vmatprep.subr.bf16.mxu0 %v3847_v53  ;;  %v3907_v53 = vld [vmem:[%s5164_s2 + $0x3b4] ss:$8 sps:$4 sm:$0xff]  }
  0x9f   :  { %1231 = vmatpush1.bf16.msra.mxu0 %v3845_v54  ;;  %v3905_v54 = vld [vmem:[%s5164_s2 + $0x3b0] ss:$8 sps:$4 sm:$0xff]  }
  0xa0   :  { %1232 = vmatprep.subr.bf16.mxu0 %v3850_v55  ;;  %v3910_v55 = vld [vmem:[%s5164_s2 + $0x3c4] ss:$8 sps:$4 sm:$0xff]  }
  0xa2   :  { %1206 = vmatmul.mubr.bf16.gmra.mrb[16].mxu0 %v3091_v58  ;;  %v3911_v58 = vld [vmem:[%s5164_s2 + $0x3d0] ss:$8 sps:$4 sm:$0xff]  }
  0xa3   :  { %1233 = vmatpush1.bf16.msra.mxu0 %v3848_v59  ;;  %1248 = vmatprep.mubr.bf16.mxu0 %v3062_v60  ;;  %v3916_v59 = vld [vmem:[%s5164_s2 + $0x3e4] ss:$8 sps:$4 sm:$0xff]   ;;  %v3914_v60 = vld [vmem:[%s5164_s2 + $0x3e0] ss:$8 sps:$4 sm:$0xff]  }
  0xa4   :  { %1234 = vmatprep.subr.bf16.mxu0 %v3853_v61  ;;  %v3919_v61 = vld [vmem:[%s5164_s2 + $0x3f4] ss:$8 sps:$4 sm:$0xff]  }
  0xa7   :  { %1235 = vmatpush1.bf16.msra.mxu0 %v3851_v62  ;;  %v3917_v62 = vld [vmem:[%s5164_s2 + $0x3f0] ss:$8 sps:$4 sm:$0xff]  }
  0xa8   :  { %1236 = vmatprep.subr.bf16.mxu0 %v3856_v63  ;;  %v41_v63 = vld [vmem:[%s5165_s0 + $0x58] sm:$0xff] }
  0xab   :  { %1237 = vmatpush1.bf16.msra.mxu0 %v3854_v0  ;;  %v45_v0 = vld [vmem:[%s5165_s0 + $0x78] sm:$0xff] }
  0xac   :  { %1238 = vmatprep.subr.bf16.mxu0 %v3859_v1  ;;  %v3063_v1 = vcombine.low %v33_v44, %v37_v45 }
  0xaf   :  { %1239 = vmatpush1.bf16.msra.mxu0 %v3857_v2  ;;  %v3072_v2 = vcombine.high %v41_v63, %v45_v0 }
  0xb0   :  { %1240 = vmatprep.subr.bf16.mxu0 %v3862_v3  ;;  %v49_v3 = vld [vmem:[%s5165_s0 + $0x98] sm:$0xff] }
  0xb3   :  { %1241 = vmatpush1.bf16.msra.mxu0 %v3860_v4  ;;  %v53_v4 = vld [vmem:[%s5165_s0 + $0xb8] sm:$0xff] }
  0xb4   :  { %1242 = vmatprep.subr.bf16.mxu0 %v3865_v5  ;;  %v3071_v5 = vcombine.low %v41_v63, %v45_v0 }
  0xb7   :  { %1243 = vmatpush1.bf16.msra.mxu0 %v3863_v6  ;;  %v3080_v6 = vcombine.high %v49_v3, %v53_v4 }
  0xb8   :  { %1244 = vmatprep.subr.bf16.mxu0 %v3868_v7  ;;  %v57_v7 = vld [vmem:[%s5165_s0 + $0xd8] sm:$0xff] }
  0xbb   :  { %1245 = vmatpush1.bf16.msra.mxu0 %v3866_v8  ;;  %v61_v8 = vld [vmem:[%s5165_s0 + $0xf8] sm:$0xff] }
  0xbc   :  { %1246 = vmatprep.subr.bf16.mxu0 %v3871_v9  ;;  %v3079_v9 = vcombine.low %v49_v3, %v53_v4  ;;  %v3087_v13 = vcombine.low %v57_v7, %v61_v8 }
  0xbf   :  { %1247 = vmatpush1.bf16.msra.mxu0 %v3869_v10  ;;  %v3088_v10 = vcombine.high %v57_v7, %v61_v8 }
  0xc0   :  { %1299 = vmatprep.subr.bf16.mxu0 %v3874_v11  ;;  %v65_v11 = vld [vmem:[%s5165_s0 + $0x118] sm:$0xff] }
  0xc2   :  { %1249 = vmatmul.mubr.bf16.vlgmr.msra.gmra.mrb[0].mxu0 %v3061_v14  ;;  %v3096_v14 = vcombine.high %v65_v11, %v69_v12 }
  0xc3   :  { %1300 = vmatpush1.bf16.msra.mxu0 %v3872_v15  ;;  %1258 = vmatprep.mubr.bf16.mxu0 %v3070_v16  ;;  %v3095_v15 = vcombine.low %v65_v11, %v69_v12  ;;  %v4045_v16 = vmov 0  }
  0xc4   :  { %1301 = vmatprep.subr.bf16.mxu0 %v3877_v17  ;;  %1507 = vmatprep.mubr.bf16.mxu1 %v4045_v16  ;;  %v200_v17 = vlaneseq }
  0xc7   :  { %1302 = vmatpush1.bf16.msra.mxu0 %v3875_v18  ;;  %v201_v18 = vshrl.u32 %v200_v17, 7 }
  0xc8   :  { %1303 = vmatprep.subr.bf16.mxu0 %v3880_v19 }
  0xc9   :  { %v202_v19 = vsub.s32 0, %v201_v18 }
  0xca   :  { %1259 = vmatmul.mubr.bf16.gmra.mrb[4].mxu0 %v3069_v22  ;;  %v206_v22 = vsub.s32 1, %v201_v18 }
  0xcb   :  { %1304 = vmatpush1.bf16.msra.mxu0 %v3878_v23  ;;  %1268 = vmatprep.mubr.bf16.mxu0 %v3078_v24  ;;  %v4601_v24 = vrot.slane %v198_v20, %v202_v19 }
  0xcc   :  { %1305 = vmatprep.subr.bf16.mxu0 %v3883_v25 }
  0xcf   :  { %1306 = vmatpush1.bf16.msra.mxu0 %v3881_v26 }
  0xd0   :  { %1307 = vmatprep.subr.bf16.mxu0 %v3886_v27  ;;  %v4603_v27 = vrot.slane %v198_v20, %v206_v22 }
  0xd2   :  { %1269 = vmatmul.mubr.bf16.gmra.mrb[8].mxu0 %v3077_v30 }
  0xd3   :  { %1308 = vmatpush1.bf16.msra.mxu0 %v3884_v31  ;;  %1278 = vmatprep.mubr.bf16.mxu0 %v3086_v32 }
  0xd4   :  { %1309 = vmatprep.subr.bf16.mxu0 %v3889_v33 }
  0xd7   :  { %1310 = vmatpush1.bf16.msra.mxu0 %v3887_v34 }
  0xd8   :  { %1311 = vmatprep.subr.bf16.mxu0 %v3892_v35 }
  0xda   :  { %1279 = vmatmul.mubr.bf16.gmra.mrb[12].mxu0 %v3085_v38 }
  0xdb   :  { %1312 = vmatpush1.bf16.msra.mxu0 %v3890_v39  ;;  %1288 = vmatprep.mubr.bf16.mxu0 %v3094_v40 }
  0xdc   :  { %1313 = vmatprep.subr.bf16.mxu0 %v3895_v41 }
  0xdf   :  { %1314 = vmatpush1.bf16.msra.mxu0 %v3893_v42 }
  0xe0   :  { %1315 = vmatprep.subr.bf16.mxu0 %v3898_v43 }
  0xe2   :  { %1289 = vmatmul.mubr.bf16.gmra.mrb[16].mxu0 %v3093_v46 }
  0xe3   :  { %1316 = vmatpush1.bf16.msra.mxu0 %v3896_v47  ;;  %1331 = vmatprep.mubr.bf16.mxu0 %v3064_v48 }
  0xe4   :  { %1317 = vmatprep.subr.bf16.mxu0 %v3901_v49 }
  0xe7   :  { %1318 = vmatpush1.bf16.msra.mxu0 %v3899_v50 }
  0xe8   :  { %1319 = vmatprep.subr.bf16.mxu0 %v3904_v51 }
  0xeb   :  { %1320 = vmatpush1.bf16.msra.mxu0 %v3902_v52 }
  0xec   :  { %1321 = vmatprep.subr.bf16.mxu0 %v3907_v53 }
  0xef   :  { %1322 = vmatpush1.bf16.msra.mxu0 %v3905_v54 }
  0xf0   :  { %1323 = vmatprep.subr.bf16.mxu0 %v3910_v55 }
  0xf3   :  { %1324 = vmatpush1.bf16.msra.mxu0 %v3908_v56 }
  0xf4   :  { %1325 = vmatprep.subr.bf16.mxu0 %v3913_v57 }
  0xf7   :  { %1326 = vmatpush1.bf16.msra.mxu0 %v3911_v58 }
  0xf8   :  { %1327 = vmatprep.subr.bf16.mxu0 %v3916_v59 }
  0xfb   :  { %1328 = vmatpush1.bf16.msra.mxu0 %v3914_v60 }
  0xfc   :  { %1329 = vmatprep.subr.bf16.mxu0 %v3919_v61 }
  0xff   :  { %1330 = vmatpush1.bf16.msra.mxu0 %v3917_v62 }
 0x102   :  { %1332 = vmatmul.mubr.bf16.vlgmr.msra.gmra.mrb[0].mxu0 %v3063_v1 }
 0x103   :  { %1341 = vmatprep.mubr.bf16.mxu0 %v3072_v2 }
 0x10a   :  { %1342 = vmatmul.mubr.bf16.gmra.mrb[4].mxu0 %v3071_v5 }
 0x10b   :  { %1351 = vmatprep.mubr.bf16.mxu0 %v3080_v6 }
 0x112   :  { %1352 = vmatmul.mubr.bf16.gmra.mrb[8].mxu0 %v3079_v9 }
 0x113   :  { %1361 = vmatprep.mubr.bf16.mxu0 %v3088_v10 }
 0x11a   :  { %1362 = vmatmul.mubr.bf16.gmra.mrb[12].mxu0 %v3087_v13 }
 0x11b   :  { %1371 = vmatprep.mubr.bf16.mxu0 %v3096_v14 }
 0x122   :  { %1372 = vmatmul.mubr.bf16.gmra.mrb[16].mxu0 %v3095_v15 }
 0x1d5   :  { %v1333_v21 = vpop.f32.mrb[0].mxu0 }
 0x1d6   :  { %v1335_v23 = vpop.f32.mrb[1].mxu0  ;;  %v3645_v28 = vadd.f32 %v1333_v21, %v4601_v24 }
 0x1d7   :  { %v1337_v25 = vpop.f32.mrb[2].mxu0  ;;  %v3646_v29 = vadd.f32 %v1335_v23, %v4603_v27 }
 0x1d8   :  { %v1339_v26 = vpop.f32.mrb[3].mxu0  ;;  %v3647_v31 = vadd.f32 %v1337_v25, %v4601_v24  ;;  %v1382_v34 = vmax.f32 %v3645_v28, 0.0 }
 0x1d9   :  { %v3648_v35 = vadd.f32 %v1339_v26, %v4603_v27  ;;  %v1383_v41 = vmax.f32 %v3646_v29, 0.0 }
 0x1da   :  { %v1384_v44 = vmax.f32 %v3647_v31, 0.0 }
 0x1db   :  { %v1385_v47 = vmax.f32 %v3648_v35, 0.0 }
 0x1dd   :  { %v1343_v30 = vpop.f32.mrb[4].mxu0 }
 0x1de   :  { %v3649_v32 = vadd.f32 %v1343_v30, %v4601_v24  ;;  %v1345_v33 = vpop.f32.mrb[5].mxu0 }
 0x1df   :  { %v3650_v36 = vadd.f32 %v1345_v33, %v4603_v27  ;;  %v1347_v37 = vpop.f32.mrb[6].mxu0 }
 0x1e0   :  { %v1386_v38 = vmax.f32 %v3649_v32, 0.0  ;;  %v3651_v39 = vadd.f32 %v1347_v37, %v4601_v24  ;;  %v1349_v40 = vpop.f32.mrb[7].mxu0 }
 0x1e1   :  { %v1387_v42 = vmax.f32 %v3650_v36, 0.0  ;;  %v3652_v43 = vadd.f32 %v1349_v40, %v4603_v27 }
 0x1e2   :  { %v1402_v45 = vadd.f32 %v1386_v38, %v1382_v34  ;;  %v1388_v46 = vmax.f32 %v3651_v39, 0.0 }
 0x1e3   :  { %v1403_v48 = vadd.f32 %v1387_v42, %v1383_v41  ;;  %v1389_v49 = vmax.f32 %v3652_v43, 0.0 }
 0x1e4   :  { %v1404_v50 = vadd.f32 %v1388_v46, %v1384_v44  ;;  %v3927_v46 = vld [vmem:[%s5167_s4 + $0xc8] sm:$0xff]  }
 0x1e5   :  { %v1405_v51 = vadd.f32 %v1389_v49, %v1385_v47  ;;  %v1353_v52 = vpop.f32.mrb[8].mxu0  ;;  %v3928_v47 = vld [vmem:[%s5167_s4 + $0x88] sm:$0xff]  }
 0x1e6   :  { %v3653_v53 = vadd.f32 %v1353_v52, %v4601_v24  ;;  %v1355_v54 = vpop.f32.mrb[9].mxu0  ;;  %v4651_v49 = vld [vmem:[%s5166_s1 + $0x8] sm:$0xff]   ;;  %v3932_v52 = vld [vmem:[%s5167_s4 + $0x98] sm:$0xff]  }
 0x1e7   :  { %v3654_v55 = vadd.f32 %v1355_v54, %v4603_v27  ;;  %v1357_v56 = vpop.f32.mrb[10].mxu0  ;;  %v4671_v54 = vld [vmem:[%s5166_s1 + $0x10] sm:$0xff]  }
 0x1e8   :  { %v1390_v57 = vmax.f32 %v3653_v53, 0.0  ;;  %v3655_v58 = vadd.f32 %v1357_v56, %v4601_v24  ;;  %v1359_v59 = vpop.f32.mrb[11].mxu0  ;;  %v3933_v53 = vld [vmem:[%s5167_s4 + $0xe0] sm:$0xff]   ;;  %v4682_v56 = vld [vmem:[%s5166_s1 + $0x18] sm:$0xff]  }
 0x1e9   :  { %v1391_v60 = vmax.f32 %v3654_v55, 0.0  ;;  %v3656_v61 = vadd.f32 %v1359_v59, %v4603_v27  ;;  %v3934_v55 = vld [vmem:[%s5167_s4 + $0xa0] sm:$0xff]   ;;  %v3936_v59 = vld [vmem:[%s5167_s4 + $0xa8] sm:$0xff]  }
 0x1ea   :  { %v1406_v62 = vadd.f32 %v1402_v45, %v1390_v57  ;;  %v1392_v63 = vmax.f32 %v3655_v58, 0.0  ;;  %v3926_v45 = vld [vmem:[%s5167_s4 + $0x80] sm:$0xff]   ;;  %v3935_v58 = vld [vmem:[%s5167_s4 + $0xe8] sm:$0xff]  }
 0x1eb   :  { %v1407_v0 = vadd.f32 %v1403_v48, %v1391_v60  ;;  %v1393_v1 = vmax.f32 %v3656_v61, 0.0  ;;  %v3929_v48 = vld [vmem:[%s5167_s4 + $0xd0] sm:$0xff]   ;;  %v4690_v57 = vld [vmem:[%s5166_s1 + $0x20] sm:$0xff]   ;;  %v3939_v61 = vld [vmem:[%s5167_s4 + $0xf8] sm:$0xff]  }
 0x1ec   :  { %v1408_v2 = vadd.f32 %v1404_v50, %v1392_v63  ;;  %v3930_v50 = vld [vmem:[%s5167_s4 + $0x90] sm:$0xff]   ;;  %v3941_v63 = vld [vmem:[%s5167_s4 + $0x40] sm:$0xff]  }
 0x1ed   :  { %v1409_v3 = vadd.f32 %v1405_v51, %v1393_v1  ;;  %v1363_v4 = vpop.f32.mrb[12].mxu0  ;;  %v3931_v51 = vld [vmem:[%s5167_s4 + $0xd8] sm:$0xff]   ;;  %v3938_v60 = vld [vmem:[%s5167_s4 + $0xb0] sm:$0xff]  }
 0x1ee   :  { %v3657_v5 = vadd.f32 %v1363_v4, %v4601_v24  ;;  %v1365_v6 = vpop.f32.mrb[13].mxu0 }
 0x1ef   :  { %v3658_v7 = vadd.f32 %v1365_v6, %v4603_v27  ;;  %v1367_v8 = vpop.f32.mrb[14].mxu0 }
 0x1f0   :  { %v1394_v9 = vmax.f32 %v3657_v5, 0.0  ;;  %v3659_v10 = vadd.f32 %v1367_v8, %v4601_v24  ;;  %v1369_v11 = vpop.f32.mrb[15].mxu0 }
 0x1f1   :  { %v1395_v12 = vmax.f32 %v3658_v7, 0.0  ;;  %v3660_v13 = vadd.f32 %v1369_v11, %v4603_v27 }
 0x1f2   :  { %v1410_v14 = vadd.f32 %v1406_v62, %v1394_v9  ;;  %v1396_v15 = vmax.f32 %v3659_v10, 0.0  ;;  %v3940_v62 = vld [vmem:[%s5167_s4 + $0xb8] sm:$0xff]  }
 0x1f3   :  { %v1411_v17 = vadd.f32 %v1407_v0, %v1395_v12  ;;  %v1397_v18 = vmax.f32 %v3660_v13, 0.0  ;;  %v3942_v12 = vld [vmem:[%s5167_s4] sm:$0xff]   ;;  %v3943_v13 = vld [vmem:[%s5167_s4 + $0x48] sm:$0xff]  }
 0x1f4   :  { %v1412_v19 = vadd.f32 %v1408_v2, %v1396_v15 }
 0x1f5   :  { %v1413_v20 = vadd.f32 %v1409_v3, %v1397_v18  ;;  %v1373_v21 = vpop.f32.mrb[16].mxu0 }
 0x1f6   :  { %v3661_v22 = vadd.f32 %v1373_v21, %v4601_v24  ;;  %v1375_v23 = vpop.f32.mrb[17].mxu0 }
 0x1f7   :  { %v3662_v25 = vadd.f32 %v1375_v23, %v4603_v27  ;;  %v1377_v26 = vpop.f32.mrb[18].mxu0 }
 0x1f8   :  { %v1398_v28 = vmax.f32 %v3661_v22, 0.0  ;;  %v3663_v29 = vadd.f32 %v1377_v26, %v4601_v24  ;;  %v1379_v30 = vpop.f32.mrb[19].mxu0  ;;  %v3925_v24 = vld [vmem:[%s5167_s4 + $0xc0] sm:$0xff]   ;;  %v3946_v22 = vld [vmem:[%s5167_s4 + $0x10] sm:$0xff]   ;;  %v3948_v26 = vld [vmem:[%s5167_s4 + $0x18] sm:$0xff]  }
 0x1f9   :  { %v1399_v31 = vmax.f32 %v3662_v25, 0.0  ;;  %v3664_v32 = vadd.f32 %v1379_v30, %v4603_v27  ;;  %v4631_v27 = vld [vmem:[%s5166_s1] sm:$0xff]   ;;  %v3947_v25 = vld [vmem:[%s5167_s4 + $0x58] sm:$0xff]  }
 0x1fa   :  { %v1414_v33 = vadd.f32 %v1410_v14, %v1398_v28  ;;  %v1400_v34 = vmax.f32 %v3663_v29, 0.0  ;;  %v3944_v14 = vld [vmem:[%s5167_s4 + $0x8] sm:$0xff]   ;;  %v3949_v29 = vld [vmem:[%s5167_s4 + $0x60] sm:$0xff]  }
 0x1fb   :  { %v1401_v35 = vmax.f32 %v3664_v32, 0.0  ;;  %v1415_v36 = vadd.f32 %v1411_v17, %v1399_v31  ;;  %v3945_v17 = vld [vmem:[%s5167_s4 + $0x50] sm:$0xff]  }
 0x1fc   :  { %v1416_v37 = vadd.f32 %v1412_v19, %v1400_v34  ;;  %v1418_v39 = vmul.f32 0.2, %v1414_v33  ;;  %v3950_v34 = vld [vmem:[%s5167_s4 + $0x20] sm:$0xff]  }
 0x1fd   :  { %v1417_v38 = vadd.f32 %v1413_v20, %v1401_v35  ;;  %v1419_v41 = vmul.f32 0.2, %v1415_v36  ;;  %v3951_v36 = vld [vmem:[%s5167_s4 + $0x68] sm:$0xff]  }
 0x1fe   :  { %v1420_v40 = vmul.f32 0.2, %v1416_v37  ;;  %v3952_v37 = vld [vmem:[%s5167_s4 + $0x28] sm:$0xff]  }
 0x1ff   :  { %v1421_v42 = vmul.f32 0.2, %v1417_v38 }
 0x200   :  { %v1422_v43 = vpack.c.bf16 %v1420_v40, %v1418_v39  ;;  %v3953_v39 = vld [vmem:[%s5167_s4 + $0x70] sm:$0xff]  }
 0x201   :  { %v1423_v44 = vpack.c.bf16 %v1421_v42, %v1419_v41 }
 0x203   :  { %1475 = vmatprep.subr.bf16.mxu1 %v1423_v44  ;;  %v3954_v44 = vld [vmem:[%s5167_s4 + $0x30] sm:$0xff]  }
 0x204   :  { %1476 = vmatpush1.bf16.msra.mxu1 %v1422_v43 }
 0x205   :  { %3362 = vmatprep.subr.bf16.mxu1 %v3925_v24 }
 0x207   :  { %3230 = vmatmul.mubr.msk.bf16.vlgmr.msra.gmra.mrb[0].mxu1 %vm1459_vm0, %v4631_v27 }
 0x208   :  { %1517 = vmatprep.mubr.bf16.mxu1 %v4045_v16  ;;  %3363 = vmatpush3.bf16.msra.mxu1 %v3926_v45  ;;  %v3955_v45 = vld [vmem:[%s5167_s4 + $0x78] sm:$0xff]  }
 0x209   :  { %3364 = vmatprep.subr.bf16.mxu1 %v3927_v46  ;;  %v3956_v46 = vld [vmem:[%s5167_s4 + $0x38] sm:$0xff]  }
 0x20c   :  { %3365 = vmatpush3.bf16.msra.mxu1 %v3928_v47  ;;  %v3957_v47 = vld [vmem:[%s5167_s4 + $0x140] sm:$0xff]  }
 0x20d   :  { %3366 = vmatprep.subr.bf16.mxu1 %v3929_v48  ;;  %v3958_v48 = vld [vmem:[%s5167_s4 + $0x100] sm:$0xff]  }
 0x20f   :  { %3231 = vmatmul.mubr.msk.bf16.gmra.mrb[4].mxu1 %vm1459_vm0, %v4651_v49 }
 0x210   :  { %1527 = vmatprep.mubr.bf16.mxu1 %v4045_v16  ;;  %3367 = vmatpush3.bf16.msra.mxu1 %v3930_v50  ;;  %v3959_v50 = vld [vmem:[%s5167_s4 + $0x148] sm:$0xff]  }
 0x211   :  { %3368 = vmatprep.subr.bf16.mxu1 %v3931_v51  ;;  %v3960_v51 = vld [vmem:[%s5167_s4 + $0x108] sm:$0xff]  }
 0x214   :  { %3369 = vmatpush3.bf16.msra.mxu1 %v3932_v52  ;;  %v3961_v52 = vld [vmem:[%s5167_s4 + $0x150] sm:$0xff]  }
 0x215   :  { %3370 = vmatprep.subr.bf16.mxu1 %v3933_v53  ;;  %v3962_v53 = vld [vmem:[%s5167_s4 + $0x110] sm:$0xff]  }
 0x217   :  { %3232 = vmatmul.mubr.msk.bf16.gmra.mrb[8].mxu1 %vm1459_vm0, %v4671_v54 }
 0x218   :  { %1537 = vmatprep.mubr.bf16.mxu1 %v4045_v16  ;;  %3371 = vmatpush3.bf16.msra.mxu1 %v3934_v55  ;;  %v3963_v55 = vld [vmem:[%s5167_s4 + $0x158] sm:$0xff]  }
 0x219   :  { %3372 = vmatprep.subr.bf16.mxu1 %v3935_v58  ;;  %v3964_v58 = vld [vmem:[%s5167_s4 + $0x118] sm:$0xff]  }
 0x21c   :  { %3373 = vmatpush3.bf16.msra.mxu1 %v3936_v59  ;;  %v3965_v59 = vld [vmem:[%s5167_s4 + $0x160] sm:$0xff]  }
 0x21f   :  { %3233 = vmatmul.mubr.msk.bf16.gmra.mrb[12].mxu1 %vm1459_vm0, %v4682_v56 }
 0x220   :  { %1547 = vmatprep.mubr.bf16.mxu1 %v4045_v16  ;;  %v3937_v16 = vld [vmem:[%s5167_s4 + $0xf0] sm:$0xff]  }
 0x221   :  { %3374 = vmatprep.subr.bf16.mxu1 %v3937_v16  ;;  %v3966_v16 = vld [vmem:[%s5167_s4 + $0x120] sm:$0xff]  }
 0x222   :  { %3375 = vmatpush3.bf16.msra.mxu1 %v3938_v60  ;;  %v3967_v60 = vld [vmem:[%s5167_s4 + $0x168] sm:$0xff]  }
 0x223   :  { %3376 = vmatprep.subr.bf16.mxu1 %v3939_v61  ;;  %v3968_v61 = vld [vmem:[%s5167_s4 + $0x128] sm:$0xff]  }
 0x226   :  { %3377 = vmatpush3.bf16.msra.mxu1 %v3940_v62  ;;  %v3969_v62 = vld [vmem:[%s5167_s4 + $0x170] sm:$0xff]  }
 0x227   :  { %3234 = vmatmul.mubr.msk.bf16.gmra.mrb[16].mxu1 %vm1459_vm0, %v4690_v57  ;;  %3384 = vmatprep.subr.bf16.mxu1 %v3941_v63  ;;  %v3970_v63 = vld [vmem:[%s5167_s4 + $0x130] sm:$0xff]  }
 0x2da   :  { %v4715_v0 = vpop.f32.mrb[0].mxu1 }
 0x2db   :  { %v1511_v1 = vpop.f32.mrb[1].mxu1 }
 0x2dc   :  { %v4717_v2 = vpop.f32.mrb[2].mxu1 }
 0x2dd   :  { %v1558_v3 = vpack.c.bf16 %v4717_v2, %v4715_v0  ;;  %v1515_v4 = vpop.f32.mrb[3].mxu1  ;;  %v3971_v0 = vld [vmem:[%s5167_s4 + $0x178] sm:$0xff]   ;;  %v3973_v2 = vld [vmem:[%s5167_s4 + $0x1c0] sm:$0xff]  }
 0x2de   :  { %v1559_v5 = vpack.c.bf16 %v1515_v4, %v1511_v1  ;;  %v3972_v1 = vld [vmem:[%s5167_s4 + $0x138] sm:$0xff]   ;;  %v3975_v4 = vld [vmem:[%s5167_s4 + $0x1c8] sm:$0xff]  }
 0x2e2   :  { %v1519_v6 = vpop.f32.mrb[4].mxu1 }
 0x2e3   :  { %v1521_v7 = vpop.f32.mrb[5].mxu1 }
 0x2e4   :  { %v1523_v8 = vpop.f32.mrb[6].mxu1 }
 0x2e5   :  { %v1560_v9 = vpack.c.bf16 %v1523_v8, %v1519_v6  ;;  %v1525_v10 = vpop.f32.mrb[7].mxu1  ;;  %v3977_v6 = vld [vmem:[%s5167_s4 + $0x1d0] sm:$0xff]   ;;  %v3979_v8 = vld [vmem:[%s5167_s4 + $0x1d8] sm:$0xff]  }
 0x2e6   :  { %v1561_v11 = vpack.c.bf16 %v1525_v10, %v1521_v7  ;;  %v3978_v7 = vld [vmem:[%s5167_s4 + $0x190] sm:$0xff]   ;;  %v3981_v10 = vld [vmem:[%s5167_s4 + $0x1e0] sm:$0xff]  }
 0x2e8   :  { %1760 = vmatprep.mubr.bf16.mxu1 %v1561_v11  ;;  %v3982_v11 = vld [vmem:[%s5167_s4 + $0x1a0] sm:$0xff]  }
 0x2e9   :  { %1761 = vmatmul.mubr.bf16.vlgmr.msra.gmra.mrb[20].mxu1 %v1560_v9  ;;  %v3980_v9 = vld [vmem:[%s5167_s4 + $0x198] sm:$0xff]  }
 0x2ea   :  { %3385 = vmatpush3.bf16.msra.mxu1 %v3942_v12  ;;  %1897 = vmatprep.mubr.bf16.mxu1 %v1559_v5  ;;  %v4730_v15 = vpop.f32.mrb[8].mxu1  ;;  %v3976_v5 = vld [vmem:[%s5167_s4 + $0x188] sm:$0xff]  }
 0x2eb   :  { %3386 = vmatprep.subr.bf16.mxu1 %v3943_v13  ;;  %v1531_v18 = vpop.f32.mrb[9].mxu1  ;;  %v3983_v12 = vld [vmem:[%s5167_s4 + $0x1e8] sm:$0xff]  }
 0x2ec   :  { %v4735_v19 = vpop.f32.mrb[10].mxu1  ;;  %v3984_v13 = vld [vmem:[%s5167_s4 + $0x1a8] sm:$0xff]  }
 0x2ed   :  { %v1562_v20 = vpack.c.bf16 %v4735_v19, %v4730_v15  ;;  %v1535_v21 = vpop.f32.mrb[11].mxu1  ;;  %v3986_v15 = vld [vmem:[%s5167_s4 + $0x1b0] sm:$0xff]   ;;  %v3989_v19 = vld [vmem:[%s5167_s4 + $0x240] sm:$0xff]  }
 0x2ee   :  { %3387 = vmatpush3.bf16.msra.mxu1 %v3944_v14  ;;  %v1563_v23 = vpack.c.bf16 %v1535_v21, %v1531_v18  ;;  %v3985_v14 = vld [vmem:[%s5167_s4 + $0x1f0] sm:$0xff]   ;;  %v3988_v18 = vld [vmem:[%s5167_s4 + $0x1b8] sm:$0xff]   ;;  %v3991_v21 = vld [vmem:[%s5167_s4 + $0x248] sm:$0xff]  }
 0x2ef   :  { %3388 = vmatprep.subr.bf16.mxu1 %v3945_v17  ;;  %v3987_v17 = vld [vmem:[%s5167_s4 + $0x1f8] sm:$0xff]  }
 0x2f2   :  { %3389 = vmatpush3.bf16.msra.mxu1 %v3946_v22  ;;  %v4748_v28 = vpop.f32.mrb[12].mxu1  ;;  %v3992_v22 = vld [vmem:[%s5167_s4 + $0x208] sm:$0xff]  }
 0x2f3   :  { %3390 = vmatprep.subr.bf16.mxu1 %v3947_v25  ;;  %v4753_v30 = vpop.f32.mrb[13].mxu1  ;;  %v3994_v25 = vld [vmem:[%s5167_s4 + $0x210] sm:$0xff]  }
 0x2f4   :  { %v4755_v31 = vpop.f32.mrb[14].mxu1 }
 0x2f5   :  { %v1564_v32 = vpack.c.bf16 %v4755_v31, %v4748_v28  ;;  %v4759_v33 = vpop.f32.mrb[15].mxu1  ;;  %v3996_v28 = vld [vmem:[%s5167_s4 + $0x218] sm:$0xff]   ;;  %v3999_v31 = vld [vmem:[%s5167_s4 + $0x268] sm:$0xff]  }
 0x2f6   :  { %3391 = vmatpush3.bf16.msra.mxu1 %v3948_v26  ;;  %v1565_v35 = vpack.c.bf16 %v4759_v33, %v4753_v30  ;;  %v3995_v26 = vld [vmem:[%s5167_s4 + $0x258] sm:$0xff]   ;;  %v3998_v30 = vld [vmem:[%s5167_s4 + $0x220] sm:$0xff]   ;;  %v4001_v33 = vld [vmem:[%s5167_s4 + $0x270] sm:$0xff]  }
 0x2f7   :  { %3392 = vmatprep.subr.bf16.mxu1 %v3949_v29  ;;  %v3997_v29 = vld [vmem:[%s5167_s4 + $0x260] sm:$0xff]  }
 0x2fa   :  { %3393 = vmatpush3.bf16.msra.mxu1 %v3950_v34  ;;  %v4772_v38 = vpop.f32.mrb[16].mxu1  ;;  %v4002_v34 = vld [vmem:[%s5167_s4 + $0x230] sm:$0xff]  }
 0x2fb   :  { %3394 = vmatprep.subr.bf16.mxu1 %v3951_v36  ;;  %v4777_v40 = vpop.f32.mrb[17].mxu1  ;;  %v4004_v36 = vld [vmem:[%s5167_s4 + $0x238] sm:$0xff]  }
 0x2fc   :  { %v4779_v41 = vpop.f32.mrb[18].mxu1 }
 0x2fd   :  { %v1566_v42 = vpack.c.bf16 %v4779_v41, %v4772_v38  ;;  %v4783_v43 = vpop.f32.mrb[19].mxu1 }
 0x2fe   :  { %3395 = vmatpush3.bf16.msra.mxu1 %v3952_v37  ;;  %v1567_v24 = vpack.c.bf16 %v4783_v43, %v4777_v40 }
 0x2ff   :  { %3396 = vmatprep.subr.bf16.mxu1 %v3953_v39 }
 0x302   :  { %3397 = vmatpush3.bf16.msra.mxu1 %v3954_v44 }
 0x303   :  { %3398 = vmatprep.subr.bf16.mxu1 %v3955_v45  ;;  %v4046_v45 = vmov 0.0  }
 0x304   :  { %3605 = vmatprep.subr.bf16.mxu0 %v4046_v45  ;;  %3621 = vmatprep.mubr.msk.bf16.mxu0 %vm4047_vm1, %v4046_v45 }
 0x306   :  { %3399 = vmatpush3.bf16.msra.mxu1 %v3956_v46 }
 0x307   :  { %3406 = vmatprep.subr.bf16.mxu1 %v3957_v47 }
 0x309   :  { %1898 = vmatmul.mubr.bf16.vlgmr.msra.gmra.mrb[24].mxu1 %v1558_v3  ;;  %v3974_v3 = vld [vmem:[%s5167_s4 + $0x180] sm:$0xff]  }
 0x30a   :  { %3407 = vmatpush3.bf16.msra.mxu1 %v3958_v48  ;;  %2066 = vmatprep.mubr.bf16.mxu1 %v1563_v23  ;;  %v3993_v23 = vld [vmem:[%s5167_s4 + $0x250] sm:$0xff]  }
 0x30b   :  { %3408 = vmatprep.subr.bf16.mxu1 %v3959_v50 }
 0x30e   :  { %3409 = vmatpush3.bf16.msra.mxu1 %v3960_v51 }
 0x30f   :  { %3410 = vmatprep.subr.bf16.mxu1 %v3961_v52 }
 0x312   :  { %3411 = vmatpush3.bf16.msra.mxu1 %v3962_v53 }
 0x313   :  { %3412 = vmatprep.subr.bf16.mxu1 %v3963_v55 }
 0x316   :  { %3413 = vmatpush3.bf16.msra.mxu1 %v3964_v58 }
 0x317   :  { %3414 = vmatprep.subr.bf16.mxu1 %v3965_v59 }
 0x31a   :  { %3415 = vmatpush3.bf16.msra.mxu1 %v3966_v16 }
 0x31b   :  { %3416 = vmatprep.subr.bf16.mxu1 %v3967_v60 }
 0x31e   :  { %3417 = vmatpush3.bf16.msra.mxu1 %v3968_v61 }
 0x31f   :  { %3418 = vmatprep.subr.bf16.mxu1 %v3969_v62 }
 0x322   :  { %3419 = vmatpush3.bf16.msra.mxu1 %v3970_v63 }
 0x323   :  { %3420 = vmatprep.subr.bf16.mxu1 %v3971_v0 }
 0x326   :  { %3421 = vmatpush3.bf16.msra.mxu1 %v3972_v1 }
 0x327   :  { %3428 = vmatprep.subr.bf16.mxu1 %v3973_v2 }
 0x329   :  { %2067 = vmatmul.mubr.bf16.vlgmr.msra.gmra.mrb[28].mxu1 %v1562_v20  ;;  %v3990_v20 = vld [vmem:[%s5167_s4 + $0x200] sm:$0xff]  }
 0x32a   :  { %3429 = vmatpush3.bf16.msra.mxu1 %v3974_v3  ;;  %2237 = vmatprep.mubr.bf16.mxu1 %v1565_v35  ;;  %v4003_v35 = vld [vmem:[%s5167_s4 + $0x278] sm:$0xff]  }
 0x32b   :  { %3430 = vmatprep.subr.bf16.mxu1 %v3975_v4 }
 0x32e   :  { %3431 = vmatpush3.bf16.msra.mxu1 %v3976_v5 }
 0x32f   :  { %3432 = vmatprep.subr.bf16.mxu1 %v3977_v6 }
 0x332   :  { %3433 = vmatpush3.bf16.msra.mxu1 %v3978_v7 }
 0x333   :  { %3434 = vmatprep.subr.bf16.mxu1 %v3979_v8 }
 0x336   :  { %3435 = vmatpush3.bf16.msra.mxu1 %v3980_v9 }
 0x337   :  { %3436 = vmatprep.subr.bf16.mxu1 %v3981_v10  ;;  %v3315_v10 = vld [vmem:[%s5170_s5] ss:$0 sm:$0xff] }
 0x33a   :  { %3437 = vmatpush3.bf16.msra.mxu1 %v3982_v11 }
 0x33b   :  { %3438 = vmatprep.subr.bf16.mxu1 %v3983_v12 }
 0x33e   :  { %3439 = vmatpush3.bf16.msra.mxu1 %v3984_v13 }
 0x33f   :  { %3440 = vmatprep.subr.bf16.mxu1 %v3985_v14 }
 0x342   :  { %3441 = vmatpush3.bf16.msra.mxu1 %v3986_v15 }
 0x343   :  { %3442 = vmatprep.subr.bf16.mxu1 %v3987_v17 }
 0x346   :  { %3443 = vmatpush3.bf16.msra.mxu1 %v3988_v18 }
 0x347   :  { %3450 = vmatprep.subr.bf16.mxu1 %v3989_v19 }
 0x349   :  { %2238 = vmatmul.mubr.bf16.vlgmr.msra.gmra.mrb[32].mxu1 %v1564_v32  ;;  %v4000_v32 = vld [vmem:[%s5167_s4 + $0x228] sm:$0xff]  }
 0x34a   :  { %3451 = vmatpush3.bf16.msra.mxu1 %v3990_v20  ;;  %2408 = vmatprep.mubr.bf16.mxu1 %v1567_v24 }
 0x34b   :  { %3452 = vmatprep.subr.bf16.mxu1 %v3991_v21  ;;  %v4005_v21 = vld [vmem:[%s5169_s6 + $0x40] sm:$0xff]  }
 0x34e   :  { %3453 = vmatpush3.bf16.msra.mxu1 %v3992_v22  ;;  %v4006_v22 = vld [vmem:[%s5169_s6 + $0x48] sm:$0xff]  }
 0x34f   :  { %3454 = vmatprep.subr.bf16.mxu1 %v3993_v23  ;;  %v4007_v23 = vld [vmem:[%s5169_s6 + $0x50] sm:$0xff]  }
 0x352   :  { %3455 = vmatpush3.bf16.msra.mxu1 %v3994_v25  ;;  %v4009_v25 = vld [vmem:[%s5169_s6 + $0x60] sm:$0xff]  }
 0x353   :  { %3456 = vmatprep.subr.bf16.mxu1 %v3995_v26  ;;  %v4024_v26 = vld [vmem:[%s5169_s6 + $0xc8] sm:$0xff]  }
 0x356   :  { %3457 = vmatpush3.bf16.msra.mxu1 %v3996_v28  ;;  %v4026_v28 = vld [vmem:[%s5169_s6 + $0xd0] sm:$0xff]  }
 0x357   :  { %3458 = vmatprep.subr.bf16.mxu1 %v3997_v29  ;;  %v4028_v29 = vld [vmem:[%s5169_s6 + $0xd8] sm:$0xff]  }
 0x35a   :  { %3459 = vmatpush3.bf16.msra.mxu1 %v3998_v30  ;;  %v4030_v30 = vld [vmem:[%s5169_s6 + $0xe0] sm:$0xff]  }
 0x35b   :  { %3460 = vmatprep.subr.bf16.mxu1 %v3999_v31  ;;  %v4032_v31 = vld [vmem:[%s5169_s6 + $0xe8] sm:$0xff]  }
 0x35e   :  { %3461 = vmatpush3.bf16.msra.mxu1 %v4000_v32  ;;  %v4034_v32 = vld [vmem:[%s5169_s6 + $0xf0] sm:$0xff]  }
 0x35f   :  { %3462 = vmatprep.subr.bf16.mxu1 %v4001_v33  ;;  %v4036_v33 = vld [vmem:[%s5169_s6 + $0xf8] sm:$0xff]  }
 0x362   :  { %3463 = vmatpush3.bf16.msra.mxu1 %v4002_v34 }
 0x363   :  { %3464 = vmatprep.subr.bf16.mxu1 %v4003_v35 }
 0x366   :  { %3465 = vmatpush3.bf16.msra.mxu1 %v4004_v36 }
 0x367   :  { %3523 = vmatprep.subr.bf16.mxu1 %v4046_v45 }
 0x369   :  { %2409 = vmatmul.mubr.bf16.vlgmr.msra.gmra.mrb[36].mxu1 %v1566_v42 }
 0x36a   :  { %3525 = vmatprep.mubr.msk.bf16.mxu1 %vm4047_vm1, %v4046_v45 }
 0x3bc   :  { %v3378_v37 = vpop.f32.mrb[20].mxu1 }
 0x3bd   :  { %v3379_v39 = vpop.f32.mrb[21].mxu1 }
 0x3be   :  { %v3380_v40 = vadd.f32 %v3379_v39, %v3378_v37  ;;  %v3381_v43 = vpop.f32.mrb[22].mxu1 }
 0x3bf   :  { %v3382_v44 = vpop.f32.mrb[23].mxu1 }
 0x3c0   :  { %v3383_v24 = vadd.f32 %v3382_v44, %v3381_v43 }
 0x3dc   :  { %v3400_v38 = vpop.f32.mrb[24].mxu1 }
 0x3dd   :  { %v3401_v41 = vpop.f32.mrb[25].mxu1 }
 0x3de   :  { %v3402_v42 = vadd.f32 %v3401_v41, %v3400_v38  ;;  %v3403_v46 = vpop.f32.mrb[26].mxu1 }
 0x3df   :  { %v3404_v47 = vpop.f32.mrb[27].mxu1 }
 0x3e0   :  { %v1900_v48 = vadd.f32 %v3402_v42, %v3380_v40  ;;  %v3405_v50 = vadd.f32 %v3404_v47, %v3403_v46  ;;  %v4014_v42 = vld [vmem:[%s5169_s6 + $0x8] sm:$0xff]  }
 0x3e2   :  { %v1903_v51 = vadd.f32 %v3405_v50, %v3383_v24  ;;  %v4013_v24 = vld [vmem:[%s5169_s6] sm:$0xff]  }
 0x3fc   :  { %v3422_v52 = vpop.f32.mrb[28].mxu1 }
 0x3fd   :  { %v3423_v53 = vpop.f32.mrb[29].mxu1 }
 0x3fe   :  { %v3424_v55 = vadd.f32 %v3423_v53, %v3422_v52  ;;  %v3425_v58 = vpop.f32.mrb[30].mxu1  ;;  %v4016_v53 = vld [vmem:[%s5169_s6 + $0x18] sm:$0xff]  }
 0x3ff   :  { %v3426_v59 = vpop.f32.mrb[31].mxu1 }
 0x400   :  { %v2075_v16 = vadd.f32 %v3424_v55, %v1900_v48  ;;  %v3427_v60 = vadd.f32 %v3426_v59, %v3425_v58  ;;  %v4015_v48 = vld [vmem:[%s5169_s6 + $0x10] sm:$0xff]   ;;  %v4017_v59 = vld [vmem:[%s5169_s6 + $0x20] sm:$0xff]  }
 0x402   :  { %v2076_v61 = vadd.f32 %v3427_v60, %v1903_v51 }
 0x41c   :  { %v3444_v62 = vpop.f32.mrb[32].mxu1 }
 0x41d   :  { %v3445_v63 = vpop.f32.mrb[33].mxu1 }
 0x41e   :  { %v3446_v0 = vadd.f32 %v3445_v63, %v3444_v62  ;;  %v3447_v1 = vpop.f32.mrb[34].mxu1  ;;  %v4018_v62 = vld [vmem:[%s5169_s6 + $0x28] sm:$0xff]  }
 0x41f   :  { %v3448_v2 = vpop.f32.mrb[35].mxu1 }
 0x420   :  { %v2246_v3 = vadd.f32 %v3446_v0, %v2075_v16  ;;  %v3449_v4 = vadd.f32 %v3448_v2, %v3447_v1  ;;  %v4019_v1 = vld [vmem:[%s5169_s6 + $0x30] sm:$0xff]  }
 0x422   :  { %v2247_v5 = vadd.f32 %v3449_v4, %v2076_v61 }
 0x43c   :  { %v3466_v6 = vpop.f32.mrb[36].mxu1 }
 0x43d   :  { %v3467_v7 = vpop.f32.mrb[37].mxu1 }
 0x43e   :  { %v3468_v8 = vadd.f32 %v3467_v7, %v3466_v6  ;;  %v3469_v9 = vpop.f32.mrb[38].mxu1  ;;  %v4021_v6 = vld [vmem:[%s5169_s6 + $0x80] sm:$0xff]   ;;  %v4023_v7 = vld [vmem:[%s5169_s6 + $0x88] sm:$0xff]  }
 0x43f   :  { %v3470_v11 = vpop.f32.mrb[39].mxu1 }
 0x440   :  { %v2417_v12 = vadd.f32 %v3468_v8, %v2246_v3  ;;  %v3471_v13 = vadd.f32 %v3470_v11, %v3469_v9  ;;  %v4025_v8 = vld [vmem:[%s5169_s6 + $0x90] sm:$0xff]   ;;  %v4027_v9 = vld [vmem:[%s5169_s6 + $0x98] sm:$0xff]   ;;  %v4031_v11 = vld [vmem:[%s5169_s6 + $0xa8] sm:$0xff]  }
 0x442   :  { %v2426_v14 = vadd.f32 %v3315_v10, %v2417_v12  ;;  %v2418_v15 = vadd.f32 %v3471_v13, %v2247_v5  ;;  %v4020_v5 = vld [vmem:[%s5169_s6 + $0x38] sm:$0xff]   ;;  %v4033_v12 = vld [vmem:[%s5169_s6 + $0xb0] sm:$0xff]  }
 0x443   :  { %v4035_v13 = vld [vmem:[%s5169_s6 + $0xb8] sm:$0xff]  }
 0x444   :  { %v2427_v17 = vadd.f32 %v3315_v10, %v2418_v15  ;;  %v2428_v18 = vmax.f32 %v2426_v14, 0.0  ;;  %v4029_v10 = vld [vmem:[%s5169_s6 + $0xa0] sm:$0xff]   ;;  %v4038_v15 = vld [vmem:[%s5169_s6 + $0x108] sm:$0xff]  }
 0x445   :  { %v4037_v14 = vld [vmem:[%s5169_s6 + $0x100] sm:$0xff]  }
 0x446   :  { %v2429_v19 = vmax.f32 %v2427_v17, 0.0  ;;  %v4039_v17 = vld [vmem:[%s5169_s6 + $0x110] sm:$0xff]  }
 0x448   :  { %v2430_v20 = vpack.c.bf16 %v2429_v19, %v2428_v18  ;;  %v4040_v18 = vld [vmem:[%s5169_s6 + $0x118] sm:$0xff]   ;;  %v4041_v19 = vld [vmem:[%s5169_s6 + $0x120] sm:$0xff]  }
 0x44a   :  { %3524 = vmatpush3.bf16.msra.mxu1 %v2430_v20  ;;  %v4042_v20 = vld [vmem:[%s5169_s6 + $0x128] sm:$0xff]  }
 0x44b   :  { %3545 = vmatprep.subr.bf16.mxu1 %v4046_v45 }
 0x44d   :  { %3526 = vmatmul.mubr.msk.bf16.vlgmr.msra.gmra.mrb[40].mxu1 %vm1459_vm0, %v4631_v27  ;;  %v4008_v27 = vld [vmem:[%s5169_s6 + $0x58] sm:$0xff]  }
 0x44e   :  { %3529 = vmatprep.mubr.msk.bf16.mxu1 %vm4047_vm1, %v4046_v45  ;;  %3546 = vmatpush3.bf16.msra.mxu1 %v4005_v21  ;;  %v4043_v21 = vld [vmem:[%s5169_s6 + $0x130] sm:$0xff]  }
 0x44f   :  { %3547 = vmatprep.subr.bf16.mxu1 %v4046_v45 }
 0x452   :  { %3548 = vmatpush3.bf16.msra.mxu1 %v4006_v22  ;;  %v4044_v22 = vld [vmem:[%s5169_s6 + $0x138] sm:$0xff]  }
 0x453   :  { %3549 = vmatprep.subr.bf16.mxu1 %v4046_v45 }
 0x455   :  { %3530 = vmatmul.mubr.msk.bf16.gmra.mrb[44].mxu1 %vm1459_vm0, %v4651_v49  ;;  %v4010_v49 = vld [vmem:[%s5169_s6 + $0x68] sm:$0xff]  }
 0x456   :  { %3533 = vmatprep.mubr.msk.bf16.mxu1 %vm4047_vm1, %v4046_v45  ;;  %3550 = vmatpush3.bf16.msra.mxu1 %v4007_v23 }
 0x457   :  { %3551 = vmatprep.subr.bf16.mxu1 %v4046_v45 }
 0x45a   :  { %3552 = vmatpush3.bf16.msra.mxu1 %v4008_v27 }
 0x45b   :  { %3553 = vmatprep.subr.bf16.mxu1 %v4046_v45 }
 0x45d   :  { %3534 = vmatmul.mubr.msk.bf16.gmra.mrb[48].mxu1 %vm1459_vm0, %v4671_v54  ;;  %v4011_v54 = vld [vmem:[%s5169_s6 + $0x70] sm:$0xff]  }
 0x45e   :  { %3537 = vmatprep.mubr.msk.bf16.mxu1 %vm4047_vm1, %v4046_v45  ;;  %3554 = vmatpush3.bf16.msra.mxu1 %v4009_v25 }
 0x45f   :  { %3555 = vmatprep.subr.bf16.mxu1 %v4046_v45 }
 0x462   :  { %3556 = vmatpush3.bf16.msra.mxu1 %v4010_v49 }
 0x463   :  { %3557 = vmatprep.subr.bf16.mxu1 %v4046_v45 }
 0x465   :  { %3538 = vmatmul.mubr.msk.bf16.gmra.mrb[52].mxu1 %vm1459_vm0, %v4682_v56  ;;  %v4012_v56 = vld [vmem:[%s5169_s6 + $0x78] sm:$0xff]  }
 0x466   :  { %3541 = vmatprep.mubr.msk.bf16.mxu1 %vm4047_vm1, %v4046_v45  ;;  %3558 = vmatpush3.bf16.msra.mxu1 %v4011_v54 }
 0x467   :  { %3559 = vmatprep.subr.bf16.mxu1 %v4046_v45 }
 0x46a   :  { %3560 = vmatpush3.bf16.msra.mxu1 %v4012_v56 }
 0x46b   :  { %3565 = vmatprep.subr.bf16.mxu1 %v4046_v45 }
 0x46d   :  { %3542 = vmatmul.mubr.msk.bf16.gmra.mrb[56].mxu1 %vm1459_vm0, %v4690_v57  ;;  %v4022_v57 = vld [vmem:[%s5169_s6 + $0xc0] sm:$0xff]  }
 0x46e   :  { %3561 = vmatprep.mubr.msk.bf16.mxu1 %vm4047_vm1, %v4046_v45  ;;  %3606 = vmatpush3.bf16.msra.mxu0 %v4022_v57 }
 0x46f   :  { %3607 = vmatprep.subr.bf16.mxu0 %v4046_v45 }
 0x472   :  { %3608 = vmatpush3.bf16.msra.mxu0 %v4024_v26 }
 0x473   :  { %3609 = vmatprep.subr.bf16.mxu0 %v4046_v45 }
 0x476   :  { %3610 = vmatpush3.bf16.msra.mxu0 %v4026_v28 }
 0x477   :  { %3611 = vmatprep.subr.bf16.mxu0 %v4046_v45 }
 0x47a   :  { %3612 = vmatpush3.bf16.msra.mxu0 %v4028_v29 }
 0x47b   :  { %3613 = vmatprep.subr.bf16.mxu0 %v4046_v45 }
 0x47e   :  { %3614 = vmatpush3.bf16.msra.mxu0 %v4030_v30 }
 0x47f   :  { %3615 = vmatprep.subr.bf16.mxu0 %v4046_v45 }
 0x482   :  { %3616 = vmatpush3.bf16.msra.mxu0 %v4032_v31 }
 0x483   :  { %3617 = vmatprep.subr.bf16.mxu0 %v4046_v45 }
 0x486   :  { %3618 = vmatpush3.bf16.msra.mxu0 %v4034_v32 }
 0x487   :  { %3619 = vmatprep.subr.bf16.mxu0 %v4046_v45 }
 0x48a   :  { %3620 = vmatpush3.bf16.msra.mxu0 %v4036_v33 }
 0x520   :  { %v2465_v34 = vpop.f32.mrb[40].mxu1 }
 0x521   :  { %v3527_v35 = vpop.f32.mrb[41].mxu1 }
 0x522   :  { %v2468_v36 = vpop.f32.mrb[42].mxu1 }
 0x523   :  { %v2504_v37 = vpack.c.bf16 %v2468_v36, %v2465_v34  ;;  %v3528_v39 = vpop.f32.mrb[43].mxu1 }
 0x528   :  { %v2473_v40 = vpop.f32.mrb[44].mxu1 }
 0x529   :  { %v3531_v43 = vpop.f32.mrb[45].mxu1 }
 0x52a   :  { %v2476_v44 = vpop.f32.mrb[46].mxu1 }
 0x52b   :  { %v2505_v38 = vpack.c.bf16 %v2476_v44, %v2473_v40  ;;  %v3532_v41 = vpop.f32.mrb[47].mxu1 }
 0x52d   :  { %3562 = vmatmul.mubr.bf16.vlgmr.msra.gmra.mrb[60].mxu1 %v2505_v38 }
 0x52e   :  { %3566 = vmatpush3.bf16.msra.mxu1 %v4013_v24  ;;  %3581 = vmatprep.mubr.msk.bf16.mxu1 %vm4047_vm1, %v4046_v45  ;;  %v3361_v24 = vld [vmem:[%s5171_s7] ss:$0 sm:$0xff] }
 0x52f   :  { %3567 = vmatprep.subr.bf16.mxu1 %v4046_v45 }
 0x530   :  { %v5057_v46 = vpop.f32.mrb[48].mxu1 }
 0x531   :  { %v3535_v47 = vpop.f32.mrb[49].mxu1 }
 0x532   :  { %3568 = vmatpush3.bf16.msra.mxu1 %v4014_v42  ;;  %v2484_v50 = vpop.f32.mrb[50].mxu1 }
 0x533   :  { %3569 = vmatprep.subr.bf16.mxu1 %v4046_v45  ;;  %v2506_v51 = vpack.c.bf16 %v2484_v50, %v5057_v46  ;;  %v3536_v52 = vpop.f32.mrb[51].mxu1 }
 0x536   :  { %3570 = vmatpush3.bf16.msra.mxu1 %v4015_v48 }
 0x537   :  { %3571 = vmatprep.subr.bf16.mxu1 %v4046_v45 }
 0x538   :  { %v2489_v55 = vpop.f32.mrb[52].mxu1 }
 0x539   :  { %v3539_v58 = vpop.f32.mrb[53].mxu1 }
 0x53a   :  { %3572 = vmatpush3.bf16.msra.mxu1 %v4016_v53  ;;  %v2492_v16 = vpop.f32.mrb[54].mxu1 }
 0x53b   :  { %3573 = vmatprep.subr.bf16.mxu1 %v4046_v45  ;;  %v2507_v60 = vpack.c.bf16 %v2492_v16, %v2489_v55  ;;  %v3540_v61 = vpop.f32.mrb[55].mxu1 }
 0x53d   :  { %3622 = vmatmul.mubr.bf16.vlgmr.msra.gmra.mrb[20].mxu0 %v2507_v60 }
 0x53e   :  { %3574 = vmatpush3.bf16.msra.mxu1 %v4017_v59 }
 0x53f   :  { %3575 = vmatprep.subr.bf16.mxu1 %v4046_v45 }
 0x540   :  { %v5076_v63 = vpop.f32.mrb[56].mxu1 }
 0x541   :  { %v3543_v0 = vpop.f32.mrb[57].mxu1 }
 0x542   :  { %3576 = vmatpush3.bf16.msra.mxu1 %v4018_v62  ;;  %v2500_v2 = vpop.f32.mrb[58].mxu1 }
 0x543   :  { %3577 = vmatprep.subr.bf16.mxu1 %v4046_v45  ;;  %v2508_v3 = vpack.c.bf16 %v2500_v2, %v5076_v63  ;;  %v3544_v4 = vpop.f32.mrb[59].mxu1 }
 0x546   :  { %3578 = vmatpush3.bf16.msra.mxu1 %v4019_v1 }
 0x547   :  { %3579 = vmatprep.subr.bf16.mxu1 %v4046_v45 }
 0x54a   :  { %3580 = vmatpush3.bf16.msra.mxu1 %v4020_v5 }
 0x54b   :  { %3585 = vmatprep.subr.bf16.mxu1 %v4046_v45 }
 0x54d   :  { %3582 = vmatmul.mubr.bf16.vlgmr.msra.gmra.mrb[64].mxu1 %v2504_v37 }
 0x54e   :  { %3586 = vmatpush3.bf16.msra.mxu1 %v4021_v6  ;;  %3601 = vmatprep.mubr.msk.bf16.mxu1 %vm4047_vm1, %v4046_v45 }
 0x54f   :  { %3587 = vmatprep.subr.bf16.mxu1 %v4046_v45 }
 0x552   :  { %3588 = vmatpush3.bf16.msra.mxu1 %v4023_v7 }
 0x553   :  { %3589 = vmatprep.subr.bf16.mxu1 %v4046_v45 }
 0x556   :  { %3590 = vmatpush3.bf16.msra.mxu1 %v4025_v8 }
 0x557   :  { %3591 = vmatprep.subr.bf16.mxu1 %v4046_v45 }
 0x55a   :  { %3592 = vmatpush3.bf16.msra.mxu1 %v4027_v9 }
 0x55b   :  { %3593 = vmatprep.subr.bf16.mxu1 %v4046_v45 }
 0x55e   :  { %3594 = vmatpush3.bf16.msra.mxu1 %v4029_v10 }
 0x55f   :  { %3595 = vmatprep.subr.bf16.mxu1 %v4046_v45 }
 0x562   :  { %3596 = vmatpush3.bf16.msra.mxu1 %v4031_v11 }
 0x563   :  { %3597 = vmatprep.subr.bf16.mxu1 %v4046_v45 }
 0x566   :  { %3598 = vmatpush3.bf16.msra.mxu1 %v4033_v12 }
 0x567   :  { %3599 = vmatprep.subr.bf16.mxu1 %v4046_v45 }
 0x56a   :  { %3600 = vmatpush3.bf16.msra.mxu1 %v4035_v13 }
 0x56b   :  { %3625 = vmatprep.subr.bf16.mxu1 %v4046_v45 }
 0x56d   :  { %3602 = vmatmul.mubr.bf16.vlgmr.msra.gmra.mrb[68].mxu1 %v2506_v51 }
 0x56e   :  { %3626 = vmatpush3.bf16.msra.mxu1 %v4037_v14  ;;  %3641 = vmatprep.mubr.msk.bf16.mxu1 %vm4047_vm1, %v4046_v45 }
 0x56f   :  { %3627 = vmatprep.subr.bf16.mxu1 %v4046_v45 }
 0x572   :  { %3628 = vmatpush3.bf16.msra.mxu1 %v4038_v15 }
 0x573   :  { %3629 = vmatprep.subr.bf16.mxu1 %v4046_v45 }
 0x576   :  { %3630 = vmatpush3.bf16.msra.mxu1 %v4039_v17 }
 0x577   :  { %3631 = vmatprep.subr.bf16.mxu1 %v4046_v45 }
 0x57a   :  { %3632 = vmatpush3.bf16.msra.mxu1 %v4040_v18 }
 0x57b   :  { %3633 = vmatprep.subr.bf16.mxu1 %v4046_v45 }
 0x57e   :  { %3634 = vmatpush3.bf16.msra.mxu1 %v4041_v19 }
 0x57f   :  { %3635 = vmatprep.subr.bf16.mxu1 %v4046_v45 }
 0x582   :  { %3636 = vmatpush3.bf16.msra.mxu1 %v4042_v20 }
 0x583   :  { %3637 = vmatprep.subr.bf16.mxu1 %v4046_v45 }
 0x586   :  { %3638 = vmatpush3.bf16.msra.mxu1 %v4043_v21 }
 0x587   :  { %3639 = vmatprep.subr.bf16.mxu1 %v4046_v45 }
 0x58a   :  { %3640 = vmatpush3.bf16.msra.mxu1 %v4044_v22 }
 0x58d   :  { %3642 = vmatmul.mubr.bf16.vlgmr.msra.gmra.mrb[72].mxu1 %v2508_v3 }
 0x600   :  { %v2623_v23 = vpop.f32.mrb[60].mxu1 }
 0x601   :  { %v3563_v27 = vpop.f32.mrb[61].mxu1 }
 0x602   :  { %v2626_v25 = vpop.f32.mrb[62].mxu1 }
 0x603   :  { %v3564_v49 = vpop.f32.mrb[63].mxu1 }
 0x610   :  { %v2924_v54 = vpop.f32.mrb[20].mxu0 }
 0x611   :  { %v3623_v56 = vpop.f32.mrb[21].mxu0 }
 0x612   :  { %v2927_v57 = vpop.f32.mrb[22].mxu0 }
 0x613   :  { %v3624_v26 = vpop.f32.mrb[23].mxu0 }
 0x620   :  { %v2712_v28 = vpop.f32.mrb[64].mxu1 }
 0x621   :  { %v2713_v29 = vadd.f32 %v2712_v28, %v2623_v23  ;;  %v3583_v30 = vpop.f32.mrb[65].mxu1 }
 0x622   :  { %v2715_v31 = vpop.f32.mrb[66].mxu1 }
 0x623   :  { %v2716_v32 = vadd.f32 %v2715_v31, %v2626_v25  ;;  %v3584_v33 = vpop.f32.mrb[67].mxu1 }
 0x640   :  { %v2817_v34 = vpop.f32.mrb[68].mxu1 }
 0x641   :  { %v2824_v35 = vadd.f32 %v2817_v34, %v2713_v29  ;;  %v3603_v36 = vpop.f32.mrb[69].mxu1 }
 0x642   :  { %v2820_v45 = vpop.f32.mrb[70].mxu1 }
 0x643   :  { %v2825_v37 = vadd.f32 %v2820_v45, %v2716_v32  ;;  %v2931_v39 = vadd.f32 %v2924_v54, %v2824_v35  ;;  %v3604_v40 = vpop.f32.mrb[71].mxu1 }
 0x645   :  { %v2932_v43 = vadd.f32 %v2927_v57, %v2825_v37 }
 0x660   :  { %v3031_v44 = vpop.f32.mrb[72].mxu1 }
 0x661   :  { %v3038_v38 = vadd.f32 %v3031_v44, %v2931_v39  ;;  %v3643_v41 = vpop.f32.mrb[73].mxu1 }
 0x662   :  { %v3034_v42 = vpop.f32.mrb[74].mxu1 }
 0x663   :  { %v3047_v46 = vadd.f32 %v3361_v24, %v3038_v38  ;;  %v3039_v47 = vadd.f32 %v3034_v42, %v2932_v43  ;;  %v3644_v48 = vpop.f32.mrb[75].mxu1 }
 0x665   :  { %v3049_v50 = vmax.f32 %v3047_v46, 0.0  ;;  %v3048_v51 = vadd.f32 %v3361_v24, %v3039_v47 }
 0x667   :  { %3051 = vst [vmem:[%s5172_s8] sm:$0xff] %v3049_v50  ;;  %v3050_v52 = vmax.f32 %v3048_v51, 0.0 }
 0x669   :  { %3052 = vst [vmem:[%s5172_s8 + $0x8] sm:$0xff] %v3050_v52 }

// kernel: hnet_forward.4
= control target key start
LH: loop header
LB: loop body
LE: loop exit
PB: predicated region body
PF: predicated region fallthrough
CT: control target
= control target key end

     0   :  { %s7772_s12 = smov 0   ;;  %s9322_s0 = inlined_call_operand.vmem [shape: bf16[512,2304], index: 0, kind: input, shape index: {}]   ;;  %s9323_s1 = inlined_call_operand.vmem [shape: bf16[2304,256], index: 1, kind: input, shape index: {}]   ;;  %s9324_s2 = inlined_call_operand.vmem [shape: f32[1,256], index: 2, kind: input, shape index: {}]   ;;  %s9325_s3 = inlined_call_operand.vmem [shape: bf16[128,256], index: 3, kind: output, shape index: {}]  }
   0x1 LB: > { %s5626_s13 = sadd.s32 4294967295, %s7750_s12   ;;  %p5630_p0 = scmp.ge.s32.totalorder %s7750_s12, 1  ;;  %s7750_s12 = sphi %s7772_s12, %s13_s12  }
   0x2   : > { %p139_p1 = scmp.lt.s32.totalorder %s7750_s12, 3 }
   0x4   : > { %p140_p2 = pnand %p5630_p0, %p139_p1 }
   0x5   : > { %v6848_v0 = vld [vmem:[%s9323_s1 + $0x4] ss:$8 sps:$4 sm:$0xff] (!%p140_p2)   ;;  %v6852_v2 = vld [vmem:[%s9323_s1] ss:$8 sps:$4 sm:$0xff] (!%p140_p2)   ;;  %v6854_v4 = vld [vmem:[%s9323_s1 + $0x14] ss:$8 sps:$4 sm:$0xff] (!%p140_p2)  }
   0x6   : > { %143 = sbr.rel (%p140_p2) target bundleno = 866 (0x362), region = 32  ;;  %v6850_v1 = vld [vmem:[%s9323_s1 + $0x404] ss:$8 sps:$4 sm:$0xff] (!%p140_p2)   ;;  %3647 = vmatprep.subr.bf16.mxu1 (!%p140_p2), %v6848_v0  ;;  %v6853_v3 = vld [vmem:[%s9323_s1 + $0x400] ss:$8 sps:$4 sm:$0xff] (!%p140_p2)   ;;  %s5631_s24 = sshll.u32 (!%p140_p2), %s5626_s13, 5 }
   0x7   : > { %4419 = vmatprep.subr.bf16.mxu0 (!%p140_p2), %v6850_v1  ;;  %3648 = vmatpush1.bf16.msra.mxu1 (!%p140_p2), %v6852_v2  ;;  %v6856_v5 = vld [vmem:[%s9323_s1 + $0x414] ss:$8 sps:$4 sm:$0xff] (!%p140_p2)   ;;  %v6858_v6 = vld [vmem:[%s9323_s1 + $0x10] ss:$8 sps:$4 sm:$0xff] (!%p140_p2)   ;;  %v6860_v8 = vld [vmem:[%s9323_s1 + $0x24] ss:$8 sps:$4 sm:$0xff] (!%p140_p2)  }
   0x8   : > { %4420 = vmatpush1.bf16.msra.mxu0 (!%p140_p2), %v6853_v3  ;;  %3649 = vmatprep.subr.bf16.mxu1 (!%p140_p2), %v6854_v4  ;;  %v6859_v7 = vld [vmem:[%s9323_s1 + $0x410] ss:$8 sps:$4 sm:$0xff] (!%p140_p2)   ;;  %v6862_v9 = vld [vmem:[%s9323_s1 + $0x424] ss:$8 sps:$4 sm:$0xff] (!%p140_p2)   ;;  %v6864_v10 = vld [vmem:[%s9323_s1 + $0x20] ss:$8 sps:$4 sm:$0xff] (!%p140_p2)  }
   0x9   : > { %4421 = vmatprep.subr.bf16.mxu0 (!%p140_p2), %v6856_v5  ;;  %v6865_v11 = vld [vmem:[%s9323_s1 + $0x420] ss:$8 sps:$4 sm:$0xff] (!%p140_p2)   ;;  %v6866_v12 = vld [vmem:[%s9323_s1 + $0x34] ss:$8 sps:$4 sm:$0xff] (!%p140_p2)   ;;  %v6870_v14 = vld [vmem:[%s9323_s1 + $0x30] ss:$8 sps:$4 sm:$0xff] (!%p140_p2)  }
   0xa   : > { %v6868_v13 = vld [vmem:[%s9323_s1 + $0x434] ss:$8 sps:$4 sm:$0xff] (!%p140_p2)   ;;  %v6871_v15 = vld [vmem:[%s9323_s1 + $0x430] ss:$8 sps:$4 sm:$0xff] (!%p140_p2)   ;;  %v6872_v16 = vld [vmem:[%s9323_s1 + $0x44] ss:$8 sps:$4 sm:$0xff] (!%p140_p2)  }
   0xb   : > { %3650 = vmatpush1.bf16.msra.mxu1 (!%p140_p2), %v6858_v6  ;;  %v6874_v17 = vld [vmem:[%s9323_s1 + $0x444] ss:$8 sps:$4 sm:$0xff] (!%p140_p2)   ;;  %v6876_v18 = vld [vmem:[%s9323_s1 + $0x40] ss:$8 sps:$4 sm:$0xff] (!%p140_p2)   ;;  %v6878_v20 = vld [vmem:[%s9323_s1 + $0x54] ss:$8 sps:$4 sm:$0xff] (!%p140_p2)  }
   0xc   : > { %4422 = vmatpush1.bf16.msra.mxu0 (!%p140_p2), %v6859_v7  ;;  %3651 = vmatprep.subr.bf16.mxu1 (!%p140_p2), %v6860_v8  ;;  %v6877_v19 = vld [vmem:[%s9323_s1 + $0x440] ss:$8 sps:$4 sm:$0xff] (!%p140_p2)   ;;  %v6880_v21 = vld [vmem:[%s9323_s1 + $0x454] ss:$8 sps:$4 sm:$0xff] (!%p140_p2)   ;;  %v6882_v22 = vld [vmem:[%s9323_s1 + $0x50] ss:$8 sps:$4 sm:$0xff] (!%p140_p2)  }
   0xd   : > { %4423 = vmatprep.subr.bf16.mxu0 %v6862_v9  ;;  %v6883_v23 = vld [vmem:[%s9323_s1 + $0x450] ss:$8 sps:$4 sm:$0xff]   ;;  %v6884_v24 = vld [vmem:[%s9323_s1 + $0x64] ss:$8 sps:$4 sm:$0xff]   ;;  %v6888_v26 = vld [vmem:[%s9323_s1 + $0x60] ss:$8 sps:$4 sm:$0xff]  }
   0xe   : > { %v6886_v25 = vld [vmem:[%s9323_s1 + $0x464] ss:$8 sps:$4 sm:$0xff]   ;;  %v6889_v27 = vld [vmem:[%s9323_s1 + $0x460] ss:$8 sps:$4 sm:$0xff]   ;;  %v6890_v28 = vld [vmem:[%s9323_s1 + $0x74] ss:$8 sps:$4 sm:$0xff]  }
   0xf   : > { %3652 = vmatpush1.bf16.msra.mxu1 %v6864_v10  ;;  %v6892_v29 = vld [vmem:[%s9323_s1 + $0x474] ss:$8 sps:$4 sm:$0xff]   ;;  %v6894_v30 = vld [vmem:[%s9323_s1 + $0x70] ss:$8 sps:$4 sm:$0xff]   ;;  %v6896_v32 = vld [vmem:[%s9323_s1 + $0x84] ss:$8 sps:$4 sm:$0xff]  }
  0x10   : > { %4424 = vmatpush1.bf16.msra.mxu0 %v6865_v11  ;;  %3653 = vmatprep.subr.bf16.mxu1 %v6866_v12  ;;  %v6895_v31 = vld [vmem:[%s9323_s1 + $0x470] ss:$8 sps:$4 sm:$0xff]   ;;  %p166_p3 = scmp.lt.s32.totalorder %s5631_s24, 63  ;;  %v6898_v33 = vld [vmem:[%s9323_s1 + $0x484] ss:$8 sps:$4 sm:$0xff]   ;;  %s5633_s5 = sshll.u32 %s5626_s13, 3 }
  0x11   : > { %4425 = vmatprep.subr.bf16.mxu0 %v6868_v13  ;;  %v6900_v34 = vld [vmem:[%s9323_s1 + $0x80] ss:$8 sps:$4 sm:$0xff]   ;;  %v6902_v36 = vld [vmem:[%s9323_s1 + $0x94] ss:$8 sps:$4 sm:$0xff]   ;;  %v6906_v38 = vld [vmem:[%s9323_s1 + $0x90] ss:$8 sps:$4 sm:$0xff]  }
  0x12   : > { %v6901_v35 = vld [vmem:[%s9323_s1 + $0x480] ss:$8 sps:$4 sm:$0xff]   ;;  %s9327_s24 = smov (!%p166_p3, %s5631_s24), 63  ;;  %v6904_v37 = vld [vmem:[%s9323_s1 + $0x494] ss:$8 sps:$4 sm:$0xff]   ;;  %p173_p4 = scmp.lt.s32.totalorder %s5633_s5, 15 }
  0x13   : > { %3654 = vmatpush1.bf16.msra.mxu1 %v6870_v14  ;;  %v6907_v39 = vld [vmem:[%s9323_s1 + $0x490] ss:$8 sps:$4 sm:$0xff]   ;;  %v6908_v40 = vld [vmem:[%s9323_s1 + $0xa4] ss:$8 sps:$4 sm:$0xff]   ;;  %s6839_s22 = smul.u32 72, %s9327_s24 }
  0x14   : > { %4426 = vmatpush1.bf16.msra.mxu0 %v6871_v15  ;;  %3655 = vmatprep.subr.bf16.mxu1 %v6872_v16  ;;  %v6910_v41 = vld [vmem:[%s9323_s1 + $0x4a4] ss:$8 sps:$4 sm:$0xff]   ;;  %v6912_v42 = vld [vmem:[%s9323_s1 + $0xa0] ss:$8 sps:$4 sm:$0xff]   ;;  %v6914_v44 = vld [vmem:[%s9323_s1 + $0xb4] ss:$8 sps:$4 sm:$0xff]  }
  0x15   : > { %4427 = vmatprep.subr.bf16.mxu0 %v6874_v17  ;;  %v6913_v43 = vld [vmem:[%s9323_s1 + $0x4a0] ss:$8 sps:$4 sm:$0xff]   ;;  %s7920_s6 = scalar_lea.vmem %s9322_s0, %s6839_s22  ;;  %v6916_v45 = vld [vmem:[%s9323_s1 + $0x4b4] ss:$8 sps:$4 sm:$0xff]   ;;  %v6918_v46 = vld [vmem:[%s9323_s1 + $0xb0] ss:$8 sps:$4 sm:$0xff]  }
  0x16   : > { %v6919_v47 = vld [vmem:[%s9323_s1 + $0x4b0] ss:$8 sps:$4 sm:$0xff]   ;;  %v6920_v48 = vld [vmem:[%s9323_s1 + $0xc4] ss:$8 sps:$4 sm:$0xff]   ;;  %v6924_v52 = vld [vmem:[%s9323_s1 + $0xc0] ss:$8 sps:$4 sm:$0xff]  }
  0x17   : > { %3656 = vmatpush1.bf16.msra.mxu1 %v6876_v18  ;;  %v6946_v49 = vld [vmem:[%s7920_s6 + $0x4] ss:$72 sps:$4 sm:$0xff]   ;;  %v6925_v53 = vld [vmem:[%s9323_s1 + $0x4c0] ss:$8 sps:$4 sm:$0xff]   ;;  %v6926_v54 = vld [vmem:[%s9323_s1 + $0xd4] ss:$8 sps:$4 sm:$0xff]  }
  0x18   : > { %4428 = vmatpush1.bf16.msra.mxu0 %v6877_v19  ;;  %3657 = vmatprep.subr.bf16.mxu1 %v6878_v20  ;;  %v6922_v50 = vld [vmem:[%s9323_s1 + $0x4c4] ss:$8 sps:$4 sm:$0xff]   ;;  %v6928_v55 = vld [vmem:[%s9323_s1 + $0x4d4] ss:$8 sps:$4 sm:$0xff]   ;;  %v6930_v56 = vld [vmem:[%s9323_s1 + $0xd0] ss:$8 sps:$4 sm:$0xff]  }
  0x19   : > { %4429 = vmatprep.subr.bf16.mxu0 %v6880_v21  ;;  %v6949_v51 = vld [vmem:[%s7920_s6 + $0x24] ss:$72 sps:$4 sm:$0xff]   ;;  %3679 = vmatprep.mubr.bf16.mxu1 %v6946_v49  ;;  %v6931_v57 = vld [vmem:[%s9323_s1 + $0x4d0] ss:$8 sps:$4 sm:$0xff]   ;;  %v6936_v60 = vld [vmem:[%s9323_s1 + $0xe0] ss:$8 sps:$4 sm:$0xff]  }
  0x1a   : > { %4451 = vmatprep.mubr.bf16.mxu0 %v6949_v51  ;;  %v6932_v58 = vld [vmem:[%s9323_s1 + $0xe4] ss:$8 sps:$4 sm:$0xff]   ;;  %v6937_v61 = vld [vmem:[%s9323_s1 + $0x4e0] ss:$8 sps:$4 sm:$0xff]   ;;  %v6938_v62 = vld [vmem:[%s9323_s1 + $0xf4] ss:$8 sps:$4 sm:$0xff]  }
  0x1b   : > { %3658 = vmatpush1.bf16.msra.mxu1 %v6882_v22  ;;  %v6934_v59 = vld [vmem:[%s9323_s1 + $0x4e4] ss:$8 sps:$4 sm:$0xff]   ;;  %v6940_v63 = vld [vmem:[%s9323_s1 + $0x4f4] ss:$8 sps:$4 sm:$0xff]   ;;  %v6942_v0 = vld [vmem:[%s9323_s1 + $0xf0] ss:$8 sps:$4 sm:$0xff]  }
  0x1c   : > { %4430 = vmatpush1.bf16.msra.mxu0 %v6883_v23  ;;  %3659 = vmatprep.subr.bf16.mxu1 %v6884_v24  ;;  %v6943_v1 = vld [vmem:[%s9323_s1 + $0x4f0] ss:$8 sps:$4 sm:$0xff]   ;;  %v6952_v2 = vld [vmem:[%s9323_s1 + $0x104] ss:$8 sps:$4 sm:$0xff]   ;;  %v6944_v4 = vld [vmem:[%s7920_s6] ss:$72 sps:$4 sm:$0xff]  }
  0x1d   : > { %4431 = vmatprep.subr.bf16.mxu0 %v6886_v25  ;;  %v6955_v3 = vld [vmem:[%s9323_s1 + $0x504] ss:$8 sps:$4 sm:$0xff]   ;;  %v6947_v5 = vld [vmem:[%s7920_s6 + $0x20] ss:$72 sps:$4 sm:$0xff]   ;;  %v6958_v8 = vld [vmem:[%s9323_s1 + $0x514] ss:$8 sps:$4 sm:$0xff]  }
  0x1e   : > { %v6950_v6 = vld [vmem:[%s9323_s1 + $0x100] ss:$8 sps:$4 sm:$0xff]   ;;  %v6959_v9 = vld [vmem:[%s7920_s6 + $0x94] ss:$72 sps:$4 sm:$0xff]   ;;  %v6956_v12 = vld [vmem:[%s9323_s1 + $0x510] ss:$8 sps:$4 sm:$0xff]  }
  0x1f   : > { %3660 = vmatpush1.bf16.msra.mxu1 %v6888_v26  ;;  %v6953_v7 = vld [vmem:[%s9323_s1 + $0x500] ss:$8 sps:$4 sm:$0xff]   ;;  %v6961_v10 = vld [vmem:[%s7920_s6 + $0xb4] ss:$72 sps:$4 sm:$0xff]   ;;  %v6964_v13 = vld [vmem:[%s9323_s1 + $0x110] ss:$8 sps:$4 sm:$0xff]  }
  0x20   : > { %4432 = vmatpush1.bf16.msra.mxu0 %v6889_v27  ;;  %3661 = vmatprep.subr.bf16.mxu1 %v6890_v28  ;;  %v6966_v11 = vld [vmem:[%s9323_s1 + $0x114] ss:$8 sps:$4 sm:$0xff]   ;;  %v6970_v14 = vld [vmem:[%s9323_s1 + $0x524] ss:$8 sps:$4 sm:$0xff]   ;;  %v6963_v16 = vld [vmem:[%s7920_s6 + $0x90] ss:$72 sps:$4 sm:$0xff]  }
  0x21   : > { %4433 = vmatprep.subr.bf16.mxu0 %v6892_v29  ;;  %v6981_v15 = vld [vmem:[%s9323_s1 + $0x124] ss:$8 sps:$4 sm:$0xff]   ;;  %v6967_v17 = vld [vmem:[%s7920_s6 + $0xb0] ss:$72 sps:$4 sm:$0xff]   ;;  %v6968_v18 = vld [vmem:[%s9323_s1 + $0x520] ss:$8 sps:$4 sm:$0xff]  }
  0x22   : > { %v6973_v19 = vld [vmem:[%s9323_s1 + $0x534] ss:$8 sps:$4 sm:$0xff]   ;;  %v6974_v20 = vld [vmem:[%s7920_s6 + $0x124] ss:$72 sps:$4 sm:$0xff]   ;;  %v6979_v22 = vld [vmem:[%s9323_s1 + $0x120] ss:$8 sps:$4 sm:$0xff]  }
  0x23   : > { %3662 = vmatpush1.bf16.msra.mxu1 %v6894_v30  ;;  %v6976_v21 = vld [vmem:[%s7920_s6 + $0x144] ss:$72 sps:$4 sm:$0xff]   ;;  %v6996_v23 = vld [vmem:[%s9323_s1 + $0x134] ss:$8 sps:$4 sm:$0xff]   ;;  %v6971_v24 = vld [vmem:[%s9323_s1 + $0x530] ss:$8 sps:$4 sm:$0xff]  }
  0x24   : > { %4434 = vmatpush1.bf16.msra.mxu0 %v6895_v31  ;;  %3663 = vmatprep.subr.bf16.mxu1 %v6896_v32  ;;  %v6978_v25 = vld [vmem:[%s7920_s6 + $0x120] ss:$72 sps:$4 sm:$0xff]   ;;  %v6985_v26 = vld [vmem:[%s9323_s1 + $0x544] ss:$8 sps:$4 sm:$0xff]   ;;  %v6994_v27 = vld [vmem:[%s9323_s1 + $0x130] ss:$8 sps:$4 sm:$0xff]  }
  0x25   : > { %4435 = vmatprep.subr.bf16.mxu0 %v6898_v33  ;;  %v6982_v28 = vld [vmem:[%s7920_s6 + $0x140] ss:$72 sps:$4 sm:$0xff]   ;;  %v6988_v30 = vld [vmem:[%s9323_s1 + $0x554] ss:$8 sps:$4 sm:$0xff]   ;;  %v7011_v33 = vld [vmem:[%s9323_s1 + $0x144] ss:$8 sps:$4 sm:$0xff]  }
  0x26   : > { %v6983_v29 = vld [vmem:[%s9323_s1 + $0x540] ss:$8 sps:$4 sm:$0xff]   ;;  %v6989_v31 = vld [vmem:[%s7920_s6 + $0x1b4] ss:$72 sps:$4 sm:$0xff]   ;;  %s9329_s5 = smov (!%p173_p4, %s5633_s5), 15 }
  0x27   : > { %3664 = vmatpush1.bf16.msra.mxu1 %v6900_v34  ;;  %v6991_v32 = vld [vmem:[%s7920_s6 + $0x1d4] ss:$72 sps:$4 sm:$0xff]   ;;  %v7009_v34 = vld [vmem:[%s9323_s1 + $0x140] ss:$8 sps:$4 sm:$0xff]   ;;  %s6222_s13 = sshll.u32 %s9329_s5, 3 }
  0x28   : > { %4436 = vmatpush1.bf16.msra.mxu0 %v6901_v35  ;;  %3665 = vmatprep.subr.bf16.mxu1 %v6902_v36  ;;  %v6986_v35 = vld [vmem:[%s9323_s1 + $0x550] ss:$8 sps:$4 sm:$0xff]   ;;  %v7026_v36 = vld [vmem:[%s9323_s1 + $0x154] ss:$8 sps:$4 sm:$0xff]   ;;  %v7012_v49 = vld [vmem:[%s7920_s6 + $0x260] ss:$72 sps:$4 sm:$0xff]   ;;  %s9287_s9 = scalar_lea.vmem %s9325_s3, %s6222_s13 }
  0x29   : > { %4437 = vmatprep.subr.bf16.mxu0 %v6904_v37  ;;  %v7000_v37 = vld [vmem:[%s9323_s1 + $0x564] ss:$8 sps:$4 sm:$0xff]   ;;  %v7013_v51 = vld [vmem:[%s9323_s1 + $0x580] ss:$8 sps:$4 sm:$0xff]  }
  0x2b   : > { %3666 = vmatpush1.bf16.msra.mxu1 %v6906_v38  ;;  %v6993_v38 = vld [vmem:[%s7920_s6 + $0x1b0] ss:$72 sps:$4 sm:$0xff]  }
  0x2c   : > { %4438 = vmatpush1.bf16.msra.mxu0 %v6907_v39  ;;  %3667 = vmatprep.subr.bf16.mxu1 %v6908_v40  ;;  %v6997_v39 = vld [vmem:[%s7920_s6 + $0x1d0] ss:$72 sps:$4 sm:$0xff]   ;;  %v6998_v40 = vld [vmem:[%s9323_s1 + $0x560] ss:$8 sps:$4 sm:$0xff]  }
  0x2d   : > { %4439 = vmatprep.subr.bf16.mxu0 %v6910_v41  ;;  %v7003_v41 = vld [vmem:[%s9323_s1 + $0x574] ss:$8 sps:$4 sm:$0xff]  }
  0x2f   : > { %3668 = vmatpush1.bf16.msra.mxu1 %v6912_v42  ;;  %v7004_v42 = vld [vmem:[%s7920_s6 + $0x244] ss:$72 sps:$4 sm:$0xff]  }
  0x30   : > { %4440 = vmatpush1.bf16.msra.mxu0 %v6913_v43  ;;  %3669 = vmatprep.subr.bf16.mxu1 %v6914_v44  ;;  %v7006_v43 = vld [vmem:[%s7920_s6 + $0x264] ss:$72 sps:$4 sm:$0xff]   ;;  %v7024_v44 = vld [vmem:[%s9323_s1 + $0x150] ss:$8 sps:$4 sm:$0xff]  }
  0x31   : > { %4441 = vmatprep.subr.bf16.mxu0 %v6916_v45  ;;  %v7041_v45 = vld [vmem:[%s9323_s1 + $0x164] ss:$8 sps:$4 sm:$0xff]  }
  0x33   : > { %3670 = vmatpush1.bf16.msra.mxu1 %v6918_v46  ;;  %v7001_v46 = vld [vmem:[%s9323_s1 + $0x570] ss:$8 sps:$4 sm:$0xff]  }
  0x34   : > { %4442 = vmatpush1.bf16.msra.mxu0 %v6919_v47  ;;  %3671 = vmatprep.subr.bf16.mxu1 %v6920_v48  ;;  %v7008_v47 = vld [vmem:[%s7920_s6 + $0x240] ss:$72 sps:$4 sm:$0xff]   ;;  %v7015_v48 = vld [vmem:[%s9323_s1 + $0x584] ss:$8 sps:$4 sm:$0xff]  }
  0x35   : > { %4443 = vmatprep.subr.bf16.mxu0 %v6922_v50  ;;  %v7039_v50 = vld [vmem:[%s9323_s1 + $0x160] ss:$8 sps:$4 sm:$0xff]  }
  0x37   : > { %3672 = vmatpush1.bf16.msra.mxu1 %v6924_v52  ;;  %v7018_v52 = vld [vmem:[%s9323_s1 + $0x594] ss:$8 sps:$4 sm:$0xff]  }
  0x38   : > { %4444 = vmatpush1.bf16.msra.mxu0 %v6925_v53  ;;  %3673 = vmatprep.subr.bf16.mxu1 %v6926_v54  ;;  %v7019_v53 = vld [vmem:[%s7920_s6 + $0x2d4] ss:$72 sps:$4 sm:$0xff]  }
  0x39   : > { %4445 = vmatprep.subr.bf16.mxu0 %v6928_v55  ;;  %v7021_v54 = vld [vmem:[%s7920_s6 + $0x2f4] ss:$72 sps:$4 sm:$0xff]  }
  0x3a   : > { %v7056_v55 = vld [vmem:[%s9323_s1 + $0x174] ss:$8 sps:$4 sm:$0xff]  }
  0x3b   : > { %3674 = vmatpush1.bf16.msra.mxu1 %v6930_v56  ;;  %v7016_v56 = vld [vmem:[%s9323_s1 + $0x590] ss:$8 sps:$4 sm:$0xff]  }
  0x3c   : > { %4446 = vmatpush1.bf16.msra.mxu0 %v6931_v57  ;;  %3675 = vmatprep.subr.bf16.mxu1 %v6932_v58  ;;  %v7054_v57 = vld [vmem:[%s9323_s1 + $0x170] ss:$8 sps:$4 sm:$0xff]   ;;  %v7072_v58 = vld [vmem:[%s9323_s1 + $0x184] ss:$8 sps:$4 sm:$0xff]  }
  0x3d   : > { %4447 = vmatprep.subr.bf16.mxu0 %v6934_v59  ;;  %v7030_v59 = vld [vmem:[%s9323_s1 + $0x5a4] ss:$8 sps:$4 sm:$0xff]  }
  0x3f   : > { %3676 = vmatpush1.bf16.msra.mxu1 %v6936_v60  ;;  %v7023_v60 = vld [vmem:[%s7920_s6 + $0x2d0] ss:$72 sps:$4 sm:$0xff]  }
  0x40   : > { %4448 = vmatpush1.bf16.msra.mxu0 %v6937_v61  ;;  %3677 = vmatprep.subr.bf16.mxu1 %v6938_v62  ;;  %v7027_v61 = vld [vmem:[%s7920_s6 + $0x2f0] ss:$72 sps:$4 sm:$0xff]   ;;  %v7028_v62 = vld [vmem:[%s9323_s1 + $0x5a0] ss:$8 sps:$4 sm:$0xff]  }
  0x41   : > { %4449 = vmatprep.subr.bf16.mxu0 %v6940_v63  ;;  %v7033_v63 = vld [vmem:[%s9323_s1 + $0x5b4] ss:$8 sps:$4 sm:$0xff]  }
  0x43   : > { %3678 = vmatpush1.bf16.msra.mxu1 %v6942_v0  ;;  %v7034_v0 = vld [vmem:[%s7920_s6 + $0x364] ss:$72 sps:$4 sm:$0xff]  }
  0x44   : > { %4450 = vmatpush1.bf16.msra.mxu0 %v6943_v1  ;;  %3840 = vmatprep.subr.bf16.mxu1 %v6952_v2  ;;  %v7036_v1 = vld [vmem:[%s7920_s6 + $0x384] ss:$72 sps:$4 sm:$0xff]   ;;  %v7070_v2 = vld [vmem:[%s9323_s1 + $0x180] ss:$8 sps:$4 sm:$0xff]  }
  0x45   : > { %4612 = vmatprep.subr.bf16.mxu0 %v6955_v3  ;;  %v7083_v3 = vld [vmem:[%s9323_s1 + $0x194] ss:$8 sps:$4 sm:$0xff]  }
  0x46   : > { %3680 = vmatmul.mubr.bf16.vlgmr.msra.gmra.mrb[0].mxu1 %v6944_v4  ;;  %v7031_v4 = vld [vmem:[%s9323_s1 + $0x5b0] ss:$8 sps:$4 sm:$0xff]  }
  0x47   : > { %4452 = vmatmul.mubr.bf16.vlgmr.msra.gmra.mrb[0].mxu0 %v6947_v5  ;;  %3841 = vmatpush1.bf16.msra.mxu1 %v6950_v6  ;;  %v7038_v5 = vld [vmem:[%s7920_s6 + $0x360] ss:$72 sps:$4 sm:$0xff]   ;;  %v7045_v6 = vld [vmem:[%s9323_s1 + $0x5c4] ss:$8 sps:$4 sm:$0xff]  }
  0x48   : > { %4613 = vmatpush1.bf16.msra.mxu0 %v6953_v7  ;;  %3689 = vmatprep.mubr.bf16.mxu1 %v6959_v9  ;;  %v7042_v7 = vld [vmem:[%s7920_s6 + $0x380] ss:$72 sps:$4 sm:$0xff]  }
  0x49   : > { %4614 = vmatprep.subr.bf16.mxu0 %v6958_v8  ;;  %4461 = vmatprep.mubr.bf16.mxu0 %v6961_v10  ;;  %v7081_v8 = vld [vmem:[%s9323_s1 + $0x190] ss:$8 sps:$4 sm:$0xff]   ;;  %v7043_v9 = vld [vmem:[%s9323_s1 + $0x5c0] ss:$8 sps:$4 sm:$0xff]   ;;  %v7048_v10 = vld [vmem:[%s9323_s1 + $0x5d4] ss:$8 sps:$4 sm:$0xff]  }
  0x4a   : > { %3842 = vmatprep.subr.bf16.mxu1 %v6966_v11  ;;  %v7049_v11 = vld [vmem:[%s7920_s6 + $0x3f4] ss:$72 sps:$4 sm:$0xff]  }
  0x4b   : > { %3843 = vmatpush1.bf16.msra.mxu1 %v6964_v13  ;;  %v7095_v13 = vld [vmem:[%s9323_s1 + $0x1a4] ss:$8 sps:$4 sm:$0xff]  }
  0x4c   : > { %4615 = vmatpush1.bf16.msra.mxu0 %v6956_v12  ;;  %3844 = vmatprep.subr.bf16.mxu1 %v6981_v15  ;;  %v7051_v12 = vld [vmem:[%s7920_s6 + $0x414] ss:$72 sps:$4 sm:$0xff]   ;;  %v7093_v15 = vld [vmem:[%s9323_s1 + $0x1a0] ss:$8 sps:$4 sm:$0xff]  }
  0x4d   : > { %4616 = vmatprep.subr.bf16.mxu0 %v6970_v14  ;;  %v7046_v14 = vld [vmem:[%s9323_s1 + $0x5d0] ss:$8 sps:$4 sm:$0xff]  }
  0x4e   : > { %3690 = vmatmul.mubr.bf16.gmra.mrb[4].mxu1 %v6963_v16  ;;  %v7107_v16 = vld [vmem:[%s9323_s1 + $0x1b4] ss:$8 sps:$4 sm:$0xff]  }
  0x4f   : > { %4462 = vmatmul.mubr.bf16.gmra.mrb[4].mxu0 %v6967_v17  ;;  %3699 = vmatprep.mubr.bf16.mxu1 %v6974_v20  ;;  %v7060_v17 = vld [vmem:[%s9323_s1 + $0x5e4] ss:$8 sps:$4 sm:$0xff]   ;;  %v7058_v20 = vld [vmem:[%s9323_s1 + $0x5e0] ss:$8 sps:$4 sm:$0xff]  }
  0x50   : > { %4617 = vmatpush1.bf16.msra.mxu0 %v6968_v18  ;;  %4471 = vmatprep.mubr.bf16.mxu0 %v6976_v21  ;;  %v7053_v18 = vld [vmem:[%s7920_s6 + $0x3f0] ss:$72 sps:$4 sm:$0xff]   ;;  %v7063_v21 = vld [vmem:[%s9323_s1 + $0x5f4] ss:$8 sps:$4 sm:$0xff]  }
  0x51   : > { %4618 = vmatprep.subr.bf16.mxu0 %v6973_v19  ;;  %3845 = vmatpush1.bf16.msra.mxu1 %v6979_v22  ;;  %v7057_v19 = vld [vmem:[%s7920_s6 + $0x410] ss:$72 sps:$4 sm:$0xff]   ;;  %v7064_v22 = vld [vmem:[%s7920_s6 + $0x484] ss:$72 sps:$4 sm:$0xff]  }
  0x52   : > { %3846 = vmatprep.subr.bf16.mxu1 %v6996_v23  ;;  %v7068_v23 = vld [vmem:[%s7920_s6 + $0x2c] ss:$72 sps:$4 sm:$0xff]  }
  0x54   : > { %4619 = vmatpush1.bf16.msra.mxu0 %v6971_v24  ;;  %v7105_v24 = vld [vmem:[%s9323_s1 + $0x1b0] ss:$8 sps:$4 sm:$0xff]  }
  0x55   : > { %4620 = vmatprep.subr.bf16.mxu0 %v6985_v26  ;;  %3847 = vmatpush1.bf16.msra.mxu1 %v6994_v27  ;;  %v7061_v26 = vld [vmem:[%s9323_s1 + $0x5f0] ss:$8 sps:$4 sm:$0xff]  }
  0x56   : > { %3700 = vmatmul.mubr.bf16.gmra.mrb[8].mxu1 %v6978_v25  ;;  %3848 = vmatprep.subr.bf16.mxu1 %v7011_v33  ;;  %v7119_v25 = vld [vmem:[%s9323_s1 + $0x1c4] ss:$8 sps:$4 sm:$0xff]   ;;  %v7066_v27 = vld [vmem:[%s7920_s6 + $0x28] ss:$72 sps:$4 sm:$0xff]  }
  0x57   : > { %4472 = vmatmul.mubr.bf16.gmra.mrb[8].mxu0 %v6982_v28  ;;  %3709 = vmatprep.mubr.bf16.mxu1 %v6989_v31  ;;  %v7075_v28 = vld [vmem:[%s9323_s1 + $0x604] ss:$8 sps:$4 sm:$0xff]   ;;  %v7073_v31 = vld [vmem:[%s9323_s1 + $0x600] ss:$8 sps:$4 sm:$0xff]  }
  0x58   : > { %4621 = vmatpush1.bf16.msra.mxu0 %v6983_v29  ;;  %4481 = vmatprep.mubr.bf16.mxu0 %v6991_v32  ;;  %v7069_v29 = vld [vmem:[%s7920_s6 + $0x480] ss:$72 sps:$4 sm:$0xff]   ;;  %v7076_v32 = vld [vmem:[%s7920_s6 + $0x514] ss:$72 sps:$4 sm:$0xff]  }
  0x59   : > { %4622 = vmatprep.subr.bf16.mxu0 %v6988_v30  ;;  %3849 = vmatpush1.bf16.msra.mxu1 %v7009_v34  ;;  %v7117_v30 = vld [vmem:[%s9323_s1 + $0x1c0] ss:$8 sps:$4 sm:$0xff]   ;;  %v7078_v33 = vld [vmem:[%s7920_s6 + $0xbc] ss:$72 sps:$4 sm:$0xff]  }
  0x5a   : > { %3850 = vmatprep.subr.bf16.mxu1 %v7026_v36  ;;  %v7087_v34 = vld [vmem:[%s9323_s1 + $0x614] ss:$8 sps:$4 sm:$0xff]   ;;  %v7085_v36 = vld [vmem:[%s9323_s1 + $0x610] ss:$8 sps:$4 sm:$0xff]  }
  0x5c   : > { %4623 = vmatpush1.bf16.msra.mxu0 %v6986_v35  ;;  %v7131_v35 = vld [vmem:[%s9323_s1 + $0x1d4] ss:$8 sps:$4 sm:$0xff]  }
  0x5d   : > { %4624 = vmatprep.subr.bf16.mxu0 %v7000_v37  ;;  %3851 = vmatpush1.bf16.msra.mxu1 %v7024_v44  ;;  %v7129_v37 = vld [vmem:[%s9323_s1 + $0x1d0] ss:$8 sps:$4 sm:$0xff]   ;;  %v7097_v44 = vld [vmem:[%s9323_s1 + $0x620] ss:$8 sps:$4 sm:$0xff]  }
  0x5e   : > { %3710 = vmatmul.mubr.bf16.gmra.mrb[12].mxu1 %v6993_v38  ;;  %3852 = vmatprep.subr.bf16.mxu1 %v7041_v45  ;;  %v7143_v38 = vld [vmem:[%s9323_s1 + $0x1e4] ss:$8 sps:$4 sm:$0xff]   ;;  %v7141_v45 = vld [vmem:[%s9323_s1 + $0x1e0] ss:$8 sps:$4 sm:$0xff]  }
  0x5f   : > { %4482 = vmatmul.mubr.bf16.gmra.mrb[12].mxu0 %v6997_v39  ;;  %3719 = vmatprep.mubr.bf16.mxu1 %v7004_v42  ;;  %v7099_v39 = vld [vmem:[%s9323_s1 + $0x624] ss:$8 sps:$4 sm:$0xff]  }
  0x60   : > { %4625 = vmatpush1.bf16.msra.mxu0 %v6998_v40  ;;  %4491 = vmatprep.mubr.bf16.mxu0 %v7006_v43  ;;  %v7080_v40 = vld [vmem:[%s7920_s6 + $0x510] ss:$72 sps:$4 sm:$0xff]   ;;  %v7088_v42 = vld [vmem:[%s7920_s6 + $0x5a4] ss:$72 sps:$4 sm:$0xff]  }
  0x61   : > { %4626 = vmatprep.subr.bf16.mxu0 %v7003_v41  ;;  %3853 = vmatpush1.bf16.msra.mxu1 %v7039_v50  ;;  %v7084_v41 = vld [vmem:[%s7920_s6 + $0xb8] ss:$72 sps:$4 sm:$0xff]   ;;  %v7090_v43 = vld [vmem:[%s7920_s6 + $0x14c] ss:$72 sps:$4 sm:$0xff]  }
  0x62   : > { %3854 = vmatprep.subr.bf16.mxu1 %v7056_v55  ;;  %v7153_v50 = vld [vmem:[%s9323_s1 + $0x1f0] ss:$8 sps:$4 sm:$0xff]   ;;  %v7102_v55 = vld [vmem:[%s7920_s6 + $0x1dc] ss:$72 sps:$4 sm:$0xff]  }
  0x64   : > { %4627 = vmatpush1.bf16.msra.mxu0 %v7001_v46  ;;  %v7111_v46 = vld [vmem:[%s9323_s1 + $0x634] ss:$8 sps:$4 sm:$0xff]  }
  0x65   : > { %4628 = vmatprep.subr.bf16.mxu0 %v7015_v48  ;;  %3855 = vmatpush1.bf16.msra.mxu1 %v7054_v57  ;;  %v7109_v48 = vld [vmem:[%s9323_s1 + $0x630] ss:$8 sps:$4 sm:$0xff]   ;;  %v7135_v57 = vld [vmem:[%s9323_s1 + $0x654] ss:$8 sps:$4 sm:$0xff]  }
  0x66   : > { %3720 = vmatmul.mubr.bf16.gmra.mrb[16].mxu1 %v7008_v47  ;;  %3856 = vmatprep.subr.bf16.mxu1 %v7072_v58  ;;  %v7155_v47 = vld [vmem:[%s9323_s1 + $0x1f4] ss:$8 sps:$4 sm:$0xff]   ;;  %v7133_v58 = vld [vmem:[%s9323_s1 + $0x650] ss:$8 sps:$4 sm:$0xff]  }
  0x67   : > { %4492 = vmatmul.mubr.bf16.gmra.mrb[16].mxu0 %v7012_v49  ;;  %3729 = vmatprep.mubr.bf16.mxu1 %v7019_v53  ;;  %v7092_v49 = vld [vmem:[%s7920_s6 + $0x5a0] ss:$72 sps:$4 sm:$0xff]  }
  0x68   : > { %4629 = vmatpush1.bf16.msra.mxu0 %v7013_v51  ;;  %4501 = vmatprep.mubr.bf16.mxu0 %v7021_v54  ;;  %v7123_v51 = vld [vmem:[%s9323_s1 + $0x644] ss:$8 sps:$4 sm:$0xff]   ;;  %v7096_v53 = vld [vmem:[%s7920_s6 + $0x148] ss:$72 sps:$4 sm:$0xff]   ;;  %v7100_v54 = vld [vmem:[%s7920_s6 + $0x634] ss:$72 sps:$4 sm:$0xff]  }
  0x69   : > { %4630 = vmatprep.subr.bf16.mxu0 %v7018_v52  ;;  %3857 = vmatpush1.bf16.msra.mxu1 %v7070_v2  ;;  %v7167_v52 = vld [vmem:[%s9323_s1 + $0x204] ss:$8 sps:$4 sm:$0xff]   ;;  %v7157_v2 = vld [vmem:[%s9323_s1 + $0x670] ss:$8 sps:$4 sm:$0xff]  }
  0x6a   : > { %3858 = vmatprep.subr.bf16.mxu1 %v7083_v3  ;;  %v7116_v3 = vld [vmem:[%s7920_s6 + $0x6c0] ss:$72 sps:$4 sm:$0xff]  }
  0x6c   : > { %4631 = vmatpush1.bf16.msra.mxu0 %v7016_v56  ;;  %v7121_v56 = vld [vmem:[%s9323_s1 + $0x640] ss:$8 sps:$4 sm:$0xff]  }
  0x6d   : > { %4632 = vmatprep.subr.bf16.mxu0 %v7030_v59  ;;  %3859 = vmatpush1.bf16.msra.mxu1 %v7081_v8  ;;  %v7147_v59 = vld [vmem:[%s9323_s1 + $0x664] ss:$8 sps:$4 sm:$0xff]   ;;  %v7169_v8 = vld [vmem:[%s9323_s1 + $0x680] ss:$8 sps:$4 sm:$0xff]  }
  0x6e   : > { %3730 = vmatmul.mubr.bf16.gmra.mrb[20].mxu1 %v7023_v60  ;;  %3860 = vmatprep.subr.bf16.mxu1 %v7095_v13  ;;  %v7104_v60 = vld [vmem:[%s7920_s6 + $0x630] ss:$72 sps:$4 sm:$0xff]  }
  0x6f   : > { %4502 = vmatmul.mubr.bf16.gmra.mrb[20].mxu0 %v7027_v61  ;;  %3739 = vmatprep.mubr.bf16.mxu1 %v7034_v0  ;;  %v7108_v61 = vld [vmem:[%s7920_s6 + $0x1d8] ss:$72 sps:$4 sm:$0xff]  }
  0x70   : > { %4633 = vmatpush1.bf16.msra.mxu0 %v7028_v62  ;;  %4511 = vmatprep.mubr.bf16.mxu0 %v7036_v1  ;;  %v7112_v62 = vld [vmem:[%s7920_s6 + $0x6c4] ss:$72 sps:$4 sm:$0xff]   ;;  %v7145_v0 = vld [vmem:[%s9323_s1 + $0x660] ss:$8 sps:$4 sm:$0xff]   ;;  %v7159_v1 = vld [vmem:[%s9323_s1 + $0x674] ss:$8 sps:$4 sm:$0xff]  }
  0x71   : > { %4634 = vmatprep.subr.bf16.mxu0 %v7033_v63  ;;  %3861 = vmatpush1.bf16.msra.mxu1 %v7093_v15  ;;  %v7114_v63 = vld [vmem:[%s7920_s6 + $0x26c] ss:$72 sps:$4 sm:$0xff]   ;;  %v7132_v13 = vld [vmem:[%s7920_s6 + $0x2f8] ss:$72 sps:$4 sm:$0xff]  }
  0x72   : > { %3862 = vmatprep.subr.bf16.mxu1 %v7107_v16  ;;  %v7138_v15 = vld [vmem:[%s7920_s6 + $0x38c] ss:$72 sps:$4 sm:$0xff]   ;;  %v7193_v16 = vld [vmem:[%s9323_s1 + $0x6a0] ss:$8 sps:$4 sm:$0xff]  }
  0x74   : > { %4635 = vmatpush1.bf16.msra.mxu0 %v7031_v4  ;;  %v7171_v4 = vld [vmem:[%s9323_s1 + $0x684] ss:$8 sps:$4 sm:$0xff]  }
  0x75   : > { %4636 = vmatprep.subr.bf16.mxu0 %v7045_v6  ;;  %3863 = vmatpush1.bf16.msra.mxu1 %v7105_v24  ;;  %v7124_v6 = vld [vmem:[%s7920_s6 + $0x754] ss:$72 sps:$4 sm:$0xff]   ;;  %v7217_v24 = vld [vmem:[%s9323_s1 + $0x6c0] ss:$8 sps:$4 sm:$0xff]  }
  0x76   : > { %3740 = vmatmul.mubr.bf16.gmra.mrb[24].mxu1 %v7038_v5  ;;  %3864 = vmatprep.subr.bf16.mxu1 %v7119_v25  ;;  %v7120_v5 = vld [vmem:[%s7920_s6 + $0x268] ss:$72 sps:$4 sm:$0xff]   ;;  %v7231_v25 = vld [vmem:[%s9323_s1 + $0x6d4] ss:$8 sps:$4 sm:$0xff]  }
  0x77   : > { %4512 = vmatmul.mubr.bf16.gmra.mrb[24].mxu0 %v7042_v7  ;;  %3749 = vmatprep.mubr.bf16.mxu1 %v7049_v11  ;;  %v7126_v7 = vld [vmem:[%s7920_s6 + $0x2fc] ss:$72 sps:$4 sm:$0xff]  }
  0x78   : > { %4637 = vmatpush1.bf16.msra.mxu0 %v7043_v9  ;;  %4521 = vmatprep.mubr.bf16.mxu0 %v7051_v12  ;;  %v7183_v9 = vld [vmem:[%s9323_s1 + $0x694] ss:$8 sps:$4 sm:$0xff]   ;;  %v7195_v11 = vld [vmem:[%s9323_s1 + $0x6a4] ss:$8 sps:$4 sm:$0xff]   ;;  %v7128_v12 = vld [vmem:[%s7920_s6 + $0x750] ss:$72 sps:$4 sm:$0xff]  }
  0x79   : > { %4638 = vmatprep.subr.bf16.mxu0 %v7048_v10  ;;  %3865 = vmatpush1.bf16.msra.mxu1 %v7117_v30  ;;  %v7181_v10 = vld [vmem:[%s9323_s1 + $0x690] ss:$8 sps:$4 sm:$0xff]   ;;  %v7162_v30 = vld [vmem:[%s7920_s6 + $0xc] ss:$72 sps:$4 sm:$0xff]  }
  0x7a   : > { %3866 = vmatprep.subr.bf16.mxu1 %v7131_v35  ;;  %v7253_v35 = vld [vmem:[%s9323_s1 + $0x6f0] ss:$8 sps:$4 sm:$0xff]  }
  0x7c   : > { %4639 = vmatpush1.bf16.msra.mxu0 %v7046_v14  ;;  %v7136_v14 = vld [vmem:[%s7920_s6 + $0x7e4] ss:$72 sps:$4 sm:$0xff]  }
  0x7d   : > { %4640 = vmatprep.subr.bf16.mxu0 %v7060_v17  ;;  %3867 = vmatpush1.bf16.msra.mxu1 %v7129_v37  ;;  %v7207_v17 = vld [vmem:[%s9323_s1 + $0x6b4] ss:$8 sps:$4 sm:$0xff]   ;;  %v7267_v37 = vld [vmem:[%s9323_s1 + $0x704] ss:$8 sps:$4 sm:$0xff]  }
  0x7e   : > { %3750 = vmatmul.mubr.bf16.gmra.mrb[28].mxu1 %v7053_v18  ;;  %3868 = vmatprep.subr.bf16.mxu1 %v7143_v38  ;;  %v7205_v18 = vld [vmem:[%s9323_s1 + $0x6b0] ss:$8 sps:$4 sm:$0xff]  }
  0x7f   : > { %4522 = vmatmul.mubr.bf16.gmra.mrb[28].mxu0 %v7057_v19  ;;  %3759 = vmatprep.mubr.bf16.mxu1 %v7064_v22  ;;  %v7140_v19 = vld [vmem:[%s7920_s6 + $0x7e0] ss:$72 sps:$4 sm:$0xff]   ;;  %v7148_v22 = vld [vmem:[%s7920_s6 + $0x874] ss:$72 sps:$4 sm:$0xff]  }
  0x80   : > { %4641 = vmatpush1.bf16.msra.mxu0 %v7058_v20  ;;  %4644 = vmatprep.mubr.bf16.mxu0 %v7068_v23  ;;  %v7219_v20 = vld [vmem:[%s9323_s1 + $0x6c4] ss:$8 sps:$4 sm:$0xff]   ;;  %v7168_v38 = vld [vmem:[%s7920_s6 + $0x4a8] ss:$72 sps:$4 sm:$0xff]  }
  0x81   : > { %4642 = vmatprep.subr.bf16.mxu0 %v7063_v21  ;;  %3869 = vmatpush1.bf16.msra.mxu1 %v7141_v45  ;;  %v7144_v21 = vld [vmem:[%s7920_s6 + $0x388] ss:$72 sps:$4 sm:$0xff]   ;;  %v7150_v23 = vld [vmem:[%s7920_s6 + $0x41c] ss:$72 sps:$4 sm:$0xff]   ;;  %v7180_v45 = vld [vmem:[%s7920_s6 + $0x538] ss:$72 sps:$4 sm:$0xff]  }
  0x82   : > { %3870 = vmatprep.subr.bf16.mxu1 %v7155_v47  ;;  %v7186_v47 = vld [vmem:[%s7920_s6 + $0x5cc] ss:$72 sps:$4 sm:$0xff]  }
  0x84   : > { %4643 = vmatpush1.bf16.msra.mxu0 %v7061_v26  ;;  %v7229_v26 = vld [vmem:[%s9323_s1 + $0x6d0] ss:$8 sps:$4 sm:$0xff]  }
  0x85   : > { %4805 = vmatprep.subr.bf16.mxu0 %v7075_v28  ;;  %3871 = vmatpush1.bf16.msra.mxu1 %v7153_v50  ;;  %v7152_v28 = vld [vmem:[%s7920_s6 + $0x870] ss:$72 sps:$4 sm:$0xff]  }
  0x86   : > { %3760 = vmatmul.mubr.bf16.gmra.mrb[32].mxu1 %v7069_v29  ;;  %4033 = vmatprep.subr.bf16.mxu1 %v7167_v52  ;;  %v7156_v29 = vld [vmem:[%s7920_s6 + $0x418] ss:$72 sps:$4 sm:$0xff]   ;;  %v7215_v52 = vld [vmem:[%s9323_s1 + $0x244] ss:$8 sps:$4 sm:$0xff]  }
  0x87   : > { %4645 = vmatmul.mubr.bf16.vlgmr.msra.gmra.mrb[0].mxu0 %v7066_v27  ;;  %3769 = vmatprep.mubr.bf16.mxu1 %v7076_v32  ;;  %v7243_v27 = vld [vmem:[%s9323_s1 + $0x6e4] ss:$8 sps:$4 sm:$0xff]   ;;  %v7241_v32 = vld [vmem:[%s9323_s1 + $0x6e0] ss:$8 sps:$4 sm:$0xff]   ;;  %v7201_v50 = vld [vmem:[%s9323_s1 + $0x230] ss:$8 sps:$4 sm:$0xff]  }
  0x88   : > { %4806 = vmatpush1.bf16.msra.mxu0 %v7073_v31  ;;  %4654 = vmatprep.mubr.bf16.mxu0 %v7078_v33  ;;  %v7163_v31 = vld [vmem:[%s7920_s6 + $0x4ac] ss:$72 sps:$4 sm:$0xff]  }
  0x89   : > { %4807 = vmatprep.subr.bf16.mxu0 %v7087_v34  ;;  %v7255_v33 = vld [vmem:[%s9323_s1 + $0x6f4] ss:$8 sps:$4 sm:$0xff]   ;;  %v7160_v34 = vld [vmem:[%s7920_s6 + $0x8] ss:$72 sps:$4 sm:$0xff]  }
  0x8c   : > { %4808 = vmatpush1.bf16.msra.mxu0 %v7085_v36  ;;  %v7165_v36 = vld [vmem:[%s9323_s1 + $0x200] ss:$8 sps:$4 sm:$0xff]  }
  0x8d   : > { %4809 = vmatprep.subr.bf16.mxu0 %v7099_v39  ;;  %v7172_v39 = vld [vmem:[%s7920_s6 + $0x9c] ss:$72 sps:$4 sm:$0xff]  }
  0x8e   : > { %3770 = vmatmul.mubr.bf16.gmra.mrb[36].mxu1 %v7080_v40  ;;  %v7174_v40 = vld [vmem:[%s7920_s6 + $0x53c] ss:$72 sps:$4 sm:$0xff]  }
  0x8f   : > { %4655 = vmatmul.mubr.bf16.gmra.mrb[4].mxu0 %v7084_v41  ;;  %3779 = vmatprep.mubr.bf16.mxu1 %v7088_v42  ;;  %v7179_v41 = vld [vmem:[%s9323_s1 + $0x214] ss:$8 sps:$4 sm:$0xff]   ;;  %v7177_v42 = vld [vmem:[%s9323_s1 + $0x210] ss:$8 sps:$4 sm:$0xff]  }
  0x90   : > { %4664 = vmatprep.mubr.bf16.mxu0 %v7090_v43  ;;  %4810 = vmatpush1.bf16.msra.mxu0 %v7097_v44  ;;  %v7191_v43 = vld [vmem:[%s9323_s1 + $0x224] ss:$8 sps:$4 sm:$0xff]   ;;  %v7176_v44 = vld [vmem:[%s7920_s6 + $0x98] ss:$72 sps:$4 sm:$0xff]  }
  0x91   : > { %4811 = vmatprep.subr.bf16.mxu0 %v7111_v46  ;;  %v7184_v46 = vld [vmem:[%s7920_s6 + $0x12c] ss:$72 sps:$4 sm:$0xff]  }
  0x94   : > { %4812 = vmatpush1.bf16.msra.mxu0 %v7109_v48  ;;  %v7189_v48 = vld [vmem:[%s9323_s1 + $0x220] ss:$8 sps:$4 sm:$0xff]  }
  0x95   : > { %4813 = vmatprep.subr.bf16.mxu0 %v7123_v51  ;;  %v7188_v51 = vld [vmem:[%s7920_s6 + $0x128] ss:$72 sps:$4 sm:$0xff]  }
  0x96   : > { %3780 = vmatmul.mubr.bf16.gmra.mrb[40].mxu1 %v7092_v49  ;;  %v7203_v49 = vld [vmem:[%s9323_s1 + $0x234] ss:$8 sps:$4 sm:$0xff]  }
  0x97   : > { %4665 = vmatmul.mubr.bf16.gmra.mrb[8].mxu0 %v7096_v53  ;;  %3789 = vmatprep.mubr.bf16.mxu1 %v7100_v54  ;;  %v7192_v53 = vld [vmem:[%s7920_s6 + $0x5c8] ss:$72 sps:$4 sm:$0xff]   ;;  %v7196_v54 = vld [vmem:[%s7920_s6 + $0x1bc] ss:$72 sps:$4 sm:$0xff]  }
  0x98   : > { %4674 = vmatprep.mubr.bf16.mxu0 %v7102_v55  ;;  %4814 = vmatpush1.bf16.msra.mxu0 %v7121_v56  ;;  %v7198_v55 = vld [vmem:[%s7920_s6 + $0x65c] ss:$72 sps:$4 sm:$0xff]   ;;  %v7213_v56 = vld [vmem:[%s9323_s1 + $0x240] ss:$8 sps:$4 sm:$0xff]  }
  0x99   : > { %4815 = vmatprep.subr.bf16.mxu0 %v7135_v57  ;;  %v7227_v57 = vld [vmem:[%s9323_s1 + $0x254] ss:$8 sps:$4 sm:$0xff]  }
  0x9c   : > { %4816 = vmatpush1.bf16.msra.mxu0 %v7133_v58  ;;  %v7225_v58 = vld [vmem:[%s9323_s1 + $0x250] ss:$8 sps:$4 sm:$0xff]  }
  0x9d   : > { %4817 = vmatprep.subr.bf16.mxu0 %v7147_v59  ;;  %v7239_v59 = vld [vmem:[%s9323_s1 + $0x264] ss:$8 sps:$4 sm:$0xff]  }
  0x9e   : > { %3790 = vmatmul.mubr.bf16.gmra.mrb[44].mxu1 %v7104_v60  ;;  %v7200_v60 = vld [vmem:[%s7920_s6 + $0x1b8] ss:$72 sps:$4 sm:$0xff]  }
  0x9f   : > { %4675 = vmatmul.mubr.bf16.gmra.mrb[12].mxu0 %v7108_v61  ;;  %3799 = vmatprep.mubr.bf16.mxu1 %v7112_v62  ;;  %v7204_v61 = vld [vmem:[%s7920_s6 + $0x658] ss:$72 sps:$4 sm:$0xff]   ;;  %v7208_v62 = vld [vmem:[%s7920_s6 + $0x24c] ss:$72 sps:$4 sm:$0xff]  }
  0xa0   : > { %4684 = vmatprep.mubr.bf16.mxu0 %v7114_v63  ;;  %4818 = vmatpush1.bf16.msra.mxu0 %v7145_v0  ;;  %v7210_v63 = vld [vmem:[%s7920_s6 + $0x6ec] ss:$72 sps:$4 sm:$0xff]   ;;  %v7237_v0 = vld [vmem:[%s9323_s1 + $0x260] ss:$8 sps:$4 sm:$0xff]  }
  0xa1   : > { %4819 = vmatprep.subr.bf16.mxu0 %v7159_v1  ;;  %v7251_v1 = vld [vmem:[%s9323_s1 + $0x274] ss:$8 sps:$4 sm:$0xff]  }
  0xa4   : > { %4820 = vmatpush1.bf16.msra.mxu0 %v7157_v2  ;;  %v7249_v2 = vld [vmem:[%s9323_s1 + $0x270] ss:$8 sps:$4 sm:$0xff]  }
  0xa5   : > { %4821 = vmatprep.subr.bf16.mxu0 %v7171_v4  ;;  %v7264_v4 = vld [vmem:[%s9323_s1 + $0x284] ss:$8 sps:$4 sm:$0xff]  }
  0xa6   : > { %3800 = vmatmul.mubr.bf16.gmra.mrb[48].mxu1 %v7116_v3  ;;  %v7212_v3 = vld [vmem:[%s7920_s6 + $0x248] ss:$72 sps:$4 sm:$0xff]  }
  0xa7   : > { %4685 = vmatmul.mubr.bf16.gmra.mrb[16].mxu0 %v7120_v5  ;;  %3809 = vmatprep.mubr.bf16.mxu1 %v7124_v6  ;;  %v7216_v5 = vld [vmem:[%s7920_s6 + $0x6e8] ss:$72 sps:$4 sm:$0xff]   ;;  %v7220_v6 = vld [vmem:[%s7920_s6 + $0x2dc] ss:$72 sps:$4 sm:$0xff]  }
  0xa8   : > { %4694 = vmatprep.mubr.bf16.mxu0 %v7126_v7  ;;  %4822 = vmatpush1.bf16.msra.mxu0 %v7169_v8  ;;  %v7222_v7 = vld [vmem:[%s7920_s6 + $0x77c] ss:$72 sps:$4 sm:$0xff]   ;;  %v7262_v8 = vld [vmem:[%s9323_s1 + $0x280] ss:$8 sps:$4 sm:$0xff]  }
  0xa9   : > { %4823 = vmatprep.subr.bf16.mxu0 %v7183_v9  ;;  %v7275_v9 = vld [vmem:[%s9323_s1 + $0x294] ss:$8 sps:$4 sm:$0xff]  }
  0xac   : > { %4824 = vmatpush1.bf16.msra.mxu0 %v7181_v10  ;;  %v7273_v10 = vld [vmem:[%s9323_s1 + $0x290] ss:$8 sps:$4 sm:$0xff]  }
  0xad   : > { %4825 = vmatprep.subr.bf16.mxu0 %v7195_v11  ;;  %v7287_v11 = vld [vmem:[%s9323_s1 + $0x2a4] ss:$8 sps:$4 sm:$0xff]  }
  0xae   : > { %3810 = vmatmul.mubr.bf16.gmra.mrb[52].mxu1 %v7128_v12  ;;  %v7224_v12 = vld [vmem:[%s7920_s6 + $0x2d8] ss:$72 sps:$4 sm:$0xff]  }
  0xaf   : > { %4695 = vmatmul.mubr.bf16.gmra.mrb[20].mxu0 %v7132_v13  ;;  %3819 = vmatprep.mubr.bf16.mxu1 %v7136_v14  ;;  %v7228_v13 = vld [vmem:[%s7920_s6 + $0x778] ss:$72 sps:$4 sm:$0xff]   ;;  %v7232_v14 = vld [vmem:[%s7920_s6 + $0x36c] ss:$72 sps:$4 sm:$0xff]  }
  0xb0   : > { %4704 = vmatprep.mubr.bf16.mxu0 %v7138_v15  ;;  %4826 = vmatpush1.bf16.msra.mxu0 %v7193_v16  ;;  %v7234_v15 = vld [vmem:[%s7920_s6 + $0x80c] ss:$72 sps:$4 sm:$0xff]   ;;  %v7285_v16 = vld [vmem:[%s9323_s1 + $0x2a0] ss:$8 sps:$4 sm:$0xff]  }
  0xb1   : > { %4827 = vmatprep.subr.bf16.mxu0 %v7207_v17  ;;  %v7299_v17 = vld [vmem:[%s9323_s1 + $0x2b4] ss:$8 sps:$4 sm:$0xff]  }
  0xb4   : > { %4828 = vmatpush1.bf16.msra.mxu0 %v7205_v18  ;;  %v7297_v18 = vld [vmem:[%s9323_s1 + $0x2b0] ss:$8 sps:$4 sm:$0xff]  }
  0xb5   : > { %4829 = vmatprep.subr.bf16.mxu0 %v7219_v20  ;;  %v7311_v20 = vld [vmem:[%s9323_s1 + $0x2c4] ss:$8 sps:$4 sm:$0xff]  }
  0xb6   : > { %3820 = vmatmul.mubr.bf16.gmra.mrb[56].mxu1 %v7140_v19  ;;  %v7236_v19 = vld [vmem:[%s7920_s6 + $0x368] ss:$72 sps:$4 sm:$0xff]  }
  0xb7   : > { %4705 = vmatmul.mubr.bf16.gmra.mrb[24].mxu0 %v7144_v21  ;;  %3829 = vmatprep.mubr.bf16.mxu1 %v7148_v22  ;;  %v7240_v21 = vld [vmem:[%s7920_s6 + $0x808] ss:$72 sps:$4 sm:$0xff]   ;;  %v7244_v22 = vld [vmem:[%s7920_s6 + $0x3fc] ss:$72 sps:$4 sm:$0xff]  }
  0xb8   : > { %4714 = vmatprep.mubr.bf16.mxu0 %v7150_v23  ;;  %4830 = vmatpush1.bf16.msra.mxu0 %v7217_v24  ;;  %v7246_v23 = vld [vmem:[%s7920_s6 + $0x89c] ss:$72 sps:$4 sm:$0xff]   ;;  %v7309_v24 = vld [vmem:[%s9323_s1 + $0x2c0] ss:$8 sps:$4 sm:$0xff]  }
  0xb9   : > { %4831 = vmatprep.subr.bf16.mxu0 %v7231_v25  ;;  %v7323_v25 = vld [vmem:[%s9323_s1 + $0x2d4] ss:$8 sps:$4 sm:$0xff]  }
  0xbc   : > { %4832 = vmatpush1.bf16.msra.mxu0 %v7229_v26  ;;  %v7321_v26 = vld [vmem:[%s9323_s1 + $0x2d0] ss:$8 sps:$4 sm:$0xff]  }
  0xbd   : > { %4833 = vmatprep.subr.bf16.mxu0 %v7243_v27  ;;  %v7335_v27 = vld [vmem:[%s9323_s1 + $0x2e4] ss:$8 sps:$4 sm:$0xff]  }
  0xbe   : > { %3830 = vmatmul.mubr.bf16.gmra.mrb[60].mxu1 %v7152_v28  ;;  %v7248_v28 = vld [vmem:[%s7920_s6 + $0x3f8] ss:$72 sps:$4 sm:$0xff]  }
  0xbf   : > { %4715 = vmatmul.mubr.bf16.gmra.mrb[28].mxu0 %v7156_v29  ;;  %3872 = vmatprep.mubr.bf16.mxu1 %v7162_v30  ;;  %v7252_v29 = vld [vmem:[%s7920_s6 + $0x898] ss:$72 sps:$4 sm:$0xff]   ;;  %v7256_v30 = vld [vmem:[%s7920_s6 + $0x48c] ss:$72 sps:$4 sm:$0xff]  }
  0xc0   : > { %4724 = vmatprep.mubr.bf16.mxu0 %v7163_v31  ;;  %4834 = vmatpush1.bf16.msra.mxu0 %v7241_v32  ;;  %v7260_v31 = vld [vmem:[%s7920_s6 + $0x34] ss:$72 sps:$4 sm:$0xff]   ;;  %v7333_v32 = vld [vmem:[%s9323_s1 + $0x2e0] ss:$8 sps:$4 sm:$0xff]  }
  0xc1   : > { %4835 = vmatprep.subr.bf16.mxu0 %v7255_v33  ;;  %v7347_v33 = vld [vmem:[%s9323_s1 + $0x2f4] ss:$8 sps:$4 sm:$0xff]  }
  0xc4   : > { %4836 = vmatpush1.bf16.msra.mxu0 %v7253_v35  ;;  %v7345_v35 = vld [vmem:[%s9323_s1 + $0x2f0] ss:$8 sps:$4 sm:$0xff]  }
  0xc5   : > { %4998 = vmatprep.subr.bf16.mxu0 %v7267_v37  ;;  %v7359_v37 = vld [vmem:[%s9323_s1 + $0x304] ss:$8 sps:$4 sm:$0xff]  }
  0xc6   : > { %3873 = vmatmul.mubr.bf16.vlgmr.msra.gmra.mrb[0].mxu1 %v7160_v34  ;;  %v7258_v34 = vld [vmem:[%s7920_s6 + $0x30] ss:$72 sps:$4 sm:$0xff]  }
  0xc7   : > { %4725 = vmatmul.mubr.bf16.gmra.mrb[32].mxu0 %v7168_v38  ;;  %4034 = vmatpush1.bf16.msra.mxu1 %v7165_v36  ;;  %v7261_v36 = vld [vmem:[%s7920_s6 + $0x488] ss:$72 sps:$4 sm:$0xff]  }
  0xc8   : > { %3882 = vmatprep.mubr.bf16.mxu1 %v7172_v39  ;;  %4734 = vmatprep.mubr.bf16.mxu0 %v7174_v40  ;;  %v7265_v38 = vld [vmem:[%s9323_s1 + $0x700] ss:$8 sps:$4 sm:$0xff]   ;;  %v7268_v39 = vld [vmem:[%s7920_s6 + $0x51c] ss:$72 sps:$4 sm:$0xff]  }
  0xc9   : > { %4035 = vmatprep.subr.bf16.mxu1 %v7179_v41  ;;  %v7270_v40 = vld [vmem:[%s7920_s6 + $0xc4] ss:$72 sps:$4 sm:$0xff]   ;;  %v7279_v41 = vld [vmem:[%s9323_s1 + $0x714] ss:$8 sps:$4 sm:$0xff]  }
  0xcb   : > { %4036 = vmatpush1.bf16.msra.mxu1 %v7177_v42  ;;  %v7277_v42 = vld [vmem:[%s9323_s1 + $0x710] ss:$8 sps:$4 sm:$0xff]  }
  0xcc   : > { %4037 = vmatprep.subr.bf16.mxu1 %v7191_v43  ;;  %v7291_v43 = vld [vmem:[%s9323_s1 + $0x724] ss:$8 sps:$4 sm:$0xff]  }
  0xce   : > { %3883 = vmatmul.mubr.bf16.gmra.mrb[4].mxu1 %v7176_v44  ;;  %v7272_v44 = vld [vmem:[%s7920_s6 + $0x518] ss:$72 sps:$4 sm:$0xff]  }
  0xcf   : > { %4735 = vmatmul.mubr.bf16.gmra.mrb[36].mxu0 %v7180_v45  ;;  %3892 = vmatprep.mubr.bf16.mxu1 %v7184_v46  ;;  %v7276_v45 = vld [vmem:[%s7920_s6 + $0xc0] ss:$72 sps:$4 sm:$0xff]   ;;  %v7280_v46 = vld [vmem:[%s7920_s6 + $0x5ac] ss:$72 sps:$4 sm:$0xff]  }
  0xd0   : > { %4744 = vmatprep.mubr.bf16.mxu0 %v7186_v47  ;;  %4038 = vmatpush1.bf16.msra.mxu1 %v7189_v48  ;;  %v7282_v47 = vld [vmem:[%s7920_s6 + $0x154] ss:$72 sps:$4 sm:$0xff]   ;;  %v7289_v48 = vld [vmem:[%s9323_s1 + $0x720] ss:$8 sps:$4 sm:$0xff]  }
  0xd1   : > { %4039 = vmatprep.subr.bf16.mxu1 %v7203_v49  ;;  %v7303_v49 = vld [vmem:[%s9323_s1 + $0x734] ss:$8 sps:$4 sm:$0xff]  }
  0xd4   : > { %4040 = vmatpush1.bf16.msra.mxu1 %v7201_v50  ;;  %v7301_v50 = vld [vmem:[%s9323_s1 + $0x730] ss:$8 sps:$4 sm:$0xff]  }
  0xd5   : > { %4041 = vmatprep.subr.bf16.mxu1 %v7215_v52  ;;  %v7315_v52 = vld [vmem:[%s9323_s1 + $0x744] ss:$8 sps:$4 sm:$0xff]  }
  0xd6   : > { %3893 = vmatmul.mubr.bf16.gmra.mrb[8].mxu1 %v7188_v51  ;;  %v7284_v51 = vld [vmem:[%s7920_s6 + $0x5a8] ss:$72 sps:$4 sm:$0xff]  }
  0xd7   : > { %4745 = vmatmul.mubr.bf16.gmra.mrb[40].mxu0 %v7192_v53  ;;  %3902 = vmatprep.mubr.bf16.mxu1 %v7196_v54  ;;  %v7288_v53 = vld [vmem:[%s7920_s6 + $0x150] ss:$72 sps:$4 sm:$0xff]   ;;  %v7292_v54 = vld [vmem:[%s7920_s6 + $0x63c] ss:$72 sps:$4 sm:$0xff]  }
  0xd8   : > { %4754 = vmatprep.mubr.bf16.mxu0 %v7198_v55  ;;  %4042 = vmatpush1.bf16.msra.mxu1 %v7213_v56  ;;  %v7294_v55 = vld [vmem:[%s7920_s6 + $0x1e4] ss:$72 sps:$4 sm:$0xff]   ;;  %v7313_v56 = vld [vmem:[%s9323_s1 + $0x740] ss:$8 sps:$4 sm:$0xff]  }
  0xd9   : > { %4043 = vmatprep.subr.bf16.mxu1 %v7227_v57  ;;  %v7327_v57 = vld [vmem:[%s9323_s1 + $0x754] ss:$8 sps:$4 sm:$0xff]  }
  0xdc   : > { %4044 = vmatpush1.bf16.msra.mxu1 %v7225_v58  ;;  %v7325_v58 = vld [vmem:[%s9323_s1 + $0x750] ss:$8 sps:$4 sm:$0xff]  }
  0xdd   : > { %4045 = vmatprep.subr.bf16.mxu1 %v7239_v59  ;;  %v7339_v59 = vld [vmem:[%s9323_s1 + $0x764] ss:$8 sps:$4 sm:$0xff]  }
  0xde   : > { %3903 = vmatmul.mubr.bf16.gmra.mrb[12].mxu1 %v7200_v60  ;;  %v7296_v60 = vld [vmem:[%s7920_s6 + $0x638] ss:$72 sps:$4 sm:$0xff]  }
  0xdf   : > { %4755 = vmatmul.mubr.bf16.gmra.mrb[44].mxu0 %v7204_v61  ;;  %3912 = vmatprep.mubr.bf16.mxu1 %v7208_v62  ;;  %v7300_v61 = vld [vmem:[%s7920_s6 + $0x1e0] ss:$72 sps:$4 sm:$0xff]   ;;  %v7304_v62 = vld [vmem:[%s7920_s6 + $0x6cc] ss:$72 sps:$4 sm:$0xff]  }
  0xe0   : > { %4764 = vmatprep.mubr.bf16.mxu0 %v7210_v63  ;;  %4046 = vmatpush1.bf16.msra.mxu1 %v7237_v0  ;;  %v7306_v63 = vld [vmem:[%s7920_s6 + $0x274] ss:$72 sps:$4 sm:$0xff]   ;;  %v7337_v0 = vld [vmem:[%s9323_s1 + $0x760] ss:$8 sps:$4 sm:$0xff]  }
  0xe1   : > { %4047 = vmatprep.subr.bf16.mxu1 %v7251_v1  ;;  %v7351_v1 = vld [vmem:[%s9323_s1 + $0x774] ss:$8 sps:$4 sm:$0xff]  }
  0xe4   : > { %4048 = vmatpush1.bf16.msra.mxu1 %v7249_v2  ;;  %v7349_v2 = vld [vmem:[%s9323_s1 + $0x770] ss:$8 sps:$4 sm:$0xff]  }
  0xe5   : > { %4049 = vmatprep.subr.bf16.mxu1 %v7264_v4  ;;  %v7363_v4 = vld [vmem:[%s9323_s1 + $0x784] ss:$8 sps:$4 sm:$0xff]  }
  0xe6   : > { %3913 = vmatmul.mubr.bf16.gmra.mrb[16].mxu1 %v7212_v3  ;;  %v7308_v3 = vld [vmem:[%s7920_s6 + $0x6c8] ss:$72 sps:$4 sm:$0xff]  }
  0xe7   : > { %4765 = vmatmul.mubr.bf16.gmra.mrb[48].mxu0 %v7216_v5  ;;  %3922 = vmatprep.mubr.bf16.mxu1 %v7220_v6  ;;  %v7312_v5 = vld [vmem:[%s7920_s6 + $0x270] ss:$72 sps:$4 sm:$0xff]   ;;  %v7316_v6 = vld [vmem:[%s7920_s6 + $0x75c] ss:$72 sps:$4 sm:$0xff]  }
  0xe8   : > { %4774 = vmatprep.mubr.bf16.mxu0 %v7222_v7  ;;  %4050 = vmatpush1.bf16.msra.mxu1 %v7262_v8  ;;  %v7318_v7 = vld [vmem:[%s7920_s6 + $0x304] ss:$72 sps:$4 sm:$0xff]   ;;  %v7361_v8 = vld [vmem:[%s9323_s1 + $0x780] ss:$8 sps:$4 sm:$0xff]  }
  0xe9   : > { %4051 = vmatprep.subr.bf16.mxu1 %v7275_v9  ;;  %v7375_v9 = vld [vmem:[%s9323_s1 + $0x794] ss:$8 sps:$4 sm:$0xff]  }
  0xec   : > { %4052 = vmatpush1.bf16.msra.mxu1 %v7273_v10  ;;  %v7320_v10 = vld [vmem:[%s7920_s6 + $0x758] ss:$72 sps:$4 sm:$0xff]  }
  0xed   : > { %4053 = vmatprep.subr.bf16.mxu1 %v7287_v11  ;;  %v7324_v11 = vld [vmem:[%s7920_s6 + $0x300] ss:$72 sps:$4 sm:$0xff]  }
  0xee   : > { %3923 = vmatmul.mubr.bf16.gmra.mrb[20].mxu1 %v7224_v12  ;;  %v7373_v12 = vld [vmem:[%s9323_s1 + $0x790] ss:$8 sps:$4 sm:$0xff]  }
  0xef   : > { %4775 = vmatmul.mubr.bf16.gmra.mrb[52].mxu0 %v7228_v13  ;;  %3932 = vmatprep.mubr.bf16.mxu1 %v7232_v14  ;;  %v7328_v13 = vld [vmem:[%s7920_s6 + $0x7ec] ss:$72 sps:$4 sm:$0xff]  }
  0xf0   : > { %4784 = vmatprep.mubr.bf16.mxu0 %v7234_v15  ;;  %4054 = vmatpush1.bf16.msra.mxu1 %v7285_v16  ;;  %v7387_v14 = vld [vmem:[%s9323_s1 + $0x7a4] ss:$8 sps:$4 sm:$0xff]   ;;  %v7330_v15 = vld [vmem:[%s7920_s6 + $0x394] ss:$72 sps:$4 sm:$0xff]   ;;  %v7385_v16 = vld [vmem:[%s9323_s1 + $0x7a0] ss:$8 sps:$4 sm:$0xff]  }
  0xf1   : > { %4055 = vmatprep.subr.bf16.mxu1 %v7299_v17  ;;  %v7399_v17 = vld [vmem:[%s9323_s1 + $0x7b4] ss:$8 sps:$4 sm:$0xff]  }
  0xf4   : > { %4056 = vmatpush1.bf16.msra.mxu1 %v7297_v18  ;;  %v7397_v18 = vld [vmem:[%s9323_s1 + $0x7b0] ss:$8 sps:$4 sm:$0xff]  }
  0xf5   : > { %4057 = vmatprep.subr.bf16.mxu1 %v7311_v20  ;;  %v7336_v20 = vld [vmem:[%s7920_s6 + $0x390] ss:$72 sps:$4 sm:$0xff]  }
  0xf6   : > { %3933 = vmatmul.mubr.bf16.gmra.mrb[24].mxu1 %v7236_v19  ;;  %v7332_v19 = vld [vmem:[%s7920_s6 + $0x7e8] ss:$72 sps:$4 sm:$0xff]  }
  0xf7   : > { %4785 = vmatmul.mubr.bf16.gmra.mrb[56].mxu0 %v7240_v21  ;;  %3942 = vmatprep.mubr.bf16.mxu1 %v7244_v22  ;;  %v7411_v21 = vld [vmem:[%s9323_s1 + $0x7c4] ss:$8 sps:$4 sm:$0xff]  }
  0xf8   : > { %4794 = vmatprep.mubr.bf16.mxu0 %v7246_v23  ;;  %4058 = vmatpush1.bf16.msra.mxu1 %v7309_v24  ;;  %v7340_v22 = vld [vmem:[%s7920_s6 + $0x87c] ss:$72 sps:$4 sm:$0xff]   ;;  %v7409_v24 = vld [vmem:[%s9323_s1 + $0x7c0] ss:$8 sps:$4 sm:$0xff]  }
  0xf9   : > { %4059 = vmatprep.subr.bf16.mxu1 %v7323_v25  ;;  %v7342_v23 = vld [vmem:[%s7920_s6 + $0x424] ss:$72 sps:$4 sm:$0xff]   ;;  %v7423_v25 = vld [vmem:[%s9323_s1 + $0x7d4] ss:$8 sps:$4 sm:$0xff]  }
  0xfc   : > { %4060 = vmatpush1.bf16.msra.mxu1 %v7321_v26  ;;  %v7421_v26 = vld [vmem:[%s9323_s1 + $0x7d0] ss:$8 sps:$4 sm:$0xff]  }
  0xfd   : > { %4061 = vmatprep.subr.bf16.mxu1 %v7335_v27  ;;  %v7344_v27 = vld [vmem:[%s7920_s6 + $0x878] ss:$72 sps:$4 sm:$0xff]  }
  0xfe   : > { %3943 = vmatmul.mubr.bf16.gmra.mrb[28].mxu1 %v7248_v28  ;;  %v7348_v28 = vld [vmem:[%s7920_s6 + $0x420] ss:$72 sps:$4 sm:$0xff]  }
  0xff   : > { %4795 = vmatmul.mubr.bf16.gmra.mrb[60].mxu0 %v7252_v29  ;;  %3952 = vmatprep.mubr.bf16.mxu1 %v7256_v30  ;;  %v7435_v29 = vld [vmem:[%s9323_s1 + $0x7e4] ss:$8 sps:$4 sm:$0xff]   ;;  %v7354_v30 = vld [vmem:[%s7920_s6 + $0x14] ss:$72 sps:$4 sm:$0xff]  }
 0x100   : > { %4837 = vmatprep.mubr.bf16.mxu0 %v7260_v31  ;;  %4062 = vmatpush1.bf16.msra.mxu1 %v7333_v32  ;;  %v7355_v31 = vld [vmem:[%s7920_s6 + $0x4b4] ss:$72 sps:$4 sm:$0xff]   ;;  %v7433_v32 = vld [vmem:[%s9323_s1 + $0x7e0] ss:$8 sps:$4 sm:$0xff]  }
 0x101   : > { %4063 = vmatprep.subr.bf16.mxu1 %v7347_v33  ;;  %v7447_v33 = vld [vmem:[%s9323_s1 + $0x7f4] ss:$8 sps:$4 sm:$0xff]  }
 0x104   : > { %4064 = vmatpush1.bf16.msra.mxu1 %v7345_v35  ;;  %v7352_v35 = vld [vmem:[%s7920_s6 + $0x10] ss:$72 sps:$4 sm:$0xff]  }
 0x105   : > { %4226 = vmatprep.subr.bf16.mxu1 %v7359_v37  ;;  %v7459_v37 = vld [vmem:[%s9323_s1 + $0x804] ss:$8 sps:$4 sm:$0xff]  }
 0x106   : > { %3953 = vmatmul.mubr.bf16.gmra.mrb[32].mxu1 %v7261_v36  ;;  %v7360_v36 = vld [vmem:[%s7920_s6 + $0x4b0] ss:$72 sps:$4 sm:$0xff]  }
 0x107   : > { %4838 = vmatmul.mubr.bf16.vlgmr.msra.gmra.mrb[0].mxu0 %v7258_v34  ;;  %3962 = vmatprep.mubr.bf16.mxu1 %v7268_v39  ;;  %v7445_v34 = vld [vmem:[%s9323_s1 + $0x7f0] ss:$8 sps:$4 sm:$0xff]   ;;  %v7364_v39 = vld [vmem:[%s7920_s6 + $0xa4] ss:$72 sps:$4 sm:$0xff]  }
 0x108   : > { %4999 = vmatpush1.bf16.msra.mxu0 %v7265_v38  ;;  %4847 = vmatprep.mubr.bf16.mxu0 %v7270_v40  ;;  %v7357_v38 = vld [vmem:[%s9323_s1 + $0x300] ss:$8 sps:$4 sm:$0xff]   ;;  %v7366_v40 = vld [vmem:[%s7920_s6 + $0x544] ss:$72 sps:$4 sm:$0xff]  }
 0x109   : > { %5000 = vmatprep.subr.bf16.mxu0 %v7279_v41  ;;  %v7371_v41 = vld [vmem:[%s9323_s1 + $0x314] ss:$8 sps:$4 sm:$0xff]  }
 0x10c   : > { %5001 = vmatpush1.bf16.msra.mxu0 %v7277_v42  ;;  %v7369_v42 = vld [vmem:[%s9323_s1 + $0x310] ss:$8 sps:$4 sm:$0xff]  }
 0x10d   : > { %5002 = vmatprep.subr.bf16.mxu0 %v7291_v43  ;;  %v7368_v43 = vld [vmem:[%s7920_s6 + $0xa0] ss:$72 sps:$4 sm:$0xff]  }
 0x10e   : > { %3963 = vmatmul.mubr.bf16.gmra.mrb[36].mxu1 %v7272_v44  ;;  %v7372_v44 = vld [vmem:[%s7920_s6 + $0x540] ss:$72 sps:$4 sm:$0xff]  }
 0x10f   : > { %4848 = vmatmul.mubr.bf16.gmra.mrb[4].mxu0 %v7276_v45  ;;  %3972 = vmatprep.mubr.bf16.mxu1 %v7280_v46  ;;  %v7383_v45 = vld [vmem:[%s9323_s1 + $0x324] ss:$8 sps:$4 sm:$0xff]   ;;  %v7376_v46 = vld [vmem:[%s7920_s6 + $0x134] ss:$72 sps:$4 sm:$0xff]  }
 0x110   : > { %4857 = vmatprep.mubr.bf16.mxu0 %v7282_v47  ;;  %5003 = vmatpush1.bf16.msra.mxu0 %v7289_v48  ;;  %v7378_v47 = vld [vmem:[%s7920_s6 + $0x5d4] ss:$72 sps:$4 sm:$0xff]   ;;  %v7381_v48 = vld [vmem:[%s9323_s1 + $0x320] ss:$8 sps:$4 sm:$0xff]  }
 0x111   : > { %5004 = vmatprep.subr.bf16.mxu0 %v7303_v49  ;;  %v7395_v49 = vld [vmem:[%s9323_s1 + $0x334] ss:$8 sps:$4 sm:$0xff]  }
 0x114   : > { %5005 = vmatpush1.bf16.msra.mxu0 %v7301_v50  ;;  %v7393_v50 = vld [vmem:[%s9323_s1 + $0x330] ss:$8 sps:$4 sm:$0xff]  }
 0x115   : > { %5006 = vmatprep.subr.bf16.mxu0 %v7315_v52  ;;  %v7380_v52 = vld [vmem:[%s7920_s6 + $0x130] ss:$72 sps:$4 sm:$0xff]  }
 0x116   : > { %3973 = vmatmul.mubr.bf16.gmra.mrb[40].mxu1 %v7284_v51  ;;  %v7407_v51 = vld [vmem:[%s9323_s1 + $0x344] ss:$8 sps:$4 sm:$0xff]  }
 0x117   : > { %4858 = vmatmul.mubr.bf16.gmra.mrb[8].mxu0 %v7288_v53  ;;  %3982 = vmatprep.mubr.bf16.mxu1 %v7292_v54  ;;  %v7384_v53 = vld [vmem:[%s7920_s6 + $0x5d0] ss:$72 sps:$4 sm:$0xff]   ;;  %v7388_v54 = vld [vmem:[%s7920_s6 + $0x1c4] ss:$72 sps:$4 sm:$0xff]  }
 0x118   : > { %4867 = vmatprep.mubr.bf16.mxu0 %v7294_v55  ;;  %5007 = vmatpush1.bf16.msra.mxu0 %v7313_v56  ;;  %v7390_v55 = vld [vmem:[%s7920_s6 + $0x664] ss:$72 sps:$4 sm:$0xff]   ;;  %v7405_v56 = vld [vmem:[%s9323_s1 + $0x340] ss:$8 sps:$4 sm:$0xff]  }
 0x119   : > { %5008 = vmatprep.subr.bf16.mxu0 %v7327_v57  ;;  %v7419_v57 = vld [vmem:[%s9323_s1 + $0x354] ss:$8 sps:$4 sm:$0xff]  }
 0x11c   : > { %5009 = vmatpush1.bf16.msra.mxu0 %v7325_v58  ;;  %v7417_v58 = vld [vmem:[%s9323_s1 + $0x350] ss:$8 sps:$4 sm:$0xff]  }
 0x11d   : > { %5010 = vmatprep.subr.bf16.mxu0 %v7339_v59  ;;  %v7431_v59 = vld [vmem:[%s9323_s1 + $0x364] ss:$8 sps:$4 sm:$0xff]  }
 0x11e   : > { %3983 = vmatmul.mubr.bf16.gmra.mrb[44].mxu1 %v7296_v60  ;;  %v7392_v60 = vld [vmem:[%s7920_s6 + $0x1c0] ss:$72 sps:$4 sm:$0xff]  }
 0x11f   : > { %4868 = vmatmul.mubr.bf16.gmra.mrb[12].mxu0 %v7300_v61  ;;  %3992 = vmatprep.mubr.bf16.mxu1 %v7304_v62  ;;  %v7396_v61 = vld [vmem:[%s7920_s6 + $0x660] ss:$72 sps:$4 sm:$0xff]   ;;  %v7400_v62 = vld [vmem:[%s7920_s6 + $0x254] ss:$72 sps:$4 sm:$0xff]  }
 0x120   : > { %4877 = vmatprep.mubr.bf16.mxu0 %v7306_v63  ;;  %5011 = vmatpush1.bf16.msra.mxu0 %v7337_v0  ;;  %v7402_v63 = vld [vmem:[%s7920_s6 + $0x6f4] ss:$72 sps:$4 sm:$0xff]   ;;  %v7429_v0 = vld [vmem:[%s9323_s1 + $0x360] ss:$8 sps:$4 sm:$0xff]  }
 0x121   : > { %5012 = vmatprep.subr.bf16.mxu0 %v7351_v1  ;;  %v7443_v1 = vld [vmem:[%s9323_s1 + $0x374] ss:$8 sps:$4 sm:$0xff]  }
 0x124   : > { %5013 = vmatpush1.bf16.msra.mxu0 %v7349_v2  ;;  %v7441_v2 = vld [vmem:[%s9323_s1 + $0x370] ss:$8 sps:$4 sm:$0xff]  }
 0x125   : > { %5014 = vmatprep.subr.bf16.mxu0 %v7363_v4  ;;  %v7404_v4 = vld [vmem:[%s7920_s6 + $0x250] ss:$72 sps:$4 sm:$0xff]  }
 0x126   : > { %3993 = vmatmul.mubr.bf16.gmra.mrb[48].mxu1 %v7308_v3  ;;  %v7456_v3 = vld [vmem:[%s9323_s1 + $0x384] ss:$8 sps:$4 sm:$0xff]  }
 0x127   : > { %4878 = vmatmul.mubr.bf16.gmra.mrb[16].mxu0 %v7312_v5  ;;  %4002 = vmatprep.mubr.bf16.mxu1 %v7316_v6  ;;  %v7408_v5 = vld [vmem:[%s7920_s6 + $0x6f0] ss:$72 sps:$4 sm:$0xff]   ;;  %v7412_v6 = vld [vmem:[%s7920_s6 + $0x2e4] ss:$72 sps:$4 sm:$0xff]  }
 0x128   : > { %4887 = vmatprep.mubr.bf16.mxu0 %v7318_v7  ;;  %5015 = vmatpush1.bf16.msra.mxu0 %v7361_v8  ;;  %v7414_v7 = vld [vmem:[%s7920_s6 + $0x784] ss:$72 sps:$4 sm:$0xff]   ;;  %v7454_v8 = vld [vmem:[%s9323_s1 + $0x380] ss:$8 sps:$4 sm:$0xff]  }
 0x129   : > { %5016 = vmatprep.subr.bf16.mxu0 %v7375_v9  ;;  %v7467_v9 = vld [vmem:[%s9323_s1 + $0x394] ss:$8 sps:$4 sm:$0xff]  }
 0x12c   : > { %5017 = vmatpush1.bf16.msra.mxu0 %v7373_v12  ;;  %v7416_v12 = vld [vmem:[%s7920_s6 + $0x2e0] ss:$72 sps:$4 sm:$0xff]  }
 0x12d   : > { %5018 = vmatprep.subr.bf16.mxu0 %v7387_v14  ;;  %v7424_v14 = vld [vmem:[%s7920_s6 + $0x374] ss:$72 sps:$4 sm:$0xff]  }
 0x12e   : > { %4003 = vmatmul.mubr.bf16.gmra.mrb[52].mxu1 %v7320_v10  ;;  %v7465_v10 = vld [vmem:[%s9323_s1 + $0x390] ss:$8 sps:$4 sm:$0xff]  }
 0x12f   : > { %4888 = vmatmul.mubr.bf16.gmra.mrb[20].mxu0 %v7324_v11  ;;  %4012 = vmatprep.mubr.bf16.mxu1 %v7328_v13  ;;  %v7479_v11 = vld [vmem:[%s9323_s1 + $0x3a4] ss:$8 sps:$4 sm:$0xff]   ;;  %v7420_v13 = vld [vmem:[%s7920_s6 + $0x780] ss:$72 sps:$4 sm:$0xff]  }
 0x130   : > { %4897 = vmatprep.mubr.bf16.mxu0 %v7330_v15  ;;  %5019 = vmatpush1.bf16.msra.mxu0 %v7385_v16  ;;  %v7426_v15 = vld [vmem:[%s7920_s6 + $0x814] ss:$72 sps:$4 sm:$0xff]   ;;  %v7477_v16 = vld [vmem:[%s9323_s1 + $0x3a0] ss:$8 sps:$4 sm:$0xff]  }
 0x131   : > { %5020 = vmatprep.subr.bf16.mxu0 %v7399_v17  ;;  %v7491_v17 = vld [vmem:[%s9323_s1 + $0x3b4] ss:$8 sps:$4 sm:$0xff]  }
 0x134   : > { %5021 = vmatpush1.bf16.msra.mxu0 %v7397_v18  ;;  %v7489_v18 = vld [vmem:[%s9323_s1 + $0x3b0] ss:$8 sps:$4 sm:$0xff]  }
 0x135   : > { %5022 = vmatprep.subr.bf16.mxu0 %v7411_v21  ;;  %v7432_v21 = vld [vmem:[%s7920_s6 + $0x810] ss:$72 sps:$4 sm:$0xff]  }
 0x136   : > { %4013 = vmatmul.mubr.bf16.gmra.mrb[56].mxu1 %v7332_v19  ;;  %v7503_v19 = vld [vmem:[%s9323_s1 + $0x3c4] ss:$8 sps:$4 sm:$0xff]  }
 0x137   : > { %4898 = vmatmul.mubr.bf16.gmra.mrb[24].mxu0 %v7336_v20  ;;  %4022 = vmatprep.mubr.bf16.mxu1 %v7340_v22  ;;  %v7428_v20 = vld [vmem:[%s7920_s6 + $0x370] ss:$72 sps:$4 sm:$0xff]   ;;  %v7436_v22 = vld [vmem:[%s7920_s6 + $0x404] ss:$72 sps:$4 sm:$0xff]  }
 0x138   : > { %4907 = vmatprep.mubr.bf16.mxu0 %v7342_v23  ;;  %5023 = vmatpush1.bf16.msra.mxu0 %v7409_v24  ;;  %v7438_v23 = vld [vmem:[%s7920_s6 + $0x8a4] ss:$72 sps:$4 sm:$0xff]   ;;  %v7501_v24 = vld [vmem:[%s9323_s1 + $0x3c0] ss:$8 sps:$4 sm:$0xff]  }
 0x139   : > { %5024 = vmatprep.subr.bf16.mxu0 %v7423_v25  ;;  %v7515_v25 = vld [vmem:[%s9323_s1 + $0x3d4] ss:$8 sps:$4 sm:$0xff]  }
 0x13c   : > { %5025 = vmatpush1.bf16.msra.mxu0 %v7421_v26  ;;  %v7513_v26 = vld [vmem:[%s9323_s1 + $0x3d0] ss:$8 sps:$4 sm:$0xff]  }
 0x13d   : > { %5026 = vmatprep.subr.bf16.mxu0 %v7435_v29  ;;  %v7444_v29 = vld [vmem:[%s7920_s6 + $0x8a0] ss:$72 sps:$4 sm:$0xff]  }
 0x13e   : > { %4023 = vmatmul.mubr.bf16.gmra.mrb[60].mxu1 %v7344_v27  ;;  %v7527_v27 = vld [vmem:[%s9323_s1 + $0x3e4] ss:$8 sps:$4 sm:$0xff]  }
 0x13f   : > { %4908 = vmatmul.mubr.bf16.gmra.mrb[28].mxu0 %v7348_v28  ;;  %4065 = vmatprep.mubr.bf16.mxu1 %v7354_v30  ;;  %v7440_v28 = vld [vmem:[%s7920_s6 + $0x400] ss:$72 sps:$4 sm:$0xff]   ;;  %v7448_v30 = vld [vmem:[%s7920_s6 + $0x494] ss:$72 sps:$4 sm:$0xff]  }
 0x140   : > { %4917 = vmatprep.mubr.bf16.mxu0 %v7355_v31  ;;  %5027 = vmatpush1.bf16.msra.mxu0 %v7433_v32  ;;  %v7452_v31 = vld [vmem:[%s7920_s6 + $0x3c] ss:$72 sps:$4 sm:$0xff]   ;;  %v7525_v32 = vld [vmem:[%s9323_s1 + $0x3e0] ss:$8 sps:$4 sm:$0xff]  }
 0x141   : > { %5028 = vmatprep.subr.bf16.mxu0 %v7447_v33  ;;  %v7539_v33 = vld [vmem:[%s9323_s1 + $0x3f4] ss:$8 sps:$4 sm:$0xff]  }
 0x144   : > { %5029 = vmatpush1.bf16.msra.mxu0 %v7445_v34  ;;  %v7537_v34 = vld [vmem:[%s9323_s1 + $0x3f0] ss:$8 sps:$4 sm:$0xff]  }
 0x145   : > { %5191 = vmatprep.subr.bf16.mxu0 %v7459_v37  ;;  %v7457_v37 = vld [vmem:[%s9323_s1 + $0x800] ss:$8 sps:$4 sm:$0xff]  }
 0x146   : > { %4066 = vmatmul.mubr.bf16.vlgmr.msra.gmra.mrb[0].mxu1 %v7352_v35  ;;  %v7450_v35 = vld [vmem:[%s7920_s6 + $0x38] ss:$72 sps:$4 sm:$0xff]  }
 0x147   : > { %4918 = vmatmul.mubr.bf16.gmra.mrb[32].mxu0 %v7360_v36  ;;  %4227 = vmatpush1.bf16.msra.mxu1 %v7357_v38  ;;  %v7453_v36 = vld [vmem:[%s7920_s6 + $0x490] ss:$72 sps:$4 sm:$0xff]   ;;  %v7460_v38 = vld [vmem:[%s7920_s6 + $0x524] ss:$72 sps:$4 sm:$0xff]  }
 0x148   : > { %4075 = vmatprep.mubr.bf16.mxu1 %v7364_v39  ;;  %4927 = vmatprep.mubr.bf16.mxu0 %v7366_v40  ;;  %v7462_v39 = vld [vmem:[%s7920_s6 + $0xcc] ss:$72 sps:$4 sm:$0xff]  }
 0x149   : > { %4228 = vmatprep.subr.bf16.mxu1 %v7371_v41  ;;  %v7471_v40 = vld [vmem:[%s9323_s1 + $0x814] ss:$8 sps:$4 sm:$0xff]   ;;  %v7712_v41 = vld [vmem:[%s9323_s1 + $0x404] ss:$8 sps:$4 sm:$0xff]  }
 0x14b   : > { %4229 = vmatpush1.bf16.msra.mxu1 %v7369_v42  ;;  %v7469_v42 = vld [vmem:[%s9323_s1 + $0x810] ss:$8 sps:$4 sm:$0xff]  }
 0x14c   : > { %4230 = vmatprep.subr.bf16.mxu1 %v7383_v45  ;;  %v7468_v45 = vld [vmem:[%s7920_s6 + $0xc8] ss:$72 sps:$4 sm:$0xff]  }
 0x14e   : > { %4076 = vmatmul.mubr.bf16.gmra.mrb[4].mxu1 %v7368_v43  ;;  %v7483_v43 = vld [vmem:[%s9323_s1 + $0x824] ss:$8 sps:$4 sm:$0xff]  }
 0x14f   : > { %4928 = vmatmul.mubr.bf16.gmra.mrb[36].mxu0 %v7372_v44  ;;  %4085 = vmatprep.mubr.bf16.mxu1 %v7376_v46  ;;  %v7464_v44 = vld [vmem:[%s7920_s6 + $0x520] ss:$72 sps:$4 sm:$0xff]   ;;  %v7472_v46 = vld [vmem:[%s7920_s6 + $0x5b4] ss:$72 sps:$4 sm:$0xff]  }
 0x150   : > { %4937 = vmatprep.mubr.bf16.mxu0 %v7378_v47  ;;  %4231 = vmatpush1.bf16.msra.mxu1 %v7381_v48  ;;  %v7474_v47 = vld [vmem:[%s7920_s6 + $0x15c] ss:$72 sps:$4 sm:$0xff]   ;;  %v7481_v48 = vld [vmem:[%s9323_s1 + $0x820] ss:$8 sps:$4 sm:$0xff]  }
 0x151   : > { %4232 = vmatprep.subr.bf16.mxu1 %v7395_v49  ;;  %v7495_v49 = vld [vmem:[%s9323_s1 + $0x834] ss:$8 sps:$4 sm:$0xff]  }
 0x154   : > { %4233 = vmatpush1.bf16.msra.mxu1 %v7393_v50  ;;  %v7493_v50 = vld [vmem:[%s9323_s1 + $0x830] ss:$8 sps:$4 sm:$0xff]  }
 0x155   : > { %4234 = vmatprep.subr.bf16.mxu1 %v7407_v51  ;;  %v7507_v51 = vld [vmem:[%s9323_s1 + $0x844] ss:$8 sps:$4 sm:$0xff]  }
 0x156   : > { %4086 = vmatmul.mubr.bf16.gmra.mrb[8].mxu1 %v7380_v52  ;;  %v7476_v52 = vld [vmem:[%s7920_s6 + $0x5b0] ss:$72 sps:$4 sm:$0xff]  }
 0x157   : > { %4938 = vmatmul.mubr.bf16.gmra.mrb[40].mxu0 %v7384_v53  ;;  %4095 = vmatprep.mubr.bf16.mxu1 %v7388_v54  ;;  %v7480_v53 = vld [vmem:[%s7920_s6 + $0x158] ss:$72 sps:$4 sm:$0xff]   ;;  %v7484_v54 = vld [vmem:[%s7920_s6 + $0x644] ss:$72 sps:$4 sm:$0xff]  }
 0x158   : > { %4947 = vmatprep.mubr.bf16.mxu0 %v7390_v55  ;;  %4235 = vmatpush1.bf16.msra.mxu1 %v7405_v56  ;;  %v7486_v55 = vld [vmem:[%s7920_s6 + $0x1ec] ss:$72 sps:$4 sm:$0xff]   ;;  %v7505_v56 = vld [vmem:[%s9323_s1 + $0x840] ss:$8 sps:$4 sm:$0xff]  }
 0x159   : > { %4236 = vmatprep.subr.bf16.mxu1 %v7419_v57  ;;  %v7519_v57 = vld [vmem:[%s9323_s1 + $0x854] ss:$8 sps:$4 sm:$0xff]  }
 0x15c   : > { %4237 = vmatpush1.bf16.msra.mxu1 %v7417_v58  ;;  %v7517_v58 = vld [vmem:[%s9323_s1 + $0x850] ss:$8 sps:$4 sm:$0xff]  }
 0x15d   : > { %4238 = vmatprep.subr.bf16.mxu1 %v7431_v59  ;;  %v7531_v59 = vld [vmem:[%s9323_s1 + $0x864] ss:$8 sps:$4 sm:$0xff]  }
 0x15e   : > { %4096 = vmatmul.mubr.bf16.gmra.mrb[12].mxu1 %v7392_v60  ;;  %v7488_v60 = vld [vmem:[%s7920_s6 + $0x640] ss:$72 sps:$4 sm:$0xff]  }
 0x15f   : > { %4948 = vmatmul.mubr.bf16.gmra.mrb[44].mxu0 %v7396_v61  ;;  %4105 = vmatprep.mubr.bf16.mxu1 %v7400_v62  ;;  %v7492_v61 = vld [vmem:[%s7920_s6 + $0x1e8] ss:$72 sps:$4 sm:$0xff]   ;;  %v7496_v62 = vld [vmem:[%s7920_s6 + $0x6d4] ss:$72 sps:$4 sm:$0xff]  }
 0x160   : > { %4957 = vmatprep.mubr.bf16.mxu0 %v7402_v63  ;;  %4239 = vmatpush1.bf16.msra.mxu1 %v7429_v0  ;;  %v7498_v63 = vld [vmem:[%s7920_s6 + $0x27c] ss:$72 sps:$4 sm:$0xff]   ;;  %v7529_v0 = vld [vmem:[%s9323_s1 + $0x860] ss:$8 sps:$4 sm:$0xff]  }
 0x161   : > { %4240 = vmatprep.subr.bf16.mxu1 %v7443_v1  ;;  %v7543_v1 = vld [vmem:[%s9323_s1 + $0x874] ss:$8 sps:$4 sm:$0xff]  }
 0x164   : > { %4241 = vmatpush1.bf16.msra.mxu1 %v7441_v2  ;;  %v7541_v2 = vld [vmem:[%s9323_s1 + $0x870] ss:$8 sps:$4 sm:$0xff]  }
 0x165   : > { %4242 = vmatprep.subr.bf16.mxu1 %v7456_v3  ;;  %v7552_v3 = vld [vmem:[%s9323_s1 + $0x884] ss:$8 sps:$4 sm:$0xff]  }
 0x166   : > { %4106 = vmatmul.mubr.bf16.gmra.mrb[16].mxu1 %v7404_v4  ;;  %v7500_v4 = vld [vmem:[%s7920_s6 + $0x6d0] ss:$72 sps:$4 sm:$0xff]  }
 0x167   : > { %4958 = vmatmul.mubr.bf16.gmra.mrb[48].mxu0 %v7408_v5  ;;  %4115 = vmatprep.mubr.bf16.mxu1 %v7412_v6  ;;  %v7504_v5 = vld [vmem:[%s7920_s6 + $0x278] ss:$72 sps:$4 sm:$0xff]   ;;  %v7508_v6 = vld [vmem:[%s7920_s6 + $0x764] ss:$72 sps:$4 sm:$0xff]  }
 0x168   : > { %4967 = vmatprep.mubr.bf16.mxu0 %v7414_v7  ;;  %4243 = vmatpush1.bf16.msra.mxu1 %v7454_v8  ;;  %v7510_v7 = vld [vmem:[%s7920_s6 + $0x30c] ss:$72 sps:$4 sm:$0xff]   ;;  %v7550_v8 = vld [vmem:[%s9323_s1 + $0x880] ss:$8 sps:$4 sm:$0xff]  }
 0x169   : > { %4244 = vmatprep.subr.bf16.mxu1 %v7467_v9  ;;  %v7561_v9 = vld [vmem:[%s9323_s1 + $0x894] ss:$8 sps:$4 sm:$0xff]  }
 0x16c   : > { %4245 = vmatpush1.bf16.msra.mxu1 %v7465_v10  ;;  %v7559_v10 = vld [vmem:[%s9323_s1 + $0x890] ss:$8 sps:$4 sm:$0xff]  }
 0x16d   : > { %4246 = vmatprep.subr.bf16.mxu1 %v7479_v11  ;;  %v7570_v11 = vld [vmem:[%s9323_s1 + $0x8a4] ss:$8 sps:$4 sm:$0xff]  }
 0x16e   : > { %4116 = vmatmul.mubr.bf16.gmra.mrb[20].mxu1 %v7416_v12  ;;  %v7512_v12 = vld [vmem:[%s7920_s6 + $0x760] ss:$72 sps:$4 sm:$0xff]  }
 0x16f   : > { %4968 = vmatmul.mubr.bf16.gmra.mrb[52].mxu0 %v7420_v13  ;;  %4125 = vmatprep.mubr.bf16.mxu1 %v7424_v14  ;;  %v7516_v13 = vld [vmem:[%s7920_s6 + $0x308] ss:$72 sps:$4 sm:$0xff]   ;;  %v7520_v14 = vld [vmem:[%s7920_s6 + $0x7f4] ss:$72 sps:$4 sm:$0xff]  }
 0x170   : > { %4977 = vmatprep.mubr.bf16.mxu0 %v7426_v15  ;;  %4247 = vmatpush1.bf16.msra.mxu1 %v7477_v16  ;;  %v7522_v15 = vld [vmem:[%s7920_s6 + $0x39c] ss:$72 sps:$4 sm:$0xff]   ;;  %v7568_v16 = vld [vmem:[%s9323_s1 + $0x8a0] ss:$8 sps:$4 sm:$0xff]  }
 0x171   : > { %4248 = vmatprep.subr.bf16.mxu1 %v7491_v17  ;;  %v7579_v17 = vld [vmem:[%s9323_s1 + $0x8b4] ss:$8 sps:$4 sm:$0xff]  }
 0x174   : > { %4249 = vmatpush1.bf16.msra.mxu1 %v7489_v18  ;;  %v7577_v18 = vld [vmem:[%s9323_s1 + $0x8b0] ss:$8 sps:$4 sm:$0xff]  }
 0x175   : > { %4250 = vmatprep.subr.bf16.mxu1 %v7503_v19  ;;  %v7588_v19 = vld [vmem:[%s9323_s1 + $0x8c4] ss:$8 sps:$4 sm:$0xff]  }
 0x176   : > { %4126 = vmatmul.mubr.bf16.gmra.mrb[24].mxu1 %v7428_v20  ;;  %v7524_v20 = vld [vmem:[%s7920_s6 + $0x7f0] ss:$72 sps:$4 sm:$0xff]  }
 0x177   : > { %4978 = vmatmul.mubr.bf16.gmra.mrb[56].mxu0 %v7432_v21  ;;  %4135 = vmatprep.mubr.bf16.mxu1 %v7436_v22  ;;  %v7528_v21 = vld [vmem:[%s7920_s6 + $0x398] ss:$72 sps:$4 sm:$0xff]   ;;  %v7532_v22 = vld [vmem:[%s7920_s6 + $0x884] ss:$72 sps:$4 sm:$0xff]  }
 0x178   : > { %4987 = vmatprep.mubr.bf16.mxu0 %v7438_v23  ;;  %4251 = vmatpush1.bf16.msra.mxu1 %v7501_v24  ;;  %v7534_v23 = vld [vmem:[%s7920_s6 + $0x42c] ss:$72 sps:$4 sm:$0xff]   ;;  %v7586_v24 = vld [vmem:[%s9323_s1 + $0x8c0] ss:$8 sps:$4 sm:$0xff]  }
 0x179   : > { %4252 = vmatprep.subr.bf16.mxu1 %v7515_v25  ;;  %v7597_v25 = vld [vmem:[%s9323_s1 + $0x8d4] ss:$8 sps:$4 sm:$0xff]  }
 0x17c   : > { %4253 = vmatpush1.bf16.msra.mxu1 %v7513_v26  ;;  %v7595_v26 = vld [vmem:[%s9323_s1 + $0x8d0] ss:$8 sps:$4 sm:$0xff]  }
 0x17d   : > { %4254 = vmatprep.subr.bf16.mxu1 %v7527_v27  ;;  %v7606_v27 = vld [vmem:[%s9323_s1 + $0x8e4] ss:$8 sps:$4 sm:$0xff]  }
 0x17e   : > { %4136 = vmatmul.mubr.bf16.gmra.mrb[28].mxu1 %v7440_v28  ;;  %v7536_v28 = vld [vmem:[%s7920_s6 + $0x880] ss:$72 sps:$4 sm:$0xff]  }
 0x17f   : > { %4988 = vmatmul.mubr.bf16.gmra.mrb[60].mxu0 %v7444_v29  ;;  %4145 = vmatprep.mubr.bf16.mxu1 %v7448_v30  ;;  %v7540_v29 = vld [vmem:[%s7920_s6 + $0x428] ss:$72 sps:$4 sm:$0xff]   ;;  %v7546_v30 = vld [vmem:[%s7920_s6 + $0x1c] ss:$72 sps:$4 sm:$0xff]  }
 0x180   : > { %5030 = vmatprep.mubr.bf16.mxu0 %v7452_v31  ;;  %4255 = vmatpush1.bf16.msra.mxu1 %v7525_v32  ;;  %v7547_v31 = vld [vmem:[%s7920_s6 + $0x4bc] ss:$72 sps:$4 sm:$0xff]   ;;  %v7604_v32 = vld [vmem:[%s9323_s1 + $0x8e0] ss:$8 sps:$4 sm:$0xff]  }
 0x181   : > { %4256 = vmatprep.subr.bf16.mxu1 %v7539_v33  ;;  %v7615_v33 = vld [vmem:[%s9323_s1 + $0x8f4] ss:$8 sps:$4 sm:$0xff]  }
 0x184   : > { %4257 = vmatpush1.bf16.msra.mxu1 %v7537_v34  ;;  %v7613_v34 = vld [vmem:[%s9323_s1 + $0x8f0] ss:$8 sps:$4 sm:$0xff]  }
 0x185   : > { %6231 = vmatprep.subr.bf16.mxu1 %v7712_v41  ;;  %v7557_v41 = vld [vmem:[%s7920_s6 + $0xa8] ss:$72 sps:$4 sm:$0xff]  }
 0x186   : > { %4146 = vmatmul.mubr.bf16.gmra.mrb[32].mxu1 %v7453_v36  ;;  %v7549_v36 = vld [vmem:[%s7920_s6 + $0x4b8] ss:$72 sps:$4 sm:$0xff]  }
 0x187   : > { %5031 = vmatmul.mubr.bf16.vlgmr.msra.gmra.mrb[0].mxu0 %v7450_v35  ;;  %4155 = vmatprep.mubr.bf16.mxu1 %v7460_v38  ;;  %v7544_v35 = vld [vmem:[%s7920_s6 + $0x18] ss:$72 sps:$4 sm:$0xff]   ;;  %v7555_v38 = vld [vmem:[%s7920_s6 + $0x54c] ss:$72 sps:$4 sm:$0xff]  }
 0x188   : > { %5192 = vmatpush1.bf16.msra.mxu0 %v7457_v37  ;;  %5040 = vmatprep.mubr.bf16.mxu0 %v7462_v39  ;;  %v7553_v37 = vld [vmem:[%s7920_s6 + $0xac] ss:$72 sps:$4 sm:$0xff]   ;;  %v7713_v39 = vld [vmem:[%s9323_s1 + $0x400] ss:$8 sps:$4 sm:$0xff]  }
 0x189   : > { %5193 = vmatprep.subr.bf16.mxu0 %v7471_v40  ;;  %v7714_v40 = vld [vmem:[%s9323_s1 + $0x414] ss:$8 sps:$4 sm:$0xff]  }
 0x18c   : > { %5194 = vmatpush1.bf16.msra.mxu0 %v7469_v42  ;;  %v7558_v42 = vld [vmem:[%s7920_s6 + $0x548] ss:$72 sps:$4 sm:$0xff]  }
 0x18d   : > { %5195 = vmatprep.subr.bf16.mxu0 %v7483_v43  ;;  %v7715_v43 = vld [vmem:[%s9323_s1 + $0x410] ss:$8 sps:$4 sm:$0xff]  }
 0x18e   : > { %4156 = vmatmul.mubr.bf16.gmra.mrb[36].mxu1 %v7464_v44  ;;  %v7562_v44 = vld [vmem:[%s7920_s6 + $0x13c] ss:$72 sps:$4 sm:$0xff]  }
 0x18f   : > { %5041 = vmatmul.mubr.bf16.gmra.mrb[4].mxu0 %v7468_v45  ;;  %4165 = vmatprep.mubr.bf16.mxu1 %v7472_v46  ;;  %v7564_v45 = vld [vmem:[%s7920_s6 + $0x5dc] ss:$72 sps:$4 sm:$0xff]  }
 0x190   : > { %5050 = vmatprep.mubr.bf16.mxu0 %v7474_v47  ;;  %5196 = vmatpush1.bf16.msra.mxu0 %v7481_v48  ;;  %v7716_v46 = vld [vmem:[%s9323_s1 + $0x424] ss:$8 sps:$4 sm:$0xff]   ;;  %v7717_v47 = vld [vmem:[%s9323_s1 + $0x420] ss:$8 sps:$4 sm:$0xff]   ;;  %v7718_v48 = vld [vmem:[%s9323_s1 + $0x434] ss:$8 sps:$4 sm:$0xff]  }
 0x191   : > { %5197 = vmatprep.subr.bf16.mxu0 %v7495_v49  ;;  %v7566_v49 = vld [vmem:[%s7920_s6 + $0x138] ss:$72 sps:$4 sm:$0xff]  }
 0x194   : > { %5198 = vmatpush1.bf16.msra.mxu0 %v7493_v50  ;;  %v7567_v50 = vld [vmem:[%s7920_s6 + $0x5d8] ss:$72 sps:$4 sm:$0xff]  }
 0x195   : > { %5199 = vmatprep.subr.bf16.mxu0 %v7507_v51  ;;  %v7571_v51 = vld [vmem:[%s7920_s6 + $0x1cc] ss:$72 sps:$4 sm:$0xff]  }
 0x196   : > { %4166 = vmatmul.mubr.bf16.gmra.mrb[40].mxu1 %v7476_v52  ;;  %v7573_v52 = vld [vmem:[%s7920_s6 + $0x66c] ss:$72 sps:$4 sm:$0xff]  }
 0x197   : > { %5051 = vmatmul.mubr.bf16.gmra.mrb[8].mxu0 %v7480_v53  ;;  %4175 = vmatprep.mubr.bf16.mxu1 %v7484_v54  ;;  %v7719_v53 = vld [vmem:[%s9323_s1 + $0x430] ss:$8 sps:$4 sm:$0xff]   ;;  %v7720_v54 = vld [vmem:[%s9323_s1 + $0x444] ss:$8 sps:$4 sm:$0xff]  }
 0x198   : > { %5060 = vmatprep.mubr.bf16.mxu0 %v7486_v55  ;;  %5200 = vmatpush1.bf16.msra.mxu0 %v7505_v56  ;;  %v7721_v55 = vld [vmem:[%s9323_s1 + $0x440] ss:$8 sps:$4 sm:$0xff]   ;;  %v7722_v56 = vld [vmem:[%s9323_s1 + $0x454] ss:$8 sps:$4 sm:$0xff]  }
 0x199   : > { %5201 = vmatprep.subr.bf16.mxu0 %v7519_v57  ;;  %v7575_v57 = vld [vmem:[%s7920_s6 + $0x1c8] ss:$72 sps:$4 sm:$0xff]  }
 0x19c   : > { %5202 = vmatpush1.bf16.msra.mxu0 %v7517_v58  ;;  %v7576_v58 = vld [vmem:[%s7920_s6 + $0x668] ss:$72 sps:$4 sm:$0xff]  }
 0x19d   : > { %5203 = vmatprep.subr.bf16.mxu0 %v7531_v59  ;;  %v7580_v59 = vld [vmem:[%s7920_s6 + $0x25c] ss:$72 sps:$4 sm:$0xff]  }
 0x19e   : > { %4176 = vmatmul.mubr.bf16.gmra.mrb[44].mxu1 %v7488_v60  ;;  %v7582_v60 = vld [vmem:[%s7920_s6 + $0x6fc] ss:$72 sps:$4 sm:$0xff]  }
 0x19f   : > { %5061 = vmatmul.mubr.bf16.gmra.mrb[12].mxu0 %v7492_v61  ;;  %4185 = vmatprep.mubr.bf16.mxu1 %v7496_v62  ;;  %v7723_v61 = vld [vmem:[%s9323_s1 + $0x450] ss:$8 sps:$4 sm:$0xff]   ;;  %v7724_v62 = vld [vmem:[%s9323_s1 + $0x464] ss:$8 sps:$4 sm:$0xff]  }
 0x1a0   : > { %5070 = vmatprep.mubr.bf16.mxu0 %v7498_v63  ;;  %5204 = vmatpush1.bf16.msra.mxu0 %v7529_v0  ;;  %v7725_v63 = vld [vmem:[%s9323_s1 + $0x460] ss:$8 sps:$4 sm:$0xff]   ;;  %v7726_v0 = vld [vmem:[%s9323_s1 + $0x474] ss:$8 sps:$4 sm:$0xff]  }
 0x1a1   : > { %5205 = vmatprep.subr.bf16.mxu0 %v7543_v1  ;;  %v7584_v1 = vld [vmem:[%s7920_s6 + $0x258] ss:$72 sps:$4 sm:$0xff]  }
 0x1a4   : > { %5206 = vmatpush1.bf16.msra.mxu0 %v7541_v2  ;;  %v7585_v2 = vld [vmem:[%s7920_s6 + $0x6f8] ss:$72 sps:$4 sm:$0xff]  }
 0x1a5   : > { %5207 = vmatprep.subr.bf16.mxu0 %v7552_v3  ;;  %v7589_v3 = vld [vmem:[%s7920_s6 + $0x2ec] ss:$72 sps:$4 sm:$0xff]  }
 0x1a6   : > { %4186 = vmatmul.mubr.bf16.gmra.mrb[48].mxu1 %v7500_v4  ;;  %v7591_v4 = vld [vmem:[%s7920_s6 + $0x78c] ss:$72 sps:$4 sm:$0xff]  }
 0x1a7   : > { %5071 = vmatmul.mubr.bf16.gmra.mrb[16].mxu0 %v7504_v5  ;;  %4195 = vmatprep.mubr.bf16.mxu1 %v7508_v6  ;;  %v7727_v5 = vld [vmem:[%s9323_s1 + $0x470] ss:$8 sps:$4 sm:$0xff]   ;;  %v7728_v6 = vld [vmem:[%s9323_s1 + $0x484] ss:$8 sps:$4 sm:$0xff]  }
 0x1a8   : > { %5080 = vmatprep.mubr.bf16.mxu0 %v7510_v7  ;;  %5208 = vmatpush1.bf16.msra.mxu0 %v7550_v8  ;;  %v7729_v7 = vld [vmem:[%s9323_s1 + $0x480] ss:$8 sps:$4 sm:$0xff]   ;;  %v7730_v8 = vld [vmem:[%s9323_s1 + $0x494] ss:$8 sps:$4 sm:$0xff]  }
 0x1a9   : > { %5209 = vmatprep.subr.bf16.mxu0 %v7561_v9  ;;  %v7593_v9 = vld [vmem:[%s7920_s6 + $0x2e8] ss:$72 sps:$4 sm:$0xff]  }
 0x1ac   : > { %5210 = vmatpush1.bf16.msra.mxu0 %v7559_v10  ;;  %v7594_v10 = vld [vmem:[%s7920_s6 + $0x788] ss:$72 sps:$4 sm:$0xff]  }
 0x1ad   : > { %5211 = vmatprep.subr.bf16.mxu0 %v7570_v11  ;;  %v7598_v11 = vld [vmem:[%s7920_s6 + $0x37c] ss:$72 sps:$4 sm:$0xff]  }
 0x1ae   : > { %4196 = vmatmul.mubr.bf16.gmra.mrb[52].mxu1 %v7512_v12  ;;  %v7600_v12 = vld [vmem:[%s7920_s6 + $0x81c] ss:$72 sps:$4 sm:$0xff]  }
 0x1af   : > { %5081 = vmatmul.mubr.bf16.gmra.mrb[20].mxu0 %v7516_v13  ;;  %4205 = vmatprep.mubr.bf16.mxu1 %v7520_v14  ;;  %v7731_v13 = vld [vmem:[%s9323_s1 + $0x490] ss:$8 sps:$4 sm:$0xff]   ;;  %v7732_v14 = vld [vmem:[%s9323_s1 + $0x4a4] ss:$8 sps:$4 sm:$0xff]  }
 0x1b0   : > { %5090 = vmatprep.mubr.bf16.mxu0 %v7522_v15  ;;  %5212 = vmatpush1.bf16.msra.mxu0 %v7568_v16  ;;  %v7733_v15 = vld [vmem:[%s9323_s1 + $0x4a0] ss:$8 sps:$4 sm:$0xff]   ;;  %v7734_v16 = vld [vmem:[%s9323_s1 + $0x4b4] ss:$8 sps:$4 sm:$0xff]  }
 0x1b1   : > { %5213 = vmatprep.subr.bf16.mxu0 %v7579_v17  ;;  %v7602_v17 = vld [vmem:[%s7920_s6 + $0x378] ss:$72 sps:$4 sm:$0xff]  }
 0x1b4   : > { %5214 = vmatpush1.bf16.msra.mxu0 %v7577_v18  ;;  %v7603_v18 = vld [vmem:[%s7920_s6 + $0x818] ss:$72 sps:$4 sm:$0xff]  }
 0x1b5   : > { %5215 = vmatprep.subr.bf16.mxu0 %v7588_v19  ;;  %v7607_v19 = vld [vmem:[%s7920_s6 + $0x40c] ss:$72 sps:$4 sm:$0xff]  }
 0x1b6   : > { %4206 = vmatmul.mubr.bf16.gmra.mrb[56].mxu1 %v7524_v20  ;;  %v7609_v20 = vld [vmem:[%s7920_s6 + $0x8ac] ss:$72 sps:$4 sm:$0xff]  }
 0x1b7   : > { %5091 = vmatmul.mubr.bf16.gmra.mrb[24].mxu0 %v7528_v21  ;;  %4215 = vmatprep.mubr.bf16.mxu1 %v7532_v22  ;;  %v7735_v21 = vld [vmem:[%s9323_s1 + $0x4b0] ss:$8 sps:$4 sm:$0xff]   ;;  %v7736_v22 = vld [vmem:[%s9323_s1 + $0x4c4] ss:$8 sps:$4 sm:$0xff]  }
 0x1b8   : > { %5100 = vmatprep.mubr.bf16.mxu0 %v7534_v23  ;;  %5216 = vmatpush1.bf16.msra.mxu0 %v7586_v24  ;;  %v7737_v23 = vld [vmem:[%s9323_s1 + $0x4c0] ss:$8 sps:$4 sm:$0xff]   ;;  %v7738_v24 = vld [vmem:[%s9323_s1 + $0x4d4] ss:$8 sps:$4 sm:$0xff]  }
 0x1b9   : > { %5217 = vmatprep.subr.bf16.mxu0 %v7597_v25  ;;  %v7611_v25 = vld [vmem:[%s7920_s6 + $0x408] ss:$72 sps:$4 sm:$0xff]  }
 0x1bc   : > { %5218 = vmatpush1.bf16.msra.mxu0 %v7595_v26  ;;  %v7612_v26 = vld [vmem:[%s7920_s6 + $0x8a8] ss:$72 sps:$4 sm:$0xff]  }
 0x1bd   : > { %5219 = vmatprep.subr.bf16.mxu0 %v7606_v27  ;;  %v7616_v27 = vld [vmem:[%s7920_s6 + $0x49c] ss:$72 sps:$4 sm:$0xff]  }
 0x1be   : > { %4216 = vmatmul.mubr.bf16.gmra.mrb[60].mxu1 %v7536_v28  ;;  %v7620_v28 = vld [vmem:[%s7920_s6 + $0x44] ss:$72 sps:$4 sm:$0xff]  }
 0x1bf   : > { %5101 = vmatmul.mubr.bf16.gmra.mrb[28].mxu0 %v7540_v29  ;;  %4258 = vmatprep.mubr.bf16.mxu1 %v7546_v30  ;;  %v7739_v29 = vld [vmem:[%s9323_s1 + $0x4d0] ss:$8 sps:$4 sm:$0xff]   ;;  %v7740_v30 = vld [vmem:[%s9323_s1 + $0x4e4] ss:$8 sps:$4 sm:$0xff]  }
 0x1c0   : > { %5110 = vmatprep.mubr.bf16.mxu0 %v7547_v31  ;;  %5220 = vmatpush1.bf16.msra.mxu0 %v7604_v32  ;;  %v7741_v31 = vld [vmem:[%s9323_s1 + $0x4e0] ss:$8 sps:$4 sm:$0xff]   ;;  %v7742_v32 = vld [vmem:[%s9323_s1 + $0x4f4] ss:$8 sps:$4 sm:$0xff]  }
 0x1c1   : > { %5221 = vmatprep.subr.bf16.mxu0 %v7615_v33  ;;  %v7618_v33 = vld [vmem:[%s7920_s6 + $0x40] ss:$72 sps:$4 sm:$0xff]  }
 0x1c4   : > { %5222 = vmatpush1.bf16.msra.mxu0 %v7613_v34  ;;  %v7621_v34 = vld [vmem:[%s7920_s6 + $0x498] ss:$72 sps:$4 sm:$0xff]  }
 0x1c6   : > { %4259 = vmatmul.mubr.bf16.vlgmr.msra.gmra.mrb[0].mxu1 %v7544_v35  ;;  %v7622_v35 = vld [vmem:[%s7920_s6 + $0x52c] ss:$72 sps:$4 sm:$0xff]  }
 0x1c7   : > { %5111 = vmatmul.mubr.bf16.gmra.mrb[32].mxu0 %v7549_v36  ;;  %6247 = vmatpush1.bf16.msra.mxu1 %v7713_v39  ;;  %v7624_v36 = vld [vmem:[%s7920_s6 + $0xd4] ss:$72 sps:$4 sm:$0xff]   ;;  %v7627_v39 = vld [vmem:[%s7920_s6 + $0xd0] ss:$72 sps:$4 sm:$0xff]  }
 0x1c8   : > { %4268 = vmatprep.mubr.bf16.mxu1 %v7553_v37  ;;  %5120 = vmatprep.mubr.bf16.mxu0 %v7555_v38  ;;  %v7743_v37 = vld [vmem:[%s9323_s1 + $0x4f0] ss:$8 sps:$4 sm:$0xff]  }
 0x1c9   : > { %6232 = vmatprep.subr.bf16.mxu1 %v7714_v40  ;;  %v7626_v38 = vld [vmem:[%s7920_s6 + $0x528] ss:$72 sps:$4 sm:$0xff]   ;;  %v7628_v40 = vld [vmem:[%s7920_s6 + $0x5bc] ss:$72 sps:$4 sm:$0xff]  }
 0x1cb   : > { %6248 = vmatpush1.bf16.msra.mxu1 %v7715_v43  ;;  %v7633_v43 = vld [vmem:[%s7920_s6 + $0x160] ss:$72 sps:$4 sm:$0xff]  }
 0x1cc   : > { %6233 = vmatprep.subr.bf16.mxu1 %v7716_v46  ;;  %v7638_v46 = vld [vmem:[%s7920_s6 + $0x648] ss:$72 sps:$4 sm:$0xff]  }
 0x1ce   : > { %4269 = vmatmul.mubr.bf16.gmra.mrb[4].mxu1 %v7557_v41  ;;  %v7630_v41 = vld [vmem:[%s7920_s6 + $0x164] ss:$72 sps:$4 sm:$0xff]  }
 0x1cf   : > { %5121 = vmatmul.mubr.bf16.gmra.mrb[36].mxu0 %v7558_v42  ;;  %4278 = vmatprep.mubr.bf16.mxu1 %v7562_v44  ;;  %v7632_v42 = vld [vmem:[%s7920_s6 + $0x5b8] ss:$72 sps:$4 sm:$0xff]   ;;  %v7634_v44 = vld [vmem:[%s7920_s6 + $0x64c] ss:$72 sps:$4 sm:$0xff]  }
 0x1d0   : > { %5130 = vmatprep.mubr.bf16.mxu0 %v7564_v45  ;;  %6249 = vmatpush1.bf16.msra.mxu1 %v7717_v47  ;;  %v7636_v45 = vld [vmem:[%s7920_s6 + $0x1f4] ss:$72 sps:$4 sm:$0xff]   ;;  %v7639_v47 = vld [vmem:[%s7920_s6 + $0x1f0] ss:$72 sps:$4 sm:$0xff]  }
 0x1d1   : > { %6234 = vmatprep.subr.bf16.mxu1 %v7718_v48  ;;  %v7640_v48 = vld [vmem:[%s7920_s6 + $0x6dc] ss:$72 sps:$4 sm:$0xff]  }
 0x1d4   : > { %6250 = vmatpush1.bf16.msra.mxu1 %v7719_v53  ;;  %v7648_v53 = vld [vmem:[%s7920_s6 + $0x314] ss:$72 sps:$4 sm:$0xff]  }
 0x1d5   : > { %6235 = vmatprep.subr.bf16.mxu1 %v7720_v54  ;;  %v7650_v54 = vld [vmem:[%s7920_s6 + $0x768] ss:$72 sps:$4 sm:$0xff]  }
 0x1d6   : > { %4279 = vmatmul.mubr.bf16.gmra.mrb[8].mxu1 %v7566_v49  ;;  %v7642_v49 = vld [vmem:[%s7920_s6 + $0x284] ss:$72 sps:$4 sm:$0xff]  }
 0x1d7   : > { %5131 = vmatmul.mubr.bf16.gmra.mrb[40].mxu0 %v7567_v50  ;;  %4288 = vmatprep.mubr.bf16.mxu1 %v7571_v51  ;;  %v7644_v50 = vld [vmem:[%s7920_s6 + $0x6d8] ss:$72 sps:$4 sm:$0xff]  }
 0x1d8   : > { %5140 = vmatprep.mubr.bf16.mxu0 %v7573_v52  ;;  %6251 = vmatpush1.bf16.msra.mxu1 %v7721_v55  ;;  %v7645_v51 = vld [vmem:[%s7920_s6 + $0x280] ss:$72 sps:$4 sm:$0xff]   ;;  %v7646_v52 = vld [vmem:[%s7920_s6 + $0x76c] ss:$72 sps:$4 sm:$0xff]   ;;  %v7651_v55 = vld [vmem:[%s7920_s6 + $0x310] ss:$72 sps:$4 sm:$0xff]  }
 0x1d9   : > { %6236 = vmatprep.subr.bf16.mxu1 %v7722_v56  ;;  %v7652_v56 = vld [vmem:[%s7920_s6 + $0x7fc] ss:$72 sps:$4 sm:$0xff]  }
 0x1dc   : > { %6252 = vmatpush1.bf16.msra.mxu1 %v7723_v61  ;;  %v7660_v61 = vld [vmem:[%s7920_s6 + $0x434] ss:$72 sps:$4 sm:$0xff]  }
 0x1dd   : > { %6237 = vmatprep.subr.bf16.mxu1 %v7724_v62  ;;  %v7662_v62 = vld [vmem:[%s7920_s6 + $0x888] ss:$72 sps:$4 sm:$0xff]  }
 0x1de   : > { %4289 = vmatmul.mubr.bf16.gmra.mrb[12].mxu1 %v7575_v57  ;;  %v7654_v57 = vld [vmem:[%s7920_s6 + $0x3a4] ss:$72 sps:$4 sm:$0xff]  }
 0x1df   : > { %5141 = vmatmul.mubr.bf16.gmra.mrb[44].mxu0 %v7576_v58  ;;  %4298 = vmatprep.mubr.bf16.mxu1 %v7580_v59  ;;  %v7656_v58 = vld [vmem:[%s7920_s6 + $0x7f8] ss:$72 sps:$4 sm:$0xff]  }
 0x1e0   : > { %5150 = vmatprep.mubr.bf16.mxu0 %v7582_v60  ;;  %6253 = vmatpush1.bf16.msra.mxu1 %v7725_v63  ;;  %v7657_v59 = vld [vmem:[%s7920_s6 + $0x3a0] ss:$72 sps:$4 sm:$0xff]   ;;  %v7658_v60 = vld [vmem:[%s7920_s6 + $0x88c] ss:$72 sps:$4 sm:$0xff]   ;;  %v7663_v63 = vld [vmem:[%s7920_s6 + $0x430] ss:$72 sps:$4 sm:$0xff]  }
 0x1e1   : > { %6238 = vmatprep.subr.bf16.mxu1 %v7726_v0  ;;  %v7666_v0 = vld [vmem:[%s7920_s6 + $0x4a4] ss:$72 sps:$4 sm:$0xff]  }
 0x1e4   : > { %6254 = vmatpush1.bf16.msra.mxu1 %v7727_v5  ;;  %v7672_v5 = vld [vmem:[%s7920_s6 + $0x554] ss:$72 sps:$4 sm:$0xff]  }
 0x1e5   : > { %6239 = vmatprep.subr.bf16.mxu1 %v7728_v6  ;;  %v7674_v6 = vld [vmem:[%s7920_s6 + $0x530] ss:$72 sps:$4 sm:$0xff]  }
 0x1e6   : > { %4299 = vmatmul.mubr.bf16.gmra.mrb[16].mxu1 %v7584_v1  ;;  %v7667_v1 = vld [vmem:[%s7920_s6 + $0x4c4] ss:$72 sps:$4 sm:$0xff]  }
 0x1e7   : > { %5151 = vmatmul.mubr.bf16.gmra.mrb[48].mxu0 %v7585_v2  ;;  %4308 = vmatprep.mubr.bf16.mxu1 %v7589_v3  ;;  %v7664_v2 = vld [vmem:[%s7920_s6 + $0x4a0] ss:$72 sps:$4 sm:$0xff]  }
 0x1e8   : > { %5160 = vmatprep.mubr.bf16.mxu0 %v7591_v4  ;;  %6255 = vmatpush1.bf16.msra.mxu1 %v7729_v7  ;;  %v7669_v3 = vld [vmem:[%s7920_s6 + $0x4c0] ss:$72 sps:$4 sm:$0xff]   ;;  %v7670_v4 = vld [vmem:[%s7920_s6 + $0x534] ss:$72 sps:$4 sm:$0xff]   ;;  %v7675_v7 = vld [vmem:[%s7920_s6 + $0x550] ss:$72 sps:$4 sm:$0xff]  }
 0x1e9   : > { %6240 = vmatprep.subr.bf16.mxu1 %v7730_v8  ;;  %v7676_v8 = vld [vmem:[%s7920_s6 + $0x5c4] ss:$72 sps:$4 sm:$0xff]  }
 0x1ec   : > { %6256 = vmatpush1.bf16.msra.mxu1 %v7731_v13  ;;  %v7684_v13 = vld [vmem:[%s7920_s6 + $0x674] ss:$72 sps:$4 sm:$0xff]  }
 0x1ed   : > { %6241 = vmatprep.subr.bf16.mxu1 %v7732_v14  ;;  %v7686_v14 = vld [vmem:[%s7920_s6 + $0x650] ss:$72 sps:$4 sm:$0xff]  }
 0x1ee   : > { %4309 = vmatmul.mubr.bf16.gmra.mrb[20].mxu1 %v7593_v9  ;;  %v7678_v9 = vld [vmem:[%s7920_s6 + $0x5e4] ss:$72 sps:$4 sm:$0xff]  }
 0x1ef   : > { %5161 = vmatmul.mubr.bf16.gmra.mrb[52].mxu0 %v7594_v10  ;;  %4318 = vmatprep.mubr.bf16.mxu1 %v7598_v11  ;;  %v7680_v10 = vld [vmem:[%s7920_s6 + $0x5c0] ss:$72 sps:$4 sm:$0xff]  }
 0x1f0   : > { %5170 = vmatprep.mubr.bf16.mxu0 %v7600_v12  ;;  %6257 = vmatpush1.bf16.msra.mxu1 %v7733_v15  ;;  %v7681_v11 = vld [vmem:[%s7920_s6 + $0x5e0] ss:$72 sps:$4 sm:$0xff]   ;;  %v7682_v12 = vld [vmem:[%s7920_s6 + $0x654] ss:$72 sps:$4 sm:$0xff]   ;;  %v7687_v15 = vld [vmem:[%s7920_s6 + $0x670] ss:$72 sps:$4 sm:$0xff]  }
 0x1f1   : > { %6242 = vmatprep.subr.bf16.mxu1 %v7734_v16  ;;  %v7688_v16 = vld [vmem:[%s7920_s6 + $0x6e4] ss:$72 sps:$4 sm:$0xff]  }
 0x1f4   : > { %6258 = vmatpush1.bf16.msra.mxu1 %v7735_v21  ;;  %v7696_v21 = vld [vmem:[%s7920_s6 + $0x794] ss:$72 sps:$4 sm:$0xff]  }
 0x1f5   : > { %6243 = vmatprep.subr.bf16.mxu1 %v7736_v22  ;;  %v7698_v22 = vld [vmem:[%s7920_s6 + $0x770] ss:$72 sps:$4 sm:$0xff]  }
 0x1f6   : > { %4319 = vmatmul.mubr.bf16.gmra.mrb[24].mxu1 %v7602_v17  ;;  %v7690_v17 = vld [vmem:[%s7920_s6 + $0x704] ss:$72 sps:$4 sm:$0xff]  }
 0x1f7   : > { %5171 = vmatmul.mubr.bf16.gmra.mrb[56].mxu0 %v7603_v18  ;;  %4328 = vmatprep.mubr.bf16.mxu1 %v7607_v19  ;;  %v7692_v18 = vld [vmem:[%s7920_s6 + $0x6e0] ss:$72 sps:$4 sm:$0xff]  }
 0x1f8   : > { %5180 = vmatprep.mubr.bf16.mxu0 %v7609_v20  ;;  %6259 = vmatpush1.bf16.msra.mxu1 %v7737_v23  ;;  %v7693_v19 = vld [vmem:[%s7920_s6 + $0x700] ss:$72 sps:$4 sm:$0xff]   ;;  %v7694_v20 = vld [vmem:[%s7920_s6 + $0x774] ss:$72 sps:$4 sm:$0xff]   ;;  %v7699_v23 = vld [vmem:[%s7920_s6 + $0x790] ss:$72 sps:$4 sm:$0xff]  }
 0x1f9   : > { %6244 = vmatprep.subr.bf16.mxu1 %v7738_v24  ;;  %v7700_v24 = vld [vmem:[%s7920_s6 + $0x804] ss:$72 sps:$4 sm:$0xff]  }
 0x1fc   : > { %6260 = vmatpush1.bf16.msra.mxu1 %v7739_v29  ;;  %v7708_v29 = vld [vmem:[%s7920_s6 + $0x8b4] ss:$72 sps:$4 sm:$0xff]  }
 0x1fd   : > { %6245 = vmatprep.subr.bf16.mxu1 %v7740_v30  ;;  %v7710_v30 = vld [vmem:[%s7920_s6 + $0x890] ss:$72 sps:$4 sm:$0xff]  }
 0x1fe   : > { %4329 = vmatmul.mubr.bf16.gmra.mrb[28].mxu1 %v7611_v25  ;;  %v7702_v25 = vld [vmem:[%s7920_s6 + $0x824] ss:$72 sps:$4 sm:$0xff]  }
 0x1ff   : > { %5181 = vmatmul.mubr.bf16.gmra.mrb[60].mxu0 %v7612_v26  ;;  %4338 = vmatprep.mubr.bf16.mxu1 %v7616_v27  ;;  %v7704_v26 = vld [vmem:[%s7920_s6 + $0x800] ss:$72 sps:$4 sm:$0xff]  }
 0x200   : > { %5223 = vmatprep.mubr.bf16.mxu0 %v7620_v28  ;;  %6261 = vmatpush1.bf16.msra.mxu1 %v7741_v31  ;;  %v7705_v27 = vld [vmem:[%s7920_s6 + $0x820] ss:$72 sps:$4 sm:$0xff]   ;;  %v7706_v28 = vld [vmem:[%s7920_s6 + $0x894] ss:$72 sps:$4 sm:$0xff]   ;;  %v7711_v31 = vld [vmem:[%s7920_s6 + $0x8b0] ss:$72 sps:$4 sm:$0xff]  }
 0x201   : > { %6246 = vmatprep.subr.bf16.mxu1 %v7742_v32 }
 0x204   : > { %6262 = vmatpush1.bf16.msra.mxu1 %v7743_v37 }
 0x206   : > { %4339 = vmatmul.mubr.bf16.gmra.mrb[32].mxu1 %v7621_v34 }
 0x207   : > { %5224 = vmatmul.mubr.bf16.vlgmr.msra.gmra.mrb[0].mxu0 %v7618_v33  ;;  %4348 = vmatprep.mubr.bf16.mxu1 %v7622_v35 }
 0x208   : > { %5233 = vmatprep.mubr.bf16.mxu0 %v7624_v36 }
 0x20e   : > { %4349 = vmatmul.mubr.bf16.gmra.mrb[36].mxu1 %v7626_v38 }
 0x20f   : > { %5234 = vmatmul.mubr.bf16.gmra.mrb[4].mxu0 %v7627_v39  ;;  %4358 = vmatprep.mubr.bf16.mxu1 %v7628_v40 }
 0x210   : > { %5243 = vmatprep.mubr.bf16.mxu0 %v7630_v41 }
 0x216   : > { %4359 = vmatmul.mubr.bf16.gmra.mrb[40].mxu1 %v7632_v42 }
 0x217   : > { %5244 = vmatmul.mubr.bf16.gmra.mrb[8].mxu0 %v7633_v43  ;;  %4368 = vmatprep.mubr.bf16.mxu1 %v7634_v44 }
 0x218   : > { %5253 = vmatprep.mubr.bf16.mxu0 %v7636_v45 }
 0x21e   : > { %4369 = vmatmul.mubr.bf16.gmra.mrb[44].mxu1 %v7638_v46 }
 0x21f   : > { %5254 = vmatmul.mubr.bf16.gmra.mrb[12].mxu0 %v7639_v47  ;;  %4378 = vmatprep.mubr.bf16.mxu1 %v7640_v48 }
 0x220   : > { %5263 = vmatprep.mubr.bf16.mxu0 %v7642_v49 }
 0x226   : > { %4379 = vmatmul.mubr.bf16.gmra.mrb[48].mxu1 %v7644_v50 }
 0x227   : > { %5264 = vmatmul.mubr.bf16.gmra.mrb[16].mxu0 %v7645_v51  ;;  %4388 = vmatprep.mubr.bf16.mxu1 %v7646_v52 }
 0x228   : > { %5273 = vmatprep.mubr.bf16.mxu0 %v7648_v53 }
 0x22e   : > { %4389 = vmatmul.mubr.bf16.gmra.mrb[52].mxu1 %v7650_v54 }
 0x22f   : > { %5274 = vmatmul.mubr.bf16.gmra.mrb[20].mxu0 %v7651_v55  ;;  %4398 = vmatprep.mubr.bf16.mxu1 %v7652_v56  ;;  %v757_v56 = vlaneseq }
 0x230   : > { %5283 = vmatprep.mubr.bf16.mxu0 %v7654_v57 }
 0x236   : > { %4399 = vmatmul.mubr.bf16.gmra.mrb[56].mxu1 %v7656_v58 }
 0x237   : > { %5284 = vmatmul.mubr.bf16.gmra.mrb[24].mxu0 %v7657_v59  ;;  %4408 = vmatprep.mubr.bf16.mxu1 %v7658_v60  ;;  %v758_v60 = vshrl.u32 %v757_v56, 7 }
 0x238   : > { %5293 = vmatprep.mubr.bf16.mxu0 %v7660_v61 }
 0x23e   : > { %4409 = vmatmul.mubr.bf16.gmra.mrb[60].mxu1 %v7662_v62  ;;  %v759_v62 = vsub.s32 0, %v758_v60 }
 0x23f   : > { %5294 = vmatmul.mubr.bf16.gmra.mrb[28].mxu0 %v7663_v63  ;;  %4531 = vmatprep.mubr.bf16.mxu1 %v7666_v0  ;;  %v755_v63 = vld [vmem:[%s9324_s2] sm:$0x3]  ;;  %v763_v0 = vsub.s32 1, %v758_v60 }
 0x240   : > { %5303 = vmatprep.mubr.bf16.mxu0 %v7667_v1 }
 0x246   : > { %4532 = vmatmul.mubr.bf16.vlgmr.msra.gmra.mrb[32].mxu1 %v7664_v2 }
 0x247   : > { %5304 = vmatmul.mubr.bf16.gmra.mrb[32].mxu0 %v7669_v3  ;;  %4541 = vmatprep.mubr.bf16.mxu1 %v7670_v4  ;;  %v9076_v4 = vrot.slane %v755_v63, %v759_v62 }
 0x248   : > { %5313 = vmatprep.mubr.bf16.mxu0 %v7672_v5 }
 0x24e   : > { %4542 = vmatmul.mubr.bf16.gmra.mrb[36].mxu1 %v7674_v6  ;;  %v9080_v6 = vrot.slane %v755_v63, %v763_v0 }
 0x24f   : > { %5314 = vmatmul.mubr.bf16.gmra.mrb[36].mxu0 %v7675_v7  ;;  %4551 = vmatprep.mubr.bf16.mxu1 %v7676_v8 }
 0x250   : > { %5323 = vmatprep.mubr.bf16.mxu0 %v7678_v9 }
 0x256   : > { %4552 = vmatmul.mubr.bf16.gmra.mrb[40].mxu1 %v7680_v10 }
 0x257   : > { %5324 = vmatmul.mubr.bf16.gmra.mrb[40].mxu0 %v7681_v11  ;;  %4561 = vmatprep.mubr.bf16.mxu1 %v7682_v12 }
 0x258   : > { %5333 = vmatprep.mubr.bf16.mxu0 %v7684_v13 }
 0x25e   : > { %4562 = vmatmul.mubr.bf16.gmra.mrb[44].mxu1 %v7686_v14 }
 0x25f   : > { %5334 = vmatmul.mubr.bf16.gmra.mrb[44].mxu0 %v7687_v15  ;;  %4571 = vmatprep.mubr.bf16.mxu1 %v7688_v16 }
 0x260   : > { %5343 = vmatprep.mubr.bf16.mxu0 %v7690_v17 }
 0x266   : > { %4572 = vmatmul.mubr.bf16.gmra.mrb[48].mxu1 %v7692_v18 }
 0x267   : > { %5344 = vmatmul.mubr.bf16.gmra.mrb[48].mxu0 %v7693_v19  ;;  %4581 = vmatprep.mubr.bf16.mxu1 %v7694_v20 }
 0x268   : > { %5353 = vmatprep.mubr.bf16.mxu0 %v7696_v21 }
 0x26e   : > { %4582 = vmatmul.mubr.bf16.gmra.mrb[52].mxu1 %v7698_v22 }
 0x26f   : > { %5354 = vmatmul.mubr.bf16.gmra.mrb[52].mxu0 %v7699_v23  ;;  %4591 = vmatprep.mubr.bf16.mxu1 %v7700_v24 }
 0x270   : > { %5363 = vmatprep.mubr.bf16.mxu0 %v7702_v25 }
 0x276   : > { %4592 = vmatmul.mubr.bf16.gmra.mrb[56].mxu1 %v7704_v26 }
 0x277   : > { %5364 = vmatmul.mubr.bf16.gmra.mrb[56].mxu0 %v7705_v27  ;;  %4601 = vmatprep.mubr.bf16.mxu1 %v7706_v28 }
 0x278   : > { %5373 = vmatprep.mubr.bf16.mxu0 %v7708_v29 }
 0x27e   : > { %4602 = vmatmul.mubr.bf16.gmra.mrb[60].mxu1 %v7710_v30 }
 0x27f   : > { %5374 = vmatmul.mubr.bf16.gmra.mrb[60].mxu0 %v7711_v31 }
 0x299   : > { %v4260_v32 = vpop.f32.mrb[0].mxu1 }
 0x29a   : > { %v4262_v33 = vpop.f32.mrb[1].mxu1  ;;  %v6263_v7 = vadd.f32 %v4260_v32, %v9076_v4 }
 0x29b   : > { %v4264_v34 = vpop.f32.mrb[2].mxu1  ;;  %v6265_v8 = vadd.f32 %v4262_v33, %v9080_v6 }
 0x29c   : > { %v4266_v35 = vpop.f32.mrb[3].mxu1  ;;  %v6267_v10 = vadd.f32 %v4264_v34, %v9076_v4 }
 0x29d   : > { %v6269_v13 = vadd.f32 %v4266_v35, %v9080_v6 }
 0x2a1   : > { %v4270_v36 = vpop.f32.mrb[4].mxu1 }
 0x2a2   : > { %v4272_v37 = vpop.f32.mrb[5].mxu1  ;;  %v6271_v19 = vadd.f32 %v4270_v36, %v9076_v4 }
 0x2a3   : > { %v4274_v38 = vpop.f32.mrb[6].mxu1  ;;  %v6273_v20 = vadd.f32 %v4272_v37, %v9080_v6 }
 0x2a4   : > { %v4276_v39 = vpop.f32.mrb[7].mxu1  ;;  %v6275_v22 = vadd.f32 %v4274_v38, %v9076_v4 }
 0x2a5   : > { %v6277_v25 = vadd.f32 %v4276_v39, %v9080_v6 }
 0x2a9   : > { %v4280_v40 = vpop.f32.mrb[8].mxu1 }
 0x2aa   : > { %v4282_v41 = vpop.f32.mrb[9].mxu1  ;;  %v6279_v31 = vadd.f32 %v4280_v40, %v9076_v4 }
 0x2ab   : > { %v4284_v42 = vpop.f32.mrb[10].mxu1  ;;  %v6281_v32 = vadd.f32 %v4282_v41, %v9080_v6 }
 0x2ac   : > { %v4286_v43 = vpop.f32.mrb[11].mxu1  ;;  %v6283_v34 = vadd.f32 %v4284_v42, %v9076_v4 }
 0x2ad   : > { %v6285_v37 = vadd.f32 %v4286_v43, %v9080_v6 }
 0x2b1   : > { %v9035_v44 = vpop.f32.mrb[12].mxu1 }
 0x2b2   : > { %v9037_v45 = vpop.f32.mrb[13].mxu1  ;;  %v6287_v40 = vadd.f32 %v9035_v44, %v9076_v4 }
 0x2b3   : > { %v9039_v46 = vpop.f32.mrb[14].mxu1  ;;  %v6289_v41 = vadd.f32 %v9037_v45, %v9080_v6 }
 0x2b4   : > { %v9041_v47 = vpop.f32.mrb[15].mxu1  ;;  %v6291_v63 = vadd.f32 %v9039_v46, %v9076_v4 }
 0x2b9   : > { %v9043_v48 = vpop.f32.mrb[16].mxu1 }
 0x2ba   : > { %v9045_v49 = vpop.f32.mrb[17].mxu1  ;;  %v6295_v45 = vadd.f32 %v9043_v48, %v9076_v4 }
 0x2bb   : > { %v9047_v50 = vpop.f32.mrb[18].mxu1  ;;  %v6297_v46 = vadd.f32 %v9045_v49, %v9080_v6 }
 0x2bc   : > { %v9049_v51 = vpop.f32.mrb[19].mxu1 }
 0x2c1   : > { %v9051_v52 = vpop.f32.mrb[20].mxu1 }
 0x2c2   : > { %v9053_v53 = vpop.f32.mrb[21].mxu1 }
 0x2c3   : > { %v9055_v54 = vpop.f32.mrb[22].mxu1 }
 0x2c4   : > { %v9057_v55 = vpop.f32.mrb[23].mxu1 }
 0x2c9   : > { %v9059_v57 = vpop.f32.mrb[24].mxu1 }
 0x2ca   : > { %v9061_v58 = vpop.f32.mrb[25].mxu1 }
 0x2cb   : > { %v9063_v59 = vpop.f32.mrb[26].mxu1 }
 0x2cc   : > { %v9065_v61 = vpop.f32.mrb[27].mxu1 }
 0x2d1   : > { %v9070_v1 = vpop.f32.mrb[28].mxu1 }
 0x2d2   : > { %v9072_v2 = vpop.f32.mrb[29].mxu1 }
 0x2d3   : > { %v9074_v3 = vpop.f32.mrb[30].mxu1 }
 0x2d4   : > { %v9078_v5 = vpop.f32.mrb[31].mxu1 }
 0x2da   : > { %v5225_v9 = vpop.f32.mrb[0].mxu0 }
 0x2db   : > { %v6264_v11 = vadd.f32 %v6263_v7, %v5225_v9  ;;  %v5227_v12 = vpop.f32.mrb[1].mxu0  ;;  %v6293_v7 = vadd.f32 %v9041_v47, %v9080_v6 }
 0x2dc   : > { %v6266_v14 = vadd.f32 %v6265_v8, %v5227_v12  ;;  %v5229_v15 = vpop.f32.mrb[2].mxu0 }
 0x2dd   : > { %v9086_v16 = vadd.f32 %v6267_v10, %v5229_v15  ;;  %v5231_v17 = vpop.f32.mrb[3].mxu0  ;;  %v6299_v15 = vadd.f32 %v9047_v50, %v9076_v4 }
 0x2de   : > { %v9088_v18 = vadd.f32 %v6269_v13, %v5231_v17 }
 0x2df   : > { %v5386_v49 = vmax.f32 %v9086_v16, 0.0  ;;  %v6307_v16 = vadd.f32 %v9055_v54, %v9076_v4 }
 0x2e0   : > { %v5387_v50 = vmax.f32 %v9088_v18, 0.0  ;;  %v6309_v18 = vadd.f32 %v9057_v55, %v9080_v6 }
 0x2e2   : > { %v5235_v21 = vpop.f32.mrb[4].mxu0 }
 0x2e3   : > { %v9093_v23 = vadd.f32 %v6271_v19, %v5235_v21  ;;  %v5237_v24 = vpop.f32.mrb[5].mxu0  ;;  %v6301_v19 = vadd.f32 %v9049_v51, %v9080_v6  ;;  %v6303_v51 = vadd.f32 %v9051_v52, %v9076_v4 }
 0x2e4   : > { %v9096_v26 = vadd.f32 %v6273_v20, %v5237_v24  ;;  %v5239_v27 = vpop.f32.mrb[6].mxu0 }
 0x2e5   : > { %v9098_v28 = vadd.f32 %v6275_v22, %v5239_v27  ;;  %v5241_v29 = vpop.f32.mrb[7].mxu0  ;;  %v5384_v22 = vmax.f32 %v6264_v11, 0.0  ;;  %v5388_v52 = vmax.f32 %v9093_v23, 0.0  ;;  %v6311_v23 = vadd.f32 %v9059_v57, %v9076_v4 }
 0x2e6   : > { %v9100_v30 = vadd.f32 %v6277_v25, %v5241_v29  ;;  %v5385_v29 = vmax.f32 %v6266_v14, 0.0  ;;  %v6305_v14 = vadd.f32 %v9053_v53, %v9080_v6  ;;  %v5389_v53 = vmax.f32 %v9096_v26, 0.0 }
 0x2e7   : > { %v6313_v26 = vadd.f32 %v9061_v58, %v9080_v6 }
 0x2ea   : > { %v5245_v33 = vpop.f32.mrb[8].mxu0 }
 0x2eb   : > { %v9105_v35 = vadd.f32 %v6279_v31, %v5245_v33  ;;  %v5247_v36 = vpop.f32.mrb[9].mxu0 }
 0x2ec   : > { %v9108_v38 = vadd.f32 %v6281_v32, %v5247_v36  ;;  %v5249_v39 = vpop.f32.mrb[10].mxu0 }
 0x2ed   : > { %v9110_v56 = vadd.f32 %v6283_v34, %v5249_v39  ;;  %v5251_v60 = vpop.f32.mrb[11].mxu0  ;;  %v5392_v57 = vmax.f32 %v9105_v35, 0.0  ;;  %v6319_v35 = vadd.f32 %v9070_v1, %v9076_v4 }
 0x2ee   : > { %v9112_v62 = vadd.f32 %v6285_v37, %v5251_v60  ;;  %v5393_v58 = vmax.f32 %v9108_v38, 0.0  ;;  %v6321_v38 = vadd.f32 %v9072_v2, %v9080_v6 }
 0x2f2   : > { %v5255_v42 = vpop.f32.mrb[12].mxu0 }
 0x2f3   : > { %v9120_v0 = vadd.f32 %v6287_v40, %v5255_v42  ;;  %v5257_v43 = vpop.f32.mrb[13].mxu0 }
 0x2f4   : > { %v9124_v8 = vadd.f32 %v6289_v41, %v5257_v43  ;;  %v5259_v9 = vpop.f32.mrb[14].mxu0 }
 0x2f5   : > { %v9126_v10 = vadd.f32 %v6291_v63, %v5259_v9  ;;  %v5261_v12 = vpop.f32.mrb[15].mxu0  ;;  %v5396_v1 = vmax.f32 %v9120_v0, 0.0 }
 0x2f6   : > { %v9128_v44 = vadd.f32 %v6293_v7, %v5261_v12  ;;  %v5397_v2 = vmax.f32 %v9124_v8, 0.0 }
 0x2fa   : > { %v5265_v13 = vpop.f32.mrb[16].mxu0 }
 0x2fb   : > { %v6296_v17 = vadd.f32 %v6295_v45, %v5265_v13  ;;  %v5267_v47 = vpop.f32.mrb[17].mxu0  ;;  %v5390_v45 = vmax.f32 %v9098_v28, 0.0  ;;  %v5391_v13 = vmax.f32 %v9100_v30, 0.0  ;;  %v6315_v28 = vadd.f32 %v9063_v59, %v9076_v4 }
 0x2fc   : > { %v6298_v20 = vadd.f32 %v6297_v46, %v5267_v47  ;;  %v5269_v21 = vpop.f32.mrb[18].mxu0  ;;  %v6317_v30 = vadd.f32 %v9065_v61, %v9080_v6 }
 0x2fd   : > { %v5400_v24 = vmax.f32 %v6296_v17, 0.0  ;;  %v6300_v25 = vadd.f32 %v6299_v15, %v5269_v21  ;;  %v5271_v27 = vpop.f32.mrb[19].mxu0 }
 0x2fe   : > { %v5401_v48 = vmax.f32 %v6298_v20, 0.0  ;;  %v6302_v31 = vadd.f32 %v6301_v19, %v5271_v27 }
 0x2ff   : > { %v9139_v32 = vadd.f32 %v5400_v24, %v5384_v22  ;;  %v5402_v33 = vmax.f32 %v6300_v25, 0.0 }
 0x300   : > { %v9142_v34 = vadd.f32 %v5401_v48, %v5385_v29  ;;  %v5403_v36 = vmax.f32 %v6302_v31, 0.0 }
 0x301   : > { %v9146_v11 = vadd.f32 %v5402_v33, %v5386_v49  ;;  %v5394_v49 = vmax.f32 %v9110_v56, 0.0  ;;  %v6323_v56 = vadd.f32 %v9074_v3, %v9076_v4 }
 0x302   : > { %v9150_v37 = vadd.f32 %v5403_v36, %v5387_v50  ;;  %v5275_v39 = vpop.f32.mrb[20].mxu0  ;;  %v5395_v50 = vmax.f32 %v9112_v62, 0.0  ;;  %v6325_v62 = vadd.f32 %v9078_v5, %v9080_v6 }
 0x303   : > { %v6304_v60 = vadd.f32 %v6303_v51, %v5275_v39  ;;  %v5277_v40 = vpop.f32.mrb[21].mxu0 }
 0x304   : > { %v6306_v41 = vadd.f32 %v6305_v14, %v5277_v40  ;;  %v5279_v42 = vpop.f32.mrb[22].mxu0 }
 0x305   : > { %v5404_v63 = vmax.f32 %v6304_v60, 0.0  ;;  %v6308_v43 = vadd.f32 %v6307_v16, %v5279_v42  ;;  %v5281_v7 = vpop.f32.mrb[23].mxu0 }
 0x306   : > { %v5405_v9 = vmax.f32 %v6306_v41, 0.0  ;;  %v6310_v12 = vadd.f32 %v6309_v18, %v5281_v7  ;;  %v5398_v7 = vmax.f32 %v9126_v10, 0.0 }
 0x307   : > { %v9159_v46 = vadd.f32 %v5404_v63, %v5388_v52  ;;  %v5406_v54 = vmax.f32 %v6308_v43, 0.0 }
 0x308   : > { %v9162_v15 = vadd.f32 %v5405_v9, %v5389_v53  ;;  %v5407_v55 = vmax.f32 %v6310_v12, 0.0  ;;  %v5399_v9 = vmax.f32 %v9128_v44, 0.0 }
 0x309   : > { %v9166_v17 = vadd.f32 %v5406_v54, %v5390_v45 }
 0x30a   : > { %v9170_v47 = vadd.f32 %v5407_v55, %v5391_v13  ;;  %v5285_v19 = vpop.f32.mrb[24].mxu0 }
 0x30b   : > { %v6312_v20 = vadd.f32 %v6311_v23, %v5285_v19  ;;  %v5287_v21 = vpop.f32.mrb[25].mxu0 }
 0x30c   : > { %v6314_v22 = vadd.f32 %v6313_v26, %v5287_v21  ;;  %v5289_v24 = vpop.f32.mrb[26].mxu0 }
 0x30d   : > { %v5408_v25 = vmax.f32 %v6312_v20, 0.0  ;;  %v6316_v27 = vadd.f32 %v6315_v28, %v5289_v24  ;;  %v5291_v29 = vpop.f32.mrb[27].mxu0 }
 0x30e   : > { %v5409_v48 = vmax.f32 %v6314_v22, 0.0  ;;  %v6318_v31 = vadd.f32 %v6317_v30, %v5291_v29 }
 0x30f   : > { %v9179_v33 = vadd.f32 %v5408_v25, %v5392_v57  ;;  %v5410_v59 = vmax.f32 %v6316_v27, 0.0 }
 0x310   : > { %v9182_v36 = vadd.f32 %v5409_v48, %v5393_v58  ;;  %v5411_v61 = vmax.f32 %v6318_v31, 0.0 }
 0x311   : > { %v9186_v51 = vadd.f32 %v5410_v59, %v5394_v49 }
 0x312   : > { %v9190_v14 = vadd.f32 %v5411_v61, %v5395_v50  ;;  %v5295_v39 = vpop.f32.mrb[28].mxu0 }
 0x313   : > { %v6320_v16 = vadd.f32 %v6319_v35, %v5295_v39  ;;  %v5297_v60 = vpop.f32.mrb[29].mxu0 }
 0x314   : > { %v6322_v40 = vadd.f32 %v6321_v38, %v5297_v60  ;;  %v5299_v18 = vpop.f32.mrb[30].mxu0 }
 0x315   : > { %v5412_v41 = vmax.f32 %v6320_v16, 0.0  ;;  %v6324_v42 = vadd.f32 %v6323_v56, %v5299_v18  ;;  %v5301_v52 = vpop.f32.mrb[31].mxu0 }
 0x316   : > { %v5413_v63 = vmax.f32 %v6322_v40, 0.0  ;;  %v6326_v43 = vadd.f32 %v6325_v62, %v5301_v52 }
 0x317   : > { %v9199_v53 = vadd.f32 %v5412_v41, %v5396_v1  ;;  %v5414_v3 = vmax.f32 %v6324_v42, 0.0 }
 0x318   : > { %v9202_v12 = vadd.f32 %v5413_v63, %v5397_v2  ;;  %v5415_v5 = vmax.f32 %v6326_v43, 0.0 }
 0x319   : > { %v9204_v45 = vadd.f32 %v5414_v3, %v5398_v7  ;;  %v4533_v54 = vpop.f32.mrb[32].mxu1 }
 0x31a   : > { %v9206_v0 = vadd.f32 %v5415_v5, %v5399_v9  ;;  %v5305_v13 = vpop.f32.mrb[32].mxu0  ;;  %v6327_v8 = vadd.f32 %v4533_v54, %v9076_v4  ;;  %v4535_v55 = vpop.f32.mrb[33].mxu1 }
 0x31b   : > { %v5307_v23 = vpop.f32.mrb[33].mxu0  ;;  %v6329_v10 = vadd.f32 %v4535_v55, %v9080_v6  ;;  %v4537_v26 = vpop.f32.mrb[34].mxu1 }
 0x31c   : > { %v5309_v19 = vpop.f32.mrb[34].mxu0  ;;  %v6328_v28 = vadd.f32 %v6327_v8, %v5305_v13  ;;  %v6331_v44 = vadd.f32 %v4537_v26, %v9076_v4  ;;  %v4539_v20 = vpop.f32.mrb[35].mxu1 }
 0x31d   : > { %v5311_v21 = vpop.f32.mrb[35].mxu0  ;;  %v6330_v30 = vadd.f32 %v6329_v10, %v5307_v23  ;;  %v6333_v22 = vadd.f32 %v4539_v20, %v9080_v6 }
 0x31e   : > { %v5416_v24 = vmax.f32 %v6328_v28, 0.0  ;;  %v6332_v57 = vadd.f32 %v6331_v44, %v5309_v19 }
 0x31f   : > { %v5417_v25 = vmax.f32 %v6330_v30, 0.0  ;;  %v6334_v27 = vadd.f32 %v6333_v22, %v5311_v21 }
 0x320   : > { %v9213_v29 = vadd.f32 %v9139_v32, %v5416_v24  ;;  %v5418_v58 = vmax.f32 %v6332_v57, 0.0 }
 0x321   : > { %v9216_v48 = vadd.f32 %v9142_v34, %v5417_v25  ;;  %v5419_v31 = vmax.f32 %v6334_v27, 0.0  ;;  %v4543_v49 = vpop.f32.mrb[36].mxu1 }
 0x322   : > { %v5315_v59 = vpop.f32.mrb[36].mxu0  ;;  %v9219_v50 = vadd.f32 %v9146_v11, %v5418_v58  ;;  %v6335_v61 = vadd.f32 %v4543_v49, %v9076_v4  ;;  %v4545_v35 = vpop.f32.mrb[37].mxu1 }
 0x323   : > { %v5317_v38 = vpop.f32.mrb[37].mxu0  ;;  %v9223_v39 = vadd.f32 %v9150_v37, %v5419_v31  ;;  %v6337_v32 = vadd.f32 %v4545_v35, %v9080_v6  ;;  %v4547_v56 = vpop.f32.mrb[38].mxu1 }
 0x324   : > { %v5319_v16 = vpop.f32.mrb[38].mxu0  ;;  %v6336_v60 = vadd.f32 %v6335_v61, %v5315_v59  ;;  %v6339_v34 = vadd.f32 %v4547_v56, %v9076_v4  ;;  %v4549_v62 = vpop.f32.mrb[39].mxu1 }
 0x325   : > { %v5321_v40 = vpop.f32.mrb[39].mxu0  ;;  %v6338_v18 = vadd.f32 %v6337_v32, %v5317_v38  ;;  %v6341_v11 = vadd.f32 %v4549_v62, %v9080_v6 }
 0x326   : > { %v5420_v1 = vmax.f32 %v6336_v60, 0.0  ;;  %v6340_v41 = vadd.f32 %v6339_v34, %v5319_v16 }
 0x327   : > { %v5421_v42 = vmax.f32 %v6338_v18, 0.0  ;;  %v6342_v52 = vadd.f32 %v6341_v11, %v5321_v40 }
 0x328   : > { %v9229_v2 = vadd.f32 %v9159_v46, %v5420_v1  ;;  %v5422_v37 = vmax.f32 %v6340_v41, 0.0 }
 0x329   : > { %v9232_v63 = vadd.f32 %v9162_v15, %v5421_v42  ;;  %v5423_v43 = vmax.f32 %v6342_v52, 0.0  ;;  %v4553_v7 = vpop.f32.mrb[40].mxu1 }
 0x32a   : > { %v5325_v3 = vpop.f32.mrb[40].mxu0  ;;  %v9235_v9 = vadd.f32 %v9166_v17, %v5422_v37  ;;  %v6343_v5 = vadd.f32 %v4553_v7, %v9076_v4  ;;  %v4555_v54 = vpop.f32.mrb[41].mxu1 }
 0x32b   : > { %v5327_v13 = vpop.f32.mrb[41].mxu0  ;;  %v9239_v8 = vadd.f32 %v9170_v47, %v5423_v43  ;;  %v6345_v46 = vadd.f32 %v4555_v54, %v9080_v6  ;;  %v4557_v55 = vpop.f32.mrb[42].mxu1 }
 0x32c   : > { %v5329_v23 = vpop.f32.mrb[42].mxu0  ;;  %v6344_v10 = vadd.f32 %v6343_v5, %v5325_v3  ;;  %v6347_v15 = vadd.f32 %v4557_v55, %v9076_v4  ;;  %v4559_v26 = vpop.f32.mrb[43].mxu1 }
 0x32d   : > { %v5331_v19 = vpop.f32.mrb[43].mxu0  ;;  %v6346_v28 = vadd.f32 %v6345_v46, %v5327_v13  ;;  %v6349_v17 = vadd.f32 %v4559_v26, %v9080_v6 }
 0x32e   : > { %v5424_v44 = vmax.f32 %v6344_v10, 0.0  ;;  %v6348_v20 = vadd.f32 %v6347_v15, %v5329_v23 }
 0x32f   : > { %v5425_v21 = vmax.f32 %v6346_v28, 0.0  ;;  %v6350_v30 = vadd.f32 %v6349_v17, %v5331_v19 }
 0x330   : > { %v9245_v22 = vadd.f32 %v9179_v33, %v5424_v44  ;;  %v5426_v47 = vmax.f32 %v6348_v20, 0.0 }
 0x331   : > { %v9248_v24 = vadd.f32 %v9182_v36, %v5425_v21  ;;  %v5427_v57 = vmax.f32 %v6350_v30, 0.0  ;;  %v4563_v25 = vpop.f32.mrb[44].mxu1 }
 0x332   : > { %v5335_v27 = vpop.f32.mrb[44].mxu0  ;;  %v9251_v58 = vadd.f32 %v9186_v51, %v5426_v47  ;;  %v6351_v31 = vadd.f32 %v4563_v25, %v9076_v4  ;;  %v4565_v49 = vpop.f32.mrb[45].mxu1 }
 0x333   : > { %v5337_v59 = vpop.f32.mrb[45].mxu0  ;;  %v9255_v61 = vadd.f32 %v9190_v14, %v5427_v57  ;;  %v6353_v33 = vadd.f32 %v4565_v49, %v9080_v6  ;;  %v4567_v35 = vpop.f32.mrb[46].mxu1 }
 0x334   : > { %v5339_v38 = vpop.f32.mrb[46].mxu0  ;;  %v6352_v36 = vadd.f32 %v6351_v31, %v5335_v27  ;;  %v6355_v32 = vadd.f32 %v4567_v35, %v9076_v4  ;;  %v4569_v56 = vpop.f32.mrb[47].mxu1 }
 0x335   : > { %v5341_v16 = vpop.f32.mrb[47].mxu0  ;;  %v6354_v60 = vadd.f32 %v6353_v33, %v5337_v59  ;;  %v6357_v51 = vadd.f32 %v4569_v56, %v9080_v6 }
 0x336   : > { %v5428_v34 = vmax.f32 %v6352_v36, 0.0  ;;  %v6356_v62 = vadd.f32 %v6355_v32, %v5339_v38 }
 0x337   : > { %v5429_v40 = vmax.f32 %v6354_v60, 0.0  ;;  %v6358_v18 = vadd.f32 %v6357_v51, %v5341_v16 }
 0x338   : > { %v9263_v14 = vadd.f32 %v9199_v53, %v5428_v34  ;;  %v5430_v11 = vmax.f32 %v6356_v62, 0.0 }
 0x339   : > { %v9266_v1 = vadd.f32 %v9202_v12, %v5429_v40  ;;  %v5431_v41 = vmax.f32 %v6358_v18, 0.0  ;;  %v4573_v42 = vpop.f32.mrb[48].mxu1 }
 0x33a   : > { %v5345_v52 = vpop.f32.mrb[48].mxu0  ;;  %v9269_v37 = vadd.f32 %v9204_v45, %v5430_v11  ;;  %v6359_v43 = vadd.f32 %v4573_v42, %v9076_v4  ;;  %v4575_v7 = vpop.f32.mrb[49].mxu1 }
 0x33b   : > { %v5347_v3 = vpop.f32.mrb[49].mxu0  ;;  %v9273_v5 = vadd.f32 %v9206_v0, %v5431_v41  ;;  %v6361_v53 = vadd.f32 %v4575_v7, %v9080_v6  ;;  %v4577_v54 = vpop.f32.mrb[50].mxu1 }
 0x33c   : > { %v5349_v13 = vpop.f32.mrb[50].mxu0  ;;  %v6360_v12 = vadd.f32 %v6359_v43, %v5345_v52  ;;  %v6363_v46 = vadd.f32 %v4577_v54, %v9076_v4  ;;  %v4579_v55 = vpop.f32.mrb[51].mxu1 }
 0x33d   : > { %v5351_v23 = vpop.f32.mrb[51].mxu0  ;;  %v6362_v10 = vadd.f32 %v6361_v53, %v5347_v3  ;;  %v6365_v45 = vadd.f32 %v4579_v55, %v9080_v6 }
 0x33e   : > { %v5432_v15 = vmax.f32 %v6360_v12, 0.0  ;;  %v6364_v26 = vadd.f32 %v6363_v46, %v5349_v13 }
 0x33f   : > { %v5433_v19 = vmax.f32 %v6362_v10, 0.0  ;;  %v6366_v28 = vadd.f32 %v6365_v45, %v5351_v23 }
 0x340   : > { %v5480_v0 = vadd.f32 %v9213_v29, %v5432_v15  ;;  %v5434_v17 = vmax.f32 %v6364_v26, 0.0 }
 0x341   : > { %v5481_v44 = vadd.f32 %v9216_v48, %v5433_v19  ;;  %v5435_v20 = vmax.f32 %v6366_v28, 0.0  ;;  %v4583_v21 = vpop.f32.mrb[52].mxu1 }
 0x342   : > { %v5355_v30 = vpop.f32.mrb[52].mxu0  ;;  %v5496_v47 = vmul.f32 0.25, %v5480_v0  ;;  %v5482_v57 = vadd.f32 %v9219_v50, %v5434_v17  ;;  %v6367_v25 = vadd.f32 %v4583_v21, %v9076_v4  ;;  %v4585_v27 = vpop.f32.mrb[53].mxu1 }
 0x343   : > { %v5357_v31 = vpop.f32.mrb[53].mxu0  ;;  %v5497_v49 = vmul.f32 0.25, %v5481_v44  ;;  %v5483_v59 = vadd.f32 %v9223_v39, %v5435_v20  ;;  %v6369_v33 = vadd.f32 %v4585_v27, %v9080_v6  ;;  %v4587_v29 = vpop.f32.mrb[54].mxu1 }
 0x344   : > { %v5359_v35 = vpop.f32.mrb[54].mxu0  ;;  %v5498_v48 = vmul.f32 0.25, %v5482_v57  ;;  %v6368_v38 = vadd.f32 %v6367_v25, %v5355_v30  ;;  %v6371_v50 = vadd.f32 %v4587_v29, %v9076_v4  ;;  %v4589_v36 = vpop.f32.mrb[55].mxu1 }
 0x345   : > { %v5361_v32 = vpop.f32.mrb[55].mxu0  ;;  %v6223_v56 = vpack.c.bf16 %v5497_v49, %v5496_v47  ;;  %v5499_v16 = vmul.f32 0.25, %v5483_v59  ;;  %v6370_v39 = vadd.f32 %v6369_v33, %v5357_v31  ;;  %v6373_v60 = vadd.f32 %v4589_v36, %v9080_v6 }
 0x346   : > { %v5436_v51 = vmax.f32 %v6368_v38, 0.0  ;;  %v6372_v34 = vadd.f32 %v6371_v50, %v5359_v35 }
 0x347   : > { %5560 = vst [vmem:[%s9287_s9] sm:$0xff] %v6223_v56  ;;  %v6224_v62 = vpack.c.bf16 %v5499_v16, %v5498_v48  ;;  %v5437_v40 = vmax.f32 %v6370_v39, 0.0  ;;  %v6374_v18 = vadd.f32 %v6373_v60, %v5361_v32 }
 0x348   : > { %v5484_v11 = vadd.f32 %v9229_v2, %v5436_v51  ;;  %v5438_v41 = vmax.f32 %v6372_v34, 0.0 }
 0x349   : > { %5561 = vst [vmem:[%s9287_s9 + $0x8] sm:$0xff] %v6224_v62  ;;  %v5485_v42 = vadd.f32 %v9232_v63, %v5437_v40  ;;  %v5439_v52 = vmax.f32 %v6374_v18, 0.0  ;;  %v4593_v43 = vpop.f32.mrb[56].mxu1 }
 0x34a   : > { %v5365_v7 = vpop.f32.mrb[56].mxu0  ;;  %v5500_v3 = vmul.f32 0.25, %v5484_v11  ;;  %v5486_v53 = vadd.f32 %v9235_v9, %v5438_v41  ;;  %v6375_v54 = vadd.f32 %v4593_v43, %v9076_v4  ;;  %v4595_v13 = vpop.f32.mrb[57].mxu1 }
 0x34b   : > { %v5367_v12 = vpop.f32.mrb[57].mxu0  ;;  %v5501_v46 = vmul.f32 0.25, %v5485_v42  ;;  %v5487_v55 = vadd.f32 %v9239_v8, %v5439_v52  ;;  %v6377_v2 = vadd.f32 %v4595_v13, %v9080_v6  ;;  %v4597_v23 = vpop.f32.mrb[58].mxu1 }
 0x34c   : > { %v5369_v10 = vpop.f32.mrb[58].mxu0  ;;  %v5502_v45 = vmul.f32 0.25, %v5486_v53  ;;  %v6376_v63 = vadd.f32 %v6375_v54, %v5365_v7  ;;  %v6379_v15 = vadd.f32 %v4597_v23, %v9076_v4  ;;  %v4599_v26 = vpop.f32.mrb[59].mxu1 }
 0x34d   : > { %v5371_v19 = vpop.f32.mrb[59].mxu0  ;;  %v6225_v9 = vpack.c.bf16 %v5501_v46, %v5500_v3  ;;  %v5503_v28 = vmul.f32 0.25, %v5487_v55  ;;  %v6378_v0 = vadd.f32 %v6377_v2, %v5367_v12  ;;  %v6381_v17 = vadd.f32 %v4599_v26, %v9080_v6 }
 0x34e   : > { %v5440_v44 = vmax.f32 %v6376_v63, 0.0  ;;  %v6380_v20 = vadd.f32 %v6379_v15, %v5369_v10 }
 0x34f   : > { %5562 = vst [vmem:[%s9287_s9 + $0x10] sm:$0xff] %v6225_v9  ;;  %v6226_v8 = vpack.c.bf16 %v5503_v28, %v5502_v45  ;;  %v5441_v21 = vmax.f32 %v6378_v0, 0.0  ;;  %v6382_v30 = vadd.f32 %v6381_v17, %v5371_v19 }
 0x350   : > { %v5488_v47 = vadd.f32 %v9245_v22, %v5440_v44  ;;  %v5442_v57 = vmax.f32 %v6380_v20, 0.0 }
 0x351   : > { %5563 = vst [vmem:[%s9287_s9 + $0x18] sm:$0xff] %v6226_v8  ;;  %v5489_v25 = vadd.f32 %v9248_v24, %v5441_v21  ;;  %v5443_v27 = vmax.f32 %v6382_v30, 0.0  ;;  %v4603_v31 = vpop.f32.mrb[60].mxu1 }
 0x352   : > { %v5375_v49 = vpop.f32.mrb[60].mxu0  ;;  %v5504_v59 = vmul.f32 0.25, %v5488_v47  ;;  %v5490_v33 = vadd.f32 %v9251_v58, %v5442_v57  ;;  %v6383_v29 = vadd.f32 %v4603_v31, %v9076_v4  ;;  %v4605_v35 = vpop.f32.mrb[61].mxu1 }
 0x353   : > { %v5377_v48 = vpop.f32.mrb[61].mxu0  ;;  %v5505_v38 = vmul.f32 0.25, %v5489_v25  ;;  %v5491_v50 = vadd.f32 %v9255_v61, %v5443_v27  ;;  %v6385_v22 = vadd.f32 %v4605_v35, %v9080_v6  ;;  %v4607_v36 = vpop.f32.mrb[62].mxu1 }
 0x354   : > { %v5379_v32 = vpop.f32.mrb[62].mxu0  ;;  %v5506_v56 = vmul.f32 0.25, %v5490_v33  ;;  %v6384_v24 = vadd.f32 %v6383_v29, %v5375_v49  ;;  %v6387_v16 = vadd.f32 %v4607_v36, %v9076_v4  ;;  %v4609_v39 = vpop.f32.mrb[63].mxu1 }
 0x355   : > { %v5381_v60 = vpop.f32.mrb[63].mxu0  ;;  %v6227_v58 = vpack.c.bf16 %v5505_v38, %v5504_v59  ;;  %v5507_v51 = vmul.f32 0.25, %v5491_v50  ;;  %v6386_v34 = vadd.f32 %v6385_v22, %v5377_v48  ;;  %v6389_v62 = vadd.f32 %v4609_v39, %v9080_v6 }
 0x356   : > { %v5444_v40 = vmax.f32 %v6384_v24, 0.0  ;;  %v6388_v18 = vadd.f32 %v6387_v16, %v5379_v32 }
 0x357   : > { %5564 = vst [vmem:[%s9287_s9 + $0x20] sm:$0xff] %v6227_v58  ;;  %v6228_v61 = vpack.c.bf16 %v5507_v51, %v5506_v56  ;;  %v5445_v11 = vmax.f32 %v6386_v34, 0.0  ;;  %v6390_v41 = vadd.f32 %v6389_v62, %v5381_v60 }
 0x358   : > { %v5492_v42 = vadd.f32 %v9263_v14, %v5444_v40  ;;  %v5446_v52 = vmax.f32 %v6388_v18, 0.0 }
 0x359   : > { %5565 = vst [vmem:[%s9287_s9 + $0x28] sm:$0xff] %v6228_v61  ;;  %v5493_v4 = vadd.f32 %v9266_v1, %v5445_v11  ;;  %v5447_v43 = vmax.f32 %v6390_v41, 0.0 }
 0x35a   : > { %v5508_v7 = vmul.f32 0.25, %v5492_v42  ;;  %v5494_v3 = vadd.f32 %v9269_v37, %v5446_v52 }
 0x35b   : > { %v5509_v53 = vmul.f32 0.25, %v5493_v4  ;;  %v5495_v6 = vadd.f32 %v9273_v5, %v5447_v43 }
 0x35c   : > { %v5510_v54 = vmul.f32 0.25, %v5494_v3 }
 0x35d   : > { %v6229_v13 = vpack.c.bf16 %v5509_v53, %v5508_v7  ;;  %v5511_v12 = vmul.f32 0.25, %v5495_v6 }
 0x35f   : > { %5566 = vst [vmem:[%s9287_s9 + $0x30] sm:$0xff] %v6229_v13  ;;  %v6230_v46 = vpack.c.bf16 %v5511_v12, %v5510_v54 }
 0x361   : > { %5567 = vst [vmem:[%s9287_s9 + $0x38] sm:$0xff] %v6230_v46 }
 0x362 PF: > { %s13_s12 = sadd.s32 1, %s7750_s12  }
 0x363   : > { %p10_p5 = scmp.ge.s32.totalorder %s13_s12, 4  }
 0x365   :  { %12 = sbr.rel (!%p10_p5) target bundleno = 1 (0x1), region = 62 }

</bundles_post_ra>
